<compile_context>
chip_gen: v5e
topology: v5e:2x2
jax: 0.10.0
libtpu: 0.0.40
codegen_flags: <defaults>
</compile_context>

<pallas_src>
import jax
import jax.numpy as jnp
from jax.experimental import pallas as pl
from jax.experimental.pallas import tpu as pltpu

# ----------------------------- config (small) -------------------------------
B = 2                 # batch
S = 8                 # max_seq_length
BS = B * S
E = 32                # dim_embedding_token
NH = 4                # num_heads
K = 4                 # conv1d_kernel_size
QKV_BLOCK = 4         # m_qkv_proj_blocksize
M_INNER = 2 * E       # mLSTM proj_factor = 2.0
M_DH = M_INNER // NH
S_DH = E // NH
FF_DIM = 64           # sLSTM FFN hidden
N_TISSUES = 5
VOCAB = 65            # len(CODON_MAP_DNA) + 1 (index 0 = padding)
MAX_NORM = 1.0        # embedding_max_norm
PRED_HIDDEN = 2 * E
EPS_LN = 1e-5

VMEM_SPEC = pl.BlockSpec(memory_space=pltpu.MemorySpace.VMEM)

# --------------------- weight slab layout (one VMEM operand) ----------------
_WEIGHT_SHAPES = [
    # mLSTM block
    ("m_ln",      1, E),
    ("m_Wup",     E, 2 * M_INNER),
    ("m_conv_w",  K, M_INNER),
    ("m_conv_b",  1, M_INNER),
    ("m_Wqk",     M_INNER, 2 * M_INNER),           # [W_q | W_k]
    ("m_Wvig",    M_INNER, M_INNER + 2 * NH),      # [W_v | W_v @ W_igf_v]
    ("m_Aig",     M_INNER, 2 * NH),                # W_qk @ W_igf_qk
    ("m_bigf",    1, 2 * NH),
    ("m_onw",     1, M_INNER),
    ("m_skip",    1, M_INNER),
    ("m_Wdown",   M_INNER, E),
    # sLSTM block
    ("s_ln1",     1, E),
    ("s_conv_w",  K, E),
    ("s_conv_b",  1, E),
    ("s_Wifzo",   2 * E, 4 * E),                   # [[W_if, 0], [0, W_zo]]
    ("s_bias",    1, 4 * E),
    ("s_R",       E, 4 * E),
    ("s_gnw",     1, E),
    ("s_ln2",     1, E),
    ("s_Wup",     E, 2 * FF_DIM),
    ("s_Wdown",   FF_DIM, E),
    # post norm + predictor
    ("post_ln",   1, E),
    ("p_W1",      E, PRED_HIDDEN),
    ("p_b1",      1, PRED_HIDDEN),
    ("p_W2",      PRED_HIDDEN, 1),
    ("p_b2",      1, 1),
]


def _build_layout(shapes):
    offs, off = {}, 0
    for name, r, c in shapes:
        offs[name] = (off, r, c)
        off += r + ((-r) % 8)          # keep every entry 8-row (sublane) aligned
    return offs, off


_W_OFFS, _W_ROWS = _build_layout(_WEIGHT_SHAPES)

# data slab layout (width E=32): pre-masked seq emb, pre-masked tissue emb,
# one-hot last-token selector.
D_SEQ, D_TIS, D_SEL = 0, BS, 2 * BS
D_ROWS = 2 * BS + 8


# ------------------------------ math helpers (traced inside kernel) ---------
def _log_sigmoid(x):
    # single-branch form: min(x, 0) - log1p(exp(-|x|))
    return jnp.minimum(x, 0.0) - jnp.log1p(jnp.exp(-jnp.abs(x)))


def _silu(x):
    return x * jax.nn.sigmoid(x)


def _erf(x):
    # Abramowitz & Stegun 7.1.26 (|err| < 1.5e-7); erf has no native lowering.
    z = jnp.abs(x)
    t = 1.0 / (1.0 + 0.3275911 * z)
    poly = ((((1.061405429 * t - 1.453152027) * t + 1.421413741) * t
             - 0.284496736) * t + 0.254829592) * t
    y = 1.0 - poly * jnp.exp(-z * z)
    return jnp.where(x < 0.0, -y, y)


def _gelu(x):
    # exact-erf GELU (matches nn.GELU default) via the polynomial above.
    return 0.5 * x * (1.0 + _erf(x * 0.7071067811865476))


def _clip_norm(e):
    nrm = jnp.sqrt(jnp.sum(e * e, axis=-1, keepdims=True))
    scale = jnp.where(nrm > MAX_NORM, MAX_NORM / (nrm + 1e-7), 1.0)
    return e * scale


def _layer_norm(x, w):
    mu = jnp.mean(x, axis=-1, keepdims=True)
    xc = x - mu
    var = jnp.mean(xc * xc, axis=-1, keepdims=True)
    return xc * jax.lax.rsqrt(var + EPS_LN) * w


def _multihead_norm(x, w):
    m, f = x.shape
    dh = f // NH
    xr = x.reshape(m, NH, dh)
    mu = jnp.mean(xr, axis=-1, keepdims=True)
    xc = xr - mu
    var = jnp.mean(xc * xc, axis=-1, keepdims=True)
    return (xc * jax.lax.rsqrt(var + EPS_LN)).reshape(m, f) * w


def _causal_conv_silu(x, w, bias):
    # depthwise causal conv over time + SiLU.  x: (B*S, C) TIME-MAJOR
    # (row = t*B + b), w: (K, C), bias: (1, C).  A time shift of d positions is
    # a sublane roll by d*B; the first d*B rows (t < d) are masked to zero.
    acc = x * w[K - 1:K, :] + bias
    row = jax.lax.broadcasted_iota(jnp.int32, x.shape, 0)
    for kk in range(K - 1):
        d = (K - 1 - kk) * B
        shifted = pltpu.roll(x, d, 0)          # out[r] = x[(r - d) % BS]
        acc = acc + jnp.where(row >= d, shifted, 0.0) * w[kk:kk + 1, :]
    return _silu(acc)


# ------------------------------ the fused kernel -----------------------------
def _fused_forward_kernel(w_ref, d_ref, out_ref, h_scr):
    f32 = jnp.float32

    def W(name):
        o, r, c = _W_OFFS[name]
        return w_ref[o:o + r, :c]

    # ---- static per-sequence causal structure (time-major, row = t*B + b) --
    ridx = jax.lax.broadcasted_iota(jnp.int32, (BS, BS), 0)
    cidx = jax.lax.broadcasted_iota(jnp.int32, (BS, BS), 1)
    valid = jnp.logical_and((ridx % B) == (cidx % B), ridx >= cidx)
    tcs = valid.astype(f32)                      # inclusive per-seq cumsum matrix

    # ---- embeddings: max-norm clip + add (rows were pre-masked in wrapper) --
    seq_e = d_ref[D_SEQ:D_SEQ + BS, :E]
    tis_e = d_ref[D_TIS:D_TIS + BS, :E]
    x = _clip_norm(seq_e) + _clip_norm(tis_e)                      # (BS, E)

    # =========================== block 0: mLSTM ==============================
    xn = _layer_norm(x, W("m_ln"))
    inner = jnp.dot(xn, W("m_Wup"), preferred_element_type=f32)    # (BS, 2*MI)
    x_m = inner[:, :M_INNER]
    z = inner[:, M_INNER:]
    x_conv = _causal_conv_silu(x_m, W("m_conv_w"), W("m_conv_b"))
    qk = jnp.dot(x_conv, W("m_Wqk"), preferred_element_type=f32)   # [q | k]
    vig = jnp.dot(x_m, W("m_Wvig"), preferred_element_type=f32)    # [v | igf_v]
    v = vig[:, :M_INNER]
    igf = (jnp.dot(x_conv, W("m_Aig"), preferred_element_type=f32)
           + vig[:, M_INNER:] + W("m_bigf"))                       # (BS, 2*NH)

    # gate math for all B*NH heads at once (head index in the lane dim)
    ig = igf[:, :NH]
    lf = _log_sigmoid(igf[:, NH:])
    cum = jnp.dot(tcs, lf, preferred_element_type=f32)             # (BS, NH)
    b_rows = jnp.transpose(ig - cum)                               # (NH, BS)

    inv_sqrt_dh = 1.0 / (M_DH ** 0.5)
    q_s = qk[:, :M_INNER]
    k_s = qk[:, M_INNER:] * inv_sqrt_dh
    head_out = []
    for h in range(NH):
        log_d = jnp.where(valid, cum[:, h:h + 1] + b_rows[h:h + 1, :], -1e30)
        max_log_d = jnp.max(log_d, axis=-1, keepdims=True)
        d_mat = jnp.exp(log_d - max_log_d)
        sl = slice(h * M_DH, (h + 1) * M_DH)
        scores = jnp.einsum("sd,td->st", q_s[:, sl], k_s[:, sl],
                            preferred_element_type=f32)            # (BS, BS)
        c_mat = scores * d_mat
        norm = jnp.maximum(jnp.abs(jnp.sum(c_mat, axis=-1, keepdims=True)),
                           jnp.exp(-max_log_d))
        c_norm = c_mat / (norm + 1e-6)                             # exact division
        head_out.append(jnp.dot(c_norm, v[:, sl], preferred_element_type=f32))
    h_cell = jnp.concatenate(head_out, axis=-1)                    # (BS, M_INNER)

    h_norm = _multihead_norm(h_cell, W("m_onw"))
    h_gated = (h_norm + W("m_skip") * x_conv) * _silu(z)
    x = x + jnp.dot(h_gated, W("m_Wdown"), preferred_element_type=f32)

    # =========================== block 1: sLSTM ==============================
    xn = _layer_norm(x, W("s_ln1"))
    x_conv = _causal_conv_silu(xn, W("s_conv_w"), W("s_conv_b"))
    # fused i/f/z/o gate projection: one (BS,2E)x(2E,4E) matmul, 128-lane dense
    wx = (jnp.dot(jnp.concatenate([x_conv, xn], axis=-1), W("s_Wifzo"),
                  preferred_element_type=f32) + W("s_bias"))       # (BS, 4E)

    r_mat = W("s_R")
    zeros = jnp.zeros((B, E), f32)
    h, c, n, m = zeros, zeros, zeros, zeros
    for t in range(S):                       # inherently serial recurrence
        pre = wx[t * B:(t + 1) * B, :] + jnp.dot(h, r_mat,
                                                 preferred_element_type=f32)
        it, ft = pre[:, :E], pre[:, E:2 * E]
        zt, ot = pre[:, 2 * E:3 * E], pre[:, 3 * E:]
        logfplusm = m + _log_sigmoid(ft)
        m_new = jnp.maximum(it, logfplusm)
        igate = jnp.exp(it - m_new)
        fgate = jnp.exp(logfplusm - m_new)
        c = fgate * c + igate * jnp.tanh(zt)
        n = fgate * n + igate
        h = jax.nn.sigmoid(ot) * (c / n)                           # exact division
        m = m_new
        h_scr[t * B:(t + 1) * B, :] = h      # static-offset store, time-major
    x = x + _multihead_norm(h_scr[...], W("s_gnw"))

    # gated FFN (exact-erf GELU)
    xn = _layer_norm(x, W("s_ln2"))
    up = jnp.dot(xn, W("s_Wup"), preferred_element_type=f32)       # (BS, 2*FF)
    a = _gelu(up[:, :FF_DIM]) * up[:, FF_DIM:]
    x = x + jnp.dot(a, W("s_Wdown"), preferred_element_type=f32)

    # ---- post-blocks norm, last-valid-token gather, predictor MLP ----------
    x = _layer_norm(x, W("post_ln"))
    sel = d_ref[D_SEL:D_SEL + B, :BS]                              # (B, BS)
    out_last = jnp.dot(sel, x, preferred_element_type=f32)         # (B, E)
    h1 = jnp.maximum(jnp.dot(out_last, W("p_W1"), preferred_element_type=f32)
                     + W("p_b1"), 0.0)
    out_ref[...] = (jnp.dot(h1, W("p_W2"), preferred_element_type=f32)
                    + W("p_b2"))


# ------------------------------ parameters -----------------------------------
def _block_diag(blocks):
    n, bi, bo = blocks.shape
    w = jnp.zeros((n * bi, n * bo), jnp.float32)
    for h in range(n):
        w = w.at[h * bi:(h + 1) * bi, h * bo:(h + 1) * bo].set(blocks[h])
    return w


def _pack_weight_slab(w):
    slab = jnp.zeros((_W_ROWS, 128), jnp.float32)
    for name, r, c in _WEIGHT_SHAPES:
        off, _, _ = _W_OFFS[name]
        a = jnp.asarray(w[name], jnp.float32)
        assert a.shape == (r, c), (name, a.shape, (r, c))
        slab = slab.at[off:off + r, :c].set(a)
    return slab


def init_params(key):
    cnt = [0]

    def nrm(shape, scale=0.1):
        cnt[0] += 1
        return jax.random.normal(jax.random.fold_in(key, cnt[0]), shape,
                                 jnp.float32) * scale

    p = {}
    p['tis_emb'] = nrm((N_TISSUES, E), 0.5)
    p['seq_emb'] = nrm((VOCAB, E), 0.5).at[0].set(0.0)   # padding_idx=0

    w = {}
    # ---------------- mLSTM block ----------------
    nqk = M_INNER // QKV_BLOCK
    W_q = _block_diag(nrm((nqk, QKV_BLOCK, QKV_BLOCK)))
    W_k = _block_diag(nrm((nqk, QKV_BLOCK, QKV_BLOCK)))
    W_v = _block_diag(nrm((nqk, QKV_BLOCK, QKV_BLOCK)))
    W_ig = nrm((3 * M_INNER, NH))
    W_fg = nrm((3 * M_INNER, NH), 0.01)
    b_ig = nrm((NH,))
    b_fg = jnp.linspace(3.0, 6.0, NH).astype(jnp.float32)
    W_igf = jnp.concatenate([W_ig, W_fg], axis=1)        # acts on cat([q,k,v])
    W_qk = jnp.concatenate([W_q, W_k], axis=1)
    w['m_ln'] = jnp.ones((1, E), jnp.float32)
    w['m_Wup'] = nrm((E, 2 * M_INNER))
    w['m_conv_w'] = nrm((K, M_INNER))
    w['m_conv_b'] = nrm((1, M_INNER))
    w['m_Wqk'] = W_qk
    # pre-composed gate projections (host-side): igf = x_conv@Aig + x_m@(W_v@W_igf_v) + b
    w['m_Wvig'] = jnp.concatenate([W_v, W_v @ W_igf[2 * M_INNER:]], axis=1)
    w['m_Aig'] = W_qk @ W_igf[:2 * M_INNER]
    w['m_bigf'] = jnp.concatenate([b_ig, b_fg]).reshape(1, 2 * NH)
    w['m_onw'] = jnp.ones((1, M_INNER), jnp.float32)
    w['m_skip'] = jnp.ones((1, M_INNER), jnp.float32)
    w['m_Wdown'] = nrm((M_INNER, E))

    # ---------------- sLSTM block ----------------
    W_i = _block_diag(nrm((NH, S_DH, S_DH)))
    W_f = _block_diag(nrm((NH, S_DH, S_DH)))
    W_z = _block_diag(nrm((NH, S_DH, S_DH)))
    W_o = _block_diag(nrm((NH, S_DH, S_DH)))
    W_if = jnp.concatenate([W_i, W_f], axis=1)           # (E, 2E)
    W_zo = jnp.concatenate([W_z, W_o], axis=1)           # (E, 2E)
    wifzo = jnp.zeros((2 * E, 4 * E), jnp.float32)
    wifzo = wifzo.at[:E, :2 * E].set(W_if).at[E:, 2 * E:].set(W_zo)
    w['s_ln1'] = jnp.ones((1, E), jnp.float32)
    w['s_conv_w'] = nrm((K, E))
    w['s_conv_b'] = nrm((1, E))
    w['s_Wifzo'] = wifzo
    r = jnp.zeros((E, 4 * E), jnp.float32)
    for h in range(NH):
        for g in range(4):
            r = r.at[h * S_DH:(h + 1) * S_DH,
                     g * E + h * S_DH:g * E + (h + 1) * S_DH].set(nrm((S_DH, S_DH)))
    w['s_R'] = r
    # TODO(synk): 'powerlaw_blockdependent' forget-gate bias init replaced by a
    # deterministic positive-offset init (weights are synthetic anyway).
    w['s_bias'] = (nrm((4 * E,), 0.1).at[E:2 * E].add(2.0)).reshape(1, 4 * E)
    w['s_gnw'] = jnp.ones((1, E), jnp.float32)
    w['s_ln2'] = jnp.ones((1, E), jnp.float32)
    w['s_Wup'] = nrm((E, 2 * FF_DIM))
    w['s_Wdown'] = nrm((FF_DIM, E))

    # ---------------- post norm + predictor ----------------
    w['post_ln'] = jnp.ones((1, E), jnp.float32)
    # TODO(synk): Predictor module definition not provided in the source;
    # implemented as a 2-layer MLP (E -> 2E -> 1) with ReLU.
    w['p_W1'] = nrm((E, PRED_HIDDEN))
    w['p_b1'] = nrm((PRED_HIDDEN,)).reshape(1, PRED_HIDDEN)
    w['p_W2'] = nrm((PRED_HIDDEN, 1))
    w['p_b2'] = nrm((1,)).reshape(1, 1)

    p['wslab'] = _pack_weight_slab(w)
    return p


# ------------------------------ forward ---------------------------------------
def forward(params, rna_data_pad, tissue_id, seq_lengths):
    # Thin plain-JAX prep for the single fused kernel: embedding gathers,
    # padding-mask pre-multiplication, time-major flattening (row = t*B + b)
    # and the one-hot last-token selector.  Everything else runs in-kernel.
    mask = (rna_data_pad != 0).astype(jnp.float32)[:, :, None]        # (B,S,1)
    seq_e = params['seq_emb'][rna_data_pad] * mask                     # (B,S,E)
    tis_e = params['tis_emb'][tissue_id][:, None, :] * mask            # (B,S,E)
    seq_tm = jnp.transpose(seq_e, (1, 0, 2)).reshape(BS, E)
    tis_tm = jnp.transpose(tis_e, (1, 0, 2)).reshape(BS, E)
    last_rows = (seq_lengths - 1) * B + jnp.arange(B, dtype=jnp.int32)
    sel = jax.nn.one_hot(last_rows, BS, dtype=jnp.float32)             # (B, BS)

    dslab = jnp.zeros((D_ROWS, E), jnp.float32)
    dslab = dslab.at[D_SEQ:D_SEQ + BS, :].set(seq_tm)
    dslab = dslab.at[D_TIS:D_TIS + BS, :].set(tis_tm)
    dslab = dslab.at[D_SEL:D_SEL + B, :BS].set(sel)

    return pl.pallas_call(
        _fused_forward_kernel,
        out_shape=jax.ShapeDtypeStruct((B, 1), jnp.float32),
        in_specs=[VMEM_SPEC, VMEM_SPEC],
        out_specs=VMEM_SPEC,
        scratch_shapes=[pltpu.VMEM((BS, E), jnp.float32)],
    )(params['wslab'], dslab)


# ------------------------------ main ------------------------------------------
if __name__ == "__main__":
    key = jax.random.PRNGKey(0)
    params = init_params(key)

    data_key = jax.random.fold_in(key, 10_000)
    rna = jax.random.randint(jax.random.fold_in(data_key, 1), (B, S), 1, VOCAB,
                             jnp.int32)
    seq_lengths = jnp.array([S, 5], jnp.int32)
    pos = jnp.arange(S)[None, :]
    rna = jnp.where(pos < seq_lengths[:, None], rna, 0)          # zero-pad tail
    tissue_id = jnp.array([0, 3], jnp.int32)

    y = jax.jit(forward)(params, rna, tissue_id, seq_lengths)
    y = jax.block_until_ready(y)
    assert y.shape == (B, 1)
    assert bool(jnp.all(jnp.isfinite(y)))
    print("KERNEL_OK")
</pallas_src>

<mosaic_0001>
module attributes {stable_mosaic.version = 11 : i64} {
  func.func @_fused_forward_kernel(%arg0: memref<696x128xf32, #tpu.memory_space<vmem>>, %arg1: memref<40x32xf32, #tpu.memory_space<vmem>>, %arg2: memref<2x1xf32, #tpu.memory_space<vmem>>, %arg3: memref<16x32xf32, #tpu.memory_space<vmem>>) attributes {dimension_semantics = [], scalar_prefetch = 0 : i64, scratch_operands = 1 : i64, tpu.core_type = #tpu.core_type<tc>} {
    %0 = tpu.iota {dimensions = array<i32: 0>} : vector<16x16xi32>
    %1 = tpu.iota {dimensions = array<i32: 1>} : vector<16x16xi32>
    %c2_i32 = arith.constant 2 : i32
    %c0_i32 = arith.constant 0 : i32
    %2 = arith.cmpi eq, %c2_i32, %c0_i32 : i32
    %c1_i32 = arith.constant 1 : i32
    %3 = arith.select %2, %c1_i32, %c2_i32 : i32
    %4 = vector.broadcast %3 : i32 to vector<16x16xi32>
    %5 = arith.remsi %0, %4 : vector<16x16xi32>
    %c0_i32_0 = arith.constant 0 : i32
    %6 = vector.broadcast %c0_i32_0 : i32 to vector<16x16xi32>
    %7 = arith.cmpi ne, %5, %6 : vector<16x16xi32>
    %c0_i32_1 = arith.constant 0 : i32
    %8 = vector.broadcast %c0_i32_1 : i32 to vector<16x16xi32>
    %9 = arith.cmpi slt, %5, %8 : vector<16x16xi32>
    %c0_i32_2 = arith.constant 0 : i32
    %10 = arith.cmpi slt, %3, %c0_i32_2 : i32
    %11 = vector.broadcast %10 : i1 to vector<16x16xi1>
    %12 = vector.broadcast %11 : vector<16x16xi1> to vector<16x16xi1>
    %13 = arith.xori %9, %12 : vector<16x16xi1>
    %14 = arith.andi %13, %7 : vector<16x16xi1>
    %15 = vector.broadcast %3 : i32 to vector<16x16xi32>
    %16 = arith.addi %5, %15 : vector<16x16xi32>
    %17 = arith.select %14, %16, %5 : vector<16x16xi1>, vector<16x16xi32>
    %c2_i32_3 = arith.constant 2 : i32
    %c0_i32_4 = arith.constant 0 : i32
    %18 = arith.cmpi eq, %c2_i32_3, %c0_i32_4 : i32
    %c1_i32_5 = arith.constant 1 : i32
    %19 = arith.select %18, %c1_i32_5, %c2_i32_3 : i32
    %20 = vector.broadcast %19 : i32 to vector<16x16xi32>
    %21 = arith.remsi %1, %20 : vector<16x16xi32>
    %c0_i32_6 = arith.constant 0 : i32
    %22 = vector.broadcast %c0_i32_6 : i32 to vector<16x16xi32>
    %23 = arith.cmpi ne, %21, %22 : vector<16x16xi32>
    %c0_i32_7 = arith.constant 0 : i32
    %24 = vector.broadcast %c0_i32_7 : i32 to vector<16x16xi32>
    %25 = arith.cmpi slt, %21, %24 : vector<16x16xi32>
    %c0_i32_8 = arith.constant 0 : i32
    %26 = arith.cmpi slt, %19, %c0_i32_8 : i32
    %27 = vector.broadcast %26 : i1 to vector<16x16xi1>
    %28 = vector.broadcast %27 : vector<16x16xi1> to vector<16x16xi1>
    %29 = arith.xori %25, %28 : vector<16x16xi1>
    %30 = arith.andi %29, %23 : vector<16x16xi1>
    %31 = vector.broadcast %19 : i32 to vector<16x16xi32>
    %32 = arith.addi %21, %31 : vector<16x16xi32>
    %33 = arith.select %30, %32, %21 : vector<16x16xi1>, vector<16x16xi32>
    %34 = arith.cmpi eq, %17, %33 : vector<16x16xi32>
    %35 = arith.cmpi sge, %0, %1 : vector<16x16xi32>
    %36 = arith.andi %34, %35 : vector<16x16xi1>
    %37 = arith.extui %36 : vector<16x16xi1> to vector<16x16xi32>
    %38 = arith.sitofp %37 : vector<16x16xi32> to vector<16x16xf32>
    %c0 = arith.constant 0 : index
    %c0_9 = arith.constant 0 : index
    %39 = vector.load %arg1[%c0, %c0_9] : memref<40x32xf32, #tpu.memory_space<vmem>>, vector<16x32xf32>
    %c16 = arith.constant 16 : index
    %c0_10 = arith.constant 0 : index
    %40 = vector.load %arg1[%c16, %c0_10] : memref<40x32xf32, #tpu.memory_space<vmem>>, vector<16x32xf32>
    %41 = arith.mulf %39, %39 : vector<16x32xf32>
    %cst = arith.constant dense<0.000000e+00> : vector<16xf32>
    %42 = vector.multi_reduction <add>, %41, %cst [1] : vector<16x32xf32> to vector<16xf32>
    %43 = vector.shape_cast %42 : vector<16xf32> to vector<16x1xf32>
    %44 = math.sqrt %43 : vector<16x1xf32>
    %cst_11 = arith.constant 1.000000e+00 : f32
    %45 = vector.broadcast %cst_11 : f32 to vector<16x1xf32>
    %46 = arith.cmpf ogt, %44, %45 : vector<16x1xf32>
    %cst_12 = arith.constant 1.000000e-07 : f32
    %47 = vector.broadcast %cst_12 : f32 to vector<16x1xf32>
    %48 = arith.addf %44, %47 : vector<16x1xf32>
    %cst_13 = arith.constant 1.000000e+00 : f32
    %49 = vector.broadcast %cst_13 : f32 to vector<16x1xf32>
    %50 = arith.divf %49, %48 : vector<16x1xf32>
    %cst_14 = arith.constant 1.000000e+00 : f32
    %51 = vector.broadcast %cst_14 : f32 to vector<16x1xf32>
    %52 = arith.select %46, %50, %51 : vector<16x1xi1>, vector<16x1xf32>
    %53 = vector.broadcast %52 : vector<16x1xf32> to vector<16x32xf32>
    %54 = arith.mulf %39, %53 : vector<16x32xf32>
    %55 = arith.mulf %40, %40 : vector<16x32xf32>
    %cst_15 = arith.constant dense<0.000000e+00> : vector<16xf32>
    %56 = vector.multi_reduction <add>, %55, %cst_15 [1] : vector<16x32xf32> to vector<16xf32>
    %57 = vector.shape_cast %56 : vector<16xf32> to vector<16x1xf32>
    %58 = math.sqrt %57 : vector<16x1xf32>
    %cst_16 = arith.constant 1.000000e+00 : f32
    %59 = vector.broadcast %cst_16 : f32 to vector<16x1xf32>
    %60 = arith.cmpf ogt, %58, %59 : vector<16x1xf32>
    %cst_17 = arith.constant 1.000000e-07 : f32
    %61 = vector.broadcast %cst_17 : f32 to vector<16x1xf32>
    %62 = arith.addf %58, %61 : vector<16x1xf32>
    %cst_18 = arith.constant 1.000000e+00 : f32
    %63 = vector.broadcast %cst_18 : f32 to vector<16x1xf32>
    %64 = arith.divf %63, %62 : vector<16x1xf32>
    %cst_19 = arith.constant 1.000000e+00 : f32
    %65 = vector.broadcast %cst_19 : f32 to vector<16x1xf32>
    %66 = arith.select %60, %64, %65 : vector<16x1xi1>, vector<16x1xf32>
    %67 = vector.broadcast %66 : vector<16x1xf32> to vector<16x32xf32>
    %68 = arith.mulf %40, %67 : vector<16x32xf32>
    %69 = arith.addf %54, %68 : vector<16x32xf32>
    %c0_20 = arith.constant 0 : index
    %c0_21 = arith.constant 0 : index
    %70 = vector.load %arg0[%c0_20, %c0_21] : memref<696x128xf32, #tpu.memory_space<vmem>>, vector<1x32xf32>
    %cst_22 = arith.constant dense<0.000000e+00> : vector<16xf32>
    %71 = vector.multi_reduction <add>, %69, %cst_22 [1] : vector<16x32xf32> to vector<16xf32>
    %72 = vector.shape_cast %71 : vector<16xf32> to vector<16x1xf32>
    %cst_23 = arith.constant 3.200000e+01 : f32
    %73 = vector.broadcast %cst_23 : f32 to vector<16x1xf32>
    %74 = arith.divf %72, %73 : vector<16x1xf32>
    %75 = vector.broadcast %74 : vector<16x1xf32> to vector<16x32xf32>
    %76 = arith.subf %69, %75 : vector<16x32xf32>
    %77 = arith.mulf %76, %76 : vector<16x32xf32>
    %cst_24 = arith.constant dense<0.000000e+00> : vector<16xf32>
    %78 = vector.multi_reduction <add>, %77, %cst_24 [1] : vector<16x32xf32> to vector<16xf32>
    %79 = vector.shape_cast %78 : vector<16xf32> to vector<16x1xf32>
    %cst_25 = arith.constant 3.200000e+01 : f32
    %80 = vector.broadcast %cst_25 : f32 to vector<16x1xf32>
    %81 = arith.divf %79, %80 : vector<16x1xf32>
    %cst_26 = arith.constant 9.99999974E-6 : f32
    %82 = vector.broadcast %cst_26 : f32 to vector<16x1xf32>
    %83 = arith.addf %81, %82 : vector<16x1xf32>
    %84 = math.rsqrt %83 : vector<16x1xf32>
    %85 = vector.broadcast %84 : vector<16x1xf32> to vector<16x32xf32>
    %86 = arith.mulf %76, %85 : vector<16x32xf32>
    %87 = vector.broadcast %70 : vector<1x32xf32> to vector<16x32xf32>
    %88 = arith.mulf %86, %87 : vector<16x32xf32>
    %c8 = arith.constant 8 : index
    %c0_27 = arith.constant 0 : index
    %89 = vector.load %arg0[%c8, %c0_27] : memref<696x128xf32, #tpu.memory_space<vmem>>, vector<32x128xf32>
    %cst_28 = arith.constant dense<0.000000e+00> : vector<16x128xf32>
    %90 = tpu.matmul %88, %89, %cst_28 {dimension_numbers = #tpu.dot_dimension_numbers<[1], [0], [0], [1], [0, 0, 1, 1], [], []>} : vector<16x32xf32>, vector<32x128xf32>, vector<16x128xf32> -> vector<16x128xf32>
    %91 = vector.extract_strided_slice %90 {offsets = [0, 0], sizes = [16, 64], strides = [1, 1]} : vector<16x128xf32> to vector<16x64xf32>
    %92 = vector.extract_strided_slice %90 {offsets = [0, 64], sizes = [16, 64], strides = [1, 1]} : vector<16x128xf32> to vector<16x64xf32>
    %c40 = arith.constant 40 : index
    %c0_29 = arith.constant 0 : index
    %93 = vector.load %arg0[%c40, %c0_29] : memref<696x128xf32, #tpu.memory_space<vmem>>, vector<4x64xf32>
    %c48 = arith.constant 48 : index
    %c0_30 = arith.constant 0 : index
    %94 = vector.load %arg0[%c48, %c0_30] : memref<696x128xf32, #tpu.memory_space<vmem>>, vector<1x64xf32>
    %95 = vector.extract_strided_slice %93 {offsets = [3, 0], sizes = [1, 64], strides = [1, 1]} : vector<4x64xf32> to vector<1x64xf32>
    %96 = vector.broadcast %95 : vector<1x64xf32> to vector<16x64xf32>
    %97 = arith.mulf %91, %96 : vector<16x64xf32>
    %98 = vector.broadcast %94 : vector<1x64xf32> to vector<16x64xf32>
    %99 = arith.addf %97, %98 : vector<16x64xf32>
    %100 = tpu.iota {dimensions = array<i32: 0>} : vector<16x64xi32>
    %c6_i32 = arith.constant 6 : i32
    %101 = tpu.dynamic_rotate %91 by %c6_i32 dim 0 : vector<16x64xf32>, i32 -> vector<16x64xf32>
    %c6_i32_31 = arith.constant 6 : i32
    %102 = vector.broadcast %c6_i32_31 : i32 to vector<16x64xi32>
    %103 = arith.cmpi sge, %100, %102 : vector<16x64xi32>
    %cst_32 = arith.constant 0.000000e+00 : f32
    %104 = vector.broadcast %cst_32 : f32 to vector<16x64xf32>
    %105 = arith.select %103, %101, %104 : vector<16x64xi1>, vector<16x64xf32>
    %106 = vector.extract_strided_slice %93 {offsets = [0, 0], sizes = [1, 64], strides = [1, 1]} : vector<4x64xf32> to vector<1x64xf32>
    %107 = vector.broadcast %106 : vector<1x64xf32> to vector<16x64xf32>
    %108 = arith.mulf %105, %107 : vector<16x64xf32>
    %109 = arith.addf %99, %108 : vector<16x64xf32>
    %c4_i32 = arith.constant 4 : i32
    %110 = tpu.dynamic_rotate %91 by %c4_i32 dim 0 : vector<16x64xf32>, i32 -> vector<16x64xf32>
    %c4_i32_33 = arith.constant 4 : i32
    %111 = vector.broadcast %c4_i32_33 : i32 to vector<16x64xi32>
    %112 = arith.cmpi sge, %100, %111 : vector<16x64xi32>
    %cst_34 = arith.constant 0.000000e+00 : f32
    %113 = vector.broadcast %cst_34 : f32 to vector<16x64xf32>
    %114 = arith.select %112, %110, %113 : vector<16x64xi1>, vector<16x64xf32>
    %115 = vector.extract_strided_slice %93 {offsets = [1, 0], sizes = [1, 64], strides = [1, 1]} : vector<4x64xf32> to vector<1x64xf32>
    %116 = vector.broadcast %115 : vector<1x64xf32> to vector<16x64xf32>
    %117 = arith.mulf %114, %116 : vector<16x64xf32>
    %118 = arith.addf %109, %117 : vector<16x64xf32>
    %c2_i32_35 = arith.constant 2 : i32
    %119 = tpu.dynamic_rotate %91 by %c2_i32_35 dim 0 : vector<16x64xf32>, i32 -> vector<16x64xf32>
    %c2_i32_36 = arith.constant 2 : i32
    %120 = vector.broadcast %c2_i32_36 : i32 to vector<16x64xi32>
    %121 = arith.cmpi sge, %100, %120 : vector<16x64xi32>
    %cst_37 = arith.constant 0.000000e+00 : f32
    %122 = vector.broadcast %cst_37 : f32 to vector<16x64xf32>
    %123 = arith.select %121, %119, %122 : vector<16x64xi1>, vector<16x64xf32>
    %124 = vector.extract_strided_slice %93 {offsets = [2, 0], sizes = [1, 64], strides = [1, 1]} : vector<4x64xf32> to vector<1x64xf32>
    %125 = vector.broadcast %124 : vector<1x64xf32> to vector<16x64xf32>
    %126 = arith.mulf %123, %125 : vector<16x64xf32>
    %127 = arith.addf %118, %126 : vector<16x64xf32>
    %128 = arith.negf %127 : vector<16x64xf32>
    %129 = math.exp %128 : vector<16x64xf32>
    %cst_38 = arith.constant 1.000000e+00 : f32
    %130 = vector.broadcast %cst_38 : f32 to vector<16x64xf32>
    %131 = arith.addf %130, %129 : vector<16x64xf32>
    %132 = arith.divf %130, %131 : vector<16x64xf32>
    %133 = arith.mulf %127, %132 : vector<16x64xf32>
    %c56 = arith.constant 56 : index
    %c0_39 = arith.constant 0 : index
    %134 = vector.load %arg0[%c56, %c0_39] : memref<696x128xf32, #tpu.memory_space<vmem>>, vector<64x128xf32>
    %cst_40 = arith.constant dense<0.000000e+00> : vector<16x128xf32>
    %135 = tpu.matmul %133, %134, %cst_40 {dimension_numbers = #tpu.dot_dimension_numbers<[1], [0], [0], [1], [0, 0, 1, 1], [], []>} : vector<16x64xf32>, vector<64x128xf32>, vector<16x128xf32> -> vector<16x128xf32>
    %c120 = arith.constant 120 : index
    %c0_41 = arith.constant 0 : index
    %136 = vector.load %arg0[%c120, %c0_41] : memref<696x128xf32, #tpu.memory_space<vmem>>, vector<64x72xf32>
    %cst_42 = arith.constant dense<0.000000e+00> : vector<16x72xf32>
    %137 = tpu.matmul %91, %136, %cst_42 {dimension_numbers = #tpu.dot_dimension_numbers<[1], [0], [0], [1], [0, 0, 1, 1], [], []>} : vector<16x64xf32>, vector<64x72xf32>, vector<16x72xf32> -> vector<16x72xf32>
    %138 = vector.extract_strided_slice %137 {offsets = [0, 0], sizes = [16, 64], strides = [1, 1]} : vector<16x72xf32> to vector<16x64xf32>
    %c184 = arith.constant 184 : index
    %c0_43 = arith.constant 0 : index
    %139 = vector.load %arg0[%c184, %c0_43] : memref<696x128xf32, #tpu.memory_space<vmem>>, vector<64x8xf32>
    %cst_44 = arith.constant dense<0.000000e+00> : vector<16x8xf32>
    %140 = tpu.matmul %133, %139, %cst_44 {dimension_numbers = #tpu.dot_dimension_numbers<[1], [0], [0], [1], [0, 0, 1, 1], [], []>} : vector<16x64xf32>, vector<64x8xf32>, vector<16x8xf32> -> vector<16x8xf32>
    %141 = vector.extract_strided_slice %137 {offsets = [0, 64], sizes = [16, 8], strides = [1, 1]} : vector<16x72xf32> to vector<16x8xf32>
    %142 = arith.addf %140, %141 : vector<16x8xf32>
    %c248 = arith.constant 248 : index
    %c0_45 = arith.constant 0 : index
    %143 = vector.load %arg0[%c248, %c0_45] : memref<696x128xf32, #tpu.memory_space<vmem>>, vector<1x8xf32>
    %144 = vector.broadcast %143 : vector<1x8xf32> to vector<16x8xf32>
    %145 = arith.addf %142, %144 : vector<16x8xf32>
    %146 = vector.extract_strided_slice %145 {offsets = [0, 0], sizes = [16, 4], strides = [1, 1]} : vector<16x8xf32> to vector<16x4xf32>
    %147 = vector.extract_strided_slice %145 {offsets = [0, 4], sizes = [16, 4], strides = [1, 1]} : vector<16x8xf32> to vector<16x4xf32>
    %cst_46 = arith.constant 0.000000e+00 : f32
    %148 = vector.broadcast %cst_46 : f32 to vector<16x4xf32>
    %149 = arith.minimumf %147, %148 : vector<16x4xf32>
    %150 = math.absf %147 : vector<16x4xf32>
    %cst_47 = arith.constant 0.000000e+00 : f32
    %151 = vector.broadcast %cst_47 : f32 to vector<16x4xf32>
    %152 = arith.subf %151, %150 : vector<16x4xf32>
    %153 = math.exp %152 : vector<16x4xf32>
    %154 = math.log1p %153 : vector<16x4xf32>
    %155 = arith.subf %149, %154 : vector<16x4xf32>
    %cst_48 = arith.constant dense<0.000000e+00> : vector<16x4xf32>
    %156 = tpu.matmul %38, %155, %cst_48 {dimension_numbers = #tpu.dot_dimension_numbers<[1], [0], [0], [1], [0, 0, 1, 1], [], []>} : vector<16x16xf32>, vector<16x4xf32>, vector<16x4xf32> -> vector<16x4xf32>
    %157 = arith.subf %146, %156 : vector<16x4xf32>
    %158 = tpu.transpose %157, [1, 0] : vector<16x4xf32> -> vector<4x16xf32>
    %159 = vector.extract_strided_slice %135 {offsets = [0, 0], sizes = [16, 64], strides = [1, 1]} : vector<16x128xf32> to vector<16x64xf32>
    %160 = vector.extract_strided_slice %135 {offsets = [0, 64], sizes = [16, 64], strides = [1, 1]} : vector<16x128xf32> to vector<16x64xf32>
    %cst_49 = arith.constant 2.500000e-01 : f32
    %161 = vector.broadcast %cst_49 : f32 to vector<16x64xf32>
    %162 = arith.mulf %160, %161 : vector<16x64xf32>
    %163 = vector.extract_strided_slice %156 {offsets = [0, 0], sizes = [16, 1], strides = [1, 1]} : vector<16x4xf32> to vector<16x1xf32>
    %164 = vector.extract_strided_slice %158 {offsets = [0, 0], sizes = [1, 16], strides = [1, 1]} : vector<4x16xf32> to vector<1x16xf32>
    %165 = vector.broadcast %163 : vector<16x1xf32> to vector<16x16xf32>
    %166 = vector.broadcast %164 : vector<1x16xf32> to vector<16x16xf32>
    %167 = arith.addf %165, %166 : vector<16x16xf32>
    %cst_50 = arith.constant -1.000000e+30 : f32
    %168 = vector.broadcast %cst_50 : f32 to vector<16x16xf32>
    %169 = arith.select %36, %167, %168 : vector<16x16xi1>, vector<16x16xf32>
    %cst_51 = arith.constant dense<0xFF800000> : vector<16xf32>
    %170 = vector.multi_reduction <maximumf>, %169, %cst_51 [1] : vector<16x16xf32> to vector<16xf32>
    %171 = vector.shape_cast %170 : vector<16xf32> to vector<16x1xf32>
    %172 = vector.broadcast %171 : vector<16x1xf32> to vector<16x16xf32>
    %173 = arith.subf %169, %172 : vector<16x16xf32>
    %174 = math.exp %173 : vector<16x16xf32>
    %175 = vector.extract_strided_slice %159 {offsets = [0, 0], sizes = [16, 16], strides = [1, 1]} : vector<16x64xf32> to vector<16x16xf32>
    %176 = vector.extract_strided_slice %162 {offsets = [0, 0], sizes = [16, 16], strides = [1, 1]} : vector<16x64xf32> to vector<16x16xf32>
    "tpu.trace_start"() <{level = 10 : i32, message = "sd,td->st"}> : () -> ()
    %cst_52 = arith.constant dense<0.000000e+00> : vector<16x16xf32>
    %177 = tpu.matmul %175, %176, %cst_52 {dimension_numbers = #tpu.dot_dimension_numbers<[1], [1], [0], [0], [0, 0, 1, 0], [], []>} : vector<16x16xf32>, vector<16x16xf32>, vector<16x16xf32> -> vector<16x16xf32>
    "tpu.trace_stop"() : () -> ()
    %178 = arith.mulf %177, %174 : vector<16x16xf32>
    %cst_53 = arith.constant dense<0.000000e+00> : vector<16xf32>
    %179 = vector.multi_reduction <add>, %178, %cst_53 [1] : vector<16x16xf32> to vector<16xf32>
    %180 = vector.shape_cast %179 : vector<16xf32> to vector<16x1xf32>
    %181 = math.absf %180 : vector<16x1xf32>
    %cst_54 = arith.constant 0.000000e+00 : f32
    %182 = vector.broadcast %cst_54 : f32 to vector<16x1xf32>
    %183 = arith.subf %182, %171 : vector<16x1xf32>
    %184 = math.exp %183 : vector<16x1xf32>
    %185 = arith.maximumf %181, %184 : vector<16x1xf32>
    %cst_55 = arith.constant 9.99999997E-7 : f32
    %186 = vector.broadcast %cst_55 : f32 to vector<16x1xf32>
    %187 = arith.addf %185, %186 : vector<16x1xf32>
    %188 = vector.broadcast %187 : vector<16x1xf32> to vector<16x16xf32>
    %189 = arith.divf %178, %188 : vector<16x16xf32>
    %190 = vector.extract_strided_slice %138 {offsets = [0, 0], sizes = [16, 16], strides = [1, 1]} : vector<16x64xf32> to vector<16x16xf32>
    %cst_56 = arith.constant dense<0.000000e+00> : vector<16x16xf32>
    %191 = tpu.matmul %189, %190, %cst_56 {dimension_numbers = #tpu.dot_dimension_numbers<[1], [0], [0], [1], [0, 0, 1, 1], [], []>} : vector<16x16xf32>, vector<16x16xf32>, vector<16x16xf32> -> vector<16x16xf32>
    %192 = vector.extract_strided_slice %156 {offsets = [0, 1], sizes = [16, 1], strides = [1, 1]} : vector<16x4xf32> to vector<16x1xf32>
    %193 = vector.extract_strided_slice %158 {offsets = [1, 0], sizes = [1, 16], strides = [1, 1]} : vector<4x16xf32> to vector<1x16xf32>
    %194 = vector.broadcast %192 : vector<16x1xf32> to vector<16x16xf32>
    %195 = vector.broadcast %193 : vector<1x16xf32> to vector<16x16xf32>
    %196 = arith.addf %194, %195 : vector<16x16xf32>
    %cst_57 = arith.constant -1.000000e+30 : f32
    %197 = vector.broadcast %cst_57 : f32 to vector<16x16xf32>
    %198 = arith.select %36, %196, %197 : vector<16x16xi1>, vector<16x16xf32>
    %cst_58 = arith.constant dense<0xFF800000> : vector<16xf32>
    %199 = vector.multi_reduction <maximumf>, %198, %cst_58 [1] : vector<16x16xf32> to vector<16xf32>
    %200 = vector.shape_cast %199 : vector<16xf32> to vector<16x1xf32>
    %201 = vector.broadcast %200 : vector<16x1xf32> to vector<16x16xf32>
    %202 = arith.subf %198, %201 : vector<16x16xf32>
    %203 = math.exp %202 : vector<16x16xf32>
    %204 = vector.extract_strided_slice %159 {offsets = [0, 16], sizes = [16, 16], strides = [1, 1]} : vector<16x64xf32> to vector<16x16xf32>
    %205 = vector.extract_strided_slice %162 {offsets = [0, 16], sizes = [16, 16], strides = [1, 1]} : vector<16x64xf32> to vector<16x16xf32>
    "tpu.trace_start"() <{level = 10 : i32, message = "sd,td->st"}> : () -> ()
    %cst_59 = arith.constant dense<0.000000e+00> : vector<16x16xf32>
    %206 = tpu.matmul %204, %205, %cst_59 {dimension_numbers = #tpu.dot_dimension_numbers<[1], [1], [0], [0], [0, 0, 1, 0], [], []>} : vector<16x16xf32>, vector<16x16xf32>, vector<16x16xf32> -> vector<16x16xf32>
    "tpu.trace_stop"() : () -> ()
    %207 = arith.mulf %206, %203 : vector<16x16xf32>
    %cst_60 = arith.constant dense<0.000000e+00> : vector<16xf32>
    %208 = vector.multi_reduction <add>, %207, %cst_60 [1] : vector<16x16xf32> to vector<16xf32>
    %209 = vector.shape_cast %208 : vector<16xf32> to vector<16x1xf32>
    %210 = math.absf %209 : vector<16x1xf32>
    %cst_61 = arith.constant 0.000000e+00 : f32
    %211 = vector.broadcast %cst_61 : f32 to vector<16x1xf32>
    %212 = arith.subf %211, %200 : vector<16x1xf32>
    %213 = math.exp %212 : vector<16x1xf32>
    %214 = arith.maximumf %210, %213 : vector<16x1xf32>
    %cst_62 = arith.constant 9.99999997E-7 : f32
    %215 = vector.broadcast %cst_62 : f32 to vector<16x1xf32>
    %216 = arith.addf %214, %215 : vector<16x1xf32>
    %217 = vector.broadcast %216 : vector<16x1xf32> to vector<16x16xf32>
    %218 = arith.divf %207, %217 : vector<16x16xf32>
    %219 = vector.extract_strided_slice %138 {offsets = [0, 16], sizes = [16, 16], strides = [1, 1]} : vector<16x64xf32> to vector<16x16xf32>
    %cst_63 = arith.constant dense<0.000000e+00> : vector<16x16xf32>
    %220 = tpu.matmul %218, %219, %cst_63 {dimension_numbers = #tpu.dot_dimension_numbers<[1], [0], [0], [1], [0, 0, 1, 1], [], []>} : vector<16x16xf32>, vector<16x16xf32>, vector<16x16xf32> -> vector<16x16xf32>
    %221 = vector.extract_strided_slice %156 {offsets = [0, 2], sizes = [16, 1], strides = [1, 1]} : vector<16x4xf32> to vector<16x1xf32>
    %222 = vector.extract_strided_slice %158 {offsets = [2, 0], sizes = [1, 16], strides = [1, 1]} : vector<4x16xf32> to vector<1x16xf32>
    %223 = vector.broadcast %221 : vector<16x1xf32> to vector<16x16xf32>
    %224 = vector.broadcast %222 : vector<1x16xf32> to vector<16x16xf32>
    %225 = arith.addf %223, %224 : vector<16x16xf32>
    %cst_64 = arith.constant -1.000000e+30 : f32
    %226 = vector.broadcast %cst_64 : f32 to vector<16x16xf32>
    %227 = arith.select %36, %225, %226 : vector<16x16xi1>, vector<16x16xf32>
    %cst_65 = arith.constant dense<0xFF800000> : vector<16xf32>
    %228 = vector.multi_reduction <maximumf>, %227, %cst_65 [1] : vector<16x16xf32> to vector<16xf32>
    %229 = vector.shape_cast %228 : vector<16xf32> to vector<16x1xf32>
    %230 = vector.broadcast %229 : vector<16x1xf32> to vector<16x16xf32>
    %231 = arith.subf %227, %230 : vector<16x16xf32>
    %232 = math.exp %231 : vector<16x16xf32>
    %233 = vector.extract_strided_slice %159 {offsets = [0, 32], sizes = [16, 16], strides = [1, 1]} : vector<16x64xf32> to vector<16x16xf32>
    %234 = vector.extract_strided_slice %162 {offsets = [0, 32], sizes = [16, 16], strides = [1, 1]} : vector<16x64xf32> to vector<16x16xf32>
    "tpu.trace_start"() <{level = 10 : i32, message = "sd,td->st"}> : () -> ()
    %cst_66 = arith.constant dense<0.000000e+00> : vector<16x16xf32>
    %235 = tpu.matmul %233, %234, %cst_66 {dimension_numbers = #tpu.dot_dimension_numbers<[1], [1], [0], [0], [0, 0, 1, 0], [], []>} : vector<16x16xf32>, vector<16x16xf32>, vector<16x16xf32> -> vector<16x16xf32>
    "tpu.trace_stop"() : () -> ()
    %236 = arith.mulf %235, %232 : vector<16x16xf32>
    %cst_67 = arith.constant dense<0.000000e+00> : vector<16xf32>
    %237 = vector.multi_reduction <add>, %236, %cst_67 [1] : vector<16x16xf32> to vector<16xf32>
    %238 = vector.shape_cast %237 : vector<16xf32> to vector<16x1xf32>
    %239 = math.absf %238 : vector<16x1xf32>
    %cst_68 = arith.constant 0.000000e+00 : f32
    %240 = vector.broadcast %cst_68 : f32 to vector<16x1xf32>
    %241 = arith.subf %240, %229 : vector<16x1xf32>
    %242 = math.exp %241 : vector<16x1xf32>
    %243 = arith.maximumf %239, %242 : vector<16x1xf32>
    %cst_69 = arith.constant 9.99999997E-7 : f32
    %244 = vector.broadcast %cst_69 : f32 to vector<16x1xf32>
    %245 = arith.addf %243, %244 : vector<16x1xf32>
    %246 = vector.broadcast %245 : vector<16x1xf32> to vector<16x16xf32>
    %247 = arith.divf %236, %246 : vector<16x16xf32>
    %248 = vector.extract_strided_slice %138 {offsets = [0, 32], sizes = [16, 16], strides = [1, 1]} : vector<16x64xf32> to vector<16x16xf32>
    %cst_70 = arith.constant dense<0.000000e+00> : vector<16x16xf32>
    %249 = tpu.matmul %247, %248, %cst_70 {dimension_numbers = #tpu.dot_dimension_numbers<[1], [0], [0], [1], [0, 0, 1, 1], [], []>} : vector<16x16xf32>, vector<16x16xf32>, vector<16x16xf32> -> vector<16x16xf32>
    %250 = vector.extract_strided_slice %156 {offsets = [0, 3], sizes = [16, 1], strides = [1, 1]} : vector<16x4xf32> to vector<16x1xf32>
    %251 = vector.extract_strided_slice %158 {offsets = [3, 0], sizes = [1, 16], strides = [1, 1]} : vector<4x16xf32> to vector<1x16xf32>
    %252 = vector.broadcast %250 : vector<16x1xf32> to vector<16x16xf32>
    %253 = vector.broadcast %251 : vector<1x16xf32> to vector<16x16xf32>
    %254 = arith.addf %252, %253 : vector<16x16xf32>
    %cst_71 = arith.constant -1.000000e+30 : f32
    %255 = vector.broadcast %cst_71 : f32 to vector<16x16xf32>
    %256 = arith.select %36, %254, %255 : vector<16x16xi1>, vector<16x16xf32>
    %cst_72 = arith.constant dense<0xFF800000> : vector<16xf32>
    %257 = vector.multi_reduction <maximumf>, %256, %cst_72 [1] : vector<16x16xf32> to vector<16xf32>
    %258 = vector.shape_cast %257 : vector<16xf32> to vector<16x1xf32>
    %259 = vector.broadcast %258 : vector<16x1xf32> to vector<16x16xf32>
    %260 = arith.subf %256, %259 : vector<16x16xf32>
    %261 = math.exp %260 : vector<16x16xf32>
    %262 = vector.extract_strided_slice %159 {offsets = [0, 48], sizes = [16, 16], strides = [1, 1]} : vector<16x64xf32> to vector<16x16xf32>
    %263 = vector.extract_strided_slice %162 {offsets = [0, 48], sizes = [16, 16], strides = [1, 1]} : vector<16x64xf32> to vector<16x16xf32>
    "tpu.trace_start"() <{level = 10 : i32, message = "sd,td->st"}> : () -> ()
    %cst_73 = arith.constant dense<0.000000e+00> : vector<16x16xf32>
    %264 = tpu.matmul %262, %263, %cst_73 {dimension_numbers = #tpu.dot_dimension_numbers<[1], [1], [0], [0], [0, 0, 1, 0], [], []>} : vector<16x16xf32>, vector<16x16xf32>, vector<16x16xf32> -> vector<16x16xf32>
    "tpu.trace_stop"() : () -> ()
    %265 = arith.mulf %264, %261 : vector<16x16xf32>
    %cst_74 = arith.constant dense<0.000000e+00> : vector<16xf32>
    %266 = vector.multi_reduction <add>, %265, %cst_74 [1] : vector<16x16xf32> to vector<16xf32>
    %267 = vector.shape_cast %266 : vector<16xf32> to vector<16x1xf32>
    %268 = math.absf %267 : vector<16x1xf32>
    %cst_75 = arith.constant 0.000000e+00 : f32
    %269 = vector.broadcast %cst_75 : f32 to vector<16x1xf32>
    %270 = arith.subf %269, %258 : vector<16x1xf32>
    %271 = math.exp %270 : vector<16x1xf32>
    %272 = arith.maximumf %268, %271 : vector<16x1xf32>
    %cst_76 = arith.constant 9.99999997E-7 : f32
    %273 = vector.broadcast %cst_76 : f32 to vector<16x1xf32>
    %274 = arith.addf %272, %273 : vector<16x1xf32>
    %275 = vector.broadcast %274 : vector<16x1xf32> to vector<16x16xf32>
    %276 = arith.divf %265, %275 : vector<16x16xf32>
    %277 = vector.extract_strided_slice %138 {offsets = [0, 48], sizes = [16, 16], strides = [1, 1]} : vector<16x64xf32> to vector<16x16xf32>
    %cst_77 = arith.constant dense<0.000000e+00> : vector<16x16xf32>
    %278 = tpu.matmul %276, %277, %cst_77 {dimension_numbers = #tpu.dot_dimension_numbers<[1], [0], [0], [1], [0, 0, 1, 1], [], []>} : vector<16x16xf32>, vector<16x16xf32>, vector<16x16xf32> -> vector<16x16xf32>
    %279 = tpu.concatenate %191, %220, %249, %278 in 1 : vector<16x16xf32>, vector<16x16xf32>, vector<16x16xf32>, vector<16x16xf32> -> vector<16x64xf32>
    %c256 = arith.constant 256 : index
    %c0_78 = arith.constant 0 : index
    %280 = vector.load %arg0[%c256, %c0_78] : memref<696x128xf32, #tpu.memory_space<vmem>>, vector<1x64xf32>
    %281 = vector.shape_cast %279 : vector<16x64xf32> to vector<16x4x16xf32>
    %cst_79 = arith.constant dense<0.000000e+00> : vector<16x4xf32>
    %282 = vector.multi_reduction <add>, %281, %cst_79 [2] : vector<16x4x16xf32> to vector<16x4xf32>
    %283 = vector.shape_cast %282 : vector<16x4xf32> to vector<16x4x1xf32>
    %cst_80 = arith.constant 1.600000e+01 : f32
    %284 = vector.broadcast %cst_80 : f32 to vector<16x4x1xf32>
    %285 = arith.divf %283, %284 : vector<16x4x1xf32>
    %286 = vector.broadcast %285 : vector<16x4x1xf32> to vector<16x4x16xf32>
    %287 = arith.subf %281, %286 : vector<16x4x16xf32>
    %288 = arith.mulf %287, %287 : vector<16x4x16xf32>
    %cst_81 = arith.constant dense<0.000000e+00> : vector<16x4xf32>
    %289 = vector.multi_reduction <add>, %288, %cst_81 [2] : vector<16x4x16xf32> to vector<16x4xf32>
    %290 = vector.shape_cast %289 : vector<16x4xf32> to vector<16x4x1xf32>
    %cst_82 = arith.constant 1.600000e+01 : f32
    %291 = vector.broadcast %cst_82 : f32 to vector<16x4x1xf32>
    %292 = arith.divf %290, %291 : vector<16x4x1xf32>
    %cst_83 = arith.constant 9.99999974E-6 : f32
    %293 = vector.broadcast %cst_83 : f32 to vector<16x4x1xf32>
    %294 = arith.addf %292, %293 : vector<16x4x1xf32>
    %295 = math.rsqrt %294 : vector<16x4x1xf32>
    %296 = vector.broadcast %295 : vector<16x4x1xf32> to vector<16x4x16xf32>
    %297 = arith.mulf %287, %296 : vector<16x4x16xf32>
    %298 = vector.shape_cast %297 : vector<16x4x16xf32> to vector<16x64xf32>
    %299 = vector.broadcast %280 : vector<1x64xf32> to vector<16x64xf32>
    %300 = arith.mulf %298, %299 : vector<16x64xf32>
    %c264 = arith.constant 264 : index
    %c0_84 = arith.constant 0 : index
    %301 = vector.load %arg0[%c264, %c0_84] : memref<696x128xf32, #tpu.memory_space<vmem>>, vector<1x64xf32>
    %302 = vector.broadcast %301 : vector<1x64xf32> to vector<16x64xf32>
    %303 = arith.mulf %302, %133 : vector<16x64xf32>
    %304 = arith.addf %300, %303 : vector<16x64xf32>
    %305 = arith.negf %92 : vector<16x64xf32>
    %306 = math.exp %305 : vector<16x64xf32>
    %cst_85 = arith.constant 1.000000e+00 : f32
    %307 = vector.broadcast %cst_85 : f32 to vector<16x64xf32>
    %308 = arith.addf %307, %306 : vector<16x64xf32>
    %309 = arith.divf %307, %308 : vector<16x64xf32>
    %310 = arith.mulf %92, %309 : vector<16x64xf32>
    %311 = arith.mulf %304, %310 : vector<16x64xf32>
    %c272 = arith.constant 272 : index
    %c0_86 = arith.constant 0 : index
    %312 = vector.load %arg0[%c272, %c0_86] : memref<696x128xf32, #tpu.memory_space<vmem>>, vector<64x32xf32>
    %cst_87 = arith.constant dense<0.000000e+00> : vector<16x32xf32>
    %313 = tpu.matmul %311, %312, %cst_87 {dimension_numbers = #tpu.dot_dimension_numbers<[1], [0], [0], [1], [0, 0, 1, 1], [], []>} : vector<16x64xf32>, vector<64x32xf32>, vector<16x32xf32> -> vector<16x32xf32>
    %314 = arith.addf %69, %313 : vector<16x32xf32>
    %c336 = arith.constant 336 : index
    %c0_88 = arith.constant 0 : index
    %315 = vector.load %arg0[%c336, %c0_88] : memref<696x128xf32, #tpu.memory_space<vmem>>, vector<1x32xf32>
    %cst_89 = arith.constant dense<0.000000e+00> : vector<16xf32>
    %316 = vector.multi_reduction <add>, %314, %cst_89 [1] : vector<16x32xf32> to vector<16xf32>
    %317 = vector.shape_cast %316 : vector<16xf32> to vector<16x1xf32>
    %cst_90 = arith.constant 3.200000e+01 : f32
    %318 = vector.broadcast %cst_90 : f32 to vector<16x1xf32>
    %319 = arith.divf %317, %318 : vector<16x1xf32>
    %320 = vector.broadcast %319 : vector<16x1xf32> to vector<16x32xf32>
    %321 = arith.subf %314, %320 : vector<16x32xf32>
    %322 = arith.mulf %321, %321 : vector<16x32xf32>
    %cst_91 = arith.constant dense<0.000000e+00> : vector<16xf32>
    %323 = vector.multi_reduction <add>, %322, %cst_91 [1] : vector<16x32xf32> to vector<16xf32>
    %324 = vector.shape_cast %323 : vector<16xf32> to vector<16x1xf32>
    %cst_92 = arith.constant 3.200000e+01 : f32
    %325 = vector.broadcast %cst_92 : f32 to vector<16x1xf32>
    %326 = arith.divf %324, %325 : vector<16x1xf32>
    %cst_93 = arith.constant 9.99999974E-6 : f32
    %327 = vector.broadcast %cst_93 : f32 to vector<16x1xf32>
    %328 = arith.addf %326, %327 : vector<16x1xf32>
    %329 = math.rsqrt %328 : vector<16x1xf32>
    %330 = vector.broadcast %329 : vector<16x1xf32> to vector<16x32xf32>
    %331 = arith.mulf %321, %330 : vector<16x32xf32>
    %332 = vector.broadcast %315 : vector<1x32xf32> to vector<16x32xf32>
    %333 = arith.mulf %331, %332 : vector<16x32xf32>
    %c344 = arith.constant 344 : index
    %c0_94 = arith.constant 0 : index
    %334 = vector.load %arg0[%c344, %c0_94] : memref<696x128xf32, #tpu.memory_space<vmem>>, vector<4x32xf32>
    %c352 = arith.constant 352 : index
    %c0_95 = arith.constant 0 : index
    %335 = vector.load %arg0[%c352, %c0_95] : memref<696x128xf32, #tpu.memory_space<vmem>>, vector<1x32xf32>
    %336 = vector.extract_strided_slice %334 {offsets = [3, 0], sizes = [1, 32], strides = [1, 1]} : vector<4x32xf32> to vector<1x32xf32>
    %337 = vector.broadcast %336 : vector<1x32xf32> to vector<16x32xf32>
    %338 = arith.mulf %333, %337 : vector<16x32xf32>
    %339 = vector.broadcast %335 : vector<1x32xf32> to vector<16x32xf32>
    %340 = arith.addf %338, %339 : vector<16x32xf32>
    %341 = tpu.iota {dimensions = array<i32: 0>} : vector<16x32xi32>
    %c6_i32_96 = arith.constant 6 : i32
    %342 = tpu.dynamic_rotate %333 by %c6_i32_96 dim 0 : vector<16x32xf32>, i32 -> vector<16x32xf32>
    %c6_i32_97 = arith.constant 6 : i32
    %343 = vector.broadcast %c6_i32_97 : i32 to vector<16x32xi32>
    %344 = arith.cmpi sge, %341, %343 : vector<16x32xi32>
    %cst_98 = arith.constant 0.000000e+00 : f32
    %345 = vector.broadcast %cst_98 : f32 to vector<16x32xf32>
    %346 = arith.select %344, %342, %345 : vector<16x32xi1>, vector<16x32xf32>
    %347 = vector.extract_strided_slice %334 {offsets = [0, 0], sizes = [1, 32], strides = [1, 1]} : vector<4x32xf32> to vector<1x32xf32>
    %348 = vector.broadcast %347 : vector<1x32xf32> to vector<16x32xf32>
    %349 = arith.mulf %346, %348 : vector<16x32xf32>
    %350 = arith.addf %340, %349 : vector<16x32xf32>
    %c4_i32_99 = arith.constant 4 : i32
    %351 = tpu.dynamic_rotate %333 by %c4_i32_99 dim 0 : vector<16x32xf32>, i32 -> vector<16x32xf32>
    %c4_i32_100 = arith.constant 4 : i32
    %352 = vector.broadcast %c4_i32_100 : i32 to vector<16x32xi32>
    %353 = arith.cmpi sge, %341, %352 : vector<16x32xi32>
    %cst_101 = arith.constant 0.000000e+00 : f32
    %354 = vector.broadcast %cst_101 : f32 to vector<16x32xf32>
    %355 = arith.select %353, %351, %354 : vector<16x32xi1>, vector<16x32xf32>
    %356 = vector.extract_strided_slice %334 {offsets = [1, 0], sizes = [1, 32], strides = [1, 1]} : vector<4x32xf32> to vector<1x32xf32>
    %357 = vector.broadcast %356 : vector<1x32xf32> to vector<16x32xf32>
    %358 = arith.mulf %355, %357 : vector<16x32xf32>
    %359 = arith.addf %350, %358 : vector<16x32xf32>
    %c2_i32_102 = arith.constant 2 : i32
    %360 = tpu.dynamic_rotate %333 by %c2_i32_102 dim 0 : vector<16x32xf32>, i32 -> vector<16x32xf32>
    %c2_i32_103 = arith.constant 2 : i32
    %361 = vector.broadcast %c2_i32_103 : i32 to vector<16x32xi32>
    %362 = arith.cmpi sge, %341, %361 : vector<16x32xi32>
    %cst_104 = arith.constant 0.000000e+00 : f32
    %363 = vector.broadcast %cst_104 : f32 to vector<16x32xf32>
    %364 = arith.select %362, %360, %363 : vector<16x32xi1>, vector<16x32xf32>
    %365 = vector.extract_strided_slice %334 {offsets = [2, 0], sizes = [1, 32], strides = [1, 1]} : vector<4x32xf32> to vector<1x32xf32>
    %366 = vector.broadcast %365 : vector<1x32xf32> to vector<16x32xf32>
    %367 = arith.mulf %364, %366 : vector<16x32xf32>
    %368 = arith.addf %359, %367 : vector<16x32xf32>
    %369 = arith.negf %368 : vector<16x32xf32>
    %370 = math.exp %369 : vector<16x32xf32>
    %cst_105 = arith.constant 1.000000e+00 : f32
    %371 = vector.broadcast %cst_105 : f32 to vector<16x32xf32>
    %372 = arith.addf %371, %370 : vector<16x32xf32>
    %373 = arith.divf %371, %372 : vector<16x32xf32>
    %374 = arith.mulf %368, %373 : vector<16x32xf32>
    %375 = tpu.concatenate %374, %333 in 1 : vector<16x32xf32>, vector<16x32xf32> -> vector<16x64xf32>
    %c360 = arith.constant 360 : index
    %c0_106 = arith.constant 0 : index
    %376 = vector.load %arg0[%c360, %c0_106] : memref<696x128xf32, #tpu.memory_space<vmem>>, vector<64x128xf32>
    %cst_107 = arith.constant dense<0.000000e+00> : vector<16x128xf32>
    %377 = tpu.matmul %375, %376, %cst_107 {dimension_numbers = #tpu.dot_dimension_numbers<[1], [0], [0], [1], [0, 0, 1, 1], [], []>} : vector<16x64xf32>, vector<64x128xf32>, vector<16x128xf32> -> vector<16x128xf32>
    %c424 = arith.constant 424 : index
    %c0_108 = arith.constant 0 : index
    %378 = vector.load %arg0[%c424, %c0_108] : memref<696x128xf32, #tpu.memory_space<vmem>>, vector<1x128xf32>
    %379 = vector.broadcast %378 : vector<1x128xf32> to vector<16x128xf32>
    %380 = arith.addf %377, %379 : vector<16x128xf32>
    %c432 = arith.constant 432 : index
    %c0_109 = arith.constant 0 : index
    %381 = vector.load %arg0[%c432, %c0_109] : memref<696x128xf32, #tpu.memory_space<vmem>>, vector<32x128xf32>
    %cst_110 = arith.constant 0.000000e+00 : f32
    %382 = vector.broadcast %cst_110 : f32 to vector<2x32xf32>
    %383 = vector.extract_strided_slice %380 {offsets = [0, 0], sizes = [2, 128], strides = [1, 1]} : vector<16x128xf32> to vector<2x128xf32>
    %cst_111 = arith.constant dense<0.000000e+00> : vector<2x128xf32>
    %384 = tpu.matmul %382, %381, %cst_111 {dimension_numbers = #tpu.dot_dimension_numbers<[1], [0], [0], [1], [0, 0, 1, 1], [], []>} : vector<2x32xf32>, vector<32x128xf32>, vector<2x128xf32> -> vector<2x128xf32>
    %385 = arith.addf %383, %384 : vector<2x128xf32>
    %386 = vector.extract_strided_slice %385 {offsets = [0, 0], sizes = [2, 32], strides = [1, 1]} : vector<2x128xf32> to vector<2x32xf32>
    %387 = vector.extract_strided_slice %385 {offsets = [0, 32], sizes = [2, 32], strides = [1, 1]} : vector<2x128xf32> to vector<2x32xf32>
    %388 = vector.extract_strided_slice %385 {offsets = [0, 64], sizes = [2, 32], strides = [1, 1]} : vector<2x128xf32> to vector<2x32xf32>
    %389 = vector.extract_strided_slice %385 {offsets = [0, 96], sizes = [2, 32], strides = [1, 1]} : vector<2x128xf32> to vector<2x32xf32>
    %cst_112 = arith.constant 0.000000e+00 : f32
    %390 = vector.broadcast %cst_112 : f32 to vector<2x32xf32>
    %391 = arith.minimumf %387, %390 : vector<2x32xf32>
    %392 = math.absf %387 : vector<2x32xf32>
    %cst_113 = arith.constant 0.000000e+00 : f32
    %393 = vector.broadcast %cst_113 : f32 to vector<2x32xf32>
    %394 = arith.subf %393, %392 : vector<2x32xf32>
    %395 = math.exp %394 : vector<2x32xf32>
    %396 = math.log1p %395 : vector<2x32xf32>
    %397 = arith.subf %391, %396 : vector<2x32xf32>
    %398 = arith.addf %382, %397 : vector<2x32xf32>
    %399 = arith.maximumf %386, %398 : vector<2x32xf32>
    %400 = arith.subf %386, %399 : vector<2x32xf32>
    %401 = math.exp %400 : vector<2x32xf32>
    %402 = arith.subf %398, %399 : vector<2x32xf32>
    %403 = math.exp %402 : vector<2x32xf32>
    %404 = arith.mulf %403, %382 : vector<2x32xf32>
    %405 = math.tanh %388 : vector<2x32xf32>
    %406 = arith.mulf %401, %405 : vector<2x32xf32>
    %407 = arith.addf %404, %406 : vector<2x32xf32>
    %408 = arith.mulf %403, %382 : vector<2x32xf32>
    %409 = arith.addf %408, %401 : vector<2x32xf32>
    %410 = arith.negf %389 : vector<2x32xf32>
    %411 = math.exp %410 : vector<2x32xf32>
    %cst_114 = arith.constant 1.000000e+00 : f32
    %412 = vector.broadcast %cst_114 : f32 to vector<2x32xf32>
    %413 = arith.addf %412, %411 : vector<2x32xf32>
    %414 = arith.divf %412, %413 : vector<2x32xf32>
    %415 = arith.divf %407, %409 : vector<2x32xf32>
    %416 = arith.mulf %414, %415 : vector<2x32xf32>
    %c0_115 = arith.constant 0 : index
    %c0_116 = arith.constant 0 : index
    %417 = vector.load %arg3[%c0_115, %c0_116] : memref<16x32xf32, #tpu.memory_space<vmem>>, vector<2x32xf32>
    tpu.vector_store %arg3[%c0_115, %c0_116], %416 {strides = array<i32>} : memref<16x32xf32, #tpu.memory_space<vmem>>, vector<2x32xf32>,
    %418 = vector.extract_strided_slice %380 {offsets = [2, 0], sizes = [2, 128], strides = [1, 1]} : vector<16x128xf32> to vector<2x128xf32>
    %cst_117 = arith.constant dense<0.000000e+00> : vector<2x128xf32>
    %419 = tpu.matmul %416, %381, %cst_117 {dimension_numbers = #tpu.dot_dimension_numbers<[1], [0], [0], [1], [0, 0, 1, 1], [], []>} : vector<2x32xf32>, vector<32x128xf32>, vector<2x128xf32> -> vector<2x128xf32>
    %420 = arith.addf %418, %419 : vector<2x128xf32>
    %421 = vector.extract_strided_slice %420 {offsets = [0, 0], sizes = [2, 32], strides = [1, 1]} : vector<2x128xf32> to vector<2x32xf32>
    %422 = vector.extract_strided_slice %420 {offsets = [0, 32], sizes = [2, 32], strides = [1, 1]} : vector<2x128xf32> to vector<2x32xf32>
    %423 = vector.extract_strided_slice %420 {offsets = [0, 64], sizes = [2, 32], strides = [1, 1]} : vector<2x128xf32> to vector<2x32xf32>
    %424 = vector.extract_strided_slice %420 {offsets = [0, 96], sizes = [2, 32], strides = [1, 1]} : vector<2x128xf32> to vector<2x32xf32>
    %cst_118 = arith.constant 0.000000e+00 : f32
    %425 = vector.broadcast %cst_118 : f32 to vector<2x32xf32>
    %426 = arith.minimumf %422, %425 : vector<2x32xf32>
    %427 = math.absf %422 : vector<2x32xf32>
    %cst_119 = arith.constant 0.000000e+00 : f32
    %428 = vector.broadcast %cst_119 : f32 to vector<2x32xf32>
    %429 = arith.subf %428, %427 : vector<2x32xf32>
    %430 = math.exp %429 : vector<2x32xf32>
    %431 = math.log1p %430 : vector<2x32xf32>
    %432 = arith.subf %426, %431 : vector<2x32xf32>
    %433 = arith.addf %399, %432 : vector<2x32xf32>
    %434 = arith.maximumf %421, %433 : vector<2x32xf32>
    %435 = arith.subf %421, %434 : vector<2x32xf32>
    %436 = math.exp %435 : vector<2x32xf32>
    %437 = arith.subf %433, %434 : vector<2x32xf32>
    %438 = math.exp %437 : vector<2x32xf32>
    %439 = arith.mulf %438, %407 : vector<2x32xf32>
    %440 = math.tanh %423 : vector<2x32xf32>
    %441 = arith.mulf %436, %440 : vector<2x32xf32>
    %442 = arith.addf %439, %441 : vector<2x32xf32>
    %443 = arith.mulf %438, %409 : vector<2x32xf32>
    %444 = arith.addf %443, %436 : vector<2x32xf32>
    %445 = arith.negf %424 : vector<2x32xf32>
    %446 = math.exp %445 : vector<2x32xf32>
    %cst_120 = arith.constant 1.000000e+00 : f32
    %447 = vector.broadcast %cst_120 : f32 to vector<2x32xf32>
    %448 = arith.addf %447, %446 : vector<2x32xf32>
    %449 = arith.divf %447, %448 : vector<2x32xf32>
    %450 = arith.divf %442, %444 : vector<2x32xf32>
    %451 = arith.mulf %449, %450 : vector<2x32xf32>
    %c2 = arith.constant 2 : index
    %c0_121 = arith.constant 0 : index
    %452 = vector.load %arg3[%c2, %c0_121] : memref<16x32xf32, #tpu.memory_space<vmem>>, vector<2x32xf32>
    tpu.vector_store %arg3[%c2, %c0_121], %451 {strides = array<i32>} : memref<16x32xf32, #tpu.memory_space<vmem>>, vector<2x32xf32>,
    %453 = vector.extract_strided_slice %380 {offsets = [4, 0], sizes = [2, 128], strides = [1, 1]} : vector<16x128xf32> to vector<2x128xf32>
    %cst_122 = arith.constant dense<0.000000e+00> : vector<2x128xf32>
    %454 = tpu.matmul %451, %381, %cst_122 {dimension_numbers = #tpu.dot_dimension_numbers<[1], [0], [0], [1], [0, 0, 1, 1], [], []>} : vector<2x32xf32>, vector<32x128xf32>, vector<2x128xf32> -> vector<2x128xf32>
    %455 = arith.addf %453, %454 : vector<2x128xf32>
    %456 = vector.extract_strided_slice %455 {offsets = [0, 0], sizes = [2, 32], strides = [1, 1]} : vector<2x128xf32> to vector<2x32xf32>
    %457 = vector.extract_strided_slice %455 {offsets = [0, 32], sizes = [2, 32], strides = [1, 1]} : vector<2x128xf32> to vector<2x32xf32>
    %458 = vector.extract_strided_slice %455 {offsets = [0, 64], sizes = [2, 32], strides = [1, 1]} : vector<2x128xf32> to vector<2x32xf32>
    %459 = vector.extract_strided_slice %455 {offsets = [0, 96], sizes = [2, 32], strides = [1, 1]} : vector<2x128xf32> to vector<2x32xf32>
    %cst_123 = arith.constant 0.000000e+00 : f32
    %460 = vector.broadcast %cst_123 : f32 to vector<2x32xf32>
    %461 = arith.minimumf %457, %460 : vector<2x32xf32>
    %462 = math.absf %457 : vector<2x32xf32>
    %cst_124 = arith.constant 0.000000e+00 : f32
    %463 = vector.broadcast %cst_124 : f32 to vector<2x32xf32>
    %464 = arith.subf %463, %462 : vector<2x32xf32>
    %465 = math.exp %464 : vector<2x32xf32>
    %466 = math.log1p %465 : vector<2x32xf32>
    %467 = arith.subf %461, %466 : vector<2x32xf32>
    %468 = arith.addf %434, %467 : vector<2x32xf32>
    %469 = arith.maximumf %456, %468 : vector<2x32xf32>
    %470 = arith.subf %456, %469 : vector<2x32xf32>
    %471 = math.exp %470 : vector<2x32xf32>
    %472 = arith.subf %468, %469 : vector<2x32xf32>
    %473 = math.exp %472 : vector<2x32xf32>
    %474 = arith.mulf %473, %442 : vector<2x32xf32>
    %475 = math.tanh %458 : vector<2x32xf32>
    %476 = arith.mulf %471, %475 : vector<2x32xf32>
    %477 = arith.addf %474, %476 : vector<2x32xf32>
    %478 = arith.mulf %473, %444 : vector<2x32xf32>
    %479 = arith.addf %478, %471 : vector<2x32xf32>
    %480 = arith.negf %459 : vector<2x32xf32>
    %481 = math.exp %480 : vector<2x32xf32>
    %cst_125 = arith.constant 1.000000e+00 : f32
    %482 = vector.broadcast %cst_125 : f32 to vector<2x32xf32>
    %483 = arith.addf %482, %481 : vector<2x32xf32>
    %484 = arith.divf %482, %483 : vector<2x32xf32>
    %485 = arith.divf %477, %479 : vector<2x32xf32>
    %486 = arith.mulf %484, %485 : vector<2x32xf32>
    %c4 = arith.constant 4 : index
    %c0_126 = arith.constant 0 : index
    %487 = vector.load %arg3[%c4, %c0_126] : memref<16x32xf32, #tpu.memory_space<vmem>>, vector<2x32xf32>
    tpu.vector_store %arg3[%c4, %c0_126], %486 {strides = array<i32>} : memref<16x32xf32, #tpu.memory_space<vmem>>, vector<2x32xf32>,
    %488 = vector.extract_strided_slice %380 {offsets = [6, 0], sizes = [2, 128], strides = [1, 1]} : vector<16x128xf32> to vector<2x128xf32>
    %cst_127 = arith.constant dense<0.000000e+00> : vector<2x128xf32>
    %489 = tpu.matmul %486, %381, %cst_127 {dimension_numbers = #tpu.dot_dimension_numbers<[1], [0], [0], [1], [0, 0, 1, 1], [], []>} : vector<2x32xf32>, vector<32x128xf32>, vector<2x128xf32> -> vector<2x128xf32>
    %490 = arith.addf %488, %489 : vector<2x128xf32>
    %491 = vector.extract_strided_slice %490 {offsets = [0, 0], sizes = [2, 32], strides = [1, 1]} : vector<2x128xf32> to vector<2x32xf32>
    %492 = vector.extract_strided_slice %490 {offsets = [0, 32], sizes = [2, 32], strides = [1, 1]} : vector<2x128xf32> to vector<2x32xf32>
    %493 = vector.extract_strided_slice %490 {offsets = [0, 64], sizes = [2, 32], strides = [1, 1]} : vector<2x128xf32> to vector<2x32xf32>
    %494 = vector.extract_strided_slice %490 {offsets = [0, 96], sizes = [2, 32], strides = [1, 1]} : vector<2x128xf32> to vector<2x32xf32>
    %cst_128 = arith.constant 0.000000e+00 : f32
    %495 = vector.broadcast %cst_128 : f32 to vector<2x32xf32>
    %496 = arith.minimumf %492, %495 : vector<2x32xf32>
    %497 = math.absf %492 : vector<2x32xf32>
    %cst_129 = arith.constant 0.000000e+00 : f32
    %498 = vector.broadcast %cst_129 : f32 to vector<2x32xf32>
    %499 = arith.subf %498, %497 : vector<2x32xf32>
    %500 = math.exp %499 : vector<2x32xf32>
    %501 = math.log1p %500 : vector<2x32xf32>
    %502 = arith.subf %496, %501 : vector<2x32xf32>
    %503 = arith.addf %469, %502 : vector<2x32xf32>
    %504 = arith.maximumf %491, %503 : vector<2x32xf32>
    %505 = arith.subf %491, %504 : vector<2x32xf32>
    %506 = math.exp %505 : vector<2x32xf32>
    %507 = arith.subf %503, %504 : vector<2x32xf32>
    %508 = math.exp %507 : vector<2x32xf32>
    %509 = arith.mulf %508, %477 : vector<2x32xf32>
    %510 = math.tanh %493 : vector<2x32xf32>
    %511 = arith.mulf %506, %510 : vector<2x32xf32>
    %512 = arith.addf %509, %511 : vector<2x32xf32>
    %513 = arith.mulf %508, %479 : vector<2x32xf32>
    %514 = arith.addf %513, %506 : vector<2x32xf32>
    %515 = arith.negf %494 : vector<2x32xf32>
    %516 = math.exp %515 : vector<2x32xf32>
    %cst_130 = arith.constant 1.000000e+00 : f32
    %517 = vector.broadcast %cst_130 : f32 to vector<2x32xf32>
    %518 = arith.addf %517, %516 : vector<2x32xf32>
    %519 = arith.divf %517, %518 : vector<2x32xf32>
    %520 = arith.divf %512, %514 : vector<2x32xf32>
    %521 = arith.mulf %519, %520 : vector<2x32xf32>
    %c6 = arith.constant 6 : index
    %c0_131 = arith.constant 0 : index
    %522 = vector.load %arg3[%c6, %c0_131] : memref<16x32xf32, #tpu.memory_space<vmem>>, vector<2x32xf32>
    tpu.vector_store %arg3[%c6, %c0_131], %521 {strides = array<i32>} : memref<16x32xf32, #tpu.memory_space<vmem>>, vector<2x32xf32>,
    %523 = vector.extract_strided_slice %380 {offsets = [8, 0], sizes = [2, 128], strides = [1, 1]} : vector<16x128xf32> to vector<2x128xf32>
    %cst_132 = arith.constant dense<0.000000e+00> : vector<2x128xf32>
    %524 = tpu.matmul %521, %381, %cst_132 {dimension_numbers = #tpu.dot_dimension_numbers<[1], [0], [0], [1], [0, 0, 1, 1], [], []>} : vector<2x32xf32>, vector<32x128xf32>, vector<2x128xf32> -> vector<2x128xf32>
    %525 = arith.addf %523, %524 : vector<2x128xf32>
    %526 = vector.extract_strided_slice %525 {offsets = [0, 0], sizes = [2, 32], strides = [1, 1]} : vector<2x128xf32> to vector<2x32xf32>
    %527 = vector.extract_strided_slice %525 {offsets = [0, 32], sizes = [2, 32], strides = [1, 1]} : vector<2x128xf32> to vector<2x32xf32>
    %528 = vector.extract_strided_slice %525 {offsets = [0, 64], sizes = [2, 32], strides = [1, 1]} : vector<2x128xf32> to vector<2x32xf32>
    %529 = vector.extract_strided_slice %525 {offsets = [0, 96], sizes = [2, 32], strides = [1, 1]} : vector<2x128xf32> to vector<2x32xf32>
    %cst_133 = arith.constant 0.000000e+00 : f32
    %530 = vector.broadcast %cst_133 : f32 to vector<2x32xf32>
    %531 = arith.minimumf %527, %530 : vector<2x32xf32>
    %532 = math.absf %527 : vector<2x32xf32>
    %cst_134 = arith.constant 0.000000e+00 : f32
    %533 = vector.broadcast %cst_134 : f32 to vector<2x32xf32>
    %534 = arith.subf %533, %532 : vector<2x32xf32>
    %535 = math.exp %534 : vector<2x32xf32>
    %536 = math.log1p %535 : vector<2x32xf32>
    %537 = arith.subf %531, %536 : vector<2x32xf32>
    %538 = arith.addf %504, %537 : vector<2x32xf32>
    %539 = arith.maximumf %526, %538 : vector<2x32xf32>
    %540 = arith.subf %526, %539 : vector<2x32xf32>
    %541 = math.exp %540 : vector<2x32xf32>
    %542 = arith.subf %538, %539 : vector<2x32xf32>
    %543 = math.exp %542 : vector<2x32xf32>
    %544 = arith.mulf %543, %512 : vector<2x32xf32>
    %545 = math.tanh %528 : vector<2x32xf32>
    %546 = arith.mulf %541, %545 : vector<2x32xf32>
    %547 = arith.addf %544, %546 : vector<2x32xf32>
    %548 = arith.mulf %543, %514 : vector<2x32xf32>
    %549 = arith.addf %548, %541 : vector<2x32xf32>
    %550 = arith.negf %529 : vector<2x32xf32>
    %551 = math.exp %550 : vector<2x32xf32>
    %cst_135 = arith.constant 1.000000e+00 : f32
    %552 = vector.broadcast %cst_135 : f32 to vector<2x32xf32>
    %553 = arith.addf %552, %551 : vector<2x32xf32>
    %554 = arith.divf %552, %553 : vector<2x32xf32>
    %555 = arith.divf %547, %549 : vector<2x32xf32>
    %556 = arith.mulf %554, %555 : vector<2x32xf32>
    %c8_136 = arith.constant 8 : index
    %c0_137 = arith.constant 0 : index
    %557 = vector.load %arg3[%c8_136, %c0_137] : memref<16x32xf32, #tpu.memory_space<vmem>>, vector<2x32xf32>
    tpu.vector_store %arg3[%c8_136, %c0_137], %556 {strides = array<i32>} : memref<16x32xf32, #tpu.memory_space<vmem>>, vector<2x32xf32>,
    %558 = vector.extract_strided_slice %380 {offsets = [10, 0], sizes = [2, 128], strides = [1, 1]} : vector<16x128xf32> to vector<2x128xf32>
    %cst_138 = arith.constant dense<0.000000e+00> : vector<2x128xf32>
    %559 = tpu.matmul %556, %381, %cst_138 {dimension_numbers = #tpu.dot_dimension_numbers<[1], [0], [0], [1], [0, 0, 1, 1], [], []>} : vector<2x32xf32>, vector<32x128xf32>, vector<2x128xf32> -> vector<2x128xf32>
    %560 = arith.addf %558, %559 : vector<2x128xf32>
    %561 = vector.extract_strided_slice %560 {offsets = [0, 0], sizes = [2, 32], strides = [1, 1]} : vector<2x128xf32> to vector<2x32xf32>
    %562 = vector.extract_strided_slice %560 {offsets = [0, 32], sizes = [2, 32], strides = [1, 1]} : vector<2x128xf32> to vector<2x32xf32>
    %563 = vector.extract_strided_slice %560 {offsets = [0, 64], sizes = [2, 32], strides = [1, 1]} : vector<2x128xf32> to vector<2x32xf32>
    %564 = vector.extract_strided_slice %560 {offsets = [0, 96], sizes = [2, 32], strides = [1, 1]} : vector<2x128xf32> to vector<2x32xf32>
    %cst_139 = arith.constant 0.000000e+00 : f32
    %565 = vector.broadcast %cst_139 : f32 to vector<2x32xf32>
    %566 = arith.minimumf %562, %565 : vector<2x32xf32>
    %567 = math.absf %562 : vector<2x32xf32>
    %cst_140 = arith.constant 0.000000e+00 : f32
    %568 = vector.broadcast %cst_140 : f32 to vector<2x32xf32>
    %569 = arith.subf %568, %567 : vector<2x32xf32>
    %570 = math.exp %569 : vector<2x32xf32>
    %571 = math.log1p %570 : vector<2x32xf32>
    %572 = arith.subf %566, %571 : vector<2x32xf32>
    %573 = arith.addf %539, %572 : vector<2x32xf32>
    %574 = arith.maximumf %561, %573 : vector<2x32xf32>
    %575 = arith.subf %561, %574 : vector<2x32xf32>
    %576 = math.exp %575 : vector<2x32xf32>
    %577 = arith.subf %573, %574 : vector<2x32xf32>
    %578 = math.exp %577 : vector<2x32xf32>
    %579 = arith.mulf %578, %547 : vector<2x32xf32>
    %580 = math.tanh %563 : vector<2x32xf32>
    %581 = arith.mulf %576, %580 : vector<2x32xf32>
    %582 = arith.addf %579, %581 : vector<2x32xf32>
    %583 = arith.mulf %578, %549 : vector<2x32xf32>
    %584 = arith.addf %583, %576 : vector<2x32xf32>
    %585 = arith.negf %564 : vector<2x32xf32>
    %586 = math.exp %585 : vector<2x32xf32>
    %cst_141 = arith.constant 1.000000e+00 : f32
    %587 = vector.broadcast %cst_141 : f32 to vector<2x32xf32>
    %588 = arith.addf %587, %586 : vector<2x32xf32>
    %589 = arith.divf %587, %588 : vector<2x32xf32>
    %590 = arith.divf %582, %584 : vector<2x32xf32>
    %591 = arith.mulf %589, %590 : vector<2x32xf32>
    %c10 = arith.constant 10 : index
    %c0_142 = arith.constant 0 : index
    %592 = vector.load %arg3[%c10, %c0_142] : memref<16x32xf32, #tpu.memory_space<vmem>>, vector<2x32xf32>
    tpu.vector_store %arg3[%c10, %c0_142], %591 {strides = array<i32>} : memref<16x32xf32, #tpu.memory_space<vmem>>, vector<2x32xf32>,
    %593 = vector.extract_strided_slice %380 {offsets = [12, 0], sizes = [2, 128], strides = [1, 1]} : vector<16x128xf32> to vector<2x128xf32>
    %cst_143 = arith.constant dense<0.000000e+00> : vector<2x128xf32>
    %594 = tpu.matmul %591, %381, %cst_143 {dimension_numbers = #tpu.dot_dimension_numbers<[1], [0], [0], [1], [0, 0, 1, 1], [], []>} : vector<2x32xf32>, vector<32x128xf32>, vector<2x128xf32> -> vector<2x128xf32>
    %595 = arith.addf %593, %594 : vector<2x128xf32>
    %596 = vector.extract_strided_slice %595 {offsets = [0, 0], sizes = [2, 32], strides = [1, 1]} : vector<2x128xf32> to vector<2x32xf32>
    %597 = vector.extract_strided_slice %595 {offsets = [0, 32], sizes = [2, 32], strides = [1, 1]} : vector<2x128xf32> to vector<2x32xf32>
    %598 = vector.extract_strided_slice %595 {offsets = [0, 64], sizes = [2, 32], strides = [1, 1]} : vector<2x128xf32> to vector<2x32xf32>
    %599 = vector.extract_strided_slice %595 {offsets = [0, 96], sizes = [2, 32], strides = [1, 1]} : vector<2x128xf32> to vector<2x32xf32>
    %cst_144 = arith.constant 0.000000e+00 : f32
    %600 = vector.broadcast %cst_144 : f32 to vector<2x32xf32>
    %601 = arith.minimumf %597, %600 : vector<2x32xf32>
    %602 = math.absf %597 : vector<2x32xf32>
    %cst_145 = arith.constant 0.000000e+00 : f32
    %603 = vector.broadcast %cst_145 : f32 to vector<2x32xf32>
    %604 = arith.subf %603, %602 : vector<2x32xf32>
    %605 = math.exp %604 : vector<2x32xf32>
    %606 = math.log1p %605 : vector<2x32xf32>
    %607 = arith.subf %601, %606 : vector<2x32xf32>
    %608 = arith.addf %574, %607 : vector<2x32xf32>
    %609 = arith.maximumf %596, %608 : vector<2x32xf32>
    %610 = arith.subf %596, %609 : vector<2x32xf32>
    %611 = math.exp %610 : vector<2x32xf32>
    %612 = arith.subf %608, %609 : vector<2x32xf32>
    %613 = math.exp %612 : vector<2x32xf32>
    %614 = arith.mulf %613, %582 : vector<2x32xf32>
    %615 = math.tanh %598 : vector<2x32xf32>
    %616 = arith.mulf %611, %615 : vector<2x32xf32>
    %617 = arith.addf %614, %616 : vector<2x32xf32>
    %618 = arith.mulf %613, %584 : vector<2x32xf32>
    %619 = arith.addf %618, %611 : vector<2x32xf32>
    %620 = arith.negf %599 : vector<2x32xf32>
    %621 = math.exp %620 : vector<2x32xf32>
    %cst_146 = arith.constant 1.000000e+00 : f32
    %622 = vector.broadcast %cst_146 : f32 to vector<2x32xf32>
    %623 = arith.addf %622, %621 : vector<2x32xf32>
    %624 = arith.divf %622, %623 : vector<2x32xf32>
    %625 = arith.divf %617, %619 : vector<2x32xf32>
    %626 = arith.mulf %624, %625 : vector<2x32xf32>
    %c12 = arith.constant 12 : index
    %c0_147 = arith.constant 0 : index
    %627 = vector.load %arg3[%c12, %c0_147] : memref<16x32xf32, #tpu.memory_space<vmem>>, vector<2x32xf32>
    tpu.vector_store %arg3[%c12, %c0_147], %626 {strides = array<i32>} : memref<16x32xf32, #tpu.memory_space<vmem>>, vector<2x32xf32>,
    %628 = vector.extract_strided_slice %380 {offsets = [14, 0], sizes = [2, 128], strides = [1, 1]} : vector<16x128xf32> to vector<2x128xf32>
    %cst_148 = arith.constant dense<0.000000e+00> : vector<2x128xf32>
    %629 = tpu.matmul %626, %381, %cst_148 {dimension_numbers = #tpu.dot_dimension_numbers<[1], [0], [0], [1], [0, 0, 1, 1], [], []>} : vector<2x32xf32>, vector<32x128xf32>, vector<2x128xf32> -> vector<2x128xf32>
    %630 = arith.addf %628, %629 : vector<2x128xf32>
    %631 = vector.extract_strided_slice %630 {offsets = [0, 0], sizes = [2, 32], strides = [1, 1]} : vector<2x128xf32> to vector<2x32xf32>
    %632 = vector.extract_strided_slice %630 {offsets = [0, 32], sizes = [2, 32], strides = [1, 1]} : vector<2x128xf32> to vector<2x32xf32>
    %633 = vector.extract_strided_slice %630 {offsets = [0, 64], sizes = [2, 32], strides = [1, 1]} : vector<2x128xf32> to vector<2x32xf32>
    %634 = vector.extract_strided_slice %630 {offsets = [0, 96], sizes = [2, 32], strides = [1, 1]} : vector<2x128xf32> to vector<2x32xf32>
    %cst_149 = arith.constant 0.000000e+00 : f32
    %635 = vector.broadcast %cst_149 : f32 to vector<2x32xf32>
    %636 = arith.minimumf %632, %635 : vector<2x32xf32>
    %637 = math.absf %632 : vector<2x32xf32>
    %cst_150 = arith.constant 0.000000e+00 : f32
    %638 = vector.broadcast %cst_150 : f32 to vector<2x32xf32>
    %639 = arith.subf %638, %637 : vector<2x32xf32>
    %640 = math.exp %639 : vector<2x32xf32>
    %641 = math.log1p %640 : vector<2x32xf32>
    %642 = arith.subf %636, %641 : vector<2x32xf32>
    %643 = arith.addf %609, %642 : vector<2x32xf32>
    %644 = arith.maximumf %631, %643 : vector<2x32xf32>
    %645 = arith.subf %631, %644 : vector<2x32xf32>
    %646 = math.exp %645 : vector<2x32xf32>
    %647 = arith.subf %643, %644 : vector<2x32xf32>
    %648 = math.exp %647 : vector<2x32xf32>
    %649 = arith.mulf %648, %617 : vector<2x32xf32>
    %650 = math.tanh %633 : vector<2x32xf32>
    %651 = arith.mulf %646, %650 : vector<2x32xf32>
    %652 = arith.addf %649, %651 : vector<2x32xf32>
    %653 = arith.mulf %648, %619 : vector<2x32xf32>
    %654 = arith.addf %653, %646 : vector<2x32xf32>
    %655 = arith.negf %634 : vector<2x32xf32>
    %656 = math.exp %655 : vector<2x32xf32>
    %cst_151 = arith.constant 1.000000e+00 : f32
    %657 = vector.broadcast %cst_151 : f32 to vector<2x32xf32>
    %658 = arith.addf %657, %656 : vector<2x32xf32>
    %659 = arith.divf %657, %658 : vector<2x32xf32>
    %660 = arith.divf %652, %654 : vector<2x32xf32>
    %661 = arith.mulf %659, %660 : vector<2x32xf32>
    %c14 = arith.constant 14 : index
    %c0_152 = arith.constant 0 : index
    %662 = vector.load %arg3[%c14, %c0_152] : memref<16x32xf32, #tpu.memory_space<vmem>>, vector<2x32xf32>
    tpu.vector_store %arg3[%c14, %c0_152], %661 {strides = array<i32>} : memref<16x32xf32, #tpu.memory_space<vmem>>, vector<2x32xf32>,
    %c0_153 = arith.constant 0 : index
    %c0_154 = arith.constant 0 : index
    %663 = vector.load %arg3[%c0_153, %c0_154] : memref<16x32xf32, #tpu.memory_space<vmem>>, vector<16x32xf32>
    %c464 = arith.constant 464 : index
    %c0_155 = arith.constant 0 : index
    %664 = vector.load %arg0[%c464, %c0_155] : memref<696x128xf32, #tpu.memory_space<vmem>>, vector<1x32xf32>
    %665 = vector.shape_cast %663 : vector<16x32xf32> to vector<16x4x8xf32>
    %cst_156 = arith.constant dense<0.000000e+00> : vector<16x4xf32>
    %666 = vector.multi_reduction <add>, %665, %cst_156 [2] : vector<16x4x8xf32> to vector<16x4xf32>
    %667 = vector.shape_cast %666 : vector<16x4xf32> to vector<16x4x1xf32>
    %cst_157 = arith.constant 8.000000e+00 : f32
    %668 = vector.broadcast %cst_157 : f32 to vector<16x4x1xf32>
    %669 = arith.divf %667, %668 : vector<16x4x1xf32>
    %670 = vector.broadcast %669 : vector<16x4x1xf32> to vector<16x4x8xf32>
    %671 = arith.subf %665, %670 : vector<16x4x8xf32>
    %672 = arith.mulf %671, %671 : vector<16x4x8xf32>
    %cst_158 = arith.constant dense<0.000000e+00> : vector<16x4xf32>
    %673 = vector.multi_reduction <add>, %672, %cst_158 [2] : vector<16x4x8xf32> to vector<16x4xf32>
    %674 = vector.shape_cast %673 : vector<16x4xf32> to vector<16x4x1xf32>
    %cst_159 = arith.constant 8.000000e+00 : f32
    %675 = vector.broadcast %cst_159 : f32 to vector<16x4x1xf32>
    %676 = arith.divf %674, %675 : vector<16x4x1xf32>
    %cst_160 = arith.constant 9.99999974E-6 : f32
    %677 = vector.broadcast %cst_160 : f32 to vector<16x4x1xf32>
    %678 = arith.addf %676, %677 : vector<16x4x1xf32>
    %679 = math.rsqrt %678 : vector<16x4x1xf32>
    %680 = vector.broadcast %679 : vector<16x4x1xf32> to vector<16x4x8xf32>
    %681 = arith.mulf %671, %680 : vector<16x4x8xf32>
    %682 = vector.shape_cast %681 : vector<16x4x8xf32> to vector<16x32xf32>
    %683 = vector.broadcast %664 : vector<1x32xf32> to vector<16x32xf32>
    %684 = arith.mulf %682, %683 : vector<16x32xf32>
    %685 = arith.addf %314, %684 : vector<16x32xf32>
    %c472 = arith.constant 472 : index
    %c0_161 = arith.constant 0 : index
    %686 = vector.load %arg0[%c472, %c0_161] : memref<696x128xf32, #tpu.memory_space<vmem>>, vector<1x32xf32>
    %cst_162 = arith.constant dense<0.000000e+00> : vector<16xf32>
    %687 = vector.multi_reduction <add>, %685, %cst_162 [1] : vector<16x32xf32> to vector<16xf32>
    %688 = vector.shape_cast %687 : vector<16xf32> to vector<16x1xf32>
    %cst_163 = arith.constant 3.200000e+01 : f32
    %689 = vector.broadcast %cst_163 : f32 to vector<16x1xf32>
    %690 = arith.divf %688, %689 : vector<16x1xf32>
    %691 = vector.broadcast %690 : vector<16x1xf32> to vector<16x32xf32>
    %692 = arith.subf %685, %691 : vector<16x32xf32>
    %693 = arith.mulf %692, %692 : vector<16x32xf32>
    %cst_164 = arith.constant dense<0.000000e+00> : vector<16xf32>
    %694 = vector.multi_reduction <add>, %693, %cst_164 [1] : vector<16x32xf32> to vector<16xf32>
    %695 = vector.shape_cast %694 : vector<16xf32> to vector<16x1xf32>
    %cst_165 = arith.constant 3.200000e+01 : f32
    %696 = vector.broadcast %cst_165 : f32 to vector<16x1xf32>
    %697 = arith.divf %695, %696 : vector<16x1xf32>
    %cst_166 = arith.constant 9.99999974E-6 : f32
    %698 = vector.broadcast %cst_166 : f32 to vector<16x1xf32>
    %699 = arith.addf %697, %698 : vector<16x1xf32>
    %700 = math.rsqrt %699 : vector<16x1xf32>
    %701 = vector.broadcast %700 : vector<16x1xf32> to vector<16x32xf32>
    %702 = arith.mulf %692, %701 : vector<16x32xf32>
    %703 = vector.broadcast %686 : vector<1x32xf32> to vector<16x32xf32>
    %704 = arith.mulf %702, %703 : vector<16x32xf32>
    %c480 = arith.constant 480 : index
    %c0_167 = arith.constant 0 : index
    %705 = vector.load %arg0[%c480, %c0_167] : memref<696x128xf32, #tpu.memory_space<vmem>>, vector<32x128xf32>
    %cst_168 = arith.constant dense<0.000000e+00> : vector<16x128xf32>
    %706 = tpu.matmul %704, %705, %cst_168 {dimension_numbers = #tpu.dot_dimension_numbers<[1], [0], [0], [1], [0, 0, 1, 1], [], []>} : vector<16x32xf32>, vector<32x128xf32>, vector<16x128xf32> -> vector<16x128xf32>
    %707 = vector.extract_strided_slice %706 {offsets = [0, 0], sizes = [16, 64], strides = [1, 1]} : vector<16x128xf32> to vector<16x64xf32>
    %cst_169 = arith.constant 5.000000e-01 : f32
    %708 = vector.broadcast %cst_169 : f32 to vector<16x64xf32>
    %709 = arith.mulf %708, %707 : vector<16x64xf32>
    %cst_170 = arith.constant 0.707106769 : f32
    %710 = vector.broadcast %cst_170 : f32 to vector<16x64xf32>
    %711 = arith.mulf %707, %710 : vector<16x64xf32>
    %712 = math.absf %711 : vector<16x64xf32>
    %cst_171 = arith.constant 0.327591091 : f32
    %713 = vector.broadcast %cst_171 : f32 to vector<16x64xf32>
    %714 = arith.mulf %713, %712 : vector<16x64xf32>
    %cst_172 = arith.constant 1.000000e+00 : f32
    %715 = vector.broadcast %cst_172 : f32 to vector<16x64xf32>
    %716 = arith.addf %715, %714 : vector<16x64xf32>
    %cst_173 = arith.constant 1.000000e+00 : f32
    %717 = vector.broadcast %cst_173 : f32 to vector<16x64xf32>
    %718 = arith.divf %717, %716 : vector<16x64xf32>
    %cst_174 = arith.constant 1.06140542 : f32
    %719 = vector.broadcast %cst_174 : f32 to vector<16x64xf32>
    %720 = arith.mulf %719, %718 : vector<16x64xf32>
    %cst_175 = arith.constant 1.45315206 : f32
    %721 = vector.broadcast %cst_175 : f32 to vector<16x64xf32>
    %722 = arith.subf %720, %721 : vector<16x64xf32>
    %723 = arith.mulf %722, %718 : vector<16x64xf32>
    %cst_176 = arith.constant 1.42141378 : f32
    %724 = vector.broadcast %cst_176 : f32 to vector<16x64xf32>
    %725 = arith.addf %723, %724 : vector<16x64xf32>
    %726 = arith.mulf %725, %718 : vector<16x64xf32>
    %cst_177 = arith.constant 0.284496725 : f32
    %727 = vector.broadcast %cst_177 : f32 to vector<16x64xf32>
    %728 = arith.subf %726, %727 : vector<16x64xf32>
    %729 = arith.mulf %728, %718 : vector<16x64xf32>
    %cst_178 = arith.constant 0.254829586 : f32
    %730 = vector.broadcast %cst_178 : f32 to vector<16x64xf32>
    %731 = arith.addf %729, %730 : vector<16x64xf32>
    %732 = arith.mulf %731, %718 : vector<16x64xf32>
    %cst_179 = arith.constant 0.000000e+00 : f32
    %733 = vector.broadcast %cst_179 : f32 to vector<16x64xf32>
    %734 = arith.subf %733, %712 : vector<16x64xf32>
    %735 = arith.mulf %734, %712 : vector<16x64xf32>
    %736 = math.exp %735 : vector<16x64xf32>
    %737 = arith.mulf %732, %736 : vector<16x64xf32>
    %cst_180 = arith.constant 1.000000e+00 : f32
    %738 = vector.broadcast %cst_180 : f32 to vector<16x64xf32>
    %739 = arith.subf %738, %737 : vector<16x64xf32>
    %cst_181 = arith.constant 0.000000e+00 : f32
    %740 = vector.broadcast %cst_181 : f32 to vector<16x64xf32>
    %741 = arith.cmpf olt, %711, %740 : vector<16x64xf32>
    %cst_182 = arith.constant 0.000000e+00 : f32
    %742 = vector.broadcast %cst_182 : f32 to vector<16x64xf32>
    %743 = arith.subf %742, %739 : vector<16x64xf32>
    %744 = arith.select %741, %743, %739 : vector<16x64xi1>, vector<16x64xf32>
    %cst_183 = arith.constant 1.000000e+00 : f32
    %745 = vector.broadcast %cst_183 : f32 to vector<16x64xf32>
    %746 = arith.addf %745, %744 : vector<16x64xf32>
    %747 = arith.mulf %709, %746 : vector<16x64xf32>
    %748 = vector.extract_strided_slice %706 {offsets = [0, 64], sizes = [16, 64], strides = [1, 1]} : vector<16x128xf32> to vector<16x64xf32>
    %749 = arith.mulf %747, %748 : vector<16x64xf32>
    %c512 = arith.constant 512 : index
    %c0_184 = arith.constant 0 : index
    %750 = vector.load %arg0[%c512, %c0_184] : memref<696x128xf32, #tpu.memory_space<vmem>>, vector<64x32xf32>
    %cst_185 = arith.constant dense<0.000000e+00> : vector<16x32xf32>
    %751 = tpu.matmul %749, %750, %cst_185 {dimension_numbers = #tpu.dot_dimension_numbers<[1], [0], [0], [1], [0, 0, 1, 1], [], []>} : vector<16x64xf32>, vector<64x32xf32>, vector<16x32xf32> -> vector<16x32xf32>
    %752 = arith.addf %685, %751 : vector<16x32xf32>
    %c576 = arith.constant 576 : index
    %c0_186 = arith.constant 0 : index
    %753 = vector.load %arg0[%c576, %c0_186] : memref<696x128xf32, #tpu.memory_space<vmem>>, vector<1x32xf32>
    %cst_187 = arith.constant dense<0.000000e+00> : vector<16xf32>
    %754 = vector.multi_reduction <add>, %752, %cst_187 [1] : vector<16x32xf32> to vector<16xf32>
    %755 = vector.shape_cast %754 : vector<16xf32> to vector<16x1xf32>
    %cst_188 = arith.constant 3.200000e+01 : f32
    %756 = vector.broadcast %cst_188 : f32 to vector<16x1xf32>
    %757 = arith.divf %755, %756 : vector<16x1xf32>
    %758 = vector.broadcast %757 : vector<16x1xf32> to vector<16x32xf32>
    %759 = arith.subf %752, %758 : vector<16x32xf32>
    %760 = arith.mulf %759, %759 : vector<16x32xf32>
    %cst_189 = arith.constant dense<0.000000e+00> : vector<16xf32>
    %761 = vector.multi_reduction <add>, %760, %cst_189 [1] : vector<16x32xf32> to vector<16xf32>
    %762 = vector.shape_cast %761 : vector<16xf32> to vector<16x1xf32>
    %cst_190 = arith.constant 3.200000e+01 : f32
    %763 = vector.broadcast %cst_190 : f32 to vector<16x1xf32>
    %764 = arith.divf %762, %763 : vector<16x1xf32>
    %cst_191 = arith.constant 9.99999974E-6 : f32
    %765 = vector.broadcast %cst_191 : f32 to vector<16x1xf32>
    %766 = arith.addf %764, %765 : vector<16x1xf32>
    %767 = math.rsqrt %766 : vector<16x1xf32>
    %768 = vector.broadcast %767 : vector<16x1xf32> to vector<16x32xf32>
    %769 = arith.mulf %759, %768 : vector<16x32xf32>
    %770 = vector.broadcast %753 : vector<1x32xf32> to vector<16x32xf32>
    %771 = arith.mulf %769, %770 : vector<16x32xf32>
    %c32 = arith.constant 32 : index
    %c0_192 = arith.constant 0 : index
    %772 = vector.load %arg1[%c32, %c0_192] : memref<40x32xf32, #tpu.memory_space<vmem>>, vector<2x16xf32>
    %cst_193 = arith.constant dense<0.000000e+00> : vector<2x32xf32>
    %773 = tpu.matmul %772, %771, %cst_193 {dimension_numbers = #tpu.dot_dimension_numbers<[1], [0], [0], [1], [0, 0, 1, 1], [], []>} : vector<2x16xf32>, vector<16x32xf32>, vector<2x32xf32> -> vector<2x32xf32>
    %c584 = arith.constant 584 : index
    %c0_194 = arith.constant 0 : index
    %774 = vector.load %arg0[%c584, %c0_194] : memref<696x128xf32, #tpu.memory_space<vmem>>, vector<32x64xf32>
    %cst_195 = arith.constant dense<0.000000e+00> : vector<2x64xf32>
    %775 = tpu.matmul %773, %774, %cst_195 {dimension_numbers = #tpu.dot_dimension_numbers<[1], [0], [0], [1], [0, 0, 1, 1], [], []>} : vector<2x32xf32>, vector<32x64xf32>, vector<2x64xf32> -> vector<2x64xf32>
    %c616 = arith.constant 616 : index
    %c0_196 = arith.constant 0 : index
    %776 = vector.load %arg0[%c616, %c0_196] : memref<696x128xf32, #tpu.memory_space<vmem>>, vector<1x64xf32>
    %777 = vector.broadcast %776 : vector<1x64xf32> to vector<2x64xf32>
    %778 = arith.addf %775, %777 : vector<2x64xf32>
    %cst_197 = arith.constant 0.000000e+00 : f32
    %779 = vector.broadcast %cst_197 : f32 to vector<2x64xf32>
    %780 = arith.maximumf %778, %779 : vector<2x64xf32>
    %c624 = arith.constant 624 : index
    %c0_198 = arith.constant 0 : index
    %781 = vector.load %arg0[%c624, %c0_198] : memref<696x128xf32, #tpu.memory_space<vmem>>, vector<64x1xf32>
    %cst_199 = arith.constant dense<0.000000e+00> : vector<2x1xf32>
    %782 = tpu.matmul %780, %781, %cst_199 {dimension_numbers = #tpu.dot_dimension_numbers<[1], [0], [0], [1], [0, 0, 1, 1], [], []>} : vector<2x64xf32>, vector<64x1xf32>, vector<2x1xf32> -> vector<2x1xf32>
    %c688 = arith.constant 688 : index
    %c0_200 = arith.constant 0 : index
    %783 = vector.load %arg0[%c688, %c0_200] : memref<696x128xf32, #tpu.memory_space<vmem>>, vector<1x1xf32>
    %784 = vector.broadcast %783 : vector<1x1xf32> to vector<2x1xf32>
    %785 = arith.addf %782, %784 : vector<2x1xf32>
    %c0_201 = arith.constant 0 : index
    %c0_202 = arith.constant 0 : index
    %786 = vector.load %arg2[%c0_201, %c0_202] : memref<2x1xf32, #tpu.memory_space<vmem>>, vector<2x1xf32>
    tpu.vector_store %arg2[%c0_201, %c0_202], %785 {strides = array<i32>} : memref<2x1xf32, #tpu.memory_space<vmem>>, vector<2x1xf32>,
    return
  }
}

</mosaic_0001>

<bundles_post_ra>
// kernel: forward.1
= control target key start
LH: loop header
LB: loop body
LE: loop exit
PB: predicated region body
PF: predicated region fallthrough
CT: control target
= control target key end

     0   :  { %7 = vsyncpa [#allocation4], 0  ;;  %s4666_s12 = smov [#allocation3]   ;;  %s4667_s14 = smov 128   ;;  %s6662_s0 = inlined_call_operand.hbm [shape: f32[696,128], index: 0, kind: input, shape index: {}]   ;;  %s6663_s1 = inlined_call_operand.vmem [shape: f32[40,32], index: 1, kind: input, shape index: {}]   ;;  %s6664_s2 = inlined_call_operand.vmem [shape: f32[2,1], index: 2, kind: output, shape index: {}]  }
   0x1   :  { %s12_s11 = sshll.u32 %s6662_s0, 4  ;;  %s14_s13 = sshll.u32 %s4666_s12, 4  ;;  %s13_s11 = int_to_ptr.hbm [resolvable:$true] %s12_s11  ;;  %s15_s13 = int_to_ptr.vmem [resolvable:$true] %s14_s13 }
   0x2   :  { %s4668_s15 = smov 8  }
   0x3   :  { %20 = dma.hbm_to_vmem [thread:$0]  %s13_s11, 11136, %s15_s13, [#allocation4], %s4667_s14, %s4667_s14, %s4668_s15  }
   0x4   :  { %4664 = dma.done.wait [#allocation4], 11136  }
   0x5   :  { %4665 = vsyncadd [#allocation4], 4294956160  ;;  %v4712_v0 = vld [vmem:[%s6663_s1 + $0x8] sm:$0xff]  ;;  %vm84_vm0 = vcmask 261120   ;;  %v4717_v1 = vld [vmem:[%s6663_s1] sm:$0xff]  ;;  %s4670_s23 = smov 64  }
   0x6   :  { %v4722_v2 = vld [vmem:[%s6663_s1 + $0x18] sm:$0xff]  ;;  %v83_v3 = vmul.f32 %v4712_v0, %v4712_v0  ;;  %v82_v4 = vmul.f32 %v4717_v1, %v4717_v1  ;;  %v4731_v5 = vld [vmem:[%s6663_s1 + $0x10] sm:$0xff]  ;;  %s4671_s24 = smov 112   ;;  %s4672_s25 = smov 16  }
   0x7   :  { %v154_v8 = vmul.f32 %v4722_v2, %v4722_v2  ;;  %v153_v9 = vmul.f32 %v4731_v5, %v4731_v5  ;;  %s4673_s26 = smov 48   ;;  %s4674_s27 = smov 96  }
   0x8   :  { %v88_v6 = vsel %vm84_vm0, %v83_v3, 0.0  ;;  %v85_v7 = vsel %vm84_vm0, %v82_v4, 0.0  ;;  %s4675_s28 = smov 80   ;;  %s4676_s29 = smov 32  }
   0x9   :  { %89 = vadd.xlane.f32.xlu1 %v88_v6  ;;  %86 = vadd.xlane.f32.xlu0 %v85_v7  ;;  %v158_v10 = vsel %vm84_vm0, %v154_v8, 0.0  ;;  %v155_v11 = vsel %vm84_vm0, %v153_v9, 0.0  ;;  %s4677_s30 = smov 124   ;;  %s4686_s3 = smov 120  }
   0xa   :  { %s4687_s4 = smov 104   ;;  %s4689_s5 = smov 24  }
  0x11   :  { %159 = vadd.xlane.f32.xlu1 %v158_v10  ;;  %156 = vadd.xlane.f32.xlu0 %v155_v11 }
  0x7c   :  { %v90_v12 = vpop.xlane.xlu1 %89  ;;  %v87_v13 = vpop.xlane.xlu0 %86 }
  0x7d   :  { %4322 = vrsqrt.f32 %v90_v12  ;;  %vm110_vm1 = vcmp.eq.f32.partialorder %v90_v12, inf  ;;  %v113_v32 = vand.u32 2147483648, %v90_v12  ;;  %vm112_vm2 = vcmp.eq.f32.partialorder %v90_v12, 0.0 }
  0x7e   :  { %4324 = vrsqrt.f32 %v87_v13  ;;  %vm98_vm3 = vcmp.eq.f32.partialorder %v87_v13, inf  ;;  %v101_v37 = vand.u32 2147483648, %v87_v13  ;;  %vm100_vm4 = vcmp.eq.f32.partialorder %v87_v13, 0.0 }
  0x83   :  { %v4323_v14 = vpop.eup %4322 }
  0x84   :  { %v4325_v15 = vpop.eup %4324  ;;  %v104_v16 = vmul.f32 %v4323_v14, %v90_v12  ;;  %v160_v17 = vpop.xlane.xlu1 %159 }
  0x85   :  { %v157_v18 = vpop.xlane.xlu0 %156  ;;  %v92_v19 = vmul.f32 %v4325_v15, %v87_v13  ;;  %4326 = vrsqrt.f32 %v160_v17  ;;  %vm180_vm5 = vcmp.eq.f32.partialorder %v160_v17, inf  ;;  %v183_v50 = vand.u32 2147483648, %v160_v17 }
  0x86   :  { %4328 = vrsqrt.f32 %v157_v18  ;;  %v105_v20 = vmul.f32 %v4323_v14, %v104_v16  ;;  %vm182_vm6 = vcmp.eq.f32.partialorder %v160_v17, 0.0  ;;  %vm168_vm7 = vcmp.eq.f32.partialorder %v157_v18, inf }
  0x87   :  { %v93_v21 = vmul.f32 %v4325_v15, %v92_v19  ;;  %v171_v53 = vand.u32 2147483648, %v157_v18  ;;  %vm170_vm8 = vcmp.eq.f32.partialorder %v157_v18, 0.0 }
  0x88   :  { %v106_v22 = vmul.f32 0.5, %v105_v20 }
  0x89   :  { %v94_v23 = vmul.f32 0.5, %v93_v21 }
  0x8a   :  { %v107_v24 = vsub.f32 1.5, %v106_v22 }
  0x8b   :  { %v4327_v25 = vpop.eup %4326  ;;  %v95_v26 = vsub.f32 1.5, %v94_v23 }
  0x8c   :  { %v4329_v27 = vpop.eup %4328  ;;  %v174_v28 = vmul.f32 %v4327_v25, %v160_v17  ;;  %v108_v29 = vmul.f32 %v4323_v14, %v107_v24  ;;  %v448_v14 = vld [vmem:[#allocation3 + $0xb0] sm:$0xff] }
  0x8d   :  { %v162_v30 = vmul.f32 %v4329_v27, %v157_v18  ;;  %v96_v31 = vmul.f32 %v4325_v15, %v95_v26  ;;  %463 = vmatpush.msra.mxu2 %v448_v14 }
  0x8e   :  { %v109_v33 = vmul.f32 %v108_v29, %v90_v12  ;;  %v175_v34 = vmul.f32 %v4327_v25, %v174_v28 }
  0x8f   :  { %v97_v35 = vmul.f32 %v96_v31, %v87_v13  ;;  %v163_v36 = vmul.f32 %v4329_v27, %v162_v30 }
  0x90   :  { %v111_v38 = vsel %vm110_vm1, %v90_v12, %v109_v33  ;;  %v176_v39 = vmul.f32 0.5, %v175_v34 }
  0x91   :  { %v99_v40 = vsel %vm98_vm3, %v87_v13, %v97_v35  ;;  %v164_v41 = vmul.f32 0.5, %v163_v36  ;;  %v4741_v42 = vsel %vm112_vm2, %v113_v32, %v111_v38 }
  0x92   :  { %v4743_v43 = vsel %vm100_vm4, %v101_v37, %v99_v40  ;;  %v4746_v44 = vadd.f32 1e-07, %v4741_v42  ;;  %v177_v45 = vsub.f32 1.5, %v176_v39 }
  0x93   :  { %v117_v46 = vadd.f32 1e-07, %v4743_v43  ;;  %v165_v47 = vsub.f32 1.5, %v164_v41  ;;  %vm115_vm11 = vcmp.gt.f32.partialorder %v4743_v43, 1.0 }
  0x94   :  { %4330 = vrcp.f32 %v4746_v44  ;;  %v178_v49 = vmul.f32 %v4327_v25, %v177_v45  ;;  %vm139_vm13 = vweird.f32 %v4746_v44  ;;  %v145_v15 = vand.u32 2147483648, %v4746_v44 }
  0x95   :  { %4332 = vrcp.f32 %v117_v46  ;;  %v166_v48 = vmul.f32 %v4329_v27, %v165_v47  ;;  %v128_v8 = vand.u32 2147483647, %v117_v46  ;;  %v130_v9 = vand.u32 2147483648, %v117_v46 }
  0x96   :  { %v179_v52 = vmul.f32 %v178_v49, %v160_v17  ;;  %vm124_vm10 = vweird.f32 %v117_v46  ;;  %v143_v31 = vand.u32 2147483647, %v4746_v44  ;;  %v146_v32 = vor.u32 1.1754944e-38, %v145_v15  ;;  %v447_v15 = vld [vmem:[#allocation3 + $0xa8] sm:$0xff] }
  0x97   :  { %v167_v51 = vmul.f32 %v166_v48, %v157_v18  ;;  %vm129_vm14 = vcmp.eq.f32.partialorder %v128_v8, 8.507059e+37  ;;  %v282_v8 = vld [vmem:[#allocation3 + $0x18] sm:$0xff]  ;;  %464 = vmatpush.msra.mxu2 %v447_v15 }
  0x98   :  { %v181_v56 = vsel %vm180_vm5, %v160_v17, %v179_v52 }
  0x99   :  { %v169_v55 = vsel %vm168_vm7, %v157_v18, %v167_v51  ;;  %v4752_v59 = vsel %vm182_vm6, %v183_v50, %v181_v56  ;;  %v131_v18 = vor.u32 1.1754944e-38, %v130_v9  ;;  %v281_v9 = vld [vmem:[#allocation3 + $0x10] sm:$0xff] }
  0x9a   :  { %v4750_v54 = vpop.eup %4330  ;;  %v172_v58 = vsel %vm170_vm8, %v171_v53, %v169_v55  ;;  %v188_v63 = vadd.f32 1e-07, %v4752_v59  ;;  %v4669_v53 = vmov 32.0  }
  0x9b   :  { %v4333_v57 = vpop.eup %4332  ;;  %v187_v61 = vadd.f32 1e-07, %v172_v58  ;;  %v135_v62 = vmul.f32 %v4750_v54, %v4746_v44  ;;  %vm140_vm15 = vweird.f32 %v4750_v54 }
  0x9c   :  { %v120_v60 = vmul.f32 %v4333_v57, %v117_v46  ;;  %vm125_vm9 = vweird.f32 %v4333_v57  ;;  %v215_v25 = vand.u32 2147483648, %v188_v63  ;;  %v213_v28 = vand.u32 2147483647, %v188_v63  ;;  %vm4771_vm4 = vmor %vm139_vm13, %vm140_vm15 }
  0x9d   :  { %4334 = vrcp.f32 %v187_v61  ;;  %v136_v6 = vsub.f32 1.0, %v135_v62  ;;  %vm4759_vm12 = vmor %vm124_vm10, %vm125_vm9  ;;  %v198_v20 = vand.u32 2147483647, %v187_v61  ;;  %v200_v21 = vand.u32 2147483648, %v187_v61 }
  0x9e   :  { %v121_v3 = vsub.f32 1.0, %v120_v60  ;;  %4336 = vrcp.f32 %v188_v63  ;;  %vm194_vm3 = vweird.f32 %v187_v61  ;;  %vm209_vm7 = vweird.f32 %v188_v63 }
  0x9f   :  { %v137_v13 = vmul.f32 %v4750_v54, %v136_v6  ;;  %vm199_vm6 = vcmp.eq.f32.partialorder %v198_v20, 8.507059e+37  ;;  %v201_v33 = vor.u32 1.1754944e-38, %v200_v21  ;;  %v216_v38 = vor.u32 1.1754944e-38, %v215_v25  ;;  %v444_v20 = vld [vmem:[#allocation3 + $0x90] sm:$0xff]  ;;  %v442_v25 = vld [vmem:[#allocation3 + $0x80] sm:$0xff] }
  0xa0   :  { %v122_v4 = vmul.f32 %v4333_v57, %v121_v3  ;;  %vm185_vm9 = vcmp.gt.f32.partialorder %v172_v58, 1.0  ;;  %vm214_vm10 = vcmp.eq.f32.partialorder %v213_v28, 8.507059e+37  ;;  %vm116_vm13 = vcmp.gt.f32.partialorder %v4741_v42, 1.0 }
  0xa1   :  { %v138_v24 = vadd.f32 %v4750_v54, %v137_v13  ;;  %4338 = vrcp.f32 %v4669_v53  ;;  %v406_v53 = vld [vmem:[#allocation3 + $0x50] sm:$0xff] }
  0xa2   :  { %v123_v7 = vadd.f32 %v4333_v57, %v122_v4 }
  0xa3   :  { %v4335_v10 = vpop.eup %4334  ;;  %v142_v37 = vsel %vm4771_vm4, %v4750_v54, %v138_v24 }
  0xa4   :  { %v4337_v11 = vpop.eup %4336  ;;  %v190_v12 = vmul.f32 %v4335_v10, %v187_v61  ;;  %v127_v17 = vsel %vm4759_vm12, %v4333_v57, %v123_v7  ;;  %vm195_vm1 = vweird.f32 %v4335_v10  ;;  %vm144_vm12 = vcmp.eq.f32.partialorder %v143_v31, 8.507059e+37  ;;  %v283_v7 = vld [vmem:[#allocation3 + $0x20] sm:$0xff] }
  0xa5   :  { %v205_v16 = vmul.f32 %v4337_v11, %v188_v63  ;;  %v132_v26 = vsel %vm129_vm14, %v131_v18, %v127_v17  ;;  %vm210_vm2 = vweird.f32 %v4337_v11  ;;  %vm196_vm5 = vmor %vm194_vm3, %vm195_vm1  ;;  %v147_v46 = vsel %vm144_vm12, %v146_v32, %v142_v37  ;;  %302 = vmatpush.msra.mxu0 %v283_v7  ;;  %v445_v17 = vld [vmem:[#allocation3 + $0x98] sm:$0xff]  ;;  %v4309_v32 = vld [vmem:[#allocation3] ss:$0 sm:$0xff] }
  0xa6   :  { %v191_v19 = vsub.f32 1.0, %v190_v12  ;;  %v149_v35 = vsel %vm115_vm11, %v132_v26, 1.0  ;;  %vm211_vm8 = vmor %vm209_vm7, %vm210_vm2  ;;  %vm186_vm11 = vcmp.gt.f32.partialorder %v4752_v59, 1.0  ;;  %v150_v49 = vsel %vm116_vm13, %v147_v46, 1.0  ;;  %v485_v46 = vld [vmem:[#allocation3 + $0xf0] sm:$0xff] }
  0xa7   :  { %v206_v22 = vsub.f32 1.0, %v205_v16  ;;  %v151_v45 = vmul.f32 %v149_v35, %v4717_v1  ;;  %v152_v52 = vmul.f32 %v150_v49, %v4712_v0  ;;  %v4339_v54 = vpop.eup %4338  ;;  %303 = vmatpush.msra.mxu0 %v282_v8  ;;  %v446_v16 = vld [vmem:[#allocation3 + $0xa0] sm:$0xff]  ;;  %502 = vmatpush.msra.mxu3 %v485_v46  ;;  %v484_v49 = vld [vmem:[#allocation3 + $0xe8] sm:$0xff] }
  0xa8   :  { %v192_v23 = vmul.f32 %v4335_v10, %v191_v19  ;;  %v233_v55 = vmul.f32 32.0, %v4339_v54  ;;  %vm237_vm14 = vweird.f32 %v4339_v54  ;;  %465 = vmatpush.msra.mxu2 %v446_v16 }
  0xa9   :  { %v207_v27 = vmul.f32 %v4337_v11, %v206_v22  ;;  %304 = vmatpush.msra.mxu0 %v281_v9  ;;  %503 = vmatpush.msra.mxu3 %v484_v49 }
  0xaa   :  { %v193_v29 = vadd.f32 %v4335_v10, %v192_v23  ;;  %v234_v42 = vsub.f32 1.0, %v233_v55  ;;  %466 = vmatpush.msra.mxu2 %v445_v17  ;;  %v443_v23 = vld [vmem:[#allocation3 + $0x88] sm:$0xff] }
  0xab   :  { %v208_v34 = vadd.f32 %v4337_v11, %v207_v27  ;;  %v405_v55 = vld [vmem:[#allocation3 + $0x48] sm:$0xff] }
  0xac   :  { %v197_v36 = vsel %vm196_vm5, %v4335_v10, %v193_v29  ;;  %v235_v56 = vmul.f32 %v4339_v54, %v234_v42  ;;  %v280_v10 = vld [vmem:[#allocation3 + $0x8] sm:$0xff]  ;;  %467 = vmatpush.msra.mxu2 %v444_v20 }
  0xad   :  { %v202_v39 = vsel %vm199_vm6, %v201_v33, %v197_v36  ;;  %v212_v40 = vsel %vm211_vm8, %v4337_v11, %v208_v34  ;;  %305 = vmatpush.msra.mxu0 %v280_v10  ;;  %v480_v42 = vld [vmem:[#allocation3 + $0xc8] sm:$0xff]  ;;  %vm411_vm6 = vcmask 523264  }
  0xae   :  { %v219_v41 = vsel %vm185_vm9, %v202_v39, 1.0  ;;  %v217_v44 = vsel %vm214_vm10, %v216_v38, %v212_v40  ;;  %v236_v57 = vadd.f32 %v4339_v54, %v235_v56  ;;  %468 = vmatpush.msra.mxu2 %v443_v23  ;;  %v404_v56 = vld [vmem:[#allocation3 + $0x40] sm:$0xff] }
  0xaf   :  { %v221_v43 = vmul.f32 %v219_v41, %v4731_v5  ;;  %v220_v47 = vsel %vm186_vm11, %v217_v44, 1.0 }
  0xb0   :  { %v222_v51 = vmul.f32 %v220_v47, %v4722_v2  ;;  %v4796_v58 = vsel %vm237_vm14, %v4339_v54, %v236_v57  ;;  %469 = vmatpush.msra.mxu2 %v442_v25  ;;  %v409_v47 = vld [vmem:[#allocation3 + $0x68] sm:$0xff]  ;;  %v481_v54 = vld [vmem:[#allocation3 + $0xd0] sm:$0xff]  ;;  %v27_v57 = vlaneseq }
  0xb1   :  { %v4785_v48 = vadd.f32 %v221_v43, %v151_v45  ;;  %v441_v45 = vld [vmem:[#allocation3 + $0x78] sm:$0xff]  ;;  %v410_v43 = vld [vmem:[#allocation3 + $0x70] sm:$0xff] }
  0xb2   :  { %v4792_v1 = vadd.f32 %v222_v51, %v152_v52  ;;  %470 = vmatpush.msra.mxu2 %v441_v45  ;;  %426 = vmatpush.msra.mxu1 %v410_v43  ;;  %v483_v51 = vld [vmem:[#allocation3 + $0xe0] sm:$0xff]  ;;  %v407_v52 = vld [vmem:[#allocation3 + $0x58] sm:$0xff] }
  0xb3   :  { %v226_v50 = vsel %vm84_vm0, %v4785_v48, 0.0  ;;  %504 = vmatpush.msra.mxu3 %v483_v51 }
  0xb4   :  { %227 = vadd.xlane.f32.xlu2 %v226_v50  ;;  %v229_v5 = vsel %vm84_vm0, %v4792_v1, 0.0  ;;  %v408_v50 = vld [vmem:[#allocation3 + $0x60] sm:$0xff]  ;;  %427 = vmatpush.msra.mxu1 %v409_v47 }
  0xb6   :  { %428 = vmatpush.msra.mxu1 %v408_v50 }
  0xb8   :  { %429 = vmatpush.msra.mxu1 %v407_v52 }
  0xba   :  { %430 = vmatpush.msra.mxu1 %v406_v53 }
  0xbc   :  { %230 = vadd.xlane.f32.xlu2 %v229_v5  ;;  %v482_v5 = vld [vmem:[#allocation3 + $0xd8] sm:$0xff]  ;;  %431 = vmatpush.msra.mxu1 %v405_v55 }
  0xbd   :  { %505 = vmatpush.msra.mxu3 %v482_v5 }
  0xbe   :  { %432 = vmatpush.msra.mxu1 %v404_v56 }
  0xbf   :  { %506 = vmatpush.msra.mxu3 %v481_v54 }
  0xc1   :  { %507 = vmatpush.msra.mxu3 %v480_v42 }
 0x127   :  { %v228_v2 = vpop.xlane.xlu2 %227 }
 0x128   :  { %v239_v59 = vmul.f32 %v4796_v58, %v228_v2  ;;  %v479_v2 = vld [vmem:[#allocation3 + $0xc0] sm:$0xff] }
 0x129   :  { %508 = vmatpush.msra.mxu3 %v479_v2 }
 0x12a   :  { %v241_v0 = vsub.f32 %v4785_v48, %v239_v59 }
 0x12c   :  { %v243_v60 = vmul.f32 %v241_v0, %v241_v0 }
 0x12e   :  { %v245_v61 = vsel %vm84_vm0, %v243_v60, 0.0  ;;  %v478_v60 = vld [vmem:[#allocation3 + $0xb8] sm:$0xff] }
 0x12f   :  { %246 = vadd.xlane.f32.xlu0 %v245_v61  ;;  %v231_v62 = vpop.xlane.xlu2 %230  ;;  %v313_v61 = vld [vmem:[#allocation3 + $0x28] sm:$0xf]  ;;  %509 = vmatpush.msra.mxu3 %v478_v60 }
 0x130   :  { %v240_v63 = vmul.f32 %v4796_v58, %v231_v62  ;;  %v4813_v62 = vshrl.u32 %v27_v57, 7  ;;  %v344_v14 = vperm.slane %v313_v61, 1  ;;  %v358_v23 = vperm.slane %v313_v61, 2 }
 0x132   :  { %v242_v3 = vsub.f32 %v4792_v1, %v240_v63  ;;  %v315_v63 = vperm.slane %v313_v61, 3  ;;  %vm323_vm7 = vcmp.lt.s32.totalorder %v4813_v62, 6  ;;  %vm6667_vm8 = vcmp.ge.s32.totalorder %v4813_v62, 6 }
 0x133   :  { %vm6669_vm9 = vcmp.lt.s32.totalorder %v4813_v62, 4  ;;  %vm6666_vm10 = vcmp.ge.s32.totalorder %v4813_v62, 4  ;;  %vm6668_vm12 = vcmp.lt.s32.totalorder %v4813_v62, 2  ;;  %vm6665_vm11 = vcmp.ge.s32.totalorder %v4813_v62, 2 }
 0x134   :  { %v244_v4 = vmul.f32 %v242_v3, %v242_v3 }
 0x136   :  { %v248_v6 = vsel %vm84_vm0, %v244_v4, 0.0 }
 0x137   :  { %249 = vadd.xlane.f32.xlu1 %v248_v6 }
 0x1a2   :  { %v247_v11 = vpop.xlane.xlu0 %246 }
 0x1a3   :  { %v251_v12 = vmul.f32 %v247_v11, %v4796_v58  ;;  %v4310_v11 = vld [vmem:[#allocation3 + $0x30] ss:$0 sm:$0xff] }
 0x1a5   :  { %v253_v13 = vadd.f32 1e-05, %v251_v12 }
 0x1a7   :  { %4340 = vrsqrt.f32 %v253_v13  ;;  %vm261_vm1 = vweird.f32 %v253_v13 }
 0x1aa   :  { %v250_v18 = vpop.xlane.xlu1 %249 }
 0x1ab   :  { %v252_v19 = vmul.f32 %v250_v18, %v4796_v58 }
 0x1ad   :  { %v4341_v21 = vpop.eup %4340  ;;  %v254_v22 = vadd.f32 1e-05, %v252_v19 }
 0x1ae   :  { %v256_v24 = vmul.f32 %v4341_v21, %v253_v13  ;;  %vm262_vm15 = vweird.f32 %v4341_v21 }
 0x1af   :  { %4342 = vrsqrt.f32 %v254_v22  ;;  %vm263_vm2 = vmor %vm261_vm1, %vm262_vm15  ;;  %vm271_vm4 = vweird.f32 %v254_v22 }
 0x1b0   :  { %v257_v26 = vmul.f32 %v4341_v21, %v256_v24 }
 0x1b2   :  { %v258_v27 = vmul.f32 0.5, %v257_v26 }
 0x1b4   :  { %v259_v28 = vsub.f32 1.5, %v258_v27 }
 0x1b5   :  { %v4343_v29 = vpop.eup %4342 }
 0x1b6   :  { %v266_v30 = vmul.f32 %v4343_v29, %v254_v22  ;;  %v260_v31 = vmul.f32 %v4341_v21, %v259_v28  ;;  %vm272_vm3 = vweird.f32 %v4343_v29 }
 0x1b7   :  { %vm273_vm5 = vmor %vm271_vm4, %vm272_vm3 }
 0x1b8   :  { %v267_v33 = vmul.f32 %v4343_v29, %v266_v30  ;;  %v264_v34 = vsel %vm263_vm2, %v4341_v21, %v260_v31 }
 0x1b9   :  { %v275_v35 = vmul.f32 %v264_v34, %v241_v0  ;;  %v403_v0 = vld [vmem:[#allocation3 + $0x38] sm:$0xff] }
 0x1ba   :  { %v268_v36 = vmul.f32 0.5, %v267_v33  ;;  %433 = vmatpush.msra.mxu1 %v403_v0 }
 0x1bb   :  { %v278_v37 = vmul.f32 %v4309_v32, %v275_v35 }
 0x1bc   :  { %v269_v38 = vsub.f32 1.5, %v268_v36 }
 0x1bd   :  { %4185 = vmatmul.msk.f32.vlgmr.msra.gmra.mxu0 %vm84_vm0, %v278_v37 }
 0x1be   :  { %v270_v39 = vmul.f32 %v4343_v29, %v269_v38 }
 0x1c0   :  { %v274_v40 = vsel %vm273_vm5, %v4343_v29, %v270_v39 }
 0x1c1   :  { %v276_v41 = vmul.f32 %v274_v40, %v242_v3  ;;  %v330_v3 = vperm.slane %v313_v61, 0 }
 0x1c3   :  { %v279_v44 = vmul.f32 %v4309_v32, %v276_v41 }
 0x1c5   :  { %4186 = vmatmul.msk.f32.gmra.mxu0 %vm84_vm0, %v279_v44 }
 0x23a   :  { %v4808_v59 = vpop.f32.mrf.mxu0 }
 0x23b   :  { %4191 = vmatmul.msk.f32.vlgmr.msra.gmra.mxu2 %vm411_vm6, %v4808_v59  ;;  %v321_v4 = vrot.slane %v4808_v59, 2  ;;  %v335_v6 = vrot.slane %v4808_v59, 4  ;;  %v316_v8 = vmul.f32 %v315_v63, %v4808_v59  ;;  %v349_v12 = vrot.slane %v4808_v59, 6 }
 0x23d   :  { %v319_v21 = vadd.f32 %v4310_v11, %v316_v8 }
 0x242   :  { %v4821_v7 = vpop.f32.mrf.mxu0 }
 0x243   :  { %v322_v9 = vrot.slane %v4821_v7, 2  ;;  %v336_v10 = vrot.slane %v4821_v7, 4  ;;  %4192 = vmatmul.msk.f32.gmra.mxu2 %vm411_vm6, %v4821_v7  ;;  %v350_v13 = vrot.slane %v4821_v7, 6  ;;  %v317_v15 = vmul.f32 %v315_v63, %v4821_v7 }
 0x245   :  { %v325_v16 = vsel %vm323_vm7, %v322_v9, %v321_v4  ;;  %v339_v17 = vsel %vm6669_vm9, %v336_v10, %v335_v6  ;;  %v353_v18 = vsel %vm6668_vm12, %v350_v13, %v349_v12  ;;  %v320_v24 = vadd.f32 %v4310_v11, %v317_v15 }
 0x246   :  { %v328_v19 = vsel %vm6667_vm8, %v325_v16, 0.0  ;;  %v342_v20 = vsel %vm6666_vm10, %v339_v17, 0.0  ;;  %v356_v25 = vsel %vm6665_vm11, %v353_v18, 0.0  ;;  %v324_v26 = vsel %vm323_vm7, %v321_v4, %v322_v9  ;;  %v4311_v18 = vld [vmem:[#allocation3 + $0xf8] ss:$0 sm:$0xff] }
 0x247   :  { %v331_v22 = vmul.f32 %v330_v3, %v328_v19  ;;  %v338_v27 = vsel %vm6669_vm9, %v335_v6, %v336_v10  ;;  %v345_v29 = vmul.f32 %v344_v14, %v342_v20  ;;  %v332_v30 = vmul.f32 %v330_v3, %v324_v26 }
 0x248   :  { %v352_v31 = vsel %vm6668_vm12, %v349_v12, %v350_v13  ;;  %v359_v33 = vmul.f32 %v358_v23, %v356_v25  ;;  %v346_v35 = vmul.f32 %v344_v14, %v338_v27 }
 0x249   :  { %v333_v28 = vadd.f32 %v331_v22, %v319_v21  ;;  %v334_v34 = vadd.f32 %v332_v30, %v320_v24  ;;  %v360_v38 = vmul.f32 %v358_v23, %v352_v31 }
 0x24b   :  { %v347_v32 = vadd.f32 %v345_v29, %v333_v28  ;;  %v348_v37 = vadd.f32 %v346_v35, %v334_v34 }
 0x24d   :  { %v361_v36 = vadd.f32 %v359_v33, %v347_v32  ;;  %v362_v40 = vadd.f32 %v360_v38, %v348_v37 }
 0x24f   :  { %v4187_v39 = vmul.f32 -1.442695, %v361_v36  ;;  %v4188_v41 = vmul.f32 -1.442695, %v362_v40 }
 0x251   :  { %4344 = vpow2.f32 %v4187_v39 }
 0x252   :  { %4346 = vpow2.f32 %v4188_v41 }
 0x257   :  { %v4345_v44 = vpop.eup %4344 }
 0x258   :  { %v369_v45 = vadd.f32 1.0, %v4345_v44  ;;  %v4347_v43 = vpop.eup %4346 }
 0x259   :  { %v370_v46 = vadd.f32 1.0, %v4347_v43 }
 0x25a   :  { %4348 = vrcp.f32 %v369_v45  ;;  %v382_v52 = vand.u32 2147483648, %v369_v45  ;;  %v380_v54 = vand.u32 2147483647, %v369_v45  ;;  %vm376_vm14 = vweird.f32 %v369_v45 }
 0x25b   :  { %4350 = vrcp.f32 %v370_v46  ;;  %v397_v63 = vand.u32 2147483648, %v370_v46  ;;  %vm391_vm3 = vweird.f32 %v370_v46  ;;  %v395_v4 = vand.u32 2147483647, %v370_v46 }
 0x25c   :  { %v383_v56 = vor.u32 1.1754944e-38, %v382_v52  ;;  %vm381_vm1 = vcmp.eq.f32.partialorder %v380_v54, 8.507059e+37 }
 0x25d   :  { %v398_v8 = vor.u32 1.1754944e-38, %v397_v63  ;;  %vm396_vm5 = vcmp.eq.f32.partialorder %v395_v4, 8.507059e+37  ;;  %v29_v63 = vadd.s32 8, %v4813_v62 }
 0x260   :  { %v4349_v47 = vpop.eup %4348 }
 0x261   :  { %v372_v49 = vmul.f32 %v4349_v47, %v369_v45  ;;  %v4351_v50 = vpop.eup %4350  ;;  %vm377_vm13 = vweird.f32 %v4349_v47 }
 0x262   :  { %v387_v5 = vmul.f32 %v4351_v50, %v370_v46  ;;  %vm378_vm15 = vmor %vm376_vm14, %vm377_vm13  ;;  %vm392_vm2 = vweird.f32 %v4351_v50  ;;  %vm559_vm14 = vcmask 130048  }
 0x263   :  { %v373_v51 = vsub.f32 1.0, %v372_v49  ;;  %vm393_vm4 = vmor %vm391_vm3, %vm392_vm2 }
 0x264   :  { %v388_v55 = vsub.f32 1.0, %v387_v5 }
 0x265   :  { %v374_v53 = vmul.f32 %v4349_v47, %v373_v51 }
 0x266   :  { %v389_v2 = vmul.f32 %v4351_v50, %v388_v55 }
 0x267   :  { %v375_v42 = vadd.f32 %v4349_v47, %v374_v53 }
 0x268   :  { %v390_v61 = vadd.f32 %v4351_v50, %v389_v2 }
 0x269   :  { %v379_v0 = vsel %vm378_vm15, %v4349_v47, %v375_v42 }
 0x26a   :  { %v384_v60 = vsel %vm381_vm1, %v383_v56, %v379_v0  ;;  %v394_v6 = vsel %vm393_vm4, %v4351_v50, %v390_v61  ;;  %v31_v0 = vand.u32 127, %v27_v57 }
 0x26b   :  { %v4851_v3 = vmul.f32 %v384_v60, %v361_v36  ;;  %v399_v9 = vsel %vm396_vm5, %v398_v8, %v394_v6  ;;  %v36_v60 = vand.u32 1, %v4813_v62 }
 0x26c   :  { %v4857_v10 = vmul.f32 %v399_v9, %v362_v40  ;;  %v60_v61 = vand.u32 1, %v31_v0  ;;  %vm70_vm2 = vcmp.ge.s32.totalorder %v4813_v62, %v31_v0  ;;  %vm71_vm5 = vcmp.ge.s32.totalorder %v29_v63, %v31_v0 }
 0x26d   :  { %4189 = vmatmul.msk.f32.vlgmr.msra.gmra.mxu1 %vm411_vm6, %v4851_v3  ;;  %4193 = vmatmul.msk.f32.vlgmr.msra.gmra.mxu3 %vm411_vm6, %v4851_v3 }
 0x26e   :  { %vm68_vm1 = vcmp.eq.s32.totalorder %v36_v60, %v60_v61 }
 0x26f   :  { %vm4932_vm3 = vmand %vm68_vm1, %vm70_vm2 }
 0x275   :  { %4190 = vmatmul.msk.f32.gmra.mxu1 %vm411_vm6, %v4857_v10  ;;  %4194 = vmatmul.msk.f32.gmra.mxu3 %vm411_vm6, %v4857_v10 }
 0x2be   :  { %v4863_v11 = vpop.f32.mrf.mxu2 }
 0x2bf   :  { %488 = vrot.lane.b32.xlu0 %v4863_v11, %s4670_s23 }
 0x2c6   :  { %v4867_v12 = vpop.f32.mrf.mxu2 }
 0x2c7   :  { %490 = vrot.lane.b32.xlu2 %v4867_v12, %s4670_s23  ;;  %761 = vmatpush.msrb.mxu2 %v4867_v12 }
 0x2c9   :  { %762 = vmatpush.msrb.mxu2 %v4863_v11 }
 0x2ea   :  { %v4873_v13 = vpop.f32.mrf.mxu1 }
 0x2eb   :  { %v4876_v14 = vmul.f32 0.25, %v4873_v13 }
 0x2ed   :  { %654 = vrot.lane.b32.xlu0 %v4876_v14, %s4670_s23 }
 0x2f0   :  { %v511_v17 = vpop.f32.mrf.mxu3 }
 0x2f2   :  { %v4880_v15 = vpop.f32.mrf.mxu1 }
 0x2f3   :  { %v4883_v16 = vmul.f32 0.25, %v4880_v15 }
 0x2f5   :  { %795 = vrot.lane.b32.xlu0 %v4873_v13, %s4671_s24  ;;  %656 = vrot.lane.b32.xlu2 %v4883_v16, %s4670_s23 }
 0x2f8   :  { %v514_v19 = vpop.f32.mrf.mxu3 }
 0x2fd   :  { %1099 = vrot.lane.b32.xlu0 %v4883_v16, %s4672_s25  ;;  %801 = vrot.lane.b32.xlu2 %v4883_v16, %s4673_s26 }
 0x305   :  { %944 = vrot.lane.b32.xlu0 %v4873_v13, %s4674_s27  ;;  %797 = vrot.lane.b32.xlu2 %v4880_v15, %s4671_s24 }
 0x30d   :  { %1095 = vrot.lane.b32.xlu0 %v4880_v15, %s4675_s28  ;;  %948 = vrot.lane.b32.xlu2 %v4876_v14, %s4676_s29 }
 0x315   :  { %1093 = vrot.lane.b32.xlu2 %v4873_v13, %s4675_s28 }
 0x321   :  { %v491_v20 = vpop.permute.xlu2 %490 }
 0x322   :  { %v515_v21 = vadd.f32 %v514_v19, %v491_v20 }
 0x324   :  { %v4903_v22 = vadd.f32 %v4311_v18, %v515_v21 }
 0x326   :  { %v524_v23 = vand.u32 2147483647, %v4903_v22  ;;  %v522_v52 = vmin.f32 %v4903_v22, 0.0 }
 0x328   :  { %v526_v24 = vsub.f32 0.0, %v524_v23 }
 0x32a   :  { %v529_v25 = vmul.f32 1.442695, %v526_v24 }
 0x32c   :  { %4352 = vpow2.f32 %v529_v25 }
 0x331   :  { %v489_v26 = vpop.permute.xlu0 %488 }
 0x332   :  { %v512_v27 = vadd.f32 %v511_v17, %v489_v26  ;;  %v4353_v30 = vpop.eup %4352  ;;  %v4680_v17 = vmov 0  }
 0x333   :  { %v540_v33 = vadd.f32 1.0, %v4353_v30  ;;  %v543_v35 = vmul.f32 -0.5, %v4353_v30  ;;  %v546_v40 = vand.u32 2147483647, %v4353_v30  ;;  %4286 = vset.pattern.permute.xlu2 %v4680_v17  ;;  %4290 = vset.pattern.permute.xlu0 %v4680_v17 }
 0x334   :  { %v4906_v28 = vadd.f32 %v4311_v18, %v512_v27 }
 0x335   :  { %v544_v39 = vadd.f32 1.0, %v543_v35  ;;  %vm547_vm13 = vcmp.lt.f32.partialorder %v546_v40, 0.0004427343  ;;  %v4682_v35 = vmov 3  }
 0x336   :  { %v523_v29 = vand.u32 2147483647, %v4906_v28  ;;  %v521_v51 = vmin.f32 %v4906_v28, 0.0 }
 0x337   :  { %v545_v43 = vmul.f32 %v4353_v30, %v544_v39 }
 0x338   :  { %v525_v31 = vsub.f32 0.0, %v523_v29 }
 0x33a   :  { %v527_v32 = vmul.f32 1.442695, %v525_v31 }
 0x33c   :  { %4354 = vpow2.f32 %v527_v32 }
 0x33d   :  { %4356 = vlog2.f32 %v540_v33 }
 0x342   :  { %v4355_v34 = vpop.eup %4354 }
 0x343   :  { %v531_v36 = vadd.f32 1.0, %v4355_v34  ;;  %v534_v37 = vmul.f32 -0.5, %v4355_v34  ;;  %v4357_v38 = vpop.eup %4356  ;;  %v537_v45 = vand.u32 2147483647, %v4355_v34 }
 0x344   :  { %v542_v44 = vmul.f32 0.6931472, %v4357_v38 }
 0x345   :  { %4358 = vlog2.f32 %v531_v36  ;;  %v535_v41 = vadd.f32 1.0, %v534_v37  ;;  %vm538_vm15 = vcmp.lt.f32.partialorder %v537_v45, 0.0004427343 }
 0x346   :  { %v548_v50 = vsel %vm547_vm13, %v545_v43, %v542_v44 }
 0x347   :  { %v536_v49 = vmul.f32 %v4355_v34, %v535_v41  ;;  %v550_v55 = vsub.f32 %v522_v52, %v548_v50  ;;  %v4681_v34 = vmov 2  }
 0x34b   :  { %v4359_v46 = vpop.eup %4358 }
 0x34c   :  { %v533_v47 = vmul.f32 0.6931472, %v4359_v46 }
 0x34e   :  { %v539_v5 = vsel %vm538_vm15, %v536_v49, %v533_v47 }
 0x34f   :  { %v657_v53 = vpop.permute.xlu2 %656  ;;  %v549_v54 = vsub.f32 %v521_v51, %v539_v5 }
 0x350   :  { %4197 = vmatpush.xpose.msk.msrb.mxu1 %vm559_vm14, %v657_v53  ;;  %4255 = vmatpush.xpose.msk.msrb.mxu3 %vm559_vm14, %v657_v53 }
 0x351   :  { %v4281_v42 = vpack.i.bf16 %v549_v54, %v550_v55 }
 0x353   :  { %4282 = vrot.lane.b32.xlu1 %v4281_v42, %s4677_s30 }
 0x357   :  { %v802_v2 = vpop.permute.xlu2 %801 }
 0x35b   :  { %799 = vrot.lane.b32.xlu1 %v4876_v14, %s4673_s26 }
 0x35f   :  { %v655_v56 = vpop.permute.xlu0 %654  ;;  %v798_v18 = vpop.permute.xlu2 %797 }
 0x360   :  { %4198 = vmatpush.xpose.msk.msrb.mxu1 %vm559_vm14, %v655_v56  ;;  %4256 = vmatpush.xpose.msk.msrb.mxu3 %vm559_vm14, %v655_v56 }
 0x363   :  { %950 = vrot.lane.b32.xlu1 %v4883_v16, %s4676_s29  ;;  %4199 = vmatmul.msk.f32.vlgmr.msrb.gmra.mxu1 %vm559_vm14, %v4873_v13  ;;  %v43_v13 = vand.u32 1, %v29_v63  ;;  %v4679_v16 = vmov 1  }
 0x364   :  { %4203 = vmatpush.xpose.msk.msra.mxu3 %vm559_vm14, %v802_v2  ;;  %4287 = vset.pattern.permute.xlu1 %v4679_v16 }
 0x365   :  { %4200 = vmatmul.msk.f32.vlgmr.msrb.gmra.mxu3 %vm559_vm14, %v4880_v15  ;;  %vm69_vm4 = vcmp.eq.s32.totalorder %v43_v13, %v60_v61 }
 0x366   :  { %vm4940_vm13 = vmand %vm69_vm4, %vm71_vm5 }
 0x367   :  { %v796_v4 = vpop.permute.xlu0 %795  ;;  %v949_v25 = vpop.permute.xlu2 %948 }
 0x36b   :  { %1097 = vrot.lane.b32.xlu1 %v4876_v14, %s4672_s25 }
 0x36f   :  { %v1100_v21 = vpop.permute.xlu0 %1099  ;;  %v1094_v29 = vpop.permute.xlu2 %1093 }
 0x373   :  { %946 = vrot.lane.b32.xlu1 %v4880_v15, %s4674_s27  ;;  %v4678_v15 = vmov 0.0  }
 0x374   :  { %v4183_v57 = vsel %vm4932_vm3, 1.0, %v4678_v15  ;;  %v4184_v23 = vsel %vm4940_vm13, 1.0, %v4678_v15 }
 0x377   :  { %v945_v26 = vpop.permute.xlu0 %944 }
 0x37f   :  { %v1096_v31 = vpop.permute.xlu0 %1095 }
 0x3c5   :  { %v4283_v6 = vpop.permute.xlu1 %4282 }
 0x3c6   :  { %v4284_v9 = vunpack.i.l.bf16 %v4283_v6  ;;  %v4285_v14 = vunpack.i.h.bf16 %v4283_v6 }
 0x3c8   :  { %580 = vmatpush.msrb.mxu0 %v4284_v9 }
 0x3ca   :  { %581 = vmatpush.msrb.mxu0 %v4285_v14 }
 0x3cb   :  { %4195 = vmatmul.msk.f32.vlgmr.msrb.gmra.mxu0 %vm559_vm14, %v4183_v57 }
 0x3cd   :  { %v800_v19 = vpop.permute.xlu1 %799 }
 0x3ce   :  { %4204 = vmatpush.xpose.msk.msra.mxu3 %vm559_vm14, %v800_v19 }
 0x3d1   :  { %4205 = vmatmul.msk.f32.vlgmr.msra.gmra.mxu3 %vm559_vm14, %v796_v4 }
 0x3d2   :  { %4215 = vmatpush.xpose.msk.msrb.mxu3 %vm559_vm14, %v1100_v21  ;;  %v4987_v21 = vpack.i.bf16 %v4863_v11, %v4867_v12 }
 0x3d3   :  { %4196 = vmatmul.msk.f32.gmra.mxu0 %vm559_vm14, %v4184_v23 }
 0x3d5   :  { %v951_v24 = vpop.permute.xlu1 %950 }
 0x3d6   :  { %4209 = vmatpush.xpose.msk.msra.mxu1 %vm559_vm14, %v951_v24 }
 0x3d9   :  { %4206 = vmatmul.msk.f32.gmra.mxu3 %vm559_vm14, %v798_v18 }
 0x3da   :  { %4210 = vmatpush.xpose.msk.msra.mxu1 %vm559_vm14, %v949_v25 }
 0x3dd   :  { %v1098_v27 = vpop.permute.xlu1 %1097  ;;  %4211 = vmatmul.msk.f32.vlgmr.msra.gmra.mxu1 %vm559_vm14, %v945_v26 }
 0x3de   :  { %4216 = vmatpush.xpose.msk.msrb.mxu3 %vm559_vm14, %v1098_v27 }
 0x3e1   :  { %4217 = vmatmul.msk.f32.vlgmr.msrb.gmra.mxu3 %vm559_vm14, %v1094_v29 }
 0x3e5   :  { %v947_v30 = vpop.permute.xlu1 %946 }
 0x3e6   :  { %4212 = vmatmul.msk.f32.gmra.mxu1 %vm559_vm14, %v947_v30 }
 0x3e8   :  { %v688_v23 = vpop.f32.mrf.mxu3 }
 0x3e9   :  { %4218 = vmatmul.msk.f32.gmra.mxu3 %vm559_vm14, %v1096_v31 }
 0x448   :  { %v583_v32 = vpop.f32.mrf.mxu0 }
 0x449   :  { %771 = vperm.xlu1 %4287, %v583_v32   ;;  %627 = vperm.xlu2 %4286, %v583_v32   ;;  %v589_v36 = vsub.f32 %v4906_v28, %v583_v32 }
 0x450   :  { %v586_v33 = vpop.f32.mrf.mxu0 }
 0x451   :  { %632 = vperm.xlu0 %4290, %v586_v33   ;;  %4288 = vset.pattern.permute.xlu1 %v4681_v34  ;;  %v590_v37 = vsub.f32 %v4903_v22, %v586_v33 }
 0x452   :  { %4291 = vset.pattern.permute.xlu2 %v4679_v16  ;;  %920 = vperm.xlu1 %4288, %v583_v32  }
 0x453   :  { %775 = vperm.xlu2 %4291, %v586_v33  }
 0x454   :  { %v828_v25 = vpop.f32.mrf.mxu3 }
 0x459   :  { %4292 = vset.pattern.permute.xlu0 %v4681_v34 }
 0x45a   :  { %924 = vperm.xlu0 %4292, %v586_v33   ;;  %4289 = vset.pattern.permute.xlu1 %v4682_v35 }
 0x45b   :  { %1069 = vperm.xlu1 %4289, %v583_v32  }
 0x462   :  { %4308 = vset.pattern.permute.xlu0 %v4682_v35  ;;  %v685_v35 = vpop.f32.mrf.mxu1 }
 0x463   :  { %1073 = vperm.xlu1 %4289, %v586_v33  }
 0x479   :  { %591 = vxpose.xlu2.b32.start [1/2] (short) (narrow) %v589_v36, 8  ;;  %v831_v36 = vpop.f32.mrf.mxu3 }
 0x481   :  { %592 = vxpose.xlu2.b32.end [2/2] (short) (narrow) %v590_v37, 8 }
 0x4a3   :  { %v628_v38 = vpop.permute.xlu2 %627 }
 0x4ad   :  { %v776_v40 = vpop.permute.xlu2 %775 }
 0x4bb   :  { %v772_v39 = vpop.permute.xlu1 %771 }
 0x4c3   :  { %v633_v46 = vpop.permute.xlu0 %632 }
 0x4c4   :  { %v921_v41 = vpop.permute.xlu1 %920 }
 0x4cc   :  { %v925_v61 = vpop.permute.xlu0 %924 }
 0x4cd   :  { %v1070_v42 = vpop.permute.xlu1 %1069 }
 0x4d5   :  { %v1074_v16 = vpop.permute.xlu1 %1073 }
 0x512   :  { %v607_v44 = vpop.trf.xlu2 }
 0x513   :  { %v778_v45 = vperm.slane %v607_v44, 1  ;;  %v635_v43 = vperm.slane %v607_v44, 0  ;;  %v927_v51 = vperm.slane %v607_v44, 2  ;;  %v1076_v52 = vperm.slane %v607_v44, 3 }
 0x515   :  { %v779_v47 = vadd.f32 %v778_v45, %v772_v39  ;;  %v637_v49 = vadd.f32 %v635_v43, %v633_v46  ;;  %v636_v50 = vadd.f32 %v635_v43, %v628_v38  ;;  %v928_v56 = vadd.f32 %v927_v51, %v921_v41 }
 0x516   :  { %v1077_v2 = vadd.f32 %v1076_v52, %v1070_v42  ;;  %v929_v6 = vadd.f32 %v927_v51, %v925_v61  ;;  %v780_v9 = vadd.f32 %v778_v45, %v776_v40  ;;  %v1078_v17 = vadd.f32 %v1076_v52, %v1074_v16  ;;  %v977_v52 = vpop.f32.mrf.mxu1 }
 0x517   :  { %v781_v28 = vsel %vm4932_vm3, %v779_v47, -1e+30  ;;  %v639_v22 = vsel %vm4940_vm13, %v637_v49, -1e+30  ;;  %v638_v5 = vsel %vm4932_vm3, %v636_v50, -1e+30 }
 0x518   :  { %v783_v53 = vsel %vm559_vm14, %v781_v28, -inf  ;;  %v643_v54 = vsel %vm559_vm14, %v639_v22, -inf  ;;  %v640_v55 = vsel %vm559_vm14, %v638_v5, -inf  ;;  %v930_v0 = vsel %vm4932_vm3, %v928_v56, -1e+30 }
 0x519   :  { %784 = vmax.xlane.f32.xlu0 %v783_v53  ;;  %644 = vmax.xlane.f32.xlu2 %v643_v54  ;;  %v1079_v60 = vsel %vm4932_vm3, %v1077_v2, -1e+30  ;;  %v932_v63 = vsel %vm559_vm14, %v930_v0, -inf  ;;  %v931_v13 = vsel %vm4940_vm13, %v929_v6, -1e+30  ;;  %v1126_v53 = vpop.f32.mrf.mxu3 }
 0x51a   :  { %641 = vmax.xlane.f32.xlu1 %v640_v55  ;;  %v1081_v4 = vsel %vm559_vm14, %v1079_v60, -inf  ;;  %v782_v14 = vsel %vm4940_vm13, %v780_v9, -1e+30  ;;  %v935_v57 = vsel %vm559_vm14, %v931_v13, -inf  ;;  %v1080_v18 = vsel %vm4940_vm13, %v1078_v17, -1e+30 }
 0x51b   :  { %v786_v8 = vsel %vm559_vm14, %v782_v14, -inf  ;;  %v1084_v19 = vsel %vm559_vm14, %v1080_v18, -inf }
 0x51e   :  { %v980_v16 = vpop.f32.mrf.mxu1 }
 0x521   :  { %933 = vmax.xlane.f32.xlu0 %v932_v63 }
 0x522   :  { %1082 = vmax.xlane.f32.xlu1 %v1081_v4 }
 0x529   :  { %936 = vmax.xlane.f32.xlu0 %v935_v57 }
 0x52a   :  { %787 = vmax.xlane.f32.xlu1 %v786_v8 }
 0x532   :  { %1085 = vmax.xlane.f32.xlu1 %v1084_v19  ;;  %v1129_v19 = vpop.f32.mrf.mxu3 }
 0x54b   :  { %4294 = vrot.lane.b32.xlu1 %v4987_v21, %s4671_s24 }
 0x58c   :  { %v4991_v24 = vpop.xlane.xlu0 %784  ;;  %v5002_v32 = vpop.xlane.xlu2 %644 }
 0x58d   :  { %v789_v26 = vsub.f32 %v781_v28, %v4991_v24  ;;  %v4994_v27 = vpop.xlane.xlu1 %641  ;;  %v647_v40 = vsub.f32 %v639_v22, %v5002_v32 }
 0x58e   :  { %v646_v20 = vsub.f32 %v638_v5, %v4994_v27 }
 0x58f   :  { %v791_v29 = vmul.f32 1.442695, %v789_v26  ;;  %v650_v43 = vmul.f32 1.442695, %v647_v40 }
 0x590   :  { %v648_v30 = vmul.f32 1.442695, %v646_v20 }
 0x591   :  { %4360 = vpow2.f32 %v791_v29 }
 0x592   :  { %4362 = vpow2.f32 %v648_v30  ;;  %v844_v30 = vsub.f32 0.0, %v4991_v24 }
 0x594   :  { %v4997_v31 = vpop.xlane.xlu0 %933 }
 0x595   :  { %v938_v11 = vsub.f32 %v930_v0, %v4997_v31  ;;  %v5000_v12 = vpop.xlane.xlu1 %1082  ;;  %v993_v40 = vsub.f32 0.0, %v4997_v31 }
 0x596   :  { %v1087_v33 = vsub.f32 %v1079_v60, %v5000_v12 }
 0x597   :  { %v4361_v34 = vpop.eup %4360  ;;  %v940_v37 = vmul.f32 1.442695, %v938_v11  ;;  %v846_v11 = vmul.f32 1.442695, %v844_v30  ;;  %v995_v24 = vmul.f32 1.442695, %v993_v40 }
 0x598   :  { %v1089_v38 = vmul.f32 1.442695, %v1087_v33  ;;  %v5005_v39 = vmul.f32 %v4361_v34, %v828_v25  ;;  %v4363_v44 = vpop.eup %4362  ;;  %v701_v33 = vsub.f32 0.0, %v4994_v27 }
 0x599   :  { %4364 = vpow2.f32 %v940_v37  ;;  %v5010_v45 = vmul.f32 %v4363_v44, %v685_v35  ;;  %v1142_v35 = vsub.f32 0.0, %v5000_v12  ;;  %v702_v12 = vsub.f32 0.0, %v5002_v32 }
 0x59a   :  { %v836_v41 = vsel %vm559_vm14, %v5005_v39, 0.0  ;;  %4366 = vpow2.f32 %v1089_v38  ;;  %v703_v34 = vmul.f32 1.442695, %v701_v33 }
 0x59b   :  { %837 = vadd.xlane.f32.xlu1 %v836_v41  ;;  %v693_v47 = vsel %vm559_vm14, %v5010_v45, 0.0  ;;  %4368 = vpow2.f32 %v650_v43  ;;  %v1144_v41 = vmul.f32 1.442695, %v1142_v35 }
 0x59c   :  { %v5016_v49 = vpop.xlane.xlu0 %936  ;;  %694 = vadd.xlane.f32.xlu0 %v693_v47 }
 0x59d   :  { %v5012_v46 = vpop.xlane.xlu1 %787  ;;  %v939_v54 = vsub.f32 %v931_v13, %v5016_v49 }
 0x59e   :  { %v790_v50 = vsub.f32 %v782_v14, %v5012_v46  ;;  %v845_v27 = vsub.f32 0.0, %v5012_v46 }
 0x59f   :  { %v4365_v51 = vpop.eup %4364  ;;  %v942_v2 = vmul.f32 1.442695, %v939_v54  ;;  %v705_v54 = vmul.f32 1.442695, %v702_v12 }
 0x5a0   :  { %v793_v28 = vmul.f32 1.442695, %v790_v50  ;;  %v5019_v22 = vmul.f32 %v4365_v51, %v977_v52  ;;  %v4367_v5 = vpop.eup %4366 }
 0x5a1   :  { %v5022_v55 = vmul.f32 %v4367_v5, %v1126_v53  ;;  %v4369_v60 = vpop.eup %4368  ;;  %v848_v5 = vmul.f32 1.442695, %v845_v27 }
 0x5a2   :  { %4370 = vpow2.f32 %v793_v28  ;;  %v985_v42 = vsel %vm559_vm14, %v5019_v22, 0.0  ;;  %v5031_v4 = vmul.f32 %v4369_v60, %v688_v23 }
 0x5a3   :  { %v1134_v56 = vsel %vm559_vm14, %v5022_v55, 0.0  ;;  %4372 = vpow2.f32 %v942_v2 }
 0x5a4   :  { %1135 = vadd.xlane.f32.xlu1 %v1134_v56  ;;  %986 = vadd.xlane.f32.xlu0 %v985_v42  ;;  %v696_v14 = vsel %vm559_vm14, %v5031_v4, 0.0 }
 0x5a5   :  { %v5028_v0 = vpop.xlane.xlu1 %1085 }
 0x5a6   :  { %v1088_v63 = vsub.f32 %v1080_v18, %v5028_v0 }
 0x5a8   :  { %v4371_v61 = vpop.eup %4370  ;;  %v1091_v13 = vmul.f32 1.442695, %v1088_v63  ;;  %v994_v63 = vsub.f32 0.0, %v5016_v49 }
 0x5a9   :  { %v5033_v6 = vmul.f32 %v4371_v61, %v831_v36  ;;  %v4373_v57 = vpop.eup %4372 }
 0x5aa   :  { %4374 = vpow2.f32 %v1091_v13  ;;  %v5039_v8 = vmul.f32 %v4373_v57, %v980_v16 }
 0x5ab   :  { %v839_v9 = vsel %vm559_vm14, %v5033_v6, 0.0  ;;  %4376 = vpow2.f32 %v846_v11 }
 0x5ac   :  { %840 = vadd.xlane.f32.xlu1 %v839_v9  ;;  %697 = vadd.xlane.f32.xlu0 %v696_v14  ;;  %v988_v17 = vsel %vm559_vm14, %v5039_v8, 0.0  ;;  %4378 = vpow2.f32 %v703_v34 }
 0x5ad   :  { %4380 = vpow2.f32 %v1144_v41 }
 0x5b0   :  { %v4375_v18 = vpop.eup %4374 }
 0x5b1   :  { %v5043_v23 = vmul.f32 %v4375_v18, %v1129_v19  ;;  %v4377_v38 = vpop.eup %4376 }
 0x5b2   :  { %v4379_v50 = vpop.eup %4378 }
 0x5b3   :  { %v1137_v26 = vsel %vm559_vm14, %v5043_v23, 0.0  ;;  %v4381_v53 = vpop.eup %4380 }
 0x5b4   :  { %989 = vadd.xlane.f32.xlu0 %v988_v17 }
 0x5bc   :  { %1138 = vadd.xlane.f32.xlu0 %v1137_v26 }
 0x5bd   :  { %v4295_v25 = vpop.permute.xlu1 %4294 }
 0x5be   :  { %v4296_v20 = vunpack.i.l.bf16 %v4295_v25  ;;  %v4297_v29 = vunpack.i.h.bf16 %v4295_v25  ;;  %v997_v25 = vmul.f32 1.442695, %v994_v63 }
 0x5c0   :  { %910 = vmatpush.msra.mxu0 %v4296_v20 }
 0x5c2   :  { %911 = vmatpush.msra.mxu0 %v4297_v29 }
 0x5c5   :  { %4304 = vrot.lane.b32.xlu1 %v4987_v21, %s4675_s28 }
 0x5d0   :  { %4299 = vrot.lane.b32.xlu0 %v4987_v21, %s4674_s27 }
 0x60e   :  { %v838_v36 = vpop.xlane.xlu1 %837 }
 0x60f   :  { %v842_v37 = vand.u32 2147483647, %v838_v36  ;;  %v695_v43 = vpop.xlane.xlu0 %694 }
 0x610   :  { %v699_v47 = vand.u32 2147483647, %v695_v43  ;;  %v1143_v43 = vsub.f32 0.0, %v5028_v0 }
 0x611   :  { %v850_v44 = vmax.f32 %v842_v37, %v4377_v38 }
 0x612   :  { %v707_v51 = vmax.f32 %v699_v47, %v4379_v50 }
 0x613   :  { %v852_v21 = vadd.f32 1e-06, %v850_v44 }
 0x614   :  { %v709_v52 = vadd.f32 1e-06, %v707_v51 }
 0x615   :  { %4382 = vrcp.f32 %v852_v21  ;;  %v865_v46 = vand.u32 2147483648, %v852_v21  ;;  %v863_v9 = vand.u32 2147483647, %v852_v21  ;;  %vm859_vm1 = vweird.f32 %v852_v21 }
 0x616   :  { %4384 = vpow2.f32 %v995_v24  ;;  %v720_v11 = vand.u32 2147483647, %v709_v52  ;;  %v722_v37 = vand.u32 2147483648, %v709_v52  ;;  %vm716_vm5 = vweird.f32 %v709_v52 }
 0x617   :  { %v1136_v28 = vpop.xlane.xlu1 %1135  ;;  %4386 = vrcp.f32 %v709_v52  ;;  %v987_v42 = vpop.xlane.xlu0 %986  ;;  %v866_v26 = vor.u32 1.1754944e-38, %v865_v46  ;;  %vm5060_vm2 = vcmp.eq.f32.partialorder %v863_v9, 8.507059e+37 }
 0x618   :  { %v1140_v31 = vand.u32 2147483647, %v1136_v28  ;;  %v991_v2 = vand.u32 2147483647, %v987_v42  ;;  %4388 = vpow2.f32 %v848_v5  ;;  %v723_v12 = vor.u32 1.1754944e-38, %v722_v37 }
 0x619   :  { %4390 = vpow2.f32 %v705_v54 }
 0x61a   :  { %v1148_v60 = vmax.f32 %v1140_v31, %v4381_v53  ;;  %v1146_v31 = vmul.f32 1.442695, %v1143_v43 }
 0x61b   :  { %v4383_v56 = vpop.eup %4382 }
 0x61c   :  { %v855_v61 = vmul.f32 %v4383_v56, %v852_v21  ;;  %v4385_v13 = vpop.eup %4384  ;;  %v5058_v16 = vadd.f32 1e-06, %v1148_v60  ;;  %vm860_vm15 = vweird.f32 %v4383_v56 }
 0x61d   :  { %v4387_v14 = vpop.eup %4386  ;;  %v999_v57 = vmax.f32 %v991_v2, %v4385_v13  ;;  %vm861_vm3 = vmor %vm859_vm1, %vm860_vm15  ;;  %vm721_vm15 = vcmp.eq.f32.partialorder %v720_v11, 8.507059e+37 }
 0x61e   :  { %v856_v32 = vsub.f32 1.0, %v855_v61  ;;  %v712_v17 = vmul.f32 %v4387_v14, %v709_v52  ;;  %v4389_v34 = vpop.eup %4388  ;;  %4392 = vrcp.f32 %v5058_v16  ;;  %vm717_vm4 = vweird.f32 %v4387_v14 }
 0x61f   :  { %v841_v19 = vpop.xlane.xlu1 %840  ;;  %v698_v29 = vpop.xlane.xlu0 %697  ;;  %v5064_v35 = vadd.f32 1e-06, %v999_v57  ;;  %4394 = vpow2.f32 %v997_v25  ;;  %vm718_vm13 = vmor %vm716_vm5, %vm717_vm4 }
 0x620   :  { %v857_v18 = vmul.f32 %v4383_v56, %v856_v32  ;;  %v713_v49 = vsub.f32 1.0, %v712_v17  ;;  %v843_v30 = vand.u32 2147483647, %v841_v19  ;;  %v700_v36 = vand.u32 2147483647, %v698_v29  ;;  %v4391_v38 = vpop.eup %4390 }
 0x621   :  { %4396 = vrcp.f32 %v5064_v35 }
 0x622   :  { %v858_v33 = vadd.f32 %v4383_v56, %v857_v18  ;;  %v851_v40 = vmax.f32 %v843_v30, %v4389_v34  ;;  %v714_v41 = vmul.f32 %v4387_v14, %v713_v49  ;;  %v708_v47 = vmax.f32 %v700_v36, %v4391_v38 }
 0x624   :  { %v862_v44 = vsel %vm861_vm3, %v4383_v56, %v858_v33  ;;  %v853_v50 = vadd.f32 1e-06, %v851_v40  ;;  %v715_v24 = vadd.f32 %v4387_v14, %v714_v41  ;;  %v710_v51 = vadd.f32 1e-06, %v708_v47  ;;  %v5074_v0 = vpop.eup %4392 }
 0x625   :  { %v867_v21 = vsel %vm5060_vm2, %v866_v26, %v862_v44  ;;  %v4395_v54 = vpop.eup %4394  ;;  %v1153_v42 = vmul.f32 %v5074_v0, %v5058_v16  ;;  %vm1158_vm4 = vweird.f32 %v5074_v0 }
 0x626   :  { %v868_v27 = vmul.f32 %v867_v21, %v5005_v39  ;;  %4398 = vrcp.f32 %v853_v50  ;;  %v719_v28 = vsel %vm718_vm13, %v4387_v14, %v715_v24  ;;  %v737_v17 = vand.u32 2147483648, %v710_v51 }
 0x627   :  { %4400 = vrcp.f32 %v710_v51  ;;  %v724_v5 = vsel %vm721_vm15, %v723_v12, %v719_v28  ;;  %v990_v53 = vpop.xlane.xlu0 %989  ;;  %v5080_v56 = vpop.eup %4396  ;;  %v1154_v9 = vsub.f32 1.0, %v1153_v42  ;;  %v880_v18 = vand.u32 2147483648, %v853_v50 }
 0x628   :  { %4207 = vmatmul.msk.f32.vlgmr.msra.gmra.mxu0 %vm559_vm14, %v868_v27  ;;  %v725_v52 = vmul.f32 %v724_v5, %v5010_v45  ;;  %v992_v39 = vand.u32 2147483647, %v990_v53  ;;  %4402 = vpow2.f32 %v1146_v31  ;;  %v1004_v45 = vmul.f32 %v5080_v56, %v5064_v35 }
 0x629   :  { %v878_v26 = vand.u32 2147483647, %v853_v50  ;;  %v1155_v49 = vmul.f32 %v5074_v0, %v1154_v9  ;;  %v735_v30 = vand.u32 2147483647, %v710_v51  ;;  %vm874_vm3 = vweird.f32 %v853_v50 }
 0x62a   :  { %4201 = vmatmul.msk.f32.vlgmr.msrb.gmra.mxu2 %vm559_vm14, %v725_v52  ;;  %v1000_v2 = vmax.f32 %v992_v39, %v4395_v54  ;;  %v1005_v34 = vsub.f32 1.0, %v1004_v45  ;;  %vm731_vm5 = vweird.f32 %v710_v51  ;;  %v881_v37 = vor.u32 1.1754944e-38, %v880_v18 }
 0x62b   :  { %v738_v40 = vor.u32 1.1754944e-38, %v737_v17  ;;  %vm879_vm11 = vcmp.eq.f32.partialorder %v878_v26, 8.507059e+37  ;;  %vm736_vm10 = vcmp.eq.f32.partialorder %v735_v30, 8.507059e+37  ;;  %v1163_v24 = vand.u32 2147483648, %v5058_v16 }
 0x62c   :  { %v4399_v60 = vpop.eup %4398  ;;  %v5082_v63 = vadd.f32 1e-06, %v1000_v2  ;;  %v1161_v5 = vand.u32 2147483647, %v5058_v16  ;;  %v1006_v31 = vmul.f32 %v5080_v56, %v1005_v34  ;;  %v1014_v2 = vand.u32 2147483648, %v5064_v35 }
 0x62d   :  { %v4401_v61 = vpop.eup %4400  ;;  %v870_v46 = vmul.f32 %v4399_v60, %v853_v50  ;;  %vm875_vm1 = vweird.f32 %v4399_v60  ;;  %v1156_v50 = vadd.f32 %v5074_v0, %v1155_v49  ;;  %v1164_v54 = vor.u32 1.1754944e-38, %v1163_v24 }
 0x62e   :  { %v727_v13 = vmul.f32 %v4401_v61, %v710_v51  ;;  %4404 = vrcp.f32 %v5082_v63  ;;  %v4403_v20 = vpop.eup %4402  ;;  %vm732_vm2 = vweird.f32 %v4401_v61  ;;  %vm876_vm13 = vmor %vm874_vm3, %vm875_vm1  ;;  %vm1157_vm1 = vweird.f32 %v5058_v16 }
 0x62f   :  { %v871_v32 = vsub.f32 1.0, %v870_v46  ;;  %v1139_v14 = vpop.xlane.xlu0 %1138  ;;  %vm733_vm15 = vmor %vm731_vm5, %vm732_vm2  ;;  %v1007_v39 = vadd.f32 %v5080_v56, %v1006_v31  ;;  %vm1009_vm2 = vweird.f32 %v5080_v56  ;;  %vm1008_vm3 = vweird.f32 %v5064_v35 }
 0x630   :  { %v728_v57 = vsub.f32 1.0, %v727_v13  ;;  %v1141_v19 = vand.u32 2147483647, %v1139_v14  ;;  %v1027_v30 = vand.u32 2147483647, %v5082_v63 }
 0x631   :  { %v872_v25 = vmul.f32 %v4399_v60, %v871_v32  ;;  %v1015_v32 = vor.u32 1.1754944e-38, %v1014_v2 }
 0x632   :  { %v729_v29 = vmul.f32 %v4401_v61, %v728_v57  ;;  %v1149_v11 = vmax.f32 %v1141_v19, %v4403_v20  ;;  %v1029_v20 = vand.u32 2147483648, %v5082_v63 }
 0x633   :  { %v873_v33 = vadd.f32 %v4399_v60, %v872_v25 }
 0x634   :  { %v730_v36 = vadd.f32 %v4401_v61, %v729_v29  ;;  %v5089_v38 = vadd.f32 1e-06, %v1149_v11  ;;  %v5091_v44 = vpop.eup %4404  ;;  %v1030_v34 = vor.u32 1.1754944e-38, %v1029_v20 }
 0x635   :  { %v877_v41 = vsel %vm876_vm13, %v4399_v60, %v873_v33  ;;  %v1019_v52 = vmul.f32 %v5091_v44, %v5082_v63 }
 0x636   :  { %v734_v47 = vsel %vm733_vm15, %v4401_v61, %v730_v36  ;;  %v882_v21 = vsel %vm879_vm11, %v881_v37, %v877_v41  ;;  %4406 = vrcp.f32 %v5089_v38  ;;  %vm1159_vm11 = vmor %vm1157_vm1, %vm1158_vm4  ;;  %v1012_v61 = vand.u32 2147483647, %v5064_v35 }
 0x637   :  { %v4305_v43 = vpop.permute.xlu1 %4304  ;;  %v739_v51 = vsel %vm736_vm10, %v738_v40, %v734_v47  ;;  %v883_v28 = vmul.f32 %v882_v21, %v5033_v6  ;;  %vm1162_vm10 = vcmp.eq.f32.partialorder %v1161_v5, 8.507059e+37  ;;  %v1020_v42 = vsub.f32 1.0, %v1019_v52  ;;  %vm1010_vm4 = vmor %vm1008_vm3, %vm1009_vm2 }
 0x638   :  { %v4306_v27 = vunpack.i.l.bf16 %v4305_v43  ;;  %v740_v12 = vmul.f32 %v739_v51, %v5031_v4  ;;  %v4307_v53 = vunpack.i.h.bf16 %v4305_v43  ;;  %v1160_v4 = vsel %vm1159_vm11, %v5074_v0, %v1156_v50 }
 0x639   :  { %4208 = vmatmul.msk.f32.gmra.mxu0 %vm559_vm14, %v883_v28  ;;  %v1165_v16 = vsel %vm1162_vm10, %v1164_v54, %v1160_v4  ;;  %v1011_v9 = vsel %vm1010_vm4, %v5080_v56, %v1007_v39  ;;  %v1178_v13 = vand.u32 2147483648, %v5089_v38  ;;  %v1021_v45 = vmul.f32 %v5091_v44, %v1020_v42 }
 0x63a   :  { %1208 = vmatpush.msrb.mxu0 %v4306_v27  ;;  %4202 = vmatmul.msk.f32.gmra.mxu2 %vm559_vm14, %v740_v12  ;;  %v1166_v0 = vmul.f32 %v1165_v16, %v5022_v55  ;;  %v1176_v57 = vand.u32 2147483647, %v5089_v38  ;;  %vm1013_vm13 = vcmp.eq.f32.partialorder %v1012_v61, 8.507059e+37  ;;  %vm1172_vm15 = vweird.f32 %v5089_v38 }
 0x63b   :  { %v1016_v18 = vsel %vm1013_vm13, %v1015_v32, %v1011_v9  ;;  %v1179_v56 = vor.u32 1.1754944e-38, %v1178_v13  ;;  %v1022_v19 = vadd.f32 %v5091_v44, %v1021_v45  ;;  %vm1024_vm11 = vweird.f32 %v5091_v44 }
 0x63c   :  { %1209 = vmatpush.msrb.mxu0 %v4307_v53  ;;  %v4407_v6 = vpop.eup %4406  ;;  %vm1177_vm10 = vcmp.eq.f32.partialorder %v1176_v57, 8.507059e+37  ;;  %v1017_v49 = vmul.f32 %v1016_v18, %v5019_v22  ;;  %vm1023_vm2 = vweird.f32 %v5082_v63  ;;  %vm1028_vm4 = vcmp.eq.f32.partialorder %v1027_v30, 8.507059e+37 }
 0x63d   :  { %v1168_v60 = vmul.f32 %v4407_v6, %v5089_v38  ;;  %vm1173_vm5 = vweird.f32 %v4407_v6  ;;  %vm1025_vm3 = vmor %vm1023_vm2, %vm1024_vm11  ;;  %v4683_v4 = vmov 1983009808   ;;  %vm1270_vm13 = vcmask 1047556  }
 0x63e   :  { %vm1174_vm1 = vmor %vm1172_vm15, %vm1173_vm5  ;;  %v1026_v33 = vsel %vm1025_vm3, %v5091_v44, %v1022_v19  ;;  %vm1245_vm5 = vcmask 392192   ;;  %v1275_v54 = vunpack.c.l.s4 %v4683_v4  ;;  %vm1382_vm15 = vcmask 125952  }
 0x63f   :  { %v1169_v46 = vsub.f32 1.0, %v1168_v60  ;;  %v1031_v36 = vsel %vm1028_vm4, %v1030_v34, %v1026_v33  ;;  %v4684_v60 = vmov 1934713408  }
 0x640   :  { %v1032_v22 = vmul.f32 %v1031_v36, %v5039_v8  ;;  %v5151_v39 = vunpack.c.0.s8 %v1275_v54  ;;  %v1299_v61 = vunpack.c.l.s4 %v4684_v60 }
 0x641   :  { %4219 = vmatmul.msk.f32.vlgmr.msrb.gmra.mxu0 %vm559_vm14, %v1166_v0  ;;  %v1170_v14 = vmul.f32 %v4407_v6, %v1169_v46 }
 0x642   :  { %v4300_v17 = vpop.permute.xlu0 %4299  ;;  %v5158_v57 = vunpack.c.0.s8 %v1299_v61 }
 0x643   :  { %v4301_v35 = vunpack.i.l.bf16 %v4300_v17  ;;  %v1171_v55 = vadd.f32 %v4407_v6, %v1170_v14  ;;  %v4302_v25 = vunpack.i.h.bf16 %v4300_v17 }
 0x645   :  { %1059 = vmatpush.msra.mxu2 %v4301_v35  ;;  %v1175_v26 = vsel %vm1174_vm1, %v4407_v6, %v1171_v55 }
 0x646   :  { %v1180_v29 = vsel %vm1177_vm10, %v1179_v56, %v1175_v26 }
 0x647   :  { %1060 = vmatpush.msra.mxu2 %v4302_v25  ;;  %v1181_v11 = vmul.f32 %v1180_v29, %v5043_v23 }
 0x648   :  { %4213 = vmatmul.msk.f32.vlgmr.msra.gmra.mxu2 %vm559_vm14, %v1017_v49 }
 0x649   :  { %4220 = vmatmul.msk.f32.gmra.mxu0 %vm559_vm14, %v1181_v11 }
 0x650   :  { %4214 = vmatmul.msk.f32.gmra.mxu2 %vm559_vm14, %v1032_v22 }
 0x6a5   :  { %v913_v37 = vpop.f32.mrf.mxu0 }
 0x6a6   :  { %1219 = vrot.lane.b32.xlu0 %v913_v37, %s4672_s25 }
 0x6ad   :  { %v764_v38 = vpop.f32.mrf.mxu2 }
 0x6b6   :  { %v916_v63 = vpop.f32.mrf.mxu0 }
 0x6bd   :  { %v767_v40 = vpop.f32.mrf.mxu2 }
 0x6be   :  { %v1211_v23 = vpop.f32.mrf.mxu0 }
 0x6bf   :  { %1235 = vrot.lane.b32.xlu0 %v1211_v23, %s4673_s26 }
 0x6c6   :  { %v1214_v8 = vpop.f32.mrf.mxu0 }
 0x6cb   :  { %v1062_v41 = vpop.f32.mrf.mxu2 }
 0x6cc   :  { %1227 = vrot.lane.b32.xlu1 %v1062_v41, %s4676_s29 }
 0x6d3   :  { %v1065_v44 = vpop.f32.mrf.mxu2 }
 0x6d4   :  { %1221 = vrot.lane.b32.xlu1 %v916_v63, %s4672_s25  ;;  %1229 = vrot.lane.b32.xlu0 %v1065_v44, %s4676_s29 }
 0x6dc   :  { %1237 = vrot.lane.b32.xlu1 %v1214_v8, %s4673_s26 }
 0x718   :  { %v1220_v43 = vpop.permute.xlu0 %1219 }
 0x719   :  { %v1241_v47 = vsel %vm559_vm14, %v764_v38, %v1220_v43 }
 0x731   :  { %v1236_v50 = vpop.permute.xlu0 %1235 }
 0x73e   :  { %v1228_v21 = vpop.permute.xlu1 %1227 }
 0x73f   :  { %v1243_v24 = vsel %vm84_vm0, %v1241_v47, %v1228_v21 }
 0x740   :  { %v1246_v27 = vsel %vm1245_vm5, %v1243_v24, %v1236_v50 }
 0x741   :  { %1263 = vrot.lane.b32.xlu0 %v1246_v27, %s4675_s28  ;;  %1257 = vrot.lane.b32.xlu2 %v1246_v27, %s4674_s27  ;;  %v1272_v16 = vrot.slane %v1246_v27, 4 }
 0x742   :  { %1251 = vrot.lane.b32.xlu1 %v1246_v27, %s4671_s24 }
 0x746   :  { %v1222_v51 = vpop.permute.xlu1 %1221  ;;  %v1230_v28 = vpop.permute.xlu0 %1229 }
 0x747   :  { %v1242_v12 = vsel %vm559_vm14, %v767_v40, %v1222_v51 }
 0x748   :  { %v1244_v5 = vsel %vm84_vm0, %v1242_v12, %v1230_v28 }
 0x74e   :  { %v1238_v31 = vpop.permute.xlu1 %1237 }
 0x74f   :  { %v1247_v53 = vsel %vm1245_vm5, %v1244_v5, %v1238_v31 }
 0x750   :  { %1265 = vrot.lane.b32.xlu1 %v1247_v53, %s4675_s28  ;;  %1259 = vrot.lane.b32.xlu0 %v1247_v53, %s4674_s27  ;;  %v1328_v47 = vrot.slane %v1247_v53, 4 }
 0x758   :  { %1253 = vrot.lane.b32.xlu0 %v1247_v53, %s4671_s24 }
 0x79b   :  { %v1258_v52 = vpop.permute.xlu2 %1257 }
 0x79c   :  { %v1269_v6 = vrot.slane %v1258_v52, 4  ;;  %v1273_v2 = vsel %vm1270_vm13, %v1258_v52, %v1272_v16 }
 0x79d   :  { %v1281_v9 = vperm.slane %v1273_v2, %v5151_v39 }
 0x79e   :  { %v1271_v42 = vsel %vm1270_vm13, %v1269_v6, %v1246_v27 }
 0x79f   :  { %v1277_v0 = vperm.slane %v1271_v42, %v5151_v39  ;;  %v1308_v55 = vrot.slane %v1281_v9, 4 }
 0x7a1   :  { %v1296_v17 = vrot.slane %v1277_v0, 4 }
 0x7b3   :  { %v1264_v46 = vpop.permute.xlu0 %1263 }
 0x7b4   :  { %v1282_v13 = vrot.slane %v1264_v46, 4  ;;  %v1252_v45 = vpop.permute.xlu1 %1251 }
 0x7b5   :  { %v1284_v32 = vrot.slane %v1252_v45, 4 }
 0x7b6   :  { %v1283_v14 = vsel %vm1270_vm13, %v1282_v13, %v1252_v45 }
 0x7b7   :  { %v1285_v35 = vsel %vm1270_vm13, %v1264_v46, %v1284_v32  ;;  %v1289_v18 = vperm.slane %v1283_v14, %v5151_v39 }
 0x7b8   :  { %v1293_v56 = vperm.slane %v1285_v35, %v5151_v39 }
 0x7b9   :  { %v1294_v19 = vrot.slane %v1289_v18, 4  ;;  %v1297_v25 = vsel %vm1270_vm13, %v1289_v18, %v1296_v17 }
 0x7ba   :  { %v1309_v26 = vsel %vm1270_vm13, %v1293_v56, %v1308_v55  ;;  %v5166_v20 = vperm.slane %v1297_v25, %v5158_v57  ;;  %v1306_v49 = vrot.slane %v1293_v56, 4 }
 0x7bb   :  { %v5169_v29 = vperm.slane %v1309_v26, %v5158_v57  ;;  %v1295_v30 = vsel %vm1270_vm13, %v1294_v19, %v1277_v0 }
 0x7bc   :  { %v1389_v11 = vsel %vm1382_vm15, %v5166_v20, 0.0  ;;  %v1307_v33 = vsel %vm1270_vm13, %v1306_v49, %v1281_v9  ;;  %v5176_v34 = vperm.slane %v1295_v30, %v5158_v57  ;;  %v1320_v50 = vrot.slane %v5166_v20, 4 }
 0x7bd   :  { %v1401_v36 = vsel %vm1382_vm15, %v5169_v29, 0.0  ;;  %1390 = vadd.xlane.f32.xlu1 %v1389_v11  ;;  %v5181_v22 = vperm.slane %v1307_v33, %v5158_v57  ;;  %v1324_v37 = vrot.slane %v5169_v29, 4 }
 0x7be   :  { %1402 = vadd.xlane.f32.xlu2 %v1401_v36  ;;  %v1318_v38 = vrot.slane %v5176_v34, 4  ;;  %v1383_v44 = vsel %vm1382_vm15, %v5176_v34, 0.0  ;;  %v5205_v31 = vsel %vm1270_vm13, 0.0, %v1320_v50 }
 0x7bf   :  { %v1395_v63 = vsel %vm1382_vm15, %v5181_v22, 0.0  ;;  %v5188_v40 = vsel %vm1270_vm13, 0.0, %v1324_v37  ;;  %v1322_v27 = vrot.slane %v5181_v22, 4  ;;  %v1392_v42 = vsel %vm1382_vm15, %v5205_v31, 0.0 }
 0x7c0   :  { %1396 = vadd.xlane.f32.xlu0 %v1395_v63  ;;  %v5193_v8 = vsel %vm1270_vm13, 0.0, %v1318_v38  ;;  %v1404_v21 = vsel %vm1382_vm15, %v5188_v40, 0.0 }
 0x7c1   :  { %v1386_v12 = vsel %vm1382_vm15, %v5193_v8, 0.0  ;;  %v5209_v4 = vsel %vm1270_vm13, 0.0, %v1322_v27 }
 0x7c2   :  { %v1260_v23 = vpop.permute.xlu0 %1259  ;;  %v1266_v24 = vpop.permute.xlu1 %1265  ;;  %v1398_v61 = vsel %vm1382_vm15, %v5209_v4, 0.0 }
 0x7c3   :  { %v1326_v41 = vrot.slane %v1260_v23, 4  ;;  %v1329_v51 = vsel %vm1270_vm13, %v1260_v23, %v1328_v47  ;;  %v1338_v5 = vrot.slane %v1266_v24, 4 }
 0x7c5   :  { %v1327_v43 = vsel %vm1270_vm13, %v1326_v41, %v1247_v53  ;;  %1384 = vadd.xlane.f32.xlu1 %v1383_v44  ;;  %v1337_v53 = vperm.slane %v1329_v51, %v5151_v39 }
 0x7c6   :  { %1405 = vadd.xlane.f32.xlu2 %v1404_v21  ;;  %v1333_v28 = vperm.slane %v1327_v43, %v5151_v39  ;;  %v4685_v21 = vmov 16.0  }
 0x7c7   :  { %v1364_v0 = vrot.slane %v1337_v53, 4  ;;  %4408 = vrcp.f32 %v4685_v21 }
 0x7c8   :  { %1387 = vadd.xlane.f32.xlu0 %v1386_v12  ;;  %v1352_v2 = vrot.slane %v1333_v28, 4 }
 0x7ca   :  { %v1254_v52 = vpop.permute.xlu0 %1253 }
 0x7cb   :  { %v1339_v54 = vsel %vm1270_vm13, %v1338_v5, %v1254_v52  ;;  %v1340_v6 = vrot.slane %v1254_v52, 4 }
 0x7cc   :  { %v1345_v16 = vperm.slane %v1339_v54, %v5151_v39 }
 0x7cd   :  { %v1341_v60 = vsel %vm1270_vm13, %v1266_v24, %v1340_v6  ;;  %1393 = vadd.xlane.f32.xlu1 %v1392_v42  ;;  %v4409_v50 = vpop.eup %4408 }
 0x7ce   :  { %v1349_v46 = vperm.slane %v1341_v60, %v5151_v39  ;;  %v1350_v9 = vrot.slane %v1345_v16, 4  ;;  %1399 = vadd.xlane.f32.xlu2 %v1398_v61  ;;  %v1353_v13 = vsel %vm1270_vm13, %v1345_v16, %v1352_v2  ;;  %v1432_v24 = vmul.f32 16.0, %v4409_v50 }
 0x7cf   :  { %v5221_v45 = vperm.slane %v1353_v13, %v5158_v57  ;;  %vm1436_vm1 = vweird.f32 %v4409_v50 }
 0x7d0   :  { %v1365_v32 = vsel %vm1270_vm13, %v1349_v46, %v1364_v0  ;;  %v1351_v14 = vsel %vm1270_vm13, %v1350_v9, %v1333_v28  ;;  %v1362_v55 = vrot.slane %v1349_v46, 4  ;;  %v1433_v27 = vsub.f32 1.0, %v1432_v24 }
 0x7d1   :  { %v1413_v17 = vsel %vm1382_vm15, %v5221_v45, 0.0  ;;  %v5228_v35 = vperm.slane %v1365_v32, %v5158_v57  ;;  %v5231_v18 = vperm.slane %v1351_v14, %v5158_v57  ;;  %v1376_v56 = vrot.slane %v5221_v45, 4 }
 0x7d2   :  { %1414 = vadd.xlane.f32.xlu0 %v1413_v17  ;;  %v1363_v33 = vsel %vm1270_vm13, %v1362_v55, %v1337_v53  ;;  %v1434_v51 = vmul.f32 %v4409_v50, %v1433_v27 }
 0x7d3   :  { %v1425_v19 = vsel %vm1382_vm15, %v5228_v35, 0.0  ;;  %v1374_v25 = vrot.slane %v5231_v18, 4  ;;  %v1380_v49 = vrot.slane %v5228_v35, 4  ;;  %v5244_v11 = vsel %vm1270_vm13, 0.0, %v1376_v56 }
 0x7d4   :  { %v1416_v36 = vsel %vm1382_vm15, %v5244_v11, 0.0  ;;  %v5253_v63 = vperm.slane %v1363_v33, %v5158_v57  ;;  %v1407_v44 = vsel %vm1382_vm15, %v5231_v18, 0.0  ;;  %v1435_v12 = vadd.f32 %v4409_v50, %v1434_v51 }
 0x7d5   :  { %1426 = vadd.xlane.f32.xlu1 %v1425_v19  ;;  %v5238_v26 = vsel %vm1270_vm13, 0.0, %v1374_v25  ;;  %v5250_v37 = vsel %vm1270_vm13, 0.0, %v1380_v49 }
 0x7d6   :  { %v1410_v30 = vsel %vm1382_vm15, %v5238_v26, 0.0  ;;  %v1428_v38 = vsel %vm1382_vm15, %v5250_v37, 0.0  ;;  %v1378_v23 = vrot.slane %v5253_v63, 4  ;;  %v1419_v41 = vsel %vm1382_vm15, %v5253_v63, 0.0 }
 0x7d7   :  { %1411 = vadd.xlane.f32.xlu2 %v1410_v30  ;;  %v5267_v28 = vsel %vm1436_vm1, %v4409_v50, %v1435_v12 }
 0x7d8   :  { %v5263_v43 = vsel %vm1270_vm13, 0.0, %v1378_v23 }
 0x7d9   :  { %v1422_v47 = vsel %vm1382_vm15, %v5263_v43, 0.0 }
 0x7da   :  { %1417 = vadd.xlane.f32.xlu0 %v1416_v36 }
 0x7dd   :  { %1429 = vadd.xlane.f32.xlu1 %v1428_v38 }
 0x7df   :  { %1420 = vadd.xlane.f32.xlu2 %v1419_v41 }
 0x7e2   :  { %1408 = vadd.xlane.f32.xlu0 %v1407_v44 }
 0x7e5   :  { %1423 = vadd.xlane.f32.xlu1 %v1422_v47 }
 0x830   :  { %v1391_v5 = vpop.xlane.xlu1 %1390 }
 0x831   :  { %v1403_v53 = vpop.xlane.xlu2 %1402  ;;  %v1440_v52 = vmul.f32 %v5267_v28, %v1391_v5 }
 0x832   :  { %v1444_v54 = vmul.f32 %v5267_v28, %v1403_v53 }
 0x833   :  { %v5272_v6 = vsub.f32 %v5166_v20, %v1440_v52  ;;  %v1397_v16 = vpop.xlane.xlu0 %1396 }
 0x834   :  { %v5275_v42 = vsub.f32 %v5169_v29, %v1444_v54  ;;  %v1442_v2 = vmul.f32 %v5267_v28, %v1397_v16 }
 0x835   :  { %v1472_v60 = vmul.f32 %v5272_v6, %v5272_v6 }
 0x836   :  { %v5281_v61 = vsub.f32 %v5181_v22, %v1442_v2  ;;  %v1476_v0 = vmul.f32 %v5275_v42, %v5275_v42 }
 0x837   :  { %v1492_v46 = vsel %vm1382_vm15, %v1472_v60, 0.0 }
 0x838   :  { %v1504_v20 = vsel %vm1382_vm15, %v1476_v0, 0.0  ;;  %1493 = vadd.xlane.f32.xlu2 %v1492_v46  ;;  %v1385_v9 = vpop.xlane.xlu1 %1384  ;;  %v1474_v29 = vmul.f32 %v5281_v61, %v5281_v61 }
 0x839   :  { %v1406_v13 = vpop.xlane.xlu2 %1405  ;;  %1505 = vadd.xlane.f32.xlu0 %v1504_v20  ;;  %v1438_v32 = vmul.f32 %v5267_v28, %v1385_v9 }
 0x83a   :  { %v1445_v14 = vmul.f32 %v5267_v28, %v1406_v13  ;;  %v1498_v22 = vsel %vm1382_vm15, %v1474_v29, 0.0 }
 0x83b   :  { %v5293_v17 = vsub.f32 %v5176_v34, %v1438_v32  ;;  %v1388_v55 = vpop.xlane.xlu0 %1387  ;;  %1499 = vadd.xlane.f32.xlu1 %v1498_v22 }
 0x83c   :  { %v5296_v56 = vsub.f32 %v5188_v40, %v1445_v14  ;;  %v1439_v19 = vmul.f32 %v5267_v28, %v1388_v55 }
 0x83d   :  { %v1470_v25 = vmul.f32 %v5293_v17, %v5293_v17 }
 0x83e   :  { %v5302_v49 = vsub.f32 %v5193_v8, %v1439_v19  ;;  %v1477_v30 = vmul.f32 %v5296_v56, %v5296_v56 }
 0x83f   :  { %v1486_v33 = vsel %vm1382_vm15, %v1470_v25, 0.0 }
 0x840   :  { %v1507_v34 = vsel %vm1382_vm15, %v1477_v30, 0.0  ;;  %1487 = vadd.xlane.f32.xlu2 %v1486_v33  ;;  %v1394_v36 = vpop.xlane.xlu1 %1393  ;;  %v1471_v40 = vmul.f32 %v5302_v49, %v5302_v49 }
 0x841   :  { %v1400_v38 = vpop.xlane.xlu2 %1399  ;;  %1508 = vadd.xlane.f32.xlu0 %v1507_v34  ;;  %v1441_v23 = vmul.f32 %v5267_v28, %v1394_v36 }
 0x842   :  { %v1443_v41 = vmul.f32 %v5267_v28, %v1400_v38  ;;  %v1489_v8 = vsel %vm1382_vm15, %v1471_v40, 0.0 }
 0x843   :  { %v5314_v44 = vsub.f32 %v5205_v31, %v1441_v23  ;;  %1490 = vadd.xlane.f32.xlu1 %v1489_v8 }
 0x844   :  { %v5317_v47 = vsub.f32 %v5209_v4, %v1443_v41 }
 0x845   :  { %v1415_v21 = vpop.xlane.xlu0 %1414  ;;  %v1473_v50 = vmul.f32 %v5314_v44, %v5314_v44 }
 0x846   :  { %v1448_v24 = vmul.f32 %v5267_v28, %v1415_v21  ;;  %v1475_v27 = vmul.f32 %v5317_v47, %v5317_v47 }
 0x847   :  { %v1495_v51 = vsel %vm1382_vm15, %v1473_v50, 0.0  ;;  %v4221_v50 = vmul.f32 -1.442695, %v4808_v59 }
 0x848   :  { %v5326_v12 = vsub.f32 %v5221_v45, %v1448_v24  ;;  %v1501_v31 = vsel %vm1382_vm15, %v1475_v27, 0.0  ;;  %1496 = vadd.xlane.f32.xlu2 %v1495_v51  ;;  %v1427_v5 = vpop.xlane.xlu1 %1426  ;;  %v4222_v51 = vmul.f32 -1.442695, %v4821_v7 }
 0x849   :  { %1502 = vadd.xlane.f32.xlu0 %v1501_v31  ;;  %v1452_v4 = vmul.f32 %v5267_v28, %v1427_v5  ;;  %4410 = vpow2.f32 %v4221_v50 }
 0x84a   :  { %v1412_v53 = vpop.xlane.xlu2 %1411  ;;  %v1480_v52 = vmul.f32 %v5326_v12, %v5326_v12 }
 0x84b   :  { %v5333_v54 = vsub.f32 %v5228_v35, %v1452_v4  ;;  %v1447_v16 = vmul.f32 %v5267_v28, %v1412_v53 }
 0x84c   :  { %v1516_v2 = vsel %vm1382_vm15, %v1480_v52, 0.0 }
 0x84d   :  { %v5338_v45 = vsub.f32 %v5238_v26, %v1447_v16  ;;  %1517 = vadd.xlane.f32.xlu1 %v1516_v2  ;;  %v1418_v60 = vpop.xlane.xlu0 %1417  ;;  %v1484_v0 = vmul.f32 %v5333_v54, %v5333_v54 }
 0x84e   :  { %v1449_v46 = vmul.f32 %v5267_v28, %v1418_v60 }
 0x84f   :  { %v1528_v20 = vsel %vm1382_vm15, %v1484_v0, 0.0  ;;  %v1479_v35 = vmul.f32 %v5338_v45, %v5338_v45  ;;  %v4411_v24 = vpop.eup %4410 }
 0x850   :  { %v5347_v9 = vsub.f32 %v5244_v11, %v1449_v46  ;;  %1529 = vadd.xlane.f32.xlu2 %v1528_v20  ;;  %v1430_v29 = vpop.xlane.xlu1 %1429  ;;  %v5382_v27 = vadd.f32 1.0, %v4411_v24 }
 0x851   :  { %v1453_v26 = vmul.f32 %v5267_v28, %v1430_v29  ;;  %v1513_v13 = vsel %vm1382_vm15, %v1479_v35, 0.0 }
 0x852   :  { %1514 = vadd.xlane.f32.xlu0 %v1513_v13  ;;  %v1421_v32 = vpop.xlane.xlu2 %1420  ;;  %v1481_v14 = vmul.f32 %v5347_v9, %v5347_v9  ;;  %4412 = vrcp.f32 %v5382_v27 }
 0x853   :  { %v5354_v22 = vsub.f32 %v5250_v37, %v1453_v26  ;;  %v1450_v55 = vmul.f32 %v5267_v28, %v1421_v32  ;;  %4414 = vpow2.f32 %v4222_v51 }
 0x854   :  { %v1519_v19 = vsel %vm1382_vm15, %v1481_v14, 0.0 }
 0x855   :  { %v5359_v11 = vsub.f32 %v5253_v63, %v1450_v55  ;;  %1520 = vadd.xlane.f32.xlu1 %v1519_v19  ;;  %v1409_v25 = vpop.xlane.xlu0 %1408  ;;  %v1485_v30 = vmul.f32 %v5354_v22, %v5354_v22 }
 0x856   :  { %v1446_v33 = vmul.f32 %v5267_v28, %v1409_v25 }
 0x857   :  { %v1531_v34 = vsel %vm1382_vm15, %v1485_v30, 0.0  ;;  %v1482_v37 = vmul.f32 %v5359_v11, %v5359_v11 }
 0x858   :  { %v5368_v36 = vsub.f32 %v5231_v18, %v1446_v33  ;;  %1532 = vadd.xlane.f32.xlu2 %v1531_v34  ;;  %v1424_v40 = vpop.xlane.xlu1 %1423  ;;  %v5394_v0 = vpop.eup %4412 }
 0x859   :  { %v1451_v63 = vmul.f32 %v5267_v28, %v1424_v40  ;;  %v1522_v38 = vsel %vm1382_vm15, %v1482_v37, 0.0  ;;  %v4415_v29 = vpop.eup %4414  ;;  %v1902_v13 = vmul.f32 %v5394_v0, %v5382_v27  ;;  %vm1907_vm12 = vweird.f32 %v5394_v0 }
 0x85a   :  { %1523 = vadd.xlane.f32.xlu0 %v1522_v38  ;;  %v1478_v23 = vmul.f32 %v5368_v36, %v5368_v36 }
 0x85b   :  { %v5375_v41 = vsub.f32 %v5263_v43, %v1451_v63  ;;  %v1903_v38 = vsub.f32 1.0, %v1902_v13 }
 0x85c   :  { %v1510_v8 = vsel %vm1382_vm15, %v1478_v23, 0.0  ;;  %v5417_v23 = vadd.f32 1.0, %v4415_v29 }
 0x85d   :  { %1511 = vadd.xlane.f32.xlu1 %v1510_v8  ;;  %v1483_v18 = vmul.f32 %v5375_v41, %v5375_v41 }
 0x85f   :  { %v1525_v21 = vsel %vm1382_vm15, %v1483_v18, 0.0 }
 0x860   :  { %1526 = vadd.xlane.f32.xlu2 %v1525_v21 }
 0x8ab   :  { %v1494_v31 = vpop.xlane.xlu2 %1493 }
 0x8ac   :  { %v1506_v43 = vpop.xlane.xlu0 %1505  ;;  %v1536_v5 = vmul.f32 %v1494_v31, %v5267_v28 }
 0x8ad   :  { %v1540_v4 = vmul.f32 %v1506_v43, %v5267_v28 }
 0x8ae   :  { %v5388_v53 = vadd.f32 1e-05, %v1536_v5  ;;  %v1500_v52 = vpop.xlane.xlu1 %1499 }
 0x8af   :  { %v1556_v16 = vadd.f32 1e-05, %v1540_v4  ;;  %v1538_v2 = vmul.f32 %v1500_v52, %v5267_v28  ;;  %v1904_v4 = vmul.f32 %v5394_v0, %v1903_v38  ;;  %v1910_v52 = vand.u32 2147483647, %v5382_v27 }
 0x8b0   :  { %4416 = vrsqrt.f32 %v5388_v53  ;;  %vm1592_vm1 = vweird.f32 %v5388_v53 }
 0x8b1   :  { %4418 = vrsqrt.f32 %v1556_v16  ;;  %v5392_v60 = vadd.f32 1e-05, %v1538_v2  ;;  %vm1632_vm10 = vweird.f32 %v1556_v16 }
 0x8b3   :  { %4420 = vrsqrt.f32 %v5392_v60  ;;  %v1488_v46 = vpop.xlane.xlu2 %1487  ;;  %vm1612_vm15 = vweird.f32 %v5392_v60 }
 0x8b4   :  { %v1509_v20 = vpop.xlane.xlu0 %1508  ;;  %v1534_v35 = vmul.f32 %v1488_v46, %v5267_v28 }
 0x8b5   :  { %v1541_v26 = vmul.f32 %v1509_v20, %v5267_v28 }
 0x8b6   :  { %v5401_v32 = vpop.eup %4416  ;;  %v5403_v14 = vadd.f32 1e-05, %v1534_v35  ;;  %v1491_v55 = vpop.xlane.xlu1 %1490 }
 0x8b7   :  { %v4419_v19 = vpop.eup %4418  ;;  %v1587_v25 = vmul.f32 %v5401_v32, %v5388_v53  ;;  %v5407_v30 = vadd.f32 1e-05, %v1541_v26  ;;  %v1535_v33 = vmul.f32 %v1491_v55, %v5267_v28  ;;  %vm1593_vm4 = vweird.f32 %v5401_v32 }
 0x8b8   :  { %v1627_v34 = vmul.f32 %v4419_v19, %v1556_v16  ;;  %4422 = vrsqrt.f32 %v5403_v14  ;;  %vm1633_vm11 = vweird.f32 %v4419_v19  ;;  %v5445_v16 = vadd.f32 %v5394_v0, %v1904_v4 }
 0x8b9   :  { %v5411_v37 = vpop.eup %4420  ;;  %v1588_v40 = vmul.f32 %v5401_v32, %v1587_v25  ;;  %4424 = vrsqrt.f32 %v5407_v30  ;;  %v5415_v63 = vadd.f32 1e-05, %v1535_v33  ;;  %vm1634_vm2 = vmor %vm1632_vm10, %vm1633_vm11  ;;  %vm1572_vm10 = vweird.f32 %v5403_v14 }
 0x8ba   :  { %v1628_v8 = vmul.f32 %v4419_v19, %v1627_v34  ;;  %v1607_v18 = vmul.f32 %v5411_v37, %v5392_v60  ;;  %vm1613_vm3 = vweird.f32 %v5411_v37 }
 0x8bb   :  { %v1589_v21 = vmul.f32 0.5, %v1588_v40  ;;  %4426 = vrsqrt.f32 %v5415_v63  ;;  %v1497_v50 = vpop.xlane.xlu2 %1496  ;;  %vm5461_vm11 = vmor %vm1612_vm15, %vm1613_vm3 }
 0x8bc   :  { %v1629_v24 = vmul.f32 0.5, %v1628_v8  ;;  %v1608_v51 = vmul.f32 %v5411_v37, %v1607_v18  ;;  %v1503_v31 = vpop.xlane.xlu0 %1502  ;;  %v1537_v43 = vmul.f32 %v1497_v50, %v5267_v28  ;;  %4428 = vrcp.f32 %v5417_v23 }
 0x8bd   :  { %v1539_v5 = vmul.f32 %v1503_v31, %v5267_v28  ;;  %v1590_v29 = vsub.f32 1.5, %v1589_v21  ;;  %v1912_v18 = vand.u32 2147483648, %v5382_v27 }
 0x8be   :  { %v5427_v2 = vpop.eup %4422  ;;  %v1630_v46 = vsub.f32 1.5, %v1629_v24  ;;  %v1609_v20 = vmul.f32 0.5, %v1608_v51  ;;  %v5438_v34 = vadd.f32 1e-05, %v1537_v43 }
 0x8bf   :  { %v5430_v35 = vpop.eup %4424  ;;  %v1567_v26 = vmul.f32 %v5427_v2, %v5403_v14  ;;  %v5434_v13 = vadd.f32 1e-05, %v1539_v5  ;;  %vm1573_vm3 = vweird.f32 %v5427_v2 }
 0x8c0   :  { %v1631_v55 = vmul.f32 %v4419_v19, %v1630_v46  ;;  %v1610_v25 = vsub.f32 1.5, %v1609_v20  ;;  %v1637_v33 = vmul.f32 %v5430_v35, %v5407_v30  ;;  %v1518_v40 = vpop.xlane.xlu1 %1517  ;;  %vm1643_vm15 = vweird.f32 %v5430_v35 }
 0x8c1   :  { %v5440_v38 = vpop.eup %4426  ;;  %v1568_v8 = vmul.f32 %v5427_v2, %v1567_v26  ;;  %4430 = vrsqrt.f32 %v5434_v13 }
 0x8c2   :  { %v1635_v21 = vsel %vm1634_vm2, %v4419_v19, %v1631_v55  ;;  %v1611_v50 = vmul.f32 %v5411_v37, %v1610_v25  ;;  %v1638_v24 = vmul.f32 %v5430_v35, %v1637_v33  ;;  %v1577_v31 = vmul.f32 %v5440_v38, %v5415_v63  ;;  %v5455_v5 = vpop.eup %4428  ;;  %vm5476_vm2 = vmor %vm1592_vm1, %vm1593_vm4 }
 0x8c3   :  { %v1569_v51 = vmul.f32 0.5, %v1568_v8  ;;  %v1530_v43 = vpop.xlane.xlu2 %1529  ;;  %v1732_v4 = vmul.f32 %v1635_v21, %v5275_v42  ;;  %v1591_v19 = vmul.f32 %v5401_v32, %v1590_v29  ;;  %4432 = vrsqrt.f32 %v5438_v34  ;;  %vm5500_vm1 = vmor %vm1572_vm10, %vm1573_vm3 }
 0x8c4   :  { %v1639_v46 = vmul.f32 0.5, %v1638_v24  ;;  %v1578_v26 = vmul.f32 %v5440_v38, %v1577_v31  ;;  %v1615_v42 = vsel %vm5461_vm11, %v5411_v37, %v1611_v50  ;;  %v1544_v25 = vmul.f32 %v1518_v40, %v5267_v28 }
 0x8c5   :  { %v1570_v60 = vsub.f32 1.5, %v1569_v51  ;;  %v1515_v55 = vpop.xlane.xlu0 %1514  ;;  %v1548_v33 = vmul.f32 %v1530_v43, %v5267_v28  ;;  %v1754_v50 = vrot.slane %v1732_v4, 4  ;;  %v1595_v40 = vsel %vm5476_vm2, %v5401_v32, %v1591_v19 }
 0x8c6   :  { %v1640_v29 = vsub.f32 1.5, %v1639_v46  ;;  %v1579_v24 = vmul.f32 0.5, %v1578_v26  ;;  %v1543_v37 = vmul.f32 %v1515_v55, %v5267_v28  ;;  %v1730_v43 = vmul.f32 %v1615_v42, %v5281_v61 }
 0x8c7   :  { %v5472_v53 = vpop.eup %4430  ;;  %v1571_v21 = vmul.f32 %v5427_v2, %v1570_v60  ;;  %v5491_v20 = vadd.f32 1e-05, %v1544_v25  ;;  %v5493_v60 = vadd.f32 1e-05, %v1548_v33  ;;  %vm1642_vm4 = vweird.f32 %v5407_v30 }
 0x8c8   :  { %v1617_v51 = vmul.f32 %v5472_v53, %v5434_v13  ;;  %v1521_v31 = vpop.xlane.xlu1 %1520  ;;  %v1641_v46 = vmul.f32 %v5430_v35, %v1640_v29  ;;  %vm1582_vm11 = vweird.f32 %v5415_v63  ;;  %v5506_v4 = vadd.f32 1e-05, %v1543_v37  ;;  %vm5517_vm10 = vmor %vm1642_vm4, %vm1643_vm15 }
 0x8c9   :  { %v5495_v26 = vpop.eup %4432  ;;  %v1575_v19 = vsel %vm5500_vm1, %v5427_v2, %v1571_v21  ;;  %v1580_v55 = vsub.f32 1.5, %v1579_v24  ;;  %vm1622_vm2 = vweird.f32 %v5434_v13  ;;  %v1728_v30 = vmul.f32 %v1595_v40, %v5272_v6 }
 0x8ca   :  { %v1618_v61 = vmul.f32 %v5472_v53, %v1617_v51  ;;  %v1597_v14 = vmul.f32 %v5495_v26, %v5438_v34  ;;  %vm1583_vm3 = vweird.f32 %v5440_v38  ;;  %4434 = vrsqrt.f32 %v5491_v20 }
 0x8cb   :  { %v1533_v2 = vpop.xlane.xlu2 %1532  ;;  %v1755_v25 = vsel %vm1270_vm13, %v1754_v50, %v1730_v43  ;;  %v1645_v33 = vsel %vm5517_vm10, %v5430_v35, %v1641_v46  ;;  %4436 = vrsqrt.f32 %v5493_v60  ;;  %v1726_v21 = vmul.f32 %v1575_v19, %v5293_v17 }
 0x8cc   :  { %v1619_v29 = vmul.f32 0.5, %v1618_v61  ;;  %v1598_v6 = vmul.f32 %v5495_v26, %v1597_v14  ;;  %vm1623_vm15 = vweird.f32 %v5472_v53  ;;  %4438 = vrsqrt.f32 %v5506_v4 }
 0x8cd   :  { %v1524_v8 = vpop.xlane.xlu0 %1523  ;;  %v1581_v37 = vmul.f32 %v5440_v38, %v1580_v55  ;;  %v1545_v50 = vmul.f32 %v1521_v31, %v5267_v28  ;;  %v1549_v51 = vmul.f32 %v1533_v2, %v5267_v28  ;;  %v1742_v35 = vrot.slane %v1728_v30, 4  ;;  %vm5540_vm4 = vmor %vm1622_vm2, %vm1623_vm15 }
 0x8ce   :  { %v1620_v24 = vsub.f32 1.5, %v1619_v29  ;;  %v1599_v40 = vmul.f32 0.5, %v1598_v6  ;;  %v1733_v43 = vmul.f32 %v1645_v33, %v5296_v56  ;;  %v1546_v32 = vmul.f32 %v1524_v8, %v5267_v28  ;;  %vm5558_vm2 = vmor %vm1582_vm11, %vm1583_vm3 }
 0x8cf   :  { %vm1602_vm1 = vweird.f32 %v5438_v34  ;;  %vm1603_vm10 = vweird.f32 %v5495_v26  ;;  %v5546_v31 = vadd.f32 1e-05, %v1545_v50  ;;  %v5551_v56 = vperm.slane %v1755_v25, %v5151_v39 }
 0x8d0   :  { %v1621_v46 = vmul.f32 %v5472_v53, %v1620_v24  ;;  %v1600_v61 = vsub.f32 1.5, %v1599_v40  ;;  %v1512_v19 = vpop.xlane.xlu1 %1511  ;;  %v5548_v55 = vpop.eup %4434  ;;  %v1743_v14 = vsel %vm1270_vm13, %v1742_v35, %v1726_v21  ;;  %v5565_v42 = vadd.f32 1e-05, %v1549_v51  ;;  %vm1604_vm11 = vmor %vm1602_vm1, %vm1603_vm10 }
 0x8d1   :  { %v5567_v29 = vpop.eup %4436  ;;  %v1585_v2 = vsel %vm5558_vm2, %v5440_v38, %v1581_v37  ;;  %v1667_v63 = vmul.f32 %v5548_v55, %v5491_v20  ;;  %v5575_v33 = vadd.f32 1e-05, %v1546_v32  ;;  %v1760_v8 = vrot.slane %v1733_v43, 4 }
 0x8d2   :  { %v1625_v30 = vsel %vm5540_vm4, %v5472_v53, %v1621_v46  ;;  %v1601_v25 = vmul.f32 %v5495_v26, %v1600_v61  ;;  %v5577_v6 = vpop.eup %4438  ;;  %vm1672_vm3 = vweird.f32 %v5491_v20  ;;  %v1707_v38 = vmul.f32 %v5567_v29, %v5493_v60 }
 0x8d3   :  { %4440 = vrsqrt.f32 %v5546_v31  ;;  %v1542_v53 = vmul.f32 %v1512_v19, %v5267_v28  ;;  %v1731_v21 = vmul.f32 %v1625_v30, %v5317_v47  ;;  %v1668_v37 = vmul.f32 %v5548_v55, %v1667_v63 }
 0x8d4   :  { %v1605_v24 = vsel %vm1604_vm11, %v5495_v26, %v1601_v25  ;;  %v1657_v40 = vmul.f32 %v5577_v6, %v5506_v4  ;;  %v1727_v34 = vmul.f32 %v1585_v2, %v5302_v49  ;;  %v1708_v51 = vmul.f32 %v5567_v29, %v1707_v38  ;;  %v1527_v26 = vpop.xlane.xlu2 %1526 }
 0x8d5   :  { %v1729_v50 = vmul.f32 %v1605_v24, %v5314_v44  ;;  %4442 = vrsqrt.f32 %v5565_v42  ;;  %v1669_v35 = vmul.f32 0.5, %v1668_v37  ;;  %vm1712_vm15 = vweird.f32 %v5493_v60 }
 0x8d6   :  { %v1658_v47 = vmul.f32 %v5577_v6, %v1657_v40  ;;  %4444 = vrsqrt.f32 %v5575_v33  ;;  %v1709_v46 = vmul.f32 0.5, %v1708_v51  ;;  %v5600_v32 = vadd.f32 1e-05, %v1542_v53 }
 0x8d7   :  { %v1748_v43 = vrot.slane %v1729_v50, 4  ;;  %v5603_v49 = vperm.slane %v1743_v14, %v5151_v39  ;;  %v1761_v44 = vsel %vm1270_vm13, %v1760_v8, %v1731_v21  ;;  %v1670_v17 = vsub.f32 1.5, %v1669_v35 }
 0x8d8   :  { %v1659_v61 = vmul.f32 0.5, %v1658_v47  ;;  %vm1662_vm4 = vweird.f32 %v5506_v4  ;;  %vm1673_vm1 = vweird.f32 %v5548_v55  ;;  %v1710_v13 = vsub.f32 1.5, %v1709_v46 }
 0x8d9   :  { %v4441_v19 = vpop.eup %4440  ;;  %4446 = vrsqrt.f32 %v5600_v32  ;;  %v1547_v30 = vmul.f32 %v1527_v26, %v5267_v28  ;;  %v1671_v2 = vmul.f32 %v5548_v55, %v1670_v17  ;;  %v1780_v63 = vrot.slane %v5551_v56, 4  ;;  %vm5623_vm2 = vmor %vm1672_vm3, %vm1673_vm1 }
 0x8da   :  { %v1660_v25 = vsub.f32 1.5, %v1659_v61  ;;  %v1677_v14 = vmul.f32 %v4441_v19, %v5546_v31  ;;  %vm1713_vm10 = vweird.f32 %v5567_v29  ;;  %v1749_v38 = vsel %vm1270_vm13, %v1748_v43, %v1727_v34 }
 0x8db   :  { %v5613_v8 = vpop.eup %4442  ;;  %v1765_v53 = vperm.slane %v1761_v44, %v5151_v39  ;;  %v1768_v21 = vrot.slane %v5603_v49, 4  ;;  %v1711_v37 = vmul.f32 %v5567_v29, %v1710_v13  ;;  %vm1663_vm11 = vweird.f32 %v5577_v6  ;;  %vm5648_vm1 = vmor %vm1712_vm15, %vm1713_vm10 }
 0x8dc   :  { %v5619_v24 = vpop.eup %4444  ;;  %v1678_v40 = vmul.f32 %v4441_v19, %v1677_v14  ;;  %v1717_v34 = vmul.f32 %v5613_v8, %v5565_v42  ;;  %v1675_v50 = vsel %vm5623_vm2, %v5548_v55, %v1671_v2  ;;  %v1661_v51 = vmul.f32 %v5577_v6, %v1660_v25  ;;  %vm5663_vm15 = vmor %vm1662_vm4, %vm1663_vm11 }
 0x8dd   :  { %v1687_v20 = vmul.f32 %v5619_v24, %v5575_v33  ;;  %v5637_v35 = vadd.f32 1e-05, %v1547_v30  ;;  %vm1682_vm3 = vweird.f32 %v5546_v31  ;;  %v1753_v43 = vperm.slane %v1749_v38, %v5151_v39 }
 0x8de   :  { %v1679_v47 = vmul.f32 0.5, %v1678_v40  ;;  %v1718_v26 = vmul.f32 %v5613_v8, %v1717_v34  ;;  %vm1683_vm2 = vweird.f32 %v4441_v19  ;;  %vm1692_vm8 = vweird.f32 %v5575_v33 }
 0x8df   :  { %v5642_v46 = vpop.eup %4446  ;;  %v1688_v44 = vmul.f32 %v5619_v24, %v1687_v20  ;;  %v1781_v17 = vsel %vm1270_vm13, %v1765_v53, %v1780_v63  ;;  %v5657_v61 = vmul.f32 %v1675_v50, %v5326_v12  ;;  %vm1652_vm10 = vweird.f32 %v5600_v32 }
 0x8e0   :  { %v1680_v13 = vsub.f32 1.5, %v1679_v47  ;;  %v1719_v30 = vmul.f32 0.5, %v1718_v26  ;;  %v1647_v2 = vmul.f32 %v5642_v46, %v5600_v32  ;;  %v1715_v12 = vsel %vm5648_vm1, %v5567_v29, %v1711_v37  ;;  %vm1684_vm1 = vmor %vm1682_vm3, %vm1683_vm2 }
 0x8e1   :  { %v1665_v25 = vsel %vm5663_vm15, %v5577_v6, %v1661_v51  ;;  %v1689_v4 = vmul.f32 0.5, %v1688_v44  ;;  %4448 = vrsqrt.f32 %v5637_v35  ;;  %vm1906_vm4 = vweird.f32 %v5382_v27 }
 0x8e2   :  { %v1681_v14 = vmul.f32 %v4441_v19, %v1680_v13  ;;  %vm1722_vm11 = vweird.f32 %v5565_v42  ;;  %vm1693_vm9 = vweird.f32 %v5619_v24  ;;  %v1648_v63 = vmul.f32 %v5642_v46, %v1647_v2 }
 0x8e3   :  { %v1769_v38 = vsel %vm1270_vm13, %v1753_v43, %v1768_v21  ;;  %v1690_v29 = vsub.f32 1.5, %v1689_v4  ;;  %v1789_v28 = vperm.slane %v1781_v17, %v5158_v57  ;;  %v1766_v37 = vrot.slane %v1753_v43, 4  ;;  %vm5693_vm3 = vmor %vm1692_vm8, %vm1693_vm9 }
 0x8e4   :  { %v1777_v6 = vperm.slane %v1769_v38, %v5158_v57  ;;  %v1685_v40 = vsel %vm1684_vm1, %v4441_v19, %v1681_v14  ;;  %v1720_v34 = vsub.f32 1.5, %v1719_v30  ;;  %v1649_v50 = vmul.f32 0.5, %v1648_v63  ;;  %vm5726_vm9 = vmor %vm1906_vm4, %vm1907_vm12 }
 0x8e5   :  { %v1778_v51 = vrot.slane %v1765_v53, 4  ;;  %v1737_v20 = vmul.f32 %v1685_v40, %v5347_v9  ;;  %v1691_v47 = vmul.f32 %v5619_v24, %v1690_v29  ;;  %v1794_v26 = vrot.slane %v1789_v28, 4 }
 0x8e6   :  { %v1796_v21 = vrot.slane %v1777_v6, 4  ;;  %v1650_v55 = vsub.f32 1.5, %v1649_v50  ;;  %vm1653_vm2 = vweird.f32 %v5642_v46  ;;  %v1767_v19 = vsel %vm1270_vm13, %v1766_v37, %v5603_v49 }
 0x8e7   :  { %v1779_v9 = vsel %vm1270_vm13, %v1778_v51, %v5551_v56  ;;  %v4449_v53 = vpop.eup %4448  ;;  %v1804_v43 = vrot.slane %v1737_v20, 4  ;;  %vm1723_vm15 = vweird.f32 %v5613_v8  ;;  %v1695_v33 = vsel %vm5693_vm3, %v5619_v24, %v1691_v47  ;;  %vm1654_vm8 = vmor %vm1652_vm10, %vm1653_vm2 }
 0x8e8   :  { %v1795_v44 = vsel %vm1270_vm13, %v1794_v26, %v1777_v6  ;;  %v1740_v17 = vmul.f32 %v1715_v12, %v5333_v54  ;;  %v1721_v60 = vmul.f32 %v5613_v8, %v1720_v34  ;;  %v1651_v13 = vmul.f32 %v5642_v46, %v1650_v55  ;;  %vm5734_vm10 = vmor %vm1722_vm11, %vm1723_vm15 }
 0x8e9   :  { %v1697_v49 = vmul.f32 %v4449_v53, %v5637_v35  ;;  %1864 = vrot.lane.b32.xlu1 %v1795_v44, %s4676_s29  ;;  %v1735_v56 = vmul.f32 %v1665_v25, %v5338_v45  ;;  %v1797_v30 = vsel %vm1270_vm13, %v1789_v28, %v1796_v21  ;;  %v1773_v24 = vperm.slane %v1767_v19, %v5158_v57 }
 0x8ea   :  { %v1785_v2 = vperm.slane %v1779_v9, %v5158_v57  ;;  %v1798_v54 = vrot.slane %v5657_v61, 4  ;;  %v1738_v12 = vmul.f32 %v1695_v33, %v5359_v11  ;;  %v1655_v4 = vsel %vm1654_vm8, %v5642_v46, %v1651_v13  ;;  %1872 = vrot.lane.b32.xlu2 %v1797_v30, %s4673_s26 }
 0x8eb   :  { %v1698_v14 = vmul.f32 %v4449_v53, %v1697_v49  ;;  %v1734_v11 = vmul.f32 %v1655_v4, %v5368_v36  ;;  %v1792_v61 = vrot.slane %v1773_v24, 4  ;;  %v1805_v25 = vsel %vm1270_vm13, %v1804_v43, %v1735_v56 }
 0x8ec   :  { %v1790_v46 = vrot.slane %v1785_v2, 4  ;;  %v1725_v63 = vsel %vm5734_vm10, %v5613_v8, %v1721_v60  ;;  %v1909_v42 = vsel %vm5726_vm9, %v5394_v0, %v5445_v16  ;;  %v1917_v29 = vmul.f32 %v5455_v5, %v5417_v23 }
 0x8ed   :  { %v1699_v38 = vmul.f32 0.5, %v1698_v14  ;;  %v1810_v6 = vrot.slane %v1740_v17, 4  ;;  %v1799_v36 = vsel %vm1270_vm13, %v1798_v54, %v1734_v11  ;;  %v1793_v28 = vsel %vm1270_vm13, %v1785_v2, %v1792_v61 }
 0x8ee   :  { %v5752_v37 = vsel %vm1270_vm13, %v1790_v46, %v1773_v24  ;;  %v1803_v40 = vperm.slane %v1799_v36, %v5151_v39  ;;  %vm1703_vm12 = vweird.f32 %v4449_v53  ;;  %1856 = vrot.lane.b32.xlu0 %v1793_v28, %s4672_s25  ;;  %v1809_v34 = vperm.slane %v1805_v25, %v5151_v39  ;;  %v1943_v36 = vld [vmem:[#allocation3 + $0x110] sm:$0xff] }
 0x8ef   :  { %v1700_v8 = vsub.f32 1.5, %v1699_v38  ;;  %v1741_v0 = vmul.f32 %v1725_v63, %v5354_v22  ;;  %v1811_v16 = vsel %vm1270_vm13, %v1810_v6, %v1738_v12  ;;  %v1913_v50 = vor.u32 1.1754944e-38, %v1912_v18  ;;  %v1949_v63 = vld [vmem:[#allocation3 + $0x140] sm:$0xff]  ;;  %v1948_v38 = vld [vmem:[#allocation3 + $0x138] sm:$0xff] }
 0x8f0   :  { %vm1702_vm4 = vweird.f32 %v5637_v35  ;;  %vm1911_vm11 = vcmp.eq.f32.partialorder %v1910_v52, 8.507059e+37  ;;  %v1824_v20 = vrot.slane %v1803_v40, 4  ;;  %v1918_v26 = vsub.f32 1.0, %v1917_v29  ;;  %v1946_v29 = vld [vmem:[#allocation3 + $0x128] sm:$0xff]  ;;  %v1945_v6 = vld [vmem:[#allocation3 + $0x120] sm:$0xff] }
 0x8f1   :  { %v1701_v51 = vmul.f32 %v4449_v53, %v1700_v8  ;;  %vm1704_vm1 = vmor %vm1702_vm4, %vm1703_vm12  ;;  %v1914_v47 = vsel %vm1911_vm11, %v1913_v50, %v1909_v42  ;;  %v1815_v31 = vperm.slane %v1811_v16, %v5151_v39  ;;  %v1822_v55 = vrot.slane %v1809_v34, 4  ;;  %v1947_v42 = vld [vmem:[#allocation3 + $0x130] sm:$0xff] }
 0x8f2   :  { %v1825_v22 = vsel %vm1270_vm13, %v1809_v34, %v1824_v20  ;;  %v1816_v19 = vrot.slane %v1741_v0, 4  ;;  %v1931_v35 = vmul.f32 %v1914_v47, %v4808_v59  ;;  %v1919_v33 = vmul.f32 %v5455_v5, %v1918_v26 }
 0x8f3   :  { %v1705_v21 = vsel %vm1704_vm1, %v4449_v53, %v1701_v51  ;;  %v1833_v18 = vperm.slane %v1825_v22, %v5158_v57  ;;  %v1823_v27 = vsel %vm1270_vm13, %v1822_v55, %v1803_v40  ;;  %v1836_v43 = vrot.slane %v1815_v31, 4  ;;  %v4313_v40 = vld [vmem:[#allocation3 + $0x108] ss:$0 sm:$0xff] }
 0x8f4   :  { %v1739_v9 = vmul.f32 %v1705_v21, %v5375_v41  ;;  %v1829_v17 = vperm.slane %v1823_v27, %v5158_v57  ;;  %v1920_v49 = vadd.f32 %v5455_v5, %v1919_v33  ;;  %vm1922_vm3 = vweird.f32 %v5455_v5 }
 0x8f5   :  { %v1852_v44 = vrot.slane %v1833_v18, 4  ;;  %v1927_v56 = vand.u32 2147483648, %v5417_v23  ;;  %vm1921_vm2 = vweird.f32 %v5417_v23  ;;  %v1925_v12 = vand.u32 2147483647, %v5417_v23  ;;  %v1950_v23 = vld [vmem:[#allocation3 + $0x148] sm:$0xff] }
 0x8f6   :  { %v1817_v52 = vsel %vm1270_vm13, %v1816_v19, %v1739_v9  ;;  %1935 = vrot.lane.b32.xlu0 %v1931_v35, %s4670_s23  ;;  %v1848_v54 = vrot.slane %v1829_v17, 4  ;;  %vm1923_vm15 = vmor %vm1921_vm2, %vm1922_vm3  ;;  %1965 = vmatpush.msrb.mxu1 %v1950_v23  ;;  %v1889_v51 = vmul.f32 %v4313_v40, %v4851_v3  ;;  %v1890_v35 = vmul.f32 %v4313_v40, %v4857_v10  ;;  %v4314_v40 = vld [vmem:[#allocation3 + $0x150] ss:$0 sm:$0xff] }
 0x8f7   :  { %v1821_v53 = vperm.slane %v1817_v52, %v5151_v39  ;;  %v1924_v32 = vsel %vm1923_vm15, %v5455_v5, %v1920_v49  ;;  %v1928_v11 = vor.u32 1.1754944e-38, %v1927_v56  ;;  %vm1926_vm8 = vcmp.eq.f32.partialorder %v1925_v12, 8.507059e+37  ;;  %v1944_v5 = vld [vmem:[#allocation3 + $0x118] sm:$0xff] }
 0x8f8   :  { %1966 = vmatpush.msrb.mxu1 %v1949_v63  ;;  %v2124_v63 = vld [vmem:[#allocation3 + $0x180] sm:$0xff]  ;;  %vm6704_vm1 = vcmp.lt.s32.totalorder %v4813_v62, 4  ;;  %vm6705_vm3 = vcmp.lt.s32.totalorder %v4813_v62, 2  ;;  %vm6706_vm2 = vcmp.ge.s32.totalorder %v4813_v62, 6 }
 0x8f9   :  { %v1837_v41 = vsel %vm1270_vm13, %v1821_v53, %v1836_v43  ;;  %v1834_v60 = vrot.slane %v1821_v53, 4  ;;  %v1929_v61 = vsel %vm1926_vm8, %v1928_v11, %v1924_v32  ;;  %v2126_v32 = vld [vmem:[#allocation3 + $0x190] sm:$0xff]  ;;  %v5822_v11 = vld [vmem:[#allocation3 + $0x1c8] sm:$0xff]  ;;  %vm6707_vm15 = vmmov %vm6704_vm1  ;;  %vm6708_vm8 = vcmp.ge.s32.totalorder %v4813_v62, 4 }
 0x8fa   :  { %v1845_v13 = vperm.slane %v1837_v41, %v5158_v57  ;;  %v1932_v25 = vmul.f32 %v1929_v61, %v4821_v7  ;;  %1967 = vmatpush.msrb.mxu1 %v1948_v38  ;;  %v4312_v7 = vld [vmem:[#allocation3 + $0x100] ss:$0 sm:$0xff]  ;;  %2179 = vmatpush.msra.mxu3 %v5822_v11 }
 0x8fb   :  { %v1835_v59 = vsel %vm1270_vm13, %v1834_v60, %v1815_v31  ;;  %2295 = vmatpush.msra.mxu0 %v5822_v11 }
 0x8fc   :  { %v1853_v30 = vsel %vm1270_vm13, %v1845_v13, %v1852_v44  ;;  %v1850_v24 = vrot.slane %v1845_v13, 4  ;;  %v1841_v2 = vperm.slane %v1835_v59, %v5158_v57  ;;  %1968 = vmatpush.msrb.mxu1 %v1947_v42 }
 0x8fd   :  { %1874 = vrot.lane.b32.xlu2 %v1853_v30, %s4673_s26 }
 0x8fe   :  { %v1851_v4 = vsel %vm1270_vm13, %v1850_v24, %v1833_v18  ;;  %v1846_v14 = vrot.slane %v1841_v2, 4  ;;  %v1849_v45 = vsel %vm1270_vm13, %v1841_v2, %v1848_v54  ;;  %1969 = vmatpush.msrb.mxu1 %v1946_v29 }
 0x8ff   :  { %1866 = vrot.lane.b32.xlu0 %v1851_v4, %s4676_s29  ;;  %1858 = vrot.lane.b32.xlu1 %v1849_v45, %s4672_s25  ;;  %v2128_v4 = vld [vmem:[#allocation3 + $0x1a0] sm:$0xff] }
 0x900   :  { %v1847_v46 = vsel %vm1270_vm13, %v1846_v14, %v1829_v17  ;;  %1970 = vmatpush.msrb.mxu1 %v1945_v6  ;;  %v2127_v14 = vld [vmem:[#allocation3 + $0x198] sm:$0xff]  ;;  %2145 = vmatpush.msrb.mxu2 %v2128_v4 }
 0x901   :  { %v2123_v6 = vld [vmem:[#allocation3 + $0x178] sm:$0xff] }
 0x902   :  { %1971 = vmatpush.msrb.mxu1 %v1944_v5  ;;  %2146 = vmatpush.msrb.mxu2 %v2127_v14 }
 0x904   :  { %1972 = vmatpush.msrb.mxu1 %v1943_v36  ;;  %2147 = vmatpush.msrb.mxu2 %v2126_v32 }
 0x906   :  { %2690 = vmatpush.msra.mxu1 %v5822_v11 }
 0x907   :  { %1937 = vrot.lane.b32.xlu1 %v1932_v25, %s4670_s23  ;;  %v2125_v25 = vld [vmem:[#allocation3 + $0x188] sm:$0xff] }
 0x908   :  { %2148 = vmatpush.msrb.mxu2 %v2125_v25 }
 0x90a   :  { %2149 = vmatpush.msrb.mxu2 %v2124_v63 }
 0x90c   :  { %2150 = vmatpush.msrb.mxu2 %v2123_v6 }
 0x944   :  { %v1873_v0 = vpop.permute.xlu2 %1872 }
 0x957   :  { %v1875_v19 = vpop.permute.xlu2 %1874 }
 0x95b   :  { %v1865_v8 = vpop.permute.xlu1 %1864 }
 0x960   :  { %v1857_v28 = vpop.permute.xlu0 %1856 }
 0x961   :  { %v1878_v34 = vsel %vm559_vm14, %v5752_v37, %v1857_v28  ;;  %v2122_v28 = vld [vmem:[#allocation3 + $0x170] sm:$0xff] }
 0x962   :  { %v1880_v16 = vsel %vm84_vm0, %v1878_v34, %v1865_v8  ;;  %2151 = vmatpush.msrb.mxu2 %v2122_v28  ;;  %v2121_v28 = vld [vmem:[#allocation3 + $0x168] sm:$0xff] }
 0x963   :  { %v1882_v50 = vsel %vm1245_vm5, %v1880_v16, %v1873_v0 }
 0x964   :  { %v1885_v20 = vmul.f32 %v4312_v7, %v1882_v50  ;;  %2152 = vmatpush.msrb.mxu2 %v2121_v28 }
 0x966   :  { %v1891_v47 = vadd.f32 %v1889_v51, %v1885_v20  ;;  %2814 = vmatpush.msra.mxu2 %v5822_v11 }
 0x968   :  { %v1936_v26 = vpop.permute.xlu0 %1935 }
 0x969   :  { %v1941_v21 = vmul.f32 %v1936_v26, %v1891_v47 }
 0x96b   :  { %4223 = vmatmul.msk.f32.vlgmr.msrb.gmra.mxu1 %vm411_vm6, %v1941_v21 }
 0x971   :  { %v1867_v31 = vpop.permute.xlu0 %1866  ;;  %v1859_v22 = vpop.permute.xlu1 %1858 }
 0x972   :  { %v1879_v55 = vsel %vm559_vm14, %v1847_v46, %v1859_v22  ;;  %v5824_v46 = vld [vmem:[#allocation3 + $0x1c0] sm:$0xff] }
 0x973   :  { %v1881_v37 = vsel %vm84_vm0, %v1879_v55, %v1867_v31  ;;  %2180 = vmatpush.msra.mxu3 %v5824_v46  ;;  %2296 = vmatpush.msra.mxu0 %v5824_v46  ;;  %v2030_v31 = vld [vmem:[#allocation3 + $0x158] sm:$0xf] }
 0x974   :  { %v1883_v9 = vsel %vm1245_vm5, %v1881_v37, %v1875_v19  ;;  %2691 = vmatpush.msra.mxu1 %v5824_v46  ;;  %v2032_v19 = vperm.slane %v2030_v31, 3  ;;  %v4315_v37 = vld [vmem:[#allocation3 + $0x160] ss:$0 sm:$0xff]  ;;  %2815 = vmatpush.msra.mxu2 %v5824_v46 }
 0x975   :  { %v1886_v18 = vmul.f32 %v4312_v7, %v1883_v9 }
 0x977   :  { %v1892_v27 = vadd.f32 %v1890_v35, %v1886_v18  ;;  %v2044_v18 = vperm.slane %v2030_v31, 0 }
 0x979   :  { %v1938_v3 = vpop.permute.xlu1 %1937 }
 0x97a   :  { %v1942_v52 = vmul.f32 %v1938_v3, %v1892_v27 }
 0x97c   :  { %4224 = vmatmul.msk.f32.gmra.mxu1 %vm411_vm6, %v1942_v52 }
 0x9e8   :  { %v1974_v53 = vpop.f32.mrf.mxu1 }
 0x9e9   :  { %v5806_v43 = vadd.f32 %v1974_v53, %v4785_v48  ;;  %v2055_v53 = vperm.slane %v2030_v31, 1 }
 0x9eb   :  { %v1983_v33 = vsel %vm84_vm0, %v5806_v43, 0.0 }
 0x9ec   :  { %1984 = vadd.xlane.f32.xlu0 %v1983_v33  ;;  %v2066_v33 = vperm.slane %v2030_v31, 2 }
 0x9f9   :  { %v1977_v44 = vpop.f32.mrf.mxu1 }
 0x9fa   :  { %v5811_v17 = vadd.f32 %v1977_v44, %v4792_v1 }
 0x9fc   :  { %v1986_v10 = vsel %vm84_vm0, %v5811_v17, 0.0 }
 0x9fd   :  { %1987 = vadd.xlane.f32.xlu2 %v1986_v10 }
 0xa5f   :  { %v1985_v41 = vpop.xlane.xlu0 %1984 }
 0xa60   :  { %v1989_v60 = vmul.f32 %v1985_v41, %v4796_v58 }
 0xa62   :  { %v1991_v13 = vsub.f32 %v5806_v43, %v1989_v60 }
 0xa64   :  { %v1993_v59 = vmul.f32 %v1991_v13, %v1991_v13 }
 0xa66   :  { %v1995_v48 = vsel %vm84_vm0, %v1993_v59, 0.0 }
 0xa67   :  { %1996 = vadd.xlane.f32.xlu1 %v1995_v48 }
 0xa70   :  { %v1988_v49 = vpop.xlane.xlu2 %1987 }
 0xa71   :  { %v1990_v56 = vmul.f32 %v1988_v49, %v4796_v58 }
 0xa73   :  { %v1992_v30 = vsub.f32 %v5811_v17, %v1990_v56 }
 0xa75   :  { %v1994_v1 = vmul.f32 %v1992_v30, %v1992_v30 }
 0xa77   :  { %v1998_v24 = vsel %vm84_vm0, %v1994_v1, 0.0 }
 0xa78   :  { %1999 = vadd.xlane.f32.xlu2 %v1998_v24 }
 0xada   :  { %v1997_v2 = vpop.xlane.xlu1 %1996 }
 0xadb   :  { %v2001_v54 = vmul.f32 %v1997_v2, %v4796_v58 }
 0xadd   :  { %v2003_v12 = vadd.f32 1e-05, %v2001_v54 }
 0xadf   :  { %4450 = vrsqrt.f32 %v2003_v12  ;;  %vm2011_vm9 = vweird.f32 %v2003_v12 }
 0xae5   :  { %v4451_v45 = vpop.eup %4450 }
 0xae6   :  { %v2006_v61 = vmul.f32 %v4451_v45, %v2003_v12  ;;  %vm2012_vm5 = vweird.f32 %v4451_v45 }
 0xae7   :  { %vm2013_vm10 = vmor %vm2011_vm9, %vm2012_vm5  ;;  %vm6710_vm9 = vcmp.ge.s32.totalorder %v4813_v62, 2 }
 0xae8   :  { %v2007_v23 = vmul.f32 %v4451_v45, %v2006_v61  ;;  %vm6709_vm5 = vmmov %vm6705_vm3 }
 0xaea   :  { %v2008_v38 = vmul.f32 0.5, %v2007_v23 }
 0xaeb   :  { %v2000_v42 = vpop.xlane.xlu2 %1999 }
 0xaec   :  { %v2002_v29 = vmul.f32 %v2000_v42, %v4796_v58  ;;  %v2009_v5 = vsub.f32 1.5, %v2008_v38 }
 0xaee   :  { %v2004_v36 = vadd.f32 1e-05, %v2002_v29  ;;  %v2010_v7 = vmul.f32 %v4451_v45, %v2009_v5 }
 0xaf0   :  { %4452 = vrsqrt.f32 %v2004_v36  ;;  %v2014_v8 = vsel %vm2013_vm10, %v4451_v45, %v2010_v7  ;;  %vm2021_vm4 = vweird.f32 %v2004_v36  ;;  %v5860_v7 = vld [vmem:[#allocation3 + $0x1b8] sm:$0xff] }
 0xaf1   :  { %v2025_v34 = vmul.f32 %v2014_v8, %v1991_v13  ;;  %2181 = vmatpush.msra.mxu3 %v5860_v7  ;;  %2297 = vmatpush.msra.mxu0 %v5860_v7 }
 0xaf2   :  { %2692 = vmatpush.msra.mxu1 %v5860_v7  ;;  %2816 = vmatpush.msra.mxu2 %v5860_v7 }
 0xaf3   :  { %v2028_v0 = vmul.f32 %v4314_v40, %v2025_v34 }
 0xaf5   :  { %2113 = vrot.lane.b32.xlu0 %v2028_v0, %s4676_s29  ;;  %v2038_v52 = vrot.slane %v2028_v0, 2  ;;  %v2049_v10 = vrot.slane %v2028_v0, 4  ;;  %v2060_v41 = vrot.slane %v2028_v0, 6  ;;  %v2033_v12 = vmul.f32 %v2032_v19, %v2028_v0 }
 0xaf6   :  { %v4453_v16 = vpop.eup %4452 }
 0xaf7   :  { %v2016_v50 = vmul.f32 %v4453_v16, %v2004_v36  ;;  %vm2022_vm12 = vweird.f32 %v4453_v16  ;;  %v2036_v45 = vadd.f32 %v4315_v37, %v2033_v12 }
 0xaf8   :  { %vm2023_vm11 = vmor %vm2021_vm4, %vm2022_vm12 }
 0xaf9   :  { %v2017_v51 = vmul.f32 %v4453_v16, %v2016_v50 }
 0xafb   :  { %v2018_v20 = vmul.f32 0.5, %v2017_v51 }
 0xafd   :  { %v2019_v47 = vsub.f32 1.5, %v2018_v20 }
 0xaff   :  { %v2020_v26 = vmul.f32 %v4453_v16, %v2019_v47 }
 0xb01   :  { %v2024_v21 = vsel %vm2023_vm11, %v4453_v16, %v2020_v26 }
 0xb02   :  { %v2026_v22 = vmul.f32 %v2024_v21, %v1992_v30 }
 0xb04   :  { %v5834_v55 = vmul.f32 %v4314_v40, %v2026_v22  ;;  %v5863_v40 = vld [vmem:[#allocation3 + $0x1b0] sm:$0xff]  ;;  %v5889_v22 = vld [vmem:[#allocation3 + $0x1a8] ss:$0 sm:$0xff] }
 0xb05   :  { %2182 = vmatpush.msra.mxu3 %v5863_v40  ;;  %2298 = vmatpush.msra.mxu0 %v5863_v40 }
 0xb06   :  { %v2039_v9 = vrot.slane %v5834_v55, 2  ;;  %v2034_v35 = vmul.f32 %v2032_v19, %v5834_v55  ;;  %v2050_v27 = vrot.slane %v5834_v55, 4  ;;  %v2061_v3 = vrot.slane %v5834_v55, 6  ;;  %2183 = vmatmul.f32.vlgmr.msra.gmra.mxu3 %v4678_v15  ;;  %2693 = vmatpush.msra.mxu1 %v5863_v40 }
 0xb07   :  { %2428 = vmatpush.msrb.mxu3 %v5822_v11  ;;  %2559 = vmatpush.msrb.mxu0 %v5822_v11 }
 0xb08   :  { %v2037_v44 = vadd.f32 %v4315_v37, %v2034_v35  ;;  %v2040_v60 = vsel %vm323_vm7, %v2038_v52, %v2039_v9  ;;  %v2051_v59 = vsel %vm6704_vm1, %v2049_v10, %v2050_v27  ;;  %v2062_v48 = vsel %vm6705_vm3, %v2060_v41, %v2061_v3  ;;  %2817 = vmatpush.msra.mxu2 %v5863_v40 }
 0xb09   :  { %v2046_v13 = vmul.f32 %v2044_v18, %v2040_v60  ;;  %v2057_v56 = vmul.f32 %v2055_v53, %v2051_v59  ;;  %v2068_v30 = vmul.f32 %v2066_v33, %v2062_v48  ;;  %v2041_v2 = vsel %vm323_vm7, %v2039_v9, %v2038_v52  ;;  %2429 = vmatpush.msrb.mxu3 %v5824_v46 }
 0xb0a   :  { %v2042_v54 = vsel %vm6706_vm2, %v2041_v2, 0.0  ;;  %v2052_v14 = vsel %vm6707_vm15, %v2050_v27, %v2049_v10  ;;  %v2063_v25 = vsel %vm6709_vm5, %v2061_v3, %v2060_v41  ;;  %2560 = vmatpush.msrb.mxu0 %v5824_v46 }
 0xb0b   :  { %v2048_v49 = vadd.f32 %v2046_v13, %v2037_v44  ;;  %v2045_v4 = vmul.f32 %v2044_v18, %v2042_v54  ;;  %v2053_v32 = vsel %vm6708_vm8, %v2052_v14, 0.0  ;;  %v2064_v63 = vsel %vm6710_vm9, %v2063_v25, 0.0  ;;  %2430 = vmatpush.msrb.mxu3 %v5860_v7 }
 0xb0c   :  { %v2056_v23 = vmul.f32 %v2055_v53, %v2053_v32  ;;  %v2067_v42 = vmul.f32 %v2066_v33, %v2064_v63  ;;  %2561 = vmatpush.msrb.mxu0 %v5860_v7 }
 0xb0d   :  { %v2059_v1 = vadd.f32 %v2057_v56, %v2048_v49  ;;  %v2047_v61 = vadd.f32 %v2045_v4, %v2036_v45  ;;  %2431 = vmatpush.msrb.mxu3 %v5863_v40 }
 0xb0e   :  { %2562 = vmatpush.msrb.mxu0 %v5863_v40 }
 0xb0f   :  { %v5846_v24 = vadd.f32 %v2068_v30, %v2059_v1  ;;  %v2058_v38 = vadd.f32 %v2056_v23, %v2047_v61  ;;  %2944 = vmatpush.msra.mxu3 %v5822_v11 }
 0xb11   :  { %v2069_v29 = vadd.f32 %v2067_v42, %v2058_v38  ;;  %2945 = vmatpush.msra.mxu3 %v5824_v46 }
 0xb13   :  { %v4225_v6 = vmul.f32 -1.442695, %v2069_v29  ;;  %2946 = vmatpush.msra.mxu3 %v5860_v7 }
 0xb15   :  { %4454 = vpow2.f32 %v4225_v6  ;;  %2947 = vmatpush.msra.mxu3 %v5863_v40 }
 0xb1b   :  { %v4455_v5 = vpop.eup %4454 }
 0xb1c   :  { %v2077_v36 = vadd.f32 1.0, %v4455_v5 }
 0xb1e   :  { %4456 = vrcp.f32 %v2077_v36  ;;  %v2090_v16 = vand.u32 2147483648, %v2077_v36  ;;  %vm2084_vm10 = vweird.f32 %v2077_v36  ;;  %v2088_v50 = vand.u32 2147483647, %v2077_v36 }
 0xb20   :  { %v2091_v20 = vor.u32 1.1754944e-38, %v2090_v16  ;;  %vm2089_vm4 = vcmp.eq.f32.partialorder %v2088_v50, 8.507059e+37 }
 0xb24   :  { %v4457_v62 = vpop.eup %4456 }
 0xb25   :  { %v2080_v8 = vmul.f32 %v4457_v62, %v2077_v36  ;;  %vm2085_vm7 = vweird.f32 %v4457_v62 }
 0xb26   :  { %vm2086_vm12 = vmor %vm2084_vm10, %vm2085_vm7  ;;  %vm2279_vm10 = vcmask 254976  }
 0xb27   :  { %v2081_v15 = vsub.f32 1.0, %v2080_v8 }
 0xb29   :  { %v2082_v34 = vmul.f32 %v4457_v62, %v2081_v15 }
 0xb2b   :  { %v2083_v0 = vadd.f32 %v4457_v62, %v2082_v34 }
 0xb2d   :  { %v2087_v51 = vsel %vm2086_vm12, %v4457_v62, %v2083_v0 }
 0xb2e   :  { %v2092_v47 = vsel %vm2089_vm4, %v2091_v20, %v2087_v51 }
 0xb2f   :  { %v2109_v26 = vmul.f32 %v2092_v47, %v2069_v29 }
 0xb67   :  { %v2114_v21 = vpop.permute.xlu0 %2113 }
 0xb68   :  { %v2119_v31 = vsel %vm84_vm0, %v2109_v26, %v2114_v21 }
 0xb69   :  { %4227 = vmatmul.msk.f32.vlgmr.msrb.gmra.mxu2 %vm411_vm6, %v2119_v31 }
 0xb89   :  { %v2184_v37 = vpop.f32.mrf.mxu3 }
 0xbec   :  { %v2154_v19 = vpop.f32.mrf.mxu2 }
 0xbed   :  { %v5892_v9 = vadd.f32 %v5889_v22, %v2154_v19 }
 0xbef   :  { %v2187_v18 = vadd.f32 %v2184_v37, %v5892_v9 }
 0xbf1   :  { %v2189_v35 = vand.u32 2147483647, %v2187_v18  ;;  %4458 = vtanh.f32 %v2187_v18  ;;  %v2188_v48 = vmin.f32 %v2187_v18, 0.0  ;;  %v4229_v51 = vmul.f32 -1.442695, %v2187_v18 }
 0xbf3   :  { %v2190_v27 = vsub.f32 0.0, %v2189_v35 }
 0xbf5   :  { %v2191_v3 = vmul.f32 1.442695, %v2190_v27 }
 0xbf7   :  { %v4459_v52 = vpop.eup %4458  ;;  %4460 = vpow2.f32 %v2191_v3 }
 0xbf8   :  { %2222 = vrot.lane.b32.xlu2 %v4459_v52, %s4670_s23 }
 0xbfd   :  { %v4461_v53 = vpop.eup %4460 }
 0xbfe   :  { %v2193_v33 = vadd.f32 1.0, %v4461_v53  ;;  %v2196_v44 = vmul.f32 -0.5, %v4461_v53  ;;  %v2199_v41 = vand.u32 2147483647, %v4461_v53 }
 0xc00   :  { %4462 = vlog2.f32 %v2193_v33  ;;  %v2197_v10 = vadd.f32 1.0, %v2196_v44  ;;  %vm2200_vm11 = vcmp.lt.f32.partialorder %v2199_v41, 0.0004427343 }
 0xc02   :  { %v2198_v59 = vmul.f32 %v4461_v53, %v2197_v10 }
 0xc06   :  { %v4463_v60 = vpop.eup %4462 }
 0xc07   :  { %v2195_v13 = vmul.f32 0.6931472, %v4463_v60 }
 0xc09   :  { %v2201_v49 = vsel %vm2200_vm11, %v2198_v59, %v2195_v13 }
 0xc0a   :  { %v2202_v56 = vsub.f32 %v2188_v48, %v2201_v49 }
 0xc0c   :  { %2205 = vrot.lane.b32.xlu1 %v2202_v56, %s4674_s27 }
 0xc52   :  { %v2223_v4 = vpop.permute.xlu2 %2222 }
 0xc7e   :  { %v2206_v30 = vpop.permute.xlu1 %2205 }
 0xc7f   :  { %v5897_v1 = vmax.f32 %v2187_v18, %v2206_v30 }
 0xc81   :  { %v2209_v2 = vsub.f32 %v2187_v18, %v5897_v1  ;;  %2213 = vrot.lane.b32.xlu0 %v5897_v1, %s4676_s29 }
 0xc83   :  { %v2210_v54 = vmul.f32 1.442695, %v2209_v2 }
 0xc85   :  { %4464 = vpow2.f32 %v2210_v54 }
 0xc8b   :  { %v4465_v12 = vpop.eup %4464 }
 0xc8c   :  { %2232 = vrot.lane.b32.xlu0 %v4465_v12, %s4676_s29  ;;  %v2225_v14 = vmul.f32 %v4465_v12, %v2223_v4 }
 0xc8e   :  { %2227 = vrot.lane.b32.xlu2 %v2225_v14, %s4676_s29 }
 0xce8   :  { %v2228_v8 = vpop.permute.xlu2 %2227 }
 0xcf3   :  { %v2214_v45 = vpop.permute.xlu0 %2213 }
 0xcf4   :  { %v2216_v32 = vsub.f32 %v2202_v56, %v2214_v45 }
 0xcf6   :  { %v2217_v61 = vmul.f32 1.442695, %v2216_v32 }
 0xcf8   :  { %4466 = vpow2.f32 %v2217_v61 }
 0xcfe   :  { %v4467_v25 = vpop.eup %4466  ;;  %v2233_v63 = vpop.permute.xlu0 %2232 }
 0xcff   :  { %v2219_v23 = vmul.f32 0.0, %v4467_v25 }
 0xd01   :  { %v2235_v38 = vadd.f32 %v2233_v63, %v2219_v23  ;;  %v2230_v34 = vadd.f32 %v2228_v8, %v2219_v23 }
 0xd03   :  { %4468 = vrcp.f32 %v2235_v38  ;;  %v2266_v5 = vand.u32 2147483648, %v2235_v38  ;;  %v2264_v28 = vand.u32 2147483647, %v2235_v38  ;;  %vm2260_vm3 = vweird.f32 %v2235_v38 }
 0xd04   :  { %4470 = vpow2.f32 %v4229_v51 }
 0xd05   :  { %v2267_v15 = vor.u32 1.1754944e-38, %v2266_v5  ;;  %vm2265_vm15 = vcmp.eq.f32.partialorder %v2264_v28, 8.507059e+37 }
 0xd09   :  { %v4469_v42 = vpop.eup %4468 }
 0xd0a   :  { %v2256_v29 = vmul.f32 %v4469_v42, %v2235_v38  ;;  %vm2261_vm1 = vweird.f32 %v4469_v42  ;;  %v4471_v20 = vpop.eup %4470 }
 0xd0b   :  { %vm2262_vm2 = vmor %vm2260_vm3, %vm2261_vm1  ;;  %v2239_v47 = vadd.f32 1.0, %v4471_v20 }
 0xd0c   :  { %v2257_v6 = vsub.f32 1.0, %v2256_v29 }
 0xd0d   :  { %4472 = vrcp.f32 %v2239_v47  ;;  %v2251_v35 = vand.u32 2147483648, %v2239_v47  ;;  %vm2245_vm5 = vweird.f32 %v2239_v47  ;;  %v2249_v27 = vand.u32 2147483647, %v2239_v47 }
 0xd0e   :  { %v2258_v36 = vmul.f32 %v4469_v42, %v2257_v6 }
 0xd0f   :  { %v2252_v52 = vor.u32 1.1754944e-38, %v2251_v35  ;;  %vm2250_vm7 = vcmp.eq.f32.partialorder %v2249_v27, 8.507059e+37 }
 0xd10   :  { %v2259_v62 = vadd.f32 %v4469_v42, %v2258_v36 }
 0xd12   :  { %v2263_v0 = vsel %vm2262_vm2, %v4469_v42, %v2259_v62 }
 0xd13   :  { %v2268_v16 = vsel %vm2265_vm15, %v2267_v15, %v2263_v0  ;;  %v4473_v26 = vpop.eup %4472 }
 0xd14   :  { %v2269_v50 = vmul.f32 %v2268_v16, %v2230_v34  ;;  %v2241_v21 = vmul.f32 %v4473_v26, %v2239_v47  ;;  %vm2246_vm8 = vweird.f32 %v4473_v26 }
 0xd15   :  { %vm2247_vm9 = vmor %vm2245_vm5, %vm2246_vm8 }
 0xd16   :  { %2271 = vrot.lane.b32.xlu1 %v2269_v50, %s4670_s23  ;;  %v2242_v31 = vsub.f32 1.0, %v2241_v21 }
 0xd18   :  { %v2243_v19 = vmul.f32 %v4473_v26, %v2242_v31 }
 0xd1a   :  { %v2244_v37 = vadd.f32 %v4473_v26, %v2243_v19 }
 0xd1c   :  { %v2248_v3 = vsel %vm2247_vm9, %v4473_v26, %v2244_v37 }
 0xd1d   :  { %v2253_v53 = vsel %vm2250_vm7, %v2252_v52, %v2248_v3 }
 0xd1e   :  { %2357 = vrot.lane.b32.xlu1 %v2235_v38, %s4674_s27 }
 0xd88   :  { %v2272_v33 = vpop.permute.xlu1 %2271 }
 0xd89   :  { %v2274_v18 = vmul.f32 %v2272_v33, %v2253_v53 }
 0xd8b   :  { %2276 = vrot.lane.b32.xlu0 %v2274_v18, %s4676_s29 }
 0xd90   :  { %v2358_v28 = vpop.permute.xlu1 %2357 }
 0xdfd   :  { %v2277_v44 = vpop.permute.xlu0 %2276 }
 0xdfe   :  { %2280 = vst.msk [vmem:[#allocation2] sm:$0x3] %vm2279_vm10, %v2277_v44  ;;  %4230 = vmatmul.msk.f32.vlgmr.msra.gmra.mxu0 %vm84_vm0, %v2277_v44 }
 0xdff   :  { %3074 = vmatpush.msra.mxu0 %v5822_v11 }
 0xe01   :  { %3075 = vmatpush.msra.mxu0 %v5824_v46 }
 0xe03   :  { %3076 = vmatpush.msra.mxu0 %v5860_v7 }
 0xe05   :  { %3077 = vmatpush.msra.mxu0 %v5863_v40 }
 0xe7b   :  { %v2300_v10 = vpop.f32.mrf.mxu0 }
 0xe7c   :  { %v2304_v41 = vrot.slane %v2300_v10, 6 }
 0xe7e   :  { %v5914_v60 = vadd.f32 %v2304_v41, %v5892_v9 }
 0xe80   :  { %v2308_v13 = vand.u32 2147483647, %v5914_v60  ;;  %4474 = vtanh.f32 %v5914_v60  ;;  %v2307_v12 = vmin.f32 %v5914_v60, 0.0  ;;  %v4231_v33 = vmul.f32 -1.442695, %v5914_v60 }
 0xe82   :  { %v2309_v59 = vsub.f32 0.0, %v2308_v13 }
 0xe84   :  { %v2310_v48 = vmul.f32 1.442695, %v2309_v59 }
 0xe86   :  { %v4475_v49 = vpop.eup %4474  ;;  %4476 = vpow2.f32 %v2310_v48 }
 0xe87   :  { %2348 = vrot.lane.b32.xlu0 %v4475_v49, %s4670_s23 }
 0xe8c   :  { %v4477_v11 = vpop.eup %4476 }
 0xe8d   :  { %v2312_v46 = vadd.f32 1.0, %v4477_v11  ;;  %v2315_v7 = vmul.f32 -0.5, %v4477_v11  ;;  %v2318_v56 = vand.u32 2147483647, %v4477_v11 }
 0xe8f   :  { %4478 = vlog2.f32 %v2312_v46  ;;  %v2316_v40 = vadd.f32 1.0, %v2315_v7  ;;  %vm2319_vm12 = vcmp.lt.f32.partialorder %v2318_v56, 0.0004427343 }
 0xe91   :  { %v2317_v54 = vmul.f32 %v4477_v11, %v2316_v40 }
 0xe95   :  { %v4479_v30 = vpop.eup %4478 }
 0xe96   :  { %v2314_v2 = vmul.f32 0.6931472, %v4479_v30 }
 0xe98   :  { %v2320_v4 = vsel %vm2319_vm12, %v2317_v54, %v2314_v2 }
 0xe99   :  { %v2321_v14 = vsub.f32 %v2307_v12, %v2320_v4 }
 0xe9b   :  { %v2323_v45 = vrot.slane %v2321_v14, 2 }
 0xe9d   :  { %2324 = vrot.lane.b32.xlu2 %v2323_v45, %s4674_s27 }
 0xea5   :  { %2342 = vrot.lane.b32.xlu2 %v2230_v34, %s4674_s27 }
 0xef7   :  { %v2325_v32 = vpop.permute.xlu2 %2324 }
 0xef8   :  { %v2327_v61 = vadd.f32 %v2325_v32, %v5897_v1 }
 0xef9   :  { %v2349_v15 = vpop.permute.xlu0 %2348 }
 0xefa   :  { %v2329_v25 = vrot.slane %v2327_v61, 6 }
 0xefc   :  { %v5924_v23 = vmax.f32 %v5914_v60, %v2329_v25 }
 0xefe   :  { %v2336_v63 = vrot.slane %v5924_v23, 2  ;;  %v2332_v38 = vsub.f32 %v5914_v60, %v5924_v23 }
 0xeff   :  { %v2343_v20 = vpop.permute.xlu2 %2342 }
 0xf00   :  { %v2338_v42 = vsub.f32 %v2327_v61, %v2336_v63  ;;  %v2333_v29 = vmul.f32 1.442695, %v2332_v38 }
 0xf02   :  { %v2339_v6 = vmul.f32 1.442695, %v2338_v42  ;;  %4480 = vpow2.f32 %v2333_v29 }
 0xf04   :  { %4482 = vpow2.f32 %v2339_v6 }
 0xf08   :  { %v4481_v5 = vpop.eup %4480 }
 0xf09   :  { %v2362_v8 = vrot.slane %v4481_v5, 2  ;;  %v2351_v0 = vmul.f32 %v4481_v5, %v2349_v15 }
 0xf0a   :  { %v4483_v36 = vpop.eup %4482 }
 0xf0b   :  { %v2360_v62 = vmul.f32 %v4483_v36, %v2358_v28  ;;  %v2353_v51 = vrot.slane %v2351_v0, 2  ;;  %v2345_v26 = vmul.f32 %v4483_v36, %v2343_v20 }
 0xf0d   :  { %v5929_v1 = vadd.f32 %v2362_v8, %v2360_v62  ;;  %v5936_v35 = vadd.f32 %v2353_v51, %v2345_v26 }
 0xf0f   :  { %4484 = vrcp.f32 %v5929_v1  ;;  %v2395_v47 = vand.u32 2147483648, %v5929_v1  ;;  %v2393_v31 = vand.u32 2147483647, %v5929_v1  ;;  %vm2389_vm11 = vweird.f32 %v5929_v1 }
 0xf10   :  { %4486 = vpow2.f32 %v4231_v33 }
 0xf11   :  { %v2396_v37 = vor.u32 1.1754944e-38, %v2395_v47  ;;  %vm2394_vm3 = vcmp.eq.f32.partialorder %v2393_v31, 8.507059e+37 }
 0xf15   :  { %v4485_v34 = vpop.eup %4484 }
 0xf16   :  { %v2385_v16 = vmul.f32 %v4485_v34, %v5929_v1  ;;  %vm2390_vm4 = vweird.f32 %v4485_v34  ;;  %v4487_v18 = vpop.eup %4486 }
 0xf17   :  { %vm2391_vm1 = vmor %vm2389_vm11, %vm2390_vm4  ;;  %v2368_v44 = vadd.f32 1.0, %v4487_v18 }
 0xf18   :  { %v2386_v50 = vsub.f32 1.0, %v2385_v16 }
 0xf19   :  { %4488 = vrcp.f32 %v2368_v44  ;;  %v2380_v49 = vand.u32 2147483648, %v2368_v44  ;;  %vm2374_vm15 = vweird.f32 %v2368_v44  ;;  %v2378_v11 = vand.u32 2147483647, %v2368_v44 }
 0xf1a   :  { %v2387_v21 = vmul.f32 %v4485_v34, %v2386_v50 }
 0xf1b   :  { %v2381_v7 = vor.u32 1.1754944e-38, %v2380_v49  ;;  %vm2379_vm5 = vcmp.eq.f32.partialorder %v2378_v11, 8.507059e+37 }
 0xf1c   :  { %v2388_v19 = vadd.f32 %v4485_v34, %v2387_v21 }
 0xf1e   :  { %v2392_v27 = vsel %vm2391_vm1, %v4485_v34, %v2388_v19  ;;  %v2489_v19 = vrot.slane %v5929_v1, 6 }
 0xf1f   :  { %v2397_v3 = vsel %vm2394_vm3, %v2396_v37, %v2392_v27  ;;  %v4489_v10 = vpop.eup %4488 }
 0xf20   :  { %v2398_v52 = vmul.f32 %v2397_v3, %v5936_v35  ;;  %v2370_v41 = vmul.f32 %v4489_v10, %v2368_v44  ;;  %vm2375_vm2 = vweird.f32 %v4489_v10  ;;  %v2475_v44 = vrot.slane %v5936_v35, 6 }
 0xf21   :  { %vm2376_vm8 = vmor %vm2374_vm15, %vm2375_vm2 }
 0xf22   :  { %v2400_v53 = vrot.slane %v2398_v52, 6  ;;  %v2371_v13 = vsub.f32 1.0, %v2370_v41 }
 0xf24   :  { %2401 = vrot.lane.b32.xlu1 %v2400_v53, %s4674_s27  ;;  %v2372_v59 = vmul.f32 %v4489_v10, %v2371_v13 }
 0xf26   :  { %v2373_v48 = vadd.f32 %v4489_v10, %v2372_v59 }
 0xf28   :  { %v2377_v46 = vsel %vm2376_vm8, %v4489_v10, %v2373_v48 }
 0xf29   :  { %v2382_v40 = vsel %vm2379_vm5, %v2381_v7, %v2377_v46 }
 0xf96   :  { %v2402_v56 = vpop.permute.xlu1 %2401 }
 0xf97   :  { %v5941_v60 = vmul.f32 %v2402_v56, %v2382_v40 }
 0xf99   :  { %v2411_v30 = vrot.slane %v5941_v60, 2 }
 0xf9b   :  { %2412 = vrot.lane.b32.xlu0 %v2411_v30, %s4676_s29 }
0x100d   :  { %v2413_v2 = vpop.permute.xlu0 %2412 }
0x100e   :  { %4232 = vmatmul.msk.f32.vlgmr.msrb.gmra.mxu3 %vm84_vm0, %v2413_v2 }
0x1091   :  { %v2433_v54 = vpop.f32.mrf.mxu3 }
0x1092   :  { %v2437_v12 = vrot.slane %v2433_v54, 4 }
0x1094   :  { %v5947_v4 = vadd.f32 %v2437_v12, %v5892_v9 }
0x1096   :  { %v2441_v14 = vand.u32 2147483647, %v5947_v4  ;;  %4490 = vtanh.f32 %v5947_v4  ;;  %v2440_v28 = vmin.f32 %v5947_v4, 0.0  ;;  %v4233_v30 = vmul.f32 -1.442695, %v5947_v4 }
0x1098   :  { %v2442_v45 = vsub.f32 0.0, %v2441_v14 }
0x109a   :  { %v2443_v32 = vmul.f32 1.442695, %v2442_v45 }
0x109c   :  { %v4491_v61 = vpop.eup %4490  ;;  %4492 = vpow2.f32 %v2443_v32 }
0x109d   :  { %2480 = vrot.lane.b32.xlu1 %v4491_v61, %s4670_s23 }
0x10a2   :  { %v4493_v25 = vpop.eup %4492 }
0x10a3   :  { %v2445_v63 = vadd.f32 1.0, %v4493_v25  ;;  %v2448_v38 = vmul.f32 -0.5, %v4493_v25  ;;  %v2451_v29 = vand.u32 2147483647, %v4493_v25 }
0x10a5   :  { %4494 = vlog2.f32 %v2445_v63  ;;  %v2449_v42 = vadd.f32 1.0, %v2448_v38  ;;  %vm2452_vm9 = vcmp.lt.f32.partialorder %v2451_v29, 0.0004427343 }
0x10a7   :  { %v2450_v36 = vmul.f32 %v4493_v25, %v2449_v42 }
0x10ab   :  { %v4495_v6 = vpop.eup %4494 }
0x10ac   :  { %v2447_v5 = vmul.f32 0.6931472, %v4495_v6 }
0x10ae   :  { %v2453_v62 = vsel %vm2452_vm9, %v2450_v36, %v2447_v5 }
0x10af   :  { %v2454_v8 = vsub.f32 %v2440_v28, %v2453_v62 }
0x10b1   :  { %v2456_v15 = vrot.slane %v2454_v8, 2 }
0x10b3   :  { %2457 = vrot.lane.b32.xlu2 %v2456_v15, %s4674_s27 }
0x110d   :  { %v2458_v34 = vpop.permute.xlu2 %2457 }
0x110e   :  { %v2460_v0 = vadd.f32 %v2458_v34, %v5924_v23 }
0x110f   :  { %v2481_v53 = vpop.permute.xlu1 %2480 }
0x1110   :  { %v2462_v16 = vrot.slane %v2460_v0, 6 }
0x1112   :  { %v5956_v50 = vmax.f32 %v5947_v4, %v2462_v16 }
0x1114   :  { %v2469_v51 = vrot.slane %v5956_v50, 2  ;;  %v2465_v20 = vsub.f32 %v5947_v4, %v5956_v50 }
0x1116   :  { %v2471_v47 = vsub.f32 %v2460_v0, %v2469_v51  ;;  %v2466_v26 = vmul.f32 1.442695, %v2465_v20 }
0x1118   :  { %v2472_v21 = vmul.f32 1.442695, %v2471_v47  ;;  %4496 = vpow2.f32 %v2466_v26 }
0x111a   :  { %4498 = vpow2.f32 %v2472_v21 }
0x111e   :  { %v4497_v31 = vpop.eup %4496 }
0x111f   :  { %v2493_v23 = vrot.slane %v4497_v31, 2  ;;  %v2483_v33 = vmul.f32 %v4497_v31, %v2481_v53  ;;  %v4226_v53 = vmul.f32 -1.442695, %v5846_v24 }
0x1120   :  { %v4499_v37 = vpop.eup %4498 }
0x1121   :  { %v2491_v27 = vmul.f32 %v4499_v37, %v2489_v19  ;;  %v2477_v41 = vmul.f32 %v4499_v37, %v2475_v44  ;;  %v2485_v59 = vrot.slane %v2483_v33, 2 }
0x1123   :  { %v5962_v3 = vadd.f32 %v2493_v23, %v2491_v27  ;;  %v5970_v46 = vadd.f32 %v2485_v59, %v2477_v41 }
0x1125   :  { %4500 = vrcp.f32 %v5962_v3  ;;  %v2526_v13 = vand.u32 2147483648, %v5962_v3  ;;  %v2524_v48 = vand.u32 2147483647, %v5962_v3  ;;  %vm2520_vm12 = vweird.f32 %v5962_v3 }
0x1126   :  { %4502 = vpow2.f32 %v4233_v30 }
0x1127   :  { %v2527_v11 = vor.u32 1.1754944e-38, %v2526_v13  ;;  %vm2525_vm11 = vcmp.eq.f32.partialorder %v2524_v48, 8.507059e+37 }
0x112b   :  { %v4501_v52 = vpop.eup %4500 }
0x112c   :  { %v2516_v18 = vmul.f32 %v4501_v52, %v5962_v3  ;;  %vm2521_vm7 = vweird.f32 %v4501_v52  ;;  %v4503_v2 = vpop.eup %4502 }
0x112d   :  { %vm2522_vm4 = vmor %vm2520_vm12, %vm2521_vm7  ;;  %v2499_v54 = vadd.f32 1.0, %v4503_v2 }
0x112e   :  { %v2517_v10 = vsub.f32 1.0, %v2516_v18 }
0x112f   :  { %4504 = vrcp.f32 %v2499_v54  ;;  %v2511_v25 = vand.u32 2147483648, %v2499_v54  ;;  %vm2505_vm3 = vweird.f32 %v2499_v54  ;;  %v2509_v63 = vand.u32 2147483647, %v2499_v54 }
0x1130   :  { %v2518_v1 = vmul.f32 %v4501_v52, %v2517_v10 }
0x1131   :  { %v2512_v42 = vor.u32 1.1754944e-38, %v2511_v25  ;;  %vm2510_vm15 = vcmp.eq.f32.partialorder %v2509_v63, 8.507059e+37  ;;  %v2620_v25 = vrot.slane %v5962_v3, 6 }
0x1132   :  { %v2519_v49 = vadd.f32 %v4501_v52, %v2518_v1 }
0x1134   :  { %v2523_v7 = vsel %vm2522_vm4, %v4501_v52, %v2519_v49 }
0x1135   :  { %v2528_v40 = vsel %vm2525_vm11, %v2527_v11, %v2523_v7  ;;  %v4505_v12 = vpop.eup %4504 }
0x1136   :  { %v2529_v35 = vmul.f32 %v2528_v40, %v5970_v46  ;;  %v2501_v14 = vmul.f32 %v4505_v12, %v2499_v54  ;;  %vm2506_vm1 = vweird.f32 %v4505_v12 }
0x1137   :  { %vm2507_vm2 = vmor %vm2505_vm3, %vm2506_vm1 }
0x1138   :  { %v2531_v56 = vrot.slane %v2529_v35, 6  ;;  %v2502_v45 = vsub.f32 1.0, %v2501_v14 }
0x113a   :  { %2532 = vrot.lane.b32.xlu0 %v2531_v56, %s4674_s27  ;;  %v2503_v32 = vmul.f32 %v4505_v12, %v2502_v45 }
0x113c   :  { %v2504_v61 = vadd.f32 %v4505_v12, %v2503_v32 }
0x113e   :  { %v2508_v38 = vsel %vm2507_vm2, %v4505_v12, %v2504_v61 }
0x113f   :  { %v2513_v29 = vsel %vm2510_vm15, %v2512_v42, %v2508_v38 }
0x11ac   :  { %v2533_v6 = vpop.permute.xlu0 %2532 }
0x11ad   :  { %v5975_v4 = vmul.f32 %v2533_v6, %v2513_v29 }
0x11af   :  { %v2542_v5 = vrot.slane %v5975_v4, 4 }
0x11b1   :  { %2543 = vrot.lane.b32.xlu2 %v2542_v5, %s4676_s29 }
0x120b   :  { %v2544_v36 = vpop.permute.xlu2 %2543 }
0x120c   :  { %4234 = vmatmul.msk.f32.vlgmr.msrb.gmra.mxu0 %vm84_vm0, %v2544_v36 }
0x1289   :  { %v2564_v28 = vpop.f32.mrf.mxu0 }
0x128a   :  { %v2568_v62 = vrot.slane %v2564_v28, 2  ;;  %v2606_v28 = vrot.slane %v5970_v46, 6 }
0x128c   :  { %v5981_v8 = vadd.f32 %v2568_v62, %v5892_v9 }
0x128e   :  { %v2572_v15 = vand.u32 2147483647, %v5981_v8  ;;  %4506 = vtanh.f32 %v5981_v8  ;;  %v2571_v37 = vmin.f32 %v5981_v8, 0.0 }
0x1290   :  { %v2573_v34 = vsub.f32 0.0, %v2572_v15 }
0x1292   :  { %v2574_v0 = vmul.f32 1.442695, %v2573_v34 }
0x1294   :  { %v4507_v16 = vpop.eup %4506  ;;  %4508 = vpow2.f32 %v2574_v0 }
0x1295   :  { %2611 = vrot.lane.b32.xlu0 %v4507_v16, %s4670_s23 }
0x129a   :  { %v4509_v51 = vpop.eup %4508 }
0x129b   :  { %v2576_v20 = vadd.f32 1.0, %v4509_v51  ;;  %v2579_v47 = vmul.f32 -0.5, %v4509_v51  ;;  %v2582_v21 = vand.u32 2147483647, %v4509_v51 }
0x129d   :  { %4510 = vlog2.f32 %v2576_v20  ;;  %v2580_v26 = vadd.f32 1.0, %v2579_v47  ;;  %vm2583_vm8 = vcmp.lt.f32.partialorder %v2582_v21, 0.0004427343 }
0x129e   :  { %4512 = vpow2.f32 %v4226_v53 }
0x129f   :  { %v2581_v9 = vmul.f32 %v4509_v51, %v2580_v26 }
0x12a3   :  { %v4511_v31 = vpop.eup %4510 }
0x12a4   :  { %v2578_v19 = vmul.f32 0.6931472, %v4511_v31  ;;  %v4513_v33 = vpop.eup %4512 }
0x12a5   :  { %v2078_v18 = vadd.f32 1.0, %v4513_v33 }
0x12a6   :  { %v2584_v27 = vsel %vm2583_vm8, %v2581_v9, %v2578_v19  ;;  %v4235_v19 = vmul.f32 -1.442695, %v5981_v8 }
0x12a7   :  { %v2585_v23 = vsub.f32 %v2571_v37, %v2584_v27  ;;  %4514 = vrcp.f32 %v2078_v18  ;;  %v2105_v1 = vand.u32 2147483648, %v2078_v18  ;;  %vm2099_vm9 = vweird.f32 %v2078_v18 }
0x12a8   :  { %v2103_v48 = vand.u32 2147483647, %v2078_v18 }
0x12a9   :  { %v2587_v52 = vrot.slane %v2585_v23, 2  ;;  %v2106_v7 = vor.u32 1.1754944e-38, %v2105_v1 }
0x12aa   :  { %vm2104_vm12 = vcmp.eq.f32.partialorder %v2103_v48, 8.507059e+37 }
0x12ab   :  { %2588 = vrot.lane.b32.xlu1 %v2587_v52, %s4674_s27 }
0x12ad   :  { %v4515_v44 = vpop.eup %4514 }
0x12ae   :  { %v2095_v10 = vmul.f32 %v4515_v44, %v2078_v18  ;;  %vm2100_vm5 = vweird.f32 %v4515_v44 }
0x12af   :  { %vm2101_vm7 = vmor %vm2099_vm9, %vm2100_vm5 }
0x12b0   :  { %v2096_v41 = vsub.f32 1.0, %v2095_v10 }
0x12b2   :  { %v2097_v13 = vmul.f32 %v4515_v44, %v2096_v41 }
0x12b3   :  { %2115 = vrot.lane.b32.xlu1 %v5834_v55, %s4676_s29 }
0x12b4   :  { %v2098_v59 = vadd.f32 %v4515_v44, %v2097_v13 }
0x12b6   :  { %v2102_v55 = vsel %vm2101_vm7, %v4515_v44, %v2098_v59 }
0x12b7   :  { %v2107_v35 = vsel %vm2104_vm12, %v2106_v7, %v2102_v55 }
0x12b8   :  { %v2110_v54 = vmul.f32 %v2107_v35, %v5846_v24 }
0x1307   :  { %v2612_v6 = vpop.permute.xlu0 %2611 }
0x131d   :  { %v2589_v49 = vpop.permute.xlu1 %2588 }
0x131e   :  { %v2591_v11 = vadd.f32 %v2589_v49, %v5956_v50 }
0x1320   :  { %v2593_v40 = vrot.slane %v2591_v11, 6 }
0x1322   :  { %v5993_v56 = vmax.f32 %v5981_v8, %v2593_v40 }
0x1324   :  { %v2596_v30 = vsub.f32 %v5981_v8, %v5993_v56  ;;  %v2600_v2 = vrot.slane %v5993_v56, 2 }
0x1325   :  { %v2116_v12 = vpop.permute.xlu1 %2115 }
0x1326   :  { %v2597_v14 = vmul.f32 1.442695, %v2596_v30  ;;  %v2602_v45 = vsub.f32 %v2591_v11, %v2600_v2  ;;  %v2120_v50 = vsel %vm84_vm0, %v2110_v54, %v2116_v12 }
0x1327   :  { %4228 = vmatmul.msk.f32.gmra.mxu2 %vm411_vm6, %v2120_v50 }
0x1328   :  { %4516 = vpow2.f32 %v2597_v14  ;;  %v2603_v32 = vmul.f32 1.442695, %v2602_v45 }
0x132a   :  { %4518 = vpow2.f32 %v2603_v32 }
0x132e   :  { %v4517_v61 = vpop.eup %4516 }
0x132f   :  { %v2624_v42 = vrot.slane %v4517_v61, 2  ;;  %v2614_v5 = vmul.f32 %v4517_v61, %v2612_v6 }
0x1330   :  { %v4519_v63 = vpop.eup %4518 }
0x1331   :  { %v2622_v38 = vmul.f32 %v4519_v63, %v2620_v25  ;;  %v2608_v15 = vmul.f32 %v4519_v63, %v2606_v28  ;;  %v2616_v0 = vrot.slane %v2614_v5, 2 }
0x1333   :  { %v6002_v29 = vadd.f32 %v2624_v42, %v2622_v38  ;;  %v6010_v47 = vadd.f32 %v2616_v0, %v2608_v15 }
0x1335   :  { %4520 = vrcp.f32 %v6002_v29  ;;  %v2657_v34 = vand.u32 2147483648, %v6002_v29  ;;  %v2655_v16 = vand.u32 2147483647, %v6002_v29  ;;  %vm2651_vm11 = vweird.f32 %v6002_v29 }
0x1336   :  { %4522 = vpow2.f32 %v4235_v19 }
0x1337   :  { %v2658_v20 = vor.u32 1.1754944e-38, %v2657_v34  ;;  %vm2656_vm3 = vcmp.eq.f32.partialorder %v2655_v16, 8.507059e+37  ;;  %v2748_v16 = vrot.slane %v6002_v29, 6 }
0x133b   :  { %v4521_v24 = vpop.eup %4520 }
0x133c   :  { %v2647_v36 = vmul.f32 %v4521_v24, %v6002_v29  ;;  %vm2652_vm4 = vweird.f32 %v4521_v24  ;;  %v4523_v9 = vpop.eup %4522 }
0x133d   :  { %vm2653_vm1 = vmor %vm2651_vm11, %vm2652_vm4  ;;  %v2630_v37 = vadd.f32 1.0, %v4523_v9  ;;  %v2734_v9 = vrot.slane %v6010_v47, 6 }
0x133e   :  { %v2648_v62 = vsub.f32 1.0, %v2647_v36 }
0x133f   :  { %4524 = vrcp.f32 %v2630_v37  ;;  %v2642_v18 = vand.u32 2147483648, %v2630_v37  ;;  %vm2636_vm15 = vweird.f32 %v2630_v37  ;;  %v2640_v44 = vand.u32 2147483647, %v2630_v37 }
0x1340   :  { %v2649_v3 = vmul.f32 %v4521_v24, %v2648_v62 }
0x1341   :  { %v2643_v41 = vor.u32 1.1754944e-38, %v2642_v18  ;;  %vm2641_vm5 = vcmp.eq.f32.partialorder %v2640_v44, 8.507059e+37 }
0x1342   :  { %v2650_v51 = vadd.f32 %v4521_v24, %v2649_v3 }
0x1344   :  { %v2654_v26 = vsel %vm2653_vm1, %v4521_v24, %v2650_v51 }
0x1345   :  { %v2659_v21 = vsel %vm2656_vm3, %v2658_v20, %v2654_v26  ;;  %v4525_v27 = vpop.eup %4524 }
0x1346   :  { %v2660_v46 = vmul.f32 %v2659_v21, %v6010_v47  ;;  %v2632_v23 = vmul.f32 %v4525_v27, %v2630_v37  ;;  %vm2637_vm2 = vweird.f32 %v4525_v27 }
0x1347   :  { %vm2638_vm8 = vmor %vm2636_vm15, %vm2637_vm2 }
0x1348   :  { %v2662_v31 = vrot.slane %v2660_v46, 6  ;;  %v2633_v52 = vsub.f32 1.0, %v2632_v23 }
0x134a   :  { %2663 = vrot.lane.b32.xlu2 %v2662_v31, %s4674_s27  ;;  %v2634_v53 = vmul.f32 %v4525_v27, %v2633_v52 }
0x134c   :  { %v2635_v33 = vadd.f32 %v4525_v27, %v2634_v53 }
0x134e   :  { %v2639_v10 = vsel %vm2638_vm8, %v4525_v27, %v2635_v33 }
0x134f   :  { %v2644_v13 = vsel %vm2641_vm5, %v2643_v41, %v2639_v10 }
0x13a4   :  { %v2664_v59 = vpop.permute.xlu2 %2663 }
0x13a5   :  { %v6015_v8 = vmul.f32 %v2664_v59, %v2644_v13 }
0x13a7   :  { %v2673_v1 = vrot.slane %v6015_v8, 6 }
0x13a9   :  { %2674 = vrot.lane.b32.xlu0 %v2673_v1, %s4676_s29 }
0x13aa   :  { %v2157_v49 = vpop.f32.mrf.mxu2 }
0x13ab   :  { %v6021_v11 = vadd.f32 %v5889_v22, %v2157_v49 }
0x141b   :  { %v2675_v48 = vpop.permute.xlu0 %2674 }
0x141c   :  { %4236 = vmatmul.msk.f32.vlgmr.msra.gmra.mxu1 %vm84_vm0, %v2675_v48 }
0x1499   :  { %v2695_v55 = vpop.f32.mrf.mxu1 }
0x149a   :  { %v6024_v7 = vadd.f32 %v2695_v55, %v6021_v11 }
0x149c   :  { %v2700_v40 = vand.u32 2147483647, %v6024_v7  ;;  %4526 = vtanh.f32 %v6024_v7  ;;  %v2699_v25 = vmin.f32 %v6024_v7, 0.0  ;;  %v4237_v59 = vmul.f32 -1.442695, %v6024_v7 }
0x149e   :  { %v2701_v35 = vsub.f32 0.0, %v2700_v40 }
0x14a0   :  { %v2702_v30 = vmul.f32 1.442695, %v2701_v35 }
0x14a2   :  { %v4527_v2 = vpop.eup %4526  ;;  %4528 = vpow2.f32 %v2702_v30 }
0x14a3   :  { %2739 = vrot.lane.b32.xlu1 %v4527_v2, %s4670_s23 }
0x14a8   :  { %v4529_v54 = vpop.eup %4528 }
0x14a9   :  { %v2704_v12 = vadd.f32 1.0, %v4529_v54  ;;  %v2707_v14 = vmul.f32 -0.5, %v4529_v54  ;;  %v2710_v45 = vand.u32 2147483647, %v4529_v54 }
0x14ab   :  { %4530 = vlog2.f32 %v2704_v12  ;;  %v2708_v22 = vadd.f32 1.0, %v2707_v14  ;;  %vm2711_vm9 = vcmp.lt.f32.partialorder %v2710_v45, 0.0004427343 }
0x14ad   :  { %v2709_v61 = vmul.f32 %v4529_v54, %v2708_v22 }
0x14b1   :  { %v4531_v50 = vpop.eup %4530 }
0x14b2   :  { %v2706_v32 = vmul.f32 0.6931472, %v4531_v50 }
0x14b4   :  { %v2712_v63 = vsel %vm2711_vm9, %v2709_v61, %v2706_v32 }
0x14b5   :  { %v2713_v38 = vsub.f32 %v2699_v25, %v2712_v63 }
0x14b7   :  { %v2715_v42 = vrot.slane %v2713_v38, 2 }
0x14b9   :  { %2716 = vrot.lane.b32.xlu2 %v2715_v42, %s4674_s27 }
0x1513   :  { %v2717_v24 = vpop.permute.xlu2 %2716 }
0x1514   :  { %v2719_v6 = vadd.f32 %v2717_v24, %v5993_v56 }
0x1515   :  { %v2740_v46 = vpop.permute.xlu1 %2739 }
0x1516   :  { %v2721_v5 = vrot.slane %v2719_v6, 6 }
0x1518   :  { %v6033_v36 = vmax.f32 %v6024_v7, %v2721_v5 }
0x151a   :  { %v2728_v28 = vrot.slane %v6033_v36, 2  ;;  %v2724_v62 = vsub.f32 %v6024_v7, %v6033_v36 }
0x151c   :  { %v2730_v15 = vsub.f32 %v2719_v6, %v2728_v28  ;;  %v2725_v34 = vmul.f32 1.442695, %v2724_v62 }
0x151e   :  { %v2731_v0 = vmul.f32 1.442695, %v2730_v15  ;;  %4532 = vpow2.f32 %v2725_v34 }
0x1520   :  { %4534 = vpow2.f32 %v2731_v0 }
0x1524   :  { %v4533_v3 = vpop.eup %4532 }
0x1525   :  { %v2752_v56 = vrot.slane %v4533_v3, 2  ;;  %v2742_v31 = vmul.f32 %v4533_v3, %v2740_v46 }
0x1526   :  { %v4535_v51 = vpop.eup %4534 }
0x1527   :  { %v2750_v20 = vmul.f32 %v4535_v51, %v2748_v16  ;;  %v2736_v27 = vmul.f32 %v4535_v51, %v2734_v9  ;;  %v2744_v52 = vrot.slane %v2742_v31, 2 }
0x1529   :  { %v6039_v26 = vadd.f32 %v2752_v56, %v2750_v20  ;;  %v6047_v44 = vadd.f32 %v2744_v52, %v2736_v27 }
0x152b   :  { %4536 = vrcp.f32 %v6039_v26  ;;  %v2785_v23 = vand.u32 2147483648, %v6039_v26  ;;  %v2783_v53 = vand.u32 2147483647, %v6039_v26  ;;  %vm2779_vm12 = vweird.f32 %v6039_v26 }
0x152c   :  { %4538 = vpow2.f32 %v4237_v59 }
0x152d   :  { %v2786_v18 = vor.u32 1.1754944e-38, %v2785_v23  ;;  %vm2784_vm11 = vcmp.eq.f32.partialorder %v2783_v53, 8.507059e+37  ;;  %v2875_v53 = vrot.slane %v6039_v26, 6 }
0x1531   :  { %v4537_v21 = vpop.eup %4536 }
0x1532   :  { %v2775_v19 = vmul.f32 %v4537_v21, %v6039_v26  ;;  %vm2780_vm7 = vweird.f32 %v4537_v21  ;;  %v4539_v1 = vpop.eup %4538 }
0x1533   :  { %vm2781_vm4 = vmor %vm2779_vm12, %vm2780_vm7  ;;  %v2758_v48 = vadd.f32 1.0, %v4539_v1  ;;  %v2861_v1 = vrot.slane %v6047_v44, 6 }
0x1534   :  { %v2776_v37 = vsub.f32 1.0, %v2775_v19 }
0x1535   :  { %4540 = vrcp.f32 %v2758_v48  ;;  %v2770_v2 = vand.u32 2147483648, %v2758_v48  ;;  %vm2764_vm3 = vweird.f32 %v2758_v48  ;;  %v2768_v54 = vand.u32 2147483647, %v2758_v48 }
0x1536   :  { %v2777_v29 = vmul.f32 %v4537_v21, %v2776_v37 }
0x1537   :  { %v2771_v14 = vor.u32 1.1754944e-38, %v2770_v2  ;;  %vm2769_vm15 = vcmp.eq.f32.partialorder %v2768_v54, 8.507059e+37 }
0x1538   :  { %v2778_v33 = vadd.f32 %v4537_v21, %v2777_v29 }
0x153a   :  { %v2782_v10 = vsel %vm2781_vm4, %v4537_v21, %v2778_v33 }
0x153b   :  { %v2787_v41 = vsel %vm2784_vm11, %v2786_v18, %v2782_v10  ;;  %v4541_v49 = vpop.eup %4540 }
0x153c   :  { %v2788_v47 = vmul.f32 %v2787_v41, %v6047_v44  ;;  %v2760_v55 = vmul.f32 %v4541_v49, %v2758_v48  ;;  %vm2765_vm1 = vweird.f32 %v4541_v49 }
0x153d   :  { %vm2766_vm2 = vmor %vm2764_vm3, %vm2765_vm1 }
0x153e   :  { %v2790_v13 = vrot.slane %v2788_v47, 6  ;;  %v2761_v40 = vsub.f32 1.0, %v2760_v55 }
0x1540   :  { %2791 = vrot.lane.b32.xlu0 %v2790_v13, %s4674_s27  ;;  %v2762_v35 = vmul.f32 %v4541_v49, %v2761_v40 }
0x1542   :  { %v2763_v30 = vadd.f32 %v4541_v49, %v2762_v35 }
0x1544   :  { %v2767_v12 = vsel %vm2766_vm2, %v4541_v49, %v2763_v30 }
0x1545   :  { %v2772_v22 = vsel %vm2769_vm15, %v2771_v14, %v2767_v12 }
0x15b2   :  { %v2792_v45 = vpop.permute.xlu0 %2791 }
0x15b3   :  { %v2794_v7 = vmul.f32 %v2792_v45, %v2772_v22 }
0x15b5   :  { %2796 = vrot.lane.b32.xlu2 %v2794_v7, %s4676_s29 }
0x160f   :  { %v2797_v50 = vpop.permute.xlu2 %2796 }
0x1610   :  { %2799 = vst.msk [vmem:[#allocation2 + $0x8] sm:$0x3] %vm2279_vm10, %v2797_v50  ;;  %4238 = vmatmul.msk.f32.vlgmr.msra.gmra.mxu2 %vm84_vm0, %v2797_v50 }
0x1693   :  { %v2819_v32 = vpop.f32.mrf.mxu2 }
0x1694   :  { %v2823_v61 = vrot.slane %v2819_v32, 6 }
0x1696   :  { %v6056_v25 = vadd.f32 %v2823_v61, %v6021_v11 }
0x1698   :  { %v2827_v63 = vand.u32 2147483647, %v6056_v25  ;;  %4542 = vtanh.f32 %v6056_v25  ;;  %v2826_v16 = vmin.f32 %v6056_v25, 0.0  ;;  %v4239_v45 = vmul.f32 -1.442695, %v6056_v25 }
0x169a   :  { %v2828_v38 = vsub.f32 0.0, %v2827_v63 }
0x169c   :  { %v2829_v42 = vmul.f32 1.442695, %v2828_v38 }
0x169e   :  { %v4543_v24 = vpop.eup %4542  ;;  %4544 = vpow2.f32 %v2829_v42 }
0x169f   :  { %2866 = vrot.lane.b32.xlu0 %v4543_v24, %s4670_s23 }
0x16a4   :  { %v4545_v6 = vpop.eup %4544 }
0x16a5   :  { %v2831_v5 = vadd.f32 1.0, %v4545_v6  ;;  %v2834_v28 = vmul.f32 -0.5, %v4545_v6  ;;  %v2837_v15 = vand.u32 2147483647, %v4545_v6 }
0x16a7   :  { %4546 = vlog2.f32 %v2831_v5  ;;  %v2835_v62 = vadd.f32 1.0, %v2834_v28  ;;  %vm2838_vm10 = vcmp.lt.f32.partialorder %v2837_v15, 0.0004427343 }
0x16a9   :  { %v2836_v3 = vmul.f32 %v4545_v6, %v2835_v62 }
0x16ad   :  { %v4547_v34 = vpop.eup %4546 }
0x16ae   :  { %v2833_v0 = vmul.f32 0.6931472, %v4547_v34 }
0x16b0   :  { %v2839_v51 = vsel %vm2838_vm10, %v2836_v3, %v2833_v0 }
0x16b1   :  { %v2840_v20 = vsub.f32 %v2826_v16, %v2839_v51 }
0x16b3   :  { %v2842_v56 = vrot.slane %v2840_v20, 2 }
0x16b5   :  { %2843 = vrot.lane.b32.xlu1 %v2842_v56, %s4674_s27 }
0x1711   :  { %v2867_v47 = vpop.permute.xlu0 %2866 }
0x1727   :  { %v2844_v21 = vpop.permute.xlu1 %2843 }
0x1728   :  { %v2846_v46 = vadd.f32 %v2844_v21, %v6033_v36 }
0x172a   :  { %v2848_v31 = vrot.slane %v2846_v46, 6 }
0x172c   :  { %v6065_v19 = vmax.f32 %v6056_v25, %v2848_v31 }
0x172e   :  { %v2851_v9 = vsub.f32 %v6056_v25, %v6065_v19  ;;  %v2855_v37 = vrot.slane %v6065_v19, 2 }
0x1730   :  { %v2852_v27 = vmul.f32 1.442695, %v2851_v9  ;;  %v2857_v23 = vsub.f32 %v2846_v46, %v2855_v37 }
0x1732   :  { %4548 = vpow2.f32 %v2852_v27  ;;  %v2858_v52 = vmul.f32 1.442695, %v2857_v23 }
0x1734   :  { %4550 = vpow2.f32 %v2858_v52 }
0x1738   :  { %v4549_v29 = vpop.eup %4548 }
0x1739   :  { %v2879_v36 = vrot.slane %v4549_v29, 2  ;;  %v2869_v13 = vmul.f32 %v4549_v29, %v2867_v47 }
0x173a   :  { %v4551_v33 = vpop.eup %4550 }
0x173b   :  { %v2877_v18 = vmul.f32 %v4551_v33, %v2875_v53  ;;  %v2863_v49 = vmul.f32 %v4551_v33, %v2861_v1  ;;  %v2871_v40 = vrot.slane %v2869_v13, 2 }
0x173d   :  { %v6071_v10 = vadd.f32 %v2879_v36, %v2877_v18  ;;  %v6079_v54 = vadd.f32 %v2871_v40, %v2863_v49 }
0x173f   :  { %4552 = vrcp.f32 %v6071_v10  ;;  %v2912_v55 = vand.u32 2147483648, %v6071_v10  ;;  %v2910_v35 = vand.u32 2147483647, %v6071_v10  ;;  %vm2906_vm5 = vweird.f32 %v6071_v10 }
0x1740   :  { %4554 = vpow2.f32 %v4239_v45 }
0x1741   :  { %v2913_v2 = vor.u32 1.1754944e-38, %v2912_v55  ;;  %vm2911_vm7 = vcmp.eq.f32.partialorder %v2910_v35, 8.507059e+37 }
0x1745   :  { %v4553_v41 = vpop.eup %4552 }
0x1746   :  { %v2902_v59 = vmul.f32 %v4553_v41, %v6071_v10  ;;  %vm2907_vm8 = vweird.f32 %v4553_v41  ;;  %v4555_v7 = vpop.eup %4554 }
0x1747   :  { %vm2908_vm9 = vmor %vm2906_vm5, %vm2907_vm8  ;;  %v2885_v50 = vadd.f32 1.0, %v4555_v7 }
0x1748   :  { %v2903_v48 = vsub.f32 1.0, %v2902_v59 }
0x1749   :  { %4556 = vrcp.f32 %v2885_v50  ;;  %v2897_v24 = vand.u32 2147483648, %v2885_v50  ;;  %vm2891_vm4 = vweird.f32 %v2885_v50  ;;  %v2895_v6 = vand.u32 2147483647, %v2885_v50 }
0x174a   :  { %v2904_v26 = vmul.f32 %v4553_v41, %v2903_v48 }
0x174b   :  { %v2898_v28 = vor.u32 1.1754944e-38, %v2897_v24  ;;  %vm2896_vm1 = vcmp.eq.f32.partialorder %v2895_v6, 8.507059e+37 }
0x174c   :  { %v2905_v30 = vadd.f32 %v4553_v41, %v2904_v26 }
0x174e   :  { %v2909_v12 = vsel %vm2908_vm9, %v4553_v41, %v2905_v30  ;;  %v3005_v30 = vrot.slane %v6071_v10, 6 }
0x174f   :  { %v2914_v14 = vsel %vm2911_vm7, %v2913_v2, %v2909_v12  ;;  %v4557_v32 = vpop.eup %4556 }
0x1750   :  { %v2915_v44 = vmul.f32 %v2914_v14, %v6079_v54  ;;  %v2887_v61 = vmul.f32 %v4557_v32, %v2885_v50  ;;  %vm2892_vm12 = vweird.f32 %v4557_v32  ;;  %v2991_v50 = vrot.slane %v6079_v54, 6 }
0x1751   :  { %vm2893_vm11 = vmor %vm2891_vm4, %vm2892_vm12 }
0x1752   :  { %v2917_v22 = vrot.slane %v2915_v44, 6  ;;  %v2888_v63 = vsub.f32 1.0, %v2887_v61 }
0x1754   :  { %2918 = vrot.lane.b32.xlu2 %v2917_v22, %s4674_s27  ;;  %v2889_v38 = vmul.f32 %v4557_v32, %v2888_v63 }
0x1756   :  { %v2890_v42 = vadd.f32 %v4557_v32, %v2889_v38 }
0x1758   :  { %v2894_v5 = vsel %vm2893_vm11, %v4557_v32, %v2890_v42  ;;  %vm2409_vm11 = vcmask 257026  }
0x1759   :  { %v2899_v62 = vsel %vm2896_vm1, %v2898_v28, %v2894_v5  ;;  %vm2540_vm1 = vcmask 259076  }
0x17ae   :  { %v2919_v15 = vpop.permute.xlu2 %2918 }
0x17af   :  { %v6084_v25 = vmul.f32 %v2919_v15, %v2899_v62 }
0x17b1   :  { %v2927_v34 = vrot.slane %v6084_v25, 2 }
0x17b3   :  { %2928 = vrot.lane.b32.xlu1 %v2927_v34, %s4676_s29 }
0x1825   :  { %v2929_v0 = vpop.permute.xlu1 %2928 }
0x1826   :  { %4240 = vmatmul.msk.f32.vlgmr.msra.gmra.mxu3 %vm84_vm0, %v2929_v0 }
0x18a9   :  { %v2949_v3 = vpop.f32.mrf.mxu3 }
0x18aa   :  { %v2953_v16 = vrot.slane %v2949_v3, 4 }
0x18ac   :  { %v6090_v51 = vadd.f32 %v2953_v16, %v6021_v11 }
0x18ae   :  { %v2957_v20 = vand.u32 2147483647, %v6090_v51  ;;  %4558 = vtanh.f32 %v6090_v51  ;;  %v2956_v33 = vmin.f32 %v6090_v51, 0.0  ;;  %v4241_v34 = vmul.f32 -1.442695, %v6090_v51 }
0x18b0   :  { %v2958_v56 = vsub.f32 0.0, %v2957_v20 }
0x18b2   :  { %v2959_v21 = vmul.f32 1.442695, %v2958_v56 }
0x18b4   :  { %v4559_v46 = vpop.eup %4558  ;;  %4560 = vpow2.f32 %v2959_v21 }
0x18b5   :  { %2996 = vrot.lane.b32.xlu2 %v4559_v46, %s4670_s23 }
0x18ba   :  { %v4561_v31 = vpop.eup %4560 }
0x18bb   :  { %v2961_v9 = vadd.f32 1.0, %v4561_v31  ;;  %v2964_v37 = vmul.f32 -0.5, %v4561_v31  ;;  %v2967_v23 = vand.u32 2147483647, %v4561_v31 }
0x18bd   :  { %4562 = vlog2.f32 %v2961_v9  ;;  %v2965_v27 = vadd.f32 1.0, %v2964_v37  ;;  %vm2968_vm3 = vcmp.lt.f32.partialorder %v2967_v23, 0.0004427343 }
0x18bf   :  { %v2966_v53 = vmul.f32 %v4561_v31, %v2965_v27 }
0x18c3   :  { %v4563_v52 = vpop.eup %4562 }
0x18c4   :  { %v2963_v29 = vmul.f32 0.6931472, %v4563_v52 }
0x18c6   :  { %v2969_v18 = vsel %vm2968_vm3, %v2966_v53, %v2963_v29 }
0x18c7   :  { %v2970_v36 = vsub.f32 %v2956_v33, %v2969_v18 }
0x18c9   :  { %v2972_v41 = vrot.slane %v2970_v36, 2 }
0x18cb   :  { %2973 = vrot.lane.b32.xlu0 %v2972_v41, %s4674_s27 }
0x190f   :  { %v2997_v22 = vpop.permute.xlu2 %2996 }
0x193d   :  { %v2974_v47 = vpop.permute.xlu0 %2973 }
0x193e   :  { %v2976_v13 = vadd.f32 %v2974_v47, %v6065_v19 }
0x1940   :  { %v2978_v59 = vrot.slane %v2976_v13, 6 }
0x1942   :  { %v6099_v1 = vmax.f32 %v6090_v51, %v2978_v59 }
0x1944   :  { %v2981_v48 = vsub.f32 %v6090_v51, %v6099_v1  ;;  %v2985_v49 = vrot.slane %v6099_v1, 2 }
0x1946   :  { %v2982_v55 = vmul.f32 1.442695, %v2981_v48  ;;  %v2987_v40 = vsub.f32 %v2976_v13, %v2985_v49 }
0x1948   :  { %4564 = vpow2.f32 %v2982_v55  ;;  %v2988_v26 = vmul.f32 1.442695, %v2987_v40 }
0x194a   :  { %4566 = vpow2.f32 %v2988_v26 }
0x194e   :  { %v4565_v35 = vpop.eup %4564 }
0x194f   :  { %v3009_v19 = vrot.slane %v4565_v35, 2  ;;  %v2999_v45 = vmul.f32 %v4565_v35, %v2997_v22 }
0x1950   :  { %v4567_v2 = vpop.eup %4566 }
0x1951   :  { %v3007_v12 = vmul.f32 %v4567_v2, %v3005_v30  ;;  %v2993_v61 = vmul.f32 %v4567_v2, %v2991_v50  ;;  %v3001_v38 = vrot.slane %v2999_v45, 2 }
0x1953   :  { %v6105_v14 = vadd.f32 %v3009_v19, %v3007_v12  ;;  %v6113_v5 = vadd.f32 %v3001_v38, %v2993_v61 }
0x1955   :  { %4568 = vrcp.f32 %v6105_v14  ;;  %v3042_v63 = vand.u32 2147483648, %v6105_v14  ;;  %v3040_v42 = vand.u32 2147483647, %v6105_v14  ;;  %vm3036_vm15 = vweird.f32 %v6105_v14 }
0x1956   :  { %4570 = vpow2.f32 %v4241_v34 }
0x1957   :  { %v3043_v6 = vor.u32 1.1754944e-38, %v3042_v63  ;;  %vm3041_vm8 = vcmp.eq.f32.partialorder %v3040_v42, 8.507059e+37 }
0x195b   :  { %v4569_v44 = vpop.eup %4568 }
0x195c   :  { %v3032_v7 = vmul.f32 %v4569_v44, %v6105_v14  ;;  %vm3037_vm2 = vweird.f32 %v4569_v44  ;;  %v4571_v0 = vpop.eup %4570 }
0x195d   :  { %vm3038_vm10 = vmor %vm3036_vm15, %vm3037_vm2  ;;  %v3015_v3 = vadd.f32 1.0, %v4571_v0 }
0x195e   :  { %v3033_v32 = vsub.f32 1.0, %v3032_v7 }
0x195f   :  { %4572 = vrcp.f32 %v3015_v3  ;;  %v3027_v31 = vand.u32 2147483648, %v3015_v3  ;;  %vm3021_vm9 = vweird.f32 %v3015_v3  ;;  %v3025_v9 = vand.u32 2147483647, %v3015_v3 }
0x1960   :  { %v3034_v10 = vmul.f32 %v4569_v44, %v3033_v32 }
0x1961   :  { %v3028_v27 = vor.u32 1.1754944e-38, %v3027_v31  ;;  %vm3026_vm12 = vcmp.eq.f32.partialorder %v3025_v9, 8.507059e+37 }
0x1962   :  { %v3035_v24 = vadd.f32 %v4569_v44, %v3034_v10 }
0x1964   :  { %v3039_v28 = vsel %vm3038_vm10, %v4569_v44, %v3035_v24  ;;  %v3135_v24 = vrot.slane %v6105_v14, 6 }
0x1965   :  { %v3044_v62 = vsel %vm3041_vm8, %v3043_v6, %v3039_v28  ;;  %v4573_v16 = vpop.eup %4572 }
0x1966   :  { %v3045_v54 = vmul.f32 %v3044_v62, %v6113_v5  ;;  %v3017_v20 = vmul.f32 %v4573_v16, %v3015_v3  ;;  %vm3022_vm5 = vweird.f32 %v4573_v16 }
0x1967   :  { %vm3023_vm7 = vmor %vm3021_vm9, %vm3022_vm5 }
0x1968   :  { %v3047_v15 = vrot.slane %v3045_v54, 6  ;;  %v3018_v56 = vsub.f32 1.0, %v3017_v20 }
0x196a   :  { %3048 = vrot.lane.b32.xlu1 %v3047_v15, %s4674_s27  ;;  %v3019_v21 = vmul.f32 %v4573_v16, %v3018_v56 }
0x196c   :  { %v3020_v46 = vadd.f32 %v4573_v16, %v3019_v21 }
0x196e   :  { %v3024_v37 = vsel %vm3023_vm7, %v4573_v16, %v3020_v46  ;;  %v3121_v16 = vrot.slane %v6113_v5, 6 }
0x196f   :  { %v3029_v23 = vsel %vm3026_vm12, %v3028_v27, %v3024_v37  ;;  %vm2671_vm12 = vcmask 261126  }
0x19dc   :  { %v3049_v52 = vpop.permute.xlu1 %3048 }
0x19dd   :  { %v3051_v51 = vmul.f32 %v3049_v52, %v3029_v23 }
0x19df   :  { %v3057_v29 = vrot.slane %v3051_v51, 4 }
0x19e1   :  { %3058 = vrot.lane.b32.xlu0 %v3057_v29, %s4676_s29 }
0x1a53   :  { %v3059_v53 = vpop.permute.xlu0 %3058 }
0x1a54   :  { %4242 = vmatmul.msk.f32.vlgmr.msra.gmra.mxu0 %vm84_vm0, %v3059_v53 }
0x1ad1   :  { %v3079_v33 = vpop.f32.mrf.mxu0 }
0x1ad2   :  { %v3083_v18 = vrot.slane %v3079_v33, 2 }
0x1ad4   :  { %v6121_v36 = vadd.f32 %v3083_v18, %v6021_v11 }
0x1ad6   :  { %v3087_v41 = vand.u32 2147483647, %v6121_v36  ;;  %4574 = vtanh.f32 %v6121_v36  ;;  %v3086_v2 = vmin.f32 %v6121_v36, 0.0  ;;  %v4243_v5 = vmul.f32 -1.442695, %v6121_v36 }
0x1ad8   :  { %v3088_v47 = vsub.f32 0.0, %v3087_v41 }
0x1ada   :  { %v3089_v13 = vmul.f32 1.442695, %v3088_v47 }
0x1adc   :  { %v4575_v59 = vpop.eup %4574  ;;  %4576 = vpow2.f32 %v3089_v13 }
0x1add   :  { %3126 = vrot.lane.b32.xlu1 %v4575_v59, %s4670_s23 }
0x1ae2   :  { %v4577_v48 = vpop.eup %4576 }
0x1ae3   :  { %v3091_v49 = vadd.f32 1.0, %v4577_v48  ;;  %v3094_v55 = vmul.f32 -0.5, %v4577_v48  ;;  %v3097_v11 = vand.u32 2147483647, %v4577_v48 }
0x1ae5   :  { %2537 = vrot.lane.b32.xlu1 %v5975_v4, %s4676_s29  ;;  %4578 = vlog2.f32 %v3091_v49  ;;  %v3095_v40 = vadd.f32 1.0, %v3094_v55  ;;  %vm3098_vm4 = vcmp.lt.f32.partialorder %v3097_v11, 0.0004427343 }
0x1ae7   :  { %v3096_v30 = vmul.f32 %v4577_v48, %v3095_v40 }
0x1aeb   :  { %v4579_v26 = vpop.eup %4578 }
0x1aec   :  { %v3093_v35 = vmul.f32 0.6931472, %v4579_v26 }
0x1aed   :  { %3053 = vrot.lane.b32.xlu1 %v3051_v51, %s4676_s29 }
0x1aee   :  { %v3099_v12 = vsel %vm3098_vm4, %v3096_v30, %v3093_v35  ;;  %vm3322_vm4 = vcmask 60416  }
0x1aef   :  { %v3100_v19 = vsub.f32 %v3086_v2, %v3099_v12 }
0x1af1   :  { %v3102_v44 = vrot.slane %v3100_v19, 2 }
0x1af3   :  { %3103 = vrot.lane.b32.xlu2 %v3102_v44, %s4674_s27 }
0x1afb   :  { %2406 = vrot.lane.b32.xlu2 %v5941_v60, %s4676_s29 }
0x1b03   :  { %2923 = vrot.lane.b32.xlu2 %v6084_v25, %s4676_s29 }
0x1b4d   :  { %v3104_v4 = vpop.permute.xlu2 %3103 }
0x1b4e   :  { %v3106_v22 = vadd.f32 %v3104_v4, %v6099_v1 }
0x1b4f   :  { %v3127_v45 = vpop.permute.xlu1 %3126 }
0x1b50   :  { %v3108_v7 = vrot.slane %v3106_v22, 6 }
0x1b52   :  { %v3110_v50 = vmax.f32 %v6121_v36, %v3108_v7 }
0x1b54   :  { %v3111_v32 = vsub.f32 %v6121_v36, %v3110_v50  ;;  %v3115_v61 = vrot.slane %v3110_v50, 2 }
0x1b55   :  { %v2407_v63 = vpop.permute.xlu2 %2406 }
0x1b56   :  { %v3112_v38 = vmul.f32 1.442695, %v3111_v32  ;;  %v3117_v10 = vsub.f32 %v3106_v22, %v3115_v61  ;;  %2410 = vst.msk [vmem:[#allocation2] sm:$0xc] %vm2409_vm11, %v2407_v63 }
0x1b57   :  { %v2538_v60 = vpop.permute.xlu1 %2537 }
0x1b58   :  { %v3118_v42 = vmul.f32 1.442695, %v3117_v10  ;;  %4580 = vpow2.f32 %v3112_v38  ;;  %2541 = vst.msk [vmem:[#allocation2] sm:$0x30] %vm2540_vm1, %v2538_v60 }
0x1b5a   :  { %4582 = vpow2.f32 %v3118_v42 }
0x1b5d   :  { %v2924_v25 = vpop.permute.xlu2 %2923 }
0x1b5e   :  { %v4581_v1 = vpop.eup %4580  ;;  %2926 = vst.msk [vmem:[#allocation2 + $0x8] sm:$0xc] %vm2409_vm11, %v2924_v25 }
0x1b5f   :  { %v3054_v6 = vpop.permute.xlu1 %3053  ;;  %v3139_v54 = vrot.slane %v4581_v1, 2  ;;  %v3129_v0 = vmul.f32 %v4581_v1, %v3127_v45 }
0x1b60   :  { %v4583_v28 = vpop.eup %4582  ;;  %3056 = vst.msk [vmem:[#allocation2 + $0x8] sm:$0x30] %vm2540_vm1, %v3054_v6 }
0x1b61   :  { %v3137_v62 = vmul.f32 %v4583_v28, %v3135_v24  ;;  %v3123_v56 = vmul.f32 %v4583_v28, %v3121_v16  ;;  %v3131_v46 = vrot.slane %v3129_v0, 2 }
0x1b63   :  { %v3141_v15 = vadd.f32 %v3139_v54, %v3137_v62  ;;  %v3133_v27 = vadd.f32 %v3131_v46, %v3123_v56 }
0x1b65   :  { %4584 = vrcp.f32 %v3141_v15  ;;  %v3172_v21 = vand.u32 2147483648, %v3141_v15  ;;  %v3170_v9 = vand.u32 2147483647, %v3141_v15  ;;  %vm3166_vm2 = vweird.f32 %v3141_v15 }
0x1b66   :  { %4586 = vpow2.f32 %v4243_v5 }
0x1b67   :  { %v3173_v37 = vor.u32 1.1754944e-38, %v3172_v21  ;;  %vm3171_vm10 = vcmp.eq.f32.partialorder %v3170_v9, 8.507059e+37 }
0x1b6b   :  { %v4585_v34 = vpop.eup %4584 }
0x1b6c   :  { %v3162_v3 = vmul.f32 %v4585_v34, %v3141_v15  ;;  %vm3167_vm3 = vweird.f32 %v4585_v34  ;;  %v4587_v53 = vpop.eup %4586 }
0x1b6d   :  { %vm3168_vm15 = vmor %vm3166_vm2, %vm3167_vm3  ;;  %v3145_v33 = vadd.f32 1.0, %v4587_v53 }
0x1b6e   :  { %v3163_v20 = vsub.f32 1.0, %v3162_v3 }
0x1b6f   :  { %4588 = vrcp.f32 %v3145_v33  ;;  %v3157_v48 = vand.u32 2147483648, %v3145_v33  ;;  %vm3151_vm5 = vweird.f32 %v3145_v33  ;;  %v3155_v49 = vand.u32 2147483647, %v3145_v33 }
0x1b70   :  { %v3164_v31 = vmul.f32 %v4585_v34, %v3163_v20 }
0x1b71   :  { %v3158_v40 = vor.u32 1.1754944e-38, %v3157_v48  ;;  %vm3156_vm7 = vcmp.eq.f32.partialorder %v3155_v49, 8.507059e+37 }
0x1b72   :  { %v3165_v14 = vadd.f32 %v4585_v34, %v3164_v31 }
0x1b74   :  { %v3169_v23 = vsel %vm3168_vm15, %v4585_v34, %v3165_v14 }
0x1b75   :  { %v3174_v52 = vsel %vm3171_vm10, %v3173_v37, %v3169_v23  ;;  %v4589_v18 = vpop.eup %4588 }
0x1b76   :  { %v3175_v51 = vmul.f32 %v3174_v52, %v3133_v27  ;;  %v3147_v41 = vmul.f32 %v4589_v18, %v3145_v33  ;;  %vm3152_vm8 = vweird.f32 %v4589_v18 }
0x1b77   :  { %vm3153_vm9 = vmor %vm3151_vm5, %vm3152_vm8 }
0x1b78   :  { %v3177_v29 = vrot.slane %v3175_v51, 6  ;;  %v3148_v47 = vsub.f32 1.0, %v3147_v41 }
0x1b7a   :  { %3178 = vrot.lane.b32.xlu0 %v3177_v29, %s4674_s27  ;;  %v3149_v13 = vmul.f32 %v4589_v18, %v3148_v47 }
0x1b7c   :  { %v3150_v59 = vadd.f32 %v4589_v18, %v3149_v13 }
0x1b7e   :  { %v3154_v55 = vsel %vm3153_vm9, %v4589_v18, %v3150_v59 }
0x1b82   :  { %2668 = vrot.lane.b32.xlu0 %v6015_v8, %s4676_s29  ;;  %v3159_v8 = vsel %vm3156_vm7, %v3158_v40, %v3154_v55 }
0x1bec   :  { %v3179_v11 = vpop.permute.xlu0 %3178 }
0x1bed   :  { %v3181_v36 = vmul.f32 %v3179_v11, %v3159_v8 }
0x1bef   :  { %3183 = vrot.lane.b32.xlu0 %v3181_v36, %s4676_s29 }
0x1bf4   :  { %v2669_v26 = vpop.permute.xlu0 %2668 }
0x1bf5   :  { %2672 = vst.msk [vmem:[#allocation2] sm:$0xc0] %vm2671_vm12, %v2669_v26 }
0x1bfc   :  { %v3187_v35 = vld [vmem:[#allocation2] sm:$0xff] }
0x1bfd   :  { %3192 = vrot.lane.b32.xlu0 %v3187_v35, %s4686_s3  ;;  %3204 = vrot.lane.b32.xlu1 %v3187_v35, %s4687_s4  ;;  %v3212_v63 = vrot.slane %v3187_v35, 4 }
0x1bfe   :  { %3198 = vrot.lane.b32.xlu2 %v3187_v35, %s4671_s24 }
0x1c58   :  { %v3199_v19 = vpop.permute.xlu2 %3198 }
0x1c59   :  { %v3210_v4 = vrot.slane %v3199_v19, 4  ;;  %v3213_v60 = vsel %vm1270_vm13, %v3199_v19, %v3212_v63 }
0x1c5a   :  { %v3221_v24 = vperm.slane %v3213_v60, %v5151_v39 }
0x1c5b   :  { %v3211_v7 = vsel %vm1270_vm13, %v3210_v4, %v3187_v35 }
0x1c5c   :  { %v3217_v32 = vperm.slane %v3211_v7, %v5151_v39  ;;  %v3248_v54 = vrot.slane %v3221_v24, 4 }
0x1c5e   :  { %v3236_v10 = vrot.slane %v3217_v32, 4 }
0x1c61   :  { %v3184_v30 = vpop.permute.xlu0 %3183 }
0x1c62   :  { %3186 = vst.msk [vmem:[#allocation2 + $0x8] sm:$0xc0] %vm2671_vm12, %v3184_v30 }
0x1c69   :  { %v3188_v2 = vld [vmem:[#allocation2 + $0x8] sm:$0xff] }
0x1c6a   :  { %3194 = vrot.lane.b32.xlu0 %v3188_v2, %s4686_s3  ;;  %3206 = vrot.lane.b32.xlu1 %v3188_v2, %s4687_s4  ;;  %v3268_v47 = vrot.slane %v3188_v2, 4 }
0x1c6b   :  { %3200 = vrot.lane.b32.xlu2 %v3188_v2, %s4671_s24 }
0x1c6f   :  { %v3205_v12 = vpop.permute.xlu1 %3204  ;;  %v3193_v22 = vpop.permute.xlu0 %3192 }
0x1c70   :  { %v3222_v44 = vrot.slane %v3205_v12, 4  ;;  %v3224_v38 = vrot.slane %v3193_v22, 4 }
0x1c72   :  { %v3223_v45 = vsel %vm1270_vm13, %v3222_v44, %v3193_v22  ;;  %v3225_v1 = vsel %vm1270_vm13, %v3205_v12, %v3224_v38 }
0x1c73   :  { %v3229_v50 = vperm.slane %v3223_v45, %v5151_v39  ;;  %v3233_v62 = vperm.slane %v3225_v1, %v5151_v39 }
0x1c75   :  { %v3234_v61 = vrot.slane %v3229_v50, 4  ;;  %v3237_v42 = vsel %vm1270_vm13, %v3229_v50, %v3236_v10  ;;  %v3249_v0 = vsel %vm1270_vm13, %v3233_v62, %v3248_v54  ;;  %v3246_v3 = vrot.slane %v3233_v62, 4 }
0x1c76   :  { %v6157_v6 = vperm.slane %v3237_v42, %v5158_v57  ;;  %v6173_v56 = vperm.slane %v3249_v0, %v5158_v57 }
0x1c77   :  { %v3235_v25 = vsel %vm1270_vm13, %v3234_v61, %v3217_v32  ;;  %v3247_v9 = vsel %vm1270_vm13, %v3246_v3, %v3221_v24 }
0x1c78   :  { %v6160_v28 = vperm.slane %v3235_v25, %v5158_v57  ;;  %v3260_v15 = vrot.slane %v6157_v6, 4  ;;  %v3341_v31 = vsel %vm3322_vm4, %v6173_v56, 0.0  ;;  %v3264_v14 = vrot.slane %v6173_v56, 4 }
0x1c79   :  { %v6184_v37 = vperm.slane %v3247_v9, %v5158_v57  ;;  %v3329_v23 = vsel %vm3322_vm4, %v6157_v6, 0.0 }
0x1c7a   :  { %v3258_v34 = vrot.slane %v6160_v28, 4  ;;  %v6167_v16 = vsel %vm1270_vm13, 0.0, %v3260_v15  ;;  %v6187_v27 = vsel %vm1270_vm13, 0.0, %v3264_v14  ;;  %v3323_v53 = vsel %vm3322_vm4, %v6160_v28, 0.0 }
0x1c7b   :  { %v3332_v21 = vsel %vm3322_vm4, %v6167_v16, 0.0  ;;  %v3335_v52 = vsel %vm3322_vm4, %v6184_v37, 0.0  ;;  %v3344_v51 = vsel %vm3322_vm4, %v6187_v27, 0.0  ;;  %v3262_v29 = vrot.slane %v6184_v37, 4 }
0x1c7c   :  { %v6170_v20 = vsel %vm1270_vm13, 0.0, %v3258_v34  ;;  %v4688_v15 = vmov 8.0  }
0x1c7d   :  { %v3326_v46 = vsel %vm3322_vm4, %v6170_v20, 0.0  ;;  %v6197_v5 = vsel %vm1270_vm13, 0.0, %v3262_v29  ;;  %4590 = vrcp.f32 %v4688_v15 }
0x1c7e   :  { %v3338_v33 = vsel %vm3322_vm4, %v6197_v5, 0.0 }
0x1c94   :  { %3333 = vadd.xlane.f32.xlu2 %v3332_v21  ;;  %3327 = vadd.xlane.f32.xlu0 %v3326_v46  ;;  %v4591_v21 = vpop.eup %4590 }
0x1c95   :  { %3342 = vadd.xlane.f32.xlu1 %v3341_v31  ;;  %vm3376_vm11 = vweird.f32 %v4591_v21 }
0x1c9c   :  { %3330 = vadd.xlane.f32.xlu2 %v3329_v23  ;;  %3336 = vadd.xlane.f32.xlu0 %v3335_v52  ;;  %v3372_v23 = vmul.f32 8.0, %v4591_v21 }
0x1c9d   :  { %3345 = vadd.xlane.f32.xlu1 %v3344_v51 }
0x1c9e   :  { %v3373_v52 = vsub.f32 1.0, %v3372_v23 }
0x1ca0   :  { %v3374_v51 = vmul.f32 %v4591_v21, %v3373_v52 }
0x1ca2   :  { %v3375_v29 = vadd.f32 %v4591_v21, %v3374_v51 }
0x1ca4   :  { %3324 = vadd.xlane.f32.xlu2 %v3323_v53  ;;  %v6259_v53 = vsel %vm3376_vm11, %v4591_v21, %v3375_v29 }
0x1ca5   :  { %3339 = vadd.xlane.f32.xlu1 %v3338_v33 }
0x1cc5   :  { %v3201_v18 = vpop.permute.xlu2 %3200 }
0x1cc6   :  { %v3266_v41 = vrot.slane %v3201_v18, 4  ;;  %v3269_v59 = vsel %vm1270_vm13, %v3201_v18, %v3268_v47 }
0x1cc7   :  { %v3277_v49 = vperm.slane %v3269_v59, %v5151_v39 }
0x1cc8   :  { %v3267_v13 = vsel %vm1270_vm13, %v3266_v41, %v3188_v2 }
0x1cc9   :  { %v3273_v48 = vperm.slane %v3267_v13, %v5151_v39  ;;  %v3304_v30 = vrot.slane %v3277_v49, 4 }
0x1ccb   :  { %v3292_v35 = vrot.slane %v3273_v48, 4 }
0x1cdc   :  { %v3195_v55 = vpop.permute.xlu0 %3194  ;;  %v3207_v40 = vpop.permute.xlu1 %3206 }
0x1cdd   :  { %v3280_v8 = vrot.slane %v3195_v55, 4  ;;  %v3278_v11 = vrot.slane %v3207_v40, 4 }
0x1cdf   :  { %v3279_v36 = vsel %vm1270_vm13, %v3278_v11, %v3195_v55  ;;  %v3281_v26 = vsel %vm1270_vm13, %v3207_v40, %v3280_v8 }
0x1ce0   :  { %v3285_v12 = vperm.slane %v3279_v36, %v5151_v39  ;;  %v3289_v2 = vperm.slane %v3281_v26, %v5151_v39 }
0x1ce2   :  { %v3290_v19 = vrot.slane %v3285_v12, 4  ;;  %v3293_v44 = vsel %vm1270_vm13, %v3285_v12, %v3292_v35  ;;  %v3305_v4 = vsel %vm1270_vm13, %v3289_v2, %v3304_v30  ;;  %v3302_v22 = vrot.slane %v3289_v2, 4 }
0x1ce3   :  { %v6214_v45 = vperm.slane %v3293_v44, %v5158_v57  ;;  %v6217_v7 = vperm.slane %v3305_v4, %v5158_v57 }
0x1ce4   :  { %v3291_v50 = vsel %vm1270_vm13, %v3290_v19, %v3273_v48  ;;  %v3303_v42 = vsel %vm1270_vm13, %v3302_v22, %v3277_v49 }
0x1ce5   :  { %v3353_v32 = vsel %vm3322_vm4, %v6214_v45, 0.0  ;;  %v3365_v61 = vsel %vm3322_vm4, %v6217_v7, 0.0  ;;  %v6225_v63 = vperm.slane %v3291_v50, %v5158_v57  ;;  %v3316_v38 = vrot.slane %v6214_v45, 4 }
0x1ce6   :  { %3354 = vadd.xlane.f32.xlu0 %v3353_v32  ;;  %3366 = vadd.xlane.f32.xlu2 %v3365_v61  ;;  %v3320_v10 = vrot.slane %v6217_v7, 4  ;;  %v6243_v54 = vperm.slane %v3303_v42, %v5158_v57 }
0x1ce7   :  { %v3314_v60 = vrot.slane %v6225_v63, 4  ;;  %v6237_v24 = vsel %vm1270_vm13, 0.0, %v3316_v38  ;;  %v3347_v9 = vsel %vm3322_vm4, %v6225_v63, 0.0 }
0x1ce8   :  { %v6240_v62 = vsel %vm1270_vm13, 0.0, %v3320_v10  ;;  %v3356_v34 = vsel %vm3322_vm4, %v6237_v24, 0.0  ;;  %v3318_v3 = vrot.slane %v6243_v54, 4  ;;  %v3359_v46 = vsel %vm3322_vm4, %v6243_v54, 0.0 }
0x1ce9   :  { %v6232_v25 = vsel %vm1270_vm13, 0.0, %v3314_v60  ;;  %v3368_v0 = vsel %vm3322_vm4, %v6240_v62, 0.0 }
0x1cea   :  { %v3350_v1 = vsel %vm3322_vm4, %v6232_v25, 0.0  ;;  %v6253_v31 = vsel %vm1270_vm13, 0.0, %v3318_v3 }
0x1ceb   :  { %3351 = vadd.xlane.f32.xlu1 %v3350_v1  ;;  %v3362_v14 = vsel %vm3322_vm4, %v6253_v31, 0.0 }
0x1cee   :  { %3357 = vadd.xlane.f32.xlu0 %v3356_v34  ;;  %3369 = vadd.xlane.f32.xlu2 %v3368_v0 }
0x1cf3   :  { %3360 = vadd.xlane.f32.xlu1 %v3359_v46 }
0x1cf6   :  { %3348 = vadd.xlane.f32.xlu0 %v3347_v9  ;;  %3363 = vadd.xlane.f32.xlu2 %v3362_v14 }
0x1d07   :  { %v3334_v33 = vpop.xlane.xlu2 %3333  ;;  %v3328_v18 = vpop.xlane.xlu0 %3327 }
0x1d08   :  { %v3381_v41 = vmul.f32 %v6259_v53, %v3334_v33  ;;  %v3379_v47 = vmul.f32 %v6259_v53, %v3328_v18  ;;  %v3343_v13 = vpop.xlane.xlu1 %3342 }
0x1d09   :  { %v3384_v59 = vmul.f32 %v6259_v53, %v3343_v13 }
0x1d0a   :  { %v6265_v48 = vsub.f32 %v6167_v16, %v3381_v41  ;;  %v6268_v49 = vsub.f32 %v6170_v20, %v3379_v47 }
0x1d0b   :  { %v6271_v55 = vsub.f32 %v6173_v56, %v3384_v59 }
0x1d0c   :  { %v3413_v40 = vmul.f32 %v6265_v48, %v6265_v48  ;;  %v3411_v8 = vmul.f32 %v6268_v49, %v6268_v49 }
0x1d0d   :  { %v3416_v11 = vmul.f32 %v6271_v55, %v6271_v55 }
0x1d0e   :  { %v3435_v36 = vsel %vm3322_vm4, %v3413_v40, 0.0  ;;  %v3429_v16 = vsel %vm3322_vm4, %v3411_v8, 0.0 }
0x1d0f   :  { %v3331_v26 = vpop.xlane.xlu2 %3330  ;;  %3436 = vadd.xlane.f32.xlu1 %v3435_v36  ;;  %v3337_v20 = vpop.xlane.xlu0 %3336  ;;  %v3444_v35 = vsel %vm3322_vm4, %v3416_v11, 0.0  ;;  %3430 = vadd.xlane.f32.xlu2 %v3429_v16 }
0x1d10   :  { %v3380_v56 = vmul.f32 %v6259_v53, %v3331_v26  ;;  %v3382_v30 = vmul.f32 %v6259_v53, %v3337_v20  ;;  %v3346_v12 = vpop.xlane.xlu1 %3345  ;;  %3445 = vadd.xlane.f32.xlu0 %v3444_v35 }
0x1d11   :  { %v3385_v2 = vmul.f32 %v6259_v53, %v3346_v12 }
0x1d12   :  { %v6286_v19 = vsub.f32 %v6157_v6, %v3380_v56  ;;  %v6289_v44 = vsub.f32 %v6184_v37, %v3382_v30 }
0x1d13   :  { %v6292_v4 = vsub.f32 %v6187_v27, %v3385_v2 }
0x1d14   :  { %v3412_v22 = vmul.f32 %v6286_v19, %v6286_v19  ;;  %v3414_v50 = vmul.f32 %v6289_v44, %v6289_v44 }
0x1d15   :  { %v3417_v32 = vmul.f32 %v6292_v4, %v6292_v4 }
0x1d16   :  { %v3432_v61 = vsel %vm3322_vm4, %v3412_v22, 0.0  ;;  %v3438_v6 = vsel %vm3322_vm4, %v3414_v50, 0.0 }
0x1d17   :  { %v3325_v38 = vpop.xlane.xlu2 %3324  ;;  %3433 = vadd.xlane.f32.xlu1 %v3432_v61  ;;  %v3447_v37 = vsel %vm3322_vm4, %v3417_v32, 0.0  ;;  %3439 = vadd.xlane.f32.xlu2 %v3438_v6 }
0x1d18   :  { %v3378_v27 = vmul.f32 %v6259_v53, %v3325_v38  ;;  %v3340_v10 = vpop.xlane.xlu1 %3339  ;;  %3448 = vadd.xlane.f32.xlu0 %v3447_v37 }
0x1d19   :  { %v3383_v60 = vmul.f32 %v6259_v53, %v3340_v10 }
0x1d1a   :  { %v6306_v42 = vsub.f32 %v6160_v28, %v3378_v27 }
0x1d1b   :  { %v6309_v1 = vsub.f32 %v6197_v5, %v3383_v60 }
0x1d1c   :  { %v3410_v15 = vmul.f32 %v6306_v42, %v6306_v42 }
0x1d1d   :  { %v3415_v34 = vmul.f32 %v6309_v1, %v6309_v1 }
0x1d1e   :  { %v3426_v0 = vsel %vm3322_vm4, %v3410_v15, 0.0 }
0x1d1f   :  { %3427 = vadd.xlane.f32.xlu1 %v3426_v0  ;;  %v3441_v3 = vsel %vm3322_vm4, %v3415_v34, 0.0 }
0x1d20   :  { %3442 = vadd.xlane.f32.xlu0 %v3441_v3 }
0x1d59   :  { %v3355_v21 = vpop.xlane.xlu0 %3354  ;;  %v3367_v46 = vpop.xlane.xlu2 %3366 }
0x1d5a   :  { %v3388_v28 = vmul.f32 %v6259_v53, %v3355_v21  ;;  %v3392_v9 = vmul.f32 %v6259_v53, %v3367_v46 }
0x1d5c   :  { %v6320_v5 = vsub.f32 %v6214_v45, %v3388_v28  ;;  %v6323_v14 = vsub.f32 %v6217_v7, %v3392_v9 }
0x1d5e   :  { %v3352_v23 = vpop.xlane.xlu1 %3351  ;;  %v3424_v52 = vmul.f32 %v6323_v14, %v6323_v14  ;;  %v3420_v51 = vmul.f32 %v6320_v5, %v6320_v5 }
0x1d5f   :  { %v3387_v29 = vmul.f32 %v6259_v53, %v3352_v23 }
0x1d60   :  { %v3468_v33 = vsel %vm3322_vm4, %v3424_v52, 0.0  ;;  %v3456_v18 = vsel %vm3322_vm4, %v3420_v51, 0.0 }
0x1d61   :  { %v6333_v41 = vsub.f32 %v6232_v25, %v3387_v29  ;;  %v3358_v45 = vpop.xlane.xlu0 %3357  ;;  %v3370_v47 = vpop.xlane.xlu2 %3369  ;;  %3469 = vadd.xlane.f32.xlu1 %v3468_v33  ;;  %3457 = vadd.xlane.f32.xlu2 %v3456_v18 }
0x1d62   :  { %v3389_v7 = vmul.f32 %v6259_v53, %v3358_v45  ;;  %v3393_v13 = vmul.f32 %v6259_v53, %v3370_v47 }
0x1d63   :  { %v3419_v59 = vmul.f32 %v6333_v41, %v6333_v41 }
0x1d64   :  { %v6340_v40 = vsub.f32 %v6237_v24, %v3389_v7  ;;  %v6343_v8 = vsub.f32 %v6240_v62, %v3393_v13 }
0x1d65   :  { %v3453_v25 = vsel %vm3322_vm4, %v3419_v59, 0.0 }
0x1d66   :  { %3454 = vadd.xlane.f32.xlu0 %v3453_v25  ;;  %v3361_v11 = vpop.xlane.xlu1 %3360  ;;  %v3425_v36 = vmul.f32 %v6343_v8, %v6343_v8  ;;  %v3421_v16 = vmul.f32 %v6340_v40, %v6340_v40 }
0x1d67   :  { %v3390_v26 = vmul.f32 %v6259_v53, %v3361_v11 }
0x1d68   :  { %v3471_v20 = vsel %vm3322_vm4, %v3425_v36, 0.0  ;;  %v3459_v24 = vsel %vm3322_vm4, %v3421_v16, 0.0 }
0x1d69   :  { %v6354_v35 = vsub.f32 %v6243_v54, %v3390_v26  ;;  %v3349_v62 = vpop.xlane.xlu0 %3348  ;;  %3472 = vadd.xlane.f32.xlu1 %v3471_v20  ;;  %3460 = vadd.xlane.f32.xlu2 %v3459_v24  ;;  %v3364_v56 = vpop.xlane.xlu2 %3363 }
0x1d6a   :  { %v3386_v30 = vmul.f32 %v6259_v53, %v3349_v62  ;;  %v3391_v12 = vmul.f32 %v6259_v53, %v3364_v56 }
0x1d6b   :  { %v3422_v2 = vmul.f32 %v6354_v35, %v6354_v35 }
0x1d6c   :  { %v6361_v22 = vsub.f32 %v6225_v63, %v3386_v30  ;;  %v6364_v50 = vsub.f32 %v6253_v31, %v3391_v12 }
0x1d6d   :  { %v3462_v54 = vsel %vm3322_vm4, %v3422_v2, 0.0 }
0x1d6e   :  { %3463 = vadd.xlane.f32.xlu0 %v3462_v54  ;;  %v3418_v32 = vmul.f32 %v6361_v22, %v6361_v22  ;;  %v3423_v61 = vmul.f32 %v6364_v50, %v6364_v50 }
0x1d70   :  { %v3450_v6 = vsel %vm3322_vm4, %v3418_v32, 0.0  ;;  %v3465_v38 = vsel %vm3322_vm4, %v3423_v61, 0.0 }
0x1d71   :  { %3451 = vadd.xlane.f32.xlu2 %v3450_v6  ;;  %3466 = vadd.xlane.f32.xlu1 %v3465_v38 }
0x1d82   :  { %v3437_v63 = vpop.xlane.xlu1 %3436  ;;  %v3431_v37 = vpop.xlane.xlu2 %3430 }
0x1d83   :  { %v3477_v31 = vmul.f32 %v3437_v63, %v6259_v53  ;;  %v3446_v27 = vpop.xlane.xlu0 %3445  ;;  %v3475_v10 = vmul.f32 %v3431_v37, %v6259_v53 }
0x1d84   :  { %v3480_v60 = vmul.f32 %v3446_v27, %v6259_v53 }
0x1d85   :  { %v3493_v15 = vadd.f32 1e-05, %v3477_v31  ;;  %v6376_v34 = vadd.f32 1e-05, %v3475_v10 }
0x1d86   :  { %v6378_v0 = vadd.f32 1e-05, %v3480_v60 }
0x1d87   :  { %4592 = vrsqrt.f32 %v3493_v15  ;;  %vm3542_vm3 = vweird.f32 %v3493_v15  ;;  %vm3522_vm10 = vweird.f32 %v6376_v34 }
0x1d88   :  { %4594 = vrsqrt.f32 %v6378_v0  ;;  %vm3572_vm12 = vweird.f32 %v6378_v0 }
0x1d89   :  { %4596 = vrsqrt.f32 %v6376_v34 }
0x1d8a   :  { %v3434_v3 = vpop.xlane.xlu1 %3433  ;;  %v3440_v21 = vpop.xlane.xlu2 %3439 }
0x1d8b   :  { %v3476_v46 = vmul.f32 %v3434_v3, %v6259_v53  ;;  %v3449_v28 = vpop.xlane.xlu0 %3448  ;;  %v3478_v9 = vmul.f32 %v3440_v21, %v6259_v53 }
0x1d8c   :  { %v3481_v23 = vmul.f32 %v3449_v28, %v6259_v53 }
0x1d8d   :  { %v4593_v52 = vpop.eup %4592  ;;  %v3492_v51 = vadd.f32 1e-05, %v3476_v46  ;;  %v6385_v29 = vadd.f32 1e-05, %v3478_v9 }
0x1d8e   :  { %v6387_v33 = vpop.eup %4594  ;;  %v3537_v18 = vmul.f32 %v4593_v52, %v3493_v15  ;;  %v6389_v45 = vadd.f32 1e-05, %v3481_v23  ;;  %vm3543_vm1 = vweird.f32 %v4593_v52 }
0x1d8f   :  { %v6391_v47 = vpop.eup %4596  ;;  %v3567_v7 = vmul.f32 %v6387_v33, %v6378_v0  ;;  %4598 = vrsqrt.f32 %v3492_v51  ;;  %vm6414_vm2 = vmor %vm3542_vm3, %vm3543_vm1  ;;  %vm3573_vm5 = vweird.f32 %v6387_v33  ;;  %vm3532_vm7 = vweird.f32 %v3492_v51 }
0x1d90   :  { %v3538_v13 = vmul.f32 %v4593_v52, %v3537_v18  ;;  %v3517_v59 = vmul.f32 %v6391_v47, %v6376_v34  ;;  %4600 = vrsqrt.f32 %v6389_v45  ;;  %vm3523_vm15 = vweird.f32 %v6391_v47  ;;  %vm3574_vm1 = vmor %vm3572_vm12, %vm3573_vm5 }
0x1d91   :  { %4602 = vrsqrt.f32 %v6385_v29  ;;  %v3568_v16 = vmul.f32 %v6387_v33, %v3567_v7  ;;  %vm6430_vm9 = vmor %vm3522_vm10, %vm3523_vm15  ;;  %vm3552_vm3 = vweird.f32 %v6385_v29 }
0x1d92   :  { %v3539_v25 = vmul.f32 0.5, %v3538_v13  ;;  %v3518_v11 = vmul.f32 %v6391_v47, %v3517_v59  ;;  %v3428_v36 = vpop.xlane.xlu1 %3427 }
0x1d93   :  { %v3474_v26 = vmul.f32 %v3428_v36, %v6259_v53  ;;  %v3443_v30 = vpop.xlane.xlu0 %3442  ;;  %v3569_v61 = vmul.f32 0.5, %v3568_v16 }
0x1d94   :  { %v3540_v20 = vsub.f32 1.5, %v3539_v25  ;;  %v3519_v24 = vmul.f32 0.5, %v3518_v11  ;;  %v3479_v31 = vmul.f32 %v3443_v30, %v6259_v53 }
0x1d95   :  { %v4599_v62 = vpop.eup %4598  ;;  %v6402_v56 = vadd.f32 1e-05, %v3474_v26  ;;  %v3570_v46 = vsub.f32 1.5, %v3569_v61 }
0x1d96   :  { %v6404_v12 = vpop.eup %4600  ;;  %v3527_v2 = vmul.f32 %v4599_v62, %v3492_v51  ;;  %v3541_v32 = vmul.f32 %v4593_v52, %v3540_v20  ;;  %v3520_v38 = vsub.f32 1.5, %v3519_v24  ;;  %v6424_v15 = vadd.f32 1e-05, %v3479_v31 }
0x1d97   :  { %v6406_v54 = vpop.eup %4602  ;;  %v3577_v6 = vmul.f32 %v6404_v12, %v6389_v45  ;;  %4604 = vrsqrt.f32 %v6402_v56  ;;  %vm3533_vm8 = vweird.f32 %v4599_v62  ;;  %v3571_v36 = vmul.f32 %v6387_v33, %v3570_v46 }
0x1d98   :  { %v3528_v63 = vmul.f32 %v4599_v62, %v3527_v2  ;;  %v3547_v37 = vmul.f32 %v6406_v54, %v6385_v29  ;;  %v3545_v21 = vsel %vm6414_vm2, %v4593_v52, %v3541_v32  ;;  %v3521_v28 = vmul.f32 %v6391_v47, %v3520_v38  ;;  %vm3534_vm4 = vmor %vm3532_vm7, %vm3533_vm8 }
0x1d99   :  { %v3578_v60 = vmul.f32 %v6404_v12, %v3577_v6  ;;  %v3669_v52 = vmul.f32 %v3545_v21, %v6265_v48  ;;  %4606 = vrsqrt.f32 %v6424_v15  ;;  %vm3553_vm11 = vweird.f32 %v6406_v54 }
0x1d9a   :  { %v3529_v10 = vmul.f32 0.5, %v3528_v63  ;;  %v3548_v3 = vmul.f32 %v6406_v54, %v3547_v37  ;;  %v3525_v34 = vsel %vm6430_vm9, %v6391_v47, %v3521_v28  ;;  %v3575_v47 = vsel %vm3574_vm1, %v6387_v33, %v3571_v36  ;;  %vm3554_vm10 = vmor %vm3552_vm3, %vm3553_vm11 }
0x1d9b   :  { %v3579_v13 = vmul.f32 0.5, %v3578_v60  ;;  %v3688_v30 = vrot.slane %v3669_v52, 4  ;;  %v3667_v2 = vmul.f32 %v3525_v34, %v6268_v49  ;;  %vm3583_vm15 = vweird.f32 %v6404_v12 }
0x1d9c   :  { %v3530_v9 = vsub.f32 1.5, %v3529_v10  ;;  %v3549_v23 = vmul.f32 0.5, %v3548_v3  ;;  %vm3512_vm8 = vweird.f32 %v6402_v56  ;;  %v3672_v29 = vmul.f32 %v3575_v47, %v6271_v55 }
0x1d9d   :  { %v4605_v18 = vpop.eup %4604  ;;  %v3580_v26 = vsub.f32 1.5, %v3579_v13  ;;  %v3689_v6 = vsel %vm1270_vm13, %v3688_v30, %v3667_v2  ;;  %vm3582_vm9 = vweird.f32 %v6389_v45 }
0x1d9e   :  { %v3531_v7 = vmul.f32 %v4599_v62, %v3530_v9  ;;  %v3550_v59 = vsub.f32 1.5, %v3549_v23  ;;  %v3507_v25 = vmul.f32 %v4605_v18, %v6402_v56  ;;  %vm3513_vm2 = vweird.f32 %v4605_v18  ;;  %vm3584_vm7 = vmor %vm3582_vm9, %vm3583_vm15 }
0x1d9f   :  { %v4607_v0 = vpop.eup %4606  ;;  %vm3514_vm5 = vmor %vm3512_vm8, %vm3513_vm2  ;;  %v3693_v27 = vperm.slane %v3689_v6, %v5151_v39  ;;  %v3694_v10 = vrot.slane %v3672_v29, 4 }
0x1da0   :  { %v3508_v16 = vmul.f32 %v4605_v18, %v3507_v25  ;;  %v3535_v48 = vsel %vm3534_vm4, %v4599_v62, %v3531_v7  ;;  %v3551_v20 = vmul.f32 %v6406_v54, %v3550_v59  ;;  %v3581_v62 = vmul.f32 %v6404_v12, %v3580_v26 }
0x1da1   :  { %v3668_v32 = vmul.f32 %v3535_v48, %v6286_v19  ;;  %v3557_v33 = vmul.f32 %v4607_v0, %v6424_v15  ;;  %vm3563_vm12 = vweird.f32 %v4607_v0  ;;  %vm3562_vm4 = vweird.f32 %v6424_v15 }
0x1da2   :  { %v3509_v24 = vmul.f32 0.5, %v3508_v16  ;;  %v3555_v49 = vsel %vm3554_vm10, %v6406_v54, %v3551_v20  ;;  %v3585_v54 = vsel %vm3584_vm7, %v6404_v12, %v3581_v62  ;;  %vm3564_vm11 = vmor %vm3562_vm4, %vm3563_vm12 }
0x1da3   :  { %v3558_v38 = vmul.f32 %v4607_v0, %v3557_v33  ;;  %v3682_v63 = vrot.slane %v3668_v32, 4  ;;  %v3670_v56 = vmul.f32 %v3555_v49, %v6289_v44  ;;  %v3673_v45 = vmul.f32 %v3585_v54, %v6292_v4 }
0x1da4   :  { %v3510_v51 = vsub.f32 1.5, %v3509_v24 }
0x1da5   :  { %v3559_v31 = vmul.f32 0.5, %v3558_v38  ;;  %v3695_v21 = vsel %vm1270_vm13, %v3694_v10, %v3670_v56 }
0x1da6   :  { %v3511_v61 = vmul.f32 %v4605_v18, %v3510_v51  ;;  %v3699_v12 = vperm.slane %v3695_v21, %v5151_v39 }
0x1da7   :  { %v3560_v3 = vsub.f32 1.5, %v3559_v31 }
0x1da8   :  { %v3515_v19 = vsel %vm3514_vm5, %v4605_v18, %v3511_v61  ;;  %v3700_v18 = vrot.slane %v3673_v45, 4  ;;  %v3720_v25 = vrot.slane %v3699_v12, 4 }
0x1da9   :  { %v3666_v37 = vmul.f32 %v3515_v19, %v6306_v42  ;;  %v3561_v46 = vmul.f32 %v4607_v0, %v3560_v3  ;;  %v3706_v42 = vrot.slane %v3693_v27, 4 }
0x1dab   :  { %v3683_v55 = vsel %vm1270_vm13, %v3682_v63, %v3666_v37  ;;  %v3565_v28 = vsel %vm3564_vm11, %v4607_v0, %v3561_v46 }
0x1dac   :  { %v3687_v60 = vperm.slane %v3683_v55, %v5151_v39  ;;  %v3671_v7 = vmul.f32 %v3565_v28, %v6309_v1 }
0x1dae   :  { %v3708_v44 = vrot.slane %v3687_v60, 4  ;;  %v3707_v23 = vsel %vm1270_vm13, %v3706_v42, %v3687_v60  ;;  %v3701_v13 = vsel %vm1270_vm13, %v3700_v18, %v3671_v7 }
0x1daf   :  { %v3713_v59 = vperm.slane %v3707_v23, %v5158_v57  ;;  %v3705_v15 = vperm.slane %v3701_v13, %v5151_v39 }
0x1db0   :  { %v3709_v9 = vsel %vm1270_vm13, %v3693_v27, %v3708_v44 }
0x1db1   :  { %v3717_v4 = vperm.slane %v3709_v9, %v5158_v57  ;;  %v3721_v11 = vsel %vm1270_vm13, %v3705_v15, %v3720_v25  ;;  %v3718_v36 = vrot.slane %v3705_v15, 4  ;;  %v3732_v16 = vrot.slane %v3713_v59, 4 }
0x1db2   :  { %v3729_v34 = vperm.slane %v3721_v11, %v5158_v57 }
0x1db3   :  { %v3736_v52 = vrot.slane %v3717_v4, 4  ;;  %v3719_v48 = vsel %vm1270_vm13, %v3718_v36, %v3699_v12 }
0x1db4   :  { %v3734_v26 = vrot.slane %v3729_v34, 4  ;;  %v3725_v1 = vperm.slane %v3719_v48, %v5158_v57 }
0x1db5   :  { %v3737_v20 = vsel %vm1270_vm13, %v3729_v34, %v3736_v52 }
0x1db6   :  { %3812 = vrot.lane.b32.xlu1 %v3737_v20, %s4689_s5  ;;  %v3735_v24 = vsel %vm1270_vm13, %v3734_v26, %v3717_v4  ;;  %v3733_v30 = vsel %vm1270_vm13, %v3725_v1, %v3732_v16  ;;  %v3730_v2 = vrot.slane %v3725_v1, 4 }
0x1db7   :  { %3804 = vrot.lane.b32.xlu2 %v3735_v24, %s4672_s25  ;;  %3796 = vrot.lane.b32.xlu0 %v3733_v30, %s4668_s15 }
0x1db8   :  { %v6486_v47 = vsel %vm1270_vm13, %v3730_v2, %v3713_v59 }
0x1dd4   :  { %v3470_v51 = vpop.xlane.xlu1 %3469  ;;  %v3458_v0 = vpop.xlane.xlu2 %3457 }
0x1dd5   :  { %v3488_v32 = vmul.f32 %v3470_v51, %v6259_v53  ;;  %v3484_v62 = vmul.f32 %v3458_v0, %v6259_v53 }
0x1dd7   :  { %v3504_v49 = vadd.f32 1e-05, %v3488_v32  ;;  %v6490_v61 = vadd.f32 1e-05, %v3484_v62 }
0x1dd9   :  { %4608 = vrsqrt.f32 %v3504_v49  ;;  %v3455_v33 = vpop.xlane.xlu0 %3454  ;;  %vm3652_vm3 = vweird.f32 %v3504_v49  ;;  %vm3612_vm15 = vweird.f32 %v6490_v61 }
0x1dda   :  { %4610 = vrsqrt.f32 %v6490_v61  ;;  %v3483_v29 = vmul.f32 %v3455_v33, %v6259_v53 }
0x1ddc   :  { %v6494_v6 = vadd.f32 1e-05, %v3483_v29  ;;  %v3473_v19 = vpop.xlane.xlu1 %3472  ;;  %v3461_v38 = vpop.xlane.xlu2 %3460 }
0x1ddd   :  { %v3489_v63 = vmul.f32 %v3473_v19, %v6259_v53  ;;  %v3485_v56 = vmul.f32 %v3461_v38, %v6259_v53 }
0x1dde   :  { %4612 = vrsqrt.f32 %v6494_v6 }
0x1ddf   :  { %v6499_v37 = vpop.eup %4608  ;;  %v6501_v54 = vadd.f32 1e-05, %v3489_v63  ;;  %v3501_v31 = vadd.f32 1e-05, %v3485_v56 }
0x1de0   :  { %v6503_v27 = vpop.eup %4610  ;;  %v3647_v10 = vmul.f32 %v6499_v37, %v3504_v49  ;;  %vm3653_vm1 = vweird.f32 %v6499_v37 }
0x1de1   :  { %4614 = vrsqrt.f32 %v6501_v54  ;;  %v3464_v55 = vpop.xlane.xlu0 %3463  ;;  %v3607_v3 = vmul.f32 %v6503_v27, %v6490_v61  ;;  %vm6536_vm2 = vmor %vm3652_vm3, %vm3653_vm1  ;;  %vm3613_vm8 = vweird.f32 %v6503_v27  ;;  %vm3622_vm9 = vweird.f32 %v3501_v31 }
0x1de2   :  { %v3648_v60 = vmul.f32 %v6499_v37, %v3647_v10  ;;  %4616 = vrsqrt.f32 %v3501_v31  ;;  %v3486_v45 = vmul.f32 %v3464_v55, %v6259_v53  ;;  %vm3662_vm12 = vweird.f32 %v6501_v54  ;;  %vm6555_vm11 = vmor %vm3612_vm15, %vm3613_vm8 }
0x1de3   :  { %v3608_v23 = vmul.f32 %v6503_v27, %v3607_v3  ;;  %vm3602_vm3 = vweird.f32 %v6494_v6 }
0x1de4   :  { %v6511_v21 = vpop.eup %4612  ;;  %v3649_v46 = vmul.f32 0.5, %v3648_v60  ;;  %v6513_v44 = vadd.f32 1e-05, %v3486_v45  ;;  %v3467_v42 = vpop.xlane.xlu1 %3466 }
0x1de5   :  { %v3452_v12 = vpop.xlane.xlu2 %3451  ;;  %v3597_v28 = vmul.f32 %v6511_v21, %v6494_v6  ;;  %v3487_v9 = vmul.f32 %v3467_v42, %v6259_v53  ;;  %v3609_v36 = vmul.f32 0.5, %v3608_v23  ;;  %vm3603_vm7 = vweird.f32 %v6511_v21 }
0x1de6   :  { %4618 = vrsqrt.f32 %v6513_v44  ;;  %v3482_v18 = vmul.f32 %v3452_v12, %v6259_v53  ;;  %v3650_v15 = vsub.f32 1.5, %v3649_v46  ;;  %vm6569_vm15 = vmor %vm3602_vm3, %vm3603_vm7  ;;  %vm3823_vm3 = vcmask 195584  }
0x1de7   :  { %v6521_v7 = vpop.eup %4614  ;;  %v3598_v4 = vmul.f32 %v6511_v21, %v3597_v28  ;;  %v6524_v13 = vadd.f32 1e-05, %v3487_v9  ;;  %v3610_v30 = vsub.f32 1.5, %v3609_v36 }
0x1de8   :  { %v4617_v59 = vpop.eup %4616  ;;  %v3657_v25 = vmul.f32 %v6521_v7, %v6501_v54  ;;  %v6528_v52 = vadd.f32 1e-05, %v3482_v18  ;;  %v3651_v26 = vmul.f32 %v6499_v37, %v3650_v15  ;;  %vm3663_vm5 = vweird.f32 %v6521_v7 }
0x1de9   :  { %v3617_v11 = vmul.f32 %v4617_v59, %v3501_v31  ;;  %v3599_v34 = vmul.f32 0.5, %v3598_v4  ;;  %4620 = vrsqrt.f32 %v6524_v13  ;;  %vm3623_vm10 = vweird.f32 %v4617_v59 }
0x1dea   :  { %v3658_v16 = vmul.f32 %v6521_v7, %v3657_v25  ;;  %4622 = vrsqrt.f32 %v6528_v52  ;;  %v3655_v29 = vsel %vm6536_vm2, %v6499_v37, %v3651_v26  ;;  %v3611_v10 = vmul.f32 %v6503_v27, %v3610_v30  ;;  %vm3624_vm4 = vmor %vm3622_vm9, %vm3623_vm10 }
0x1deb   :  { %v3618_v53 = vmul.f32 %v4617_v59, %v3617_v11  ;;  %v3600_v2 = vsub.f32 1.5, %v3599_v34  ;;  %v3680_v45 = vmul.f32 %v3655_v29, %v6323_v14  ;;  %vm6563_vm2 = vmor %vm3662_vm12, %vm3663_vm5  ;;  %vm3632_vm10 = vweird.f32 %v6513_v44 }
0x1dec   :  { %v4619_v48 = vpop.eup %4618  ;;  %v3659_v1 = vmul.f32 0.5, %v3658_v16  ;;  %v3615_v28 = vsel %vm6555_vm11, %v6503_v27, %v3611_v10  ;;  %vm3642_vm9 = vweird.f32 %v6524_v13 }
0x1ded   :  { %v3619_v20 = vmul.f32 0.5, %v3618_v53  ;;  %v3627_v24 = vmul.f32 %v4619_v48, %v6513_v44  ;;  %v3601_v55 = vmul.f32 %v6511_v21, %v3600_v2  ;;  %vm3633_vm1 = vweird.f32 %v4619_v48 }
0x1dee   :  { %v3660_v51 = vsub.f32 1.5, %v3659_v1  ;;  %vm3634_vm8 = vmor %vm3632_vm10, %vm3633_vm1  ;;  %v3676_v36 = vmul.f32 %v3615_v28, %v6320_v5  ;;  %vm3818_vm1 = vcmask 64512  }
0x1def   :  { %v3620_v32 = vsub.f32 1.5, %v3619_v20  ;;  %v3628_v62 = vmul.f32 %v4619_v48, %v3627_v24  ;;  %v4621_v33 = vpop.eup %4620 }
0x1df0   :  { %v3661_v49 = vmul.f32 %v6521_v7, %v3660_v51  ;;  %v3637_v63 = vmul.f32 %v4621_v33, %v6524_v13  ;;  %v4623_v56 = vpop.eup %4622  ;;  %vm3643_vm5 = vweird.f32 %v4621_v33  ;;  %v3738_v20 = vrot.slane %v3676_v36, 4 }
0x1df1   :  { %v3621_v19 = vmul.f32 %v4617_v59, %v3620_v32  ;;  %v3629_v38 = vmul.f32 0.5, %v3628_v62  ;;  %v3587_v46 = vmul.f32 %v4623_v56, %v6528_v52  ;;  %vm3644_vm7 = vmor %vm3642_vm9, %vm3643_vm5  ;;  %vm3593_vm12 = vweird.f32 %v4623_v56 }
0x1df2   :  { %v3638_v3 = vmul.f32 %v4621_v33, %v3637_v63  ;;  %v3665_v14 = vsel %vm6563_vm2, %v6521_v7, %v3661_v49 }
0x1df3   :  { %v3625_v31 = vsel %vm3624_vm4, %v4617_v59, %v3621_v19  ;;  %v3630_v60 = vsub.f32 1.5, %v3629_v38  ;;  %v3588_v9 = vmul.f32 %v4623_v56, %v3587_v46  ;;  %v3750_v59 = vrot.slane %v3680_v45, 4 }
0x1df4   :  { %v3677_v61 = vmul.f32 %v3625_v31, %v6340_v40  ;;  %v3639_v6 = vmul.f32 0.5, %v3638_v3  ;;  %v3605_v40 = vsel %vm6569_vm15, %v6511_v21, %v3601_v55  ;;  %v3681_v7 = vmul.f32 %v3665_v14, %v6343_v8 }
0x1df5   :  { %v3631_v12 = vmul.f32 %v4619_v48, %v3630_v60  ;;  %v3589_v15 = vmul.f32 0.5, %v3588_v9  ;;  %v3675_v25 = vmul.f32 %v3605_v40, %v6333_v41  ;;  %vm3592_vm4 = vweird.f32 %v6528_v52 }
0x1df6   :  { %v3744_v23 = vrot.slane %v3677_v61, 4  ;;  %v3640_v4 = vsub.f32 1.5, %v3639_v6  ;;  %v3756_v53 = vrot.slane %v3681_v7, 4  ;;  %vm3594_vm11 = vmor %vm3592_vm4, %vm3593_vm12 }
0x1df7   :  { %v3635_v18 = vsel %vm3634_vm8, %v4619_v48, %v3631_v12  ;;  %v3590_v21 = vsub.f32 1.5, %v3589_v15 }
0x1df8   :  { %v3678_v44 = vmul.f32 %v3635_v18, %v6354_v35  ;;  %v3641_v11 = vmul.f32 %v4621_v33, %v3640_v4  ;;  %v3745_v8 = vsel %vm1270_vm13, %v3744_v23, %v3675_v25 }
0x1df9   :  { %v3591_v48 = vmul.f32 %v4623_v56, %v3590_v21  ;;  %v3749_v1 = vperm.slane %v3745_v8, %v5151_v39  ;;  %v3880_v8 = vld [vmem:[#allocation3 + $0x1e8] sm:$0xff] }
0x1dfa   :  { %v3751_v27 = vsel %vm1270_vm13, %v3750_v59, %v3678_v44  ;;  %v3645_v16 = vsel %vm3644_vm7, %v4621_v33, %v3641_v11 }
0x1dfb   :  { %v3755_v34 = vperm.slane %v3751_v27, %v5151_v39  ;;  %v3679_v35 = vmul.f32 %v3645_v16, %v6364_v50  ;;  %v3595_v26 = vsel %vm3594_vm11, %v4623_v56, %v3591_v48  ;;  %v3762_v0 = vrot.slane %v3749_v1, 4  ;;  %v3881_v16 = vld [vmem:[#allocation3 + $0x1f0] sm:$0xff] }
0x1dfc   :  { %v3674_v24 = vmul.f32 %v3595_v26, %v6361_v22 }
0x1dfd   :  { %v3776_v41 = vrot.slane %v3755_v34, 4  ;;  %v3757_v13 = vsel %vm1270_vm13, %v3756_v53, %v3679_v35  ;;  %v3879_v53 = vld [vmem:[#allocation3 + $0x1e0] sm:$0xff] }
0x1dfe   :  { %v3761_v5 = vperm.slane %v3757_v13, %v5151_v39  ;;  %v3739_v30 = vsel %vm1270_vm13, %v3738_v20, %v3674_v24 }
0x1dff   :  { %v3743_v51 = vperm.slane %v3739_v30, %v5151_v39  ;;  %v4318_v30 = vld [vmem:[#allocation3 + $0x1d8] ss:$0 sm:$0xff] }
0x1e00   :  { %v3777_v2 = vsel %vm1270_vm13, %v3761_v5, %v3776_v41  ;;  %v3774_v50 = vrot.slane %v3761_v5, 4 }
0x1e01   :  { %v3785_v52 = vperm.slane %v3777_v2, %v5158_v57  ;;  %v3764_v62 = vrot.slane %v3743_v51, 4  ;;  %v3763_v33 = vsel %vm1270_vm13, %v3762_v0, %v3743_v51 }
0x1e02   :  { %v3775_v32 = vsel %vm1270_vm13, %v3774_v50, %v3755_v34  ;;  %v3769_v22 = vperm.slane %v3763_v33, %v5158_v57  ;;  %v3882_v34 = vld [vmem:[#allocation3 + $0x1f8] sm:$0xff] }
0x1e03   :  { %v3781_v29 = vperm.slane %v3775_v32, %v5158_v57  ;;  %v3790_v49 = vrot.slane %v3785_v52, 4  ;;  %v3765_v19 = vsel %vm1270_vm13, %v3749_v1, %v3764_v62  ;;  %3901 = vmatpush.msrb.mxu1 %v3882_v34  ;;  %v4002_v34 = vld [vmem:[#allocation3 + $0x200] sm:$0xff] }
0x1e04   :  { %v3773_v63 = vperm.slane %v3765_v19, %v5158_v57  ;;  %v3788_v56 = vrot.slane %v3769_v22, 4  ;;  %v4317_v57 = vld [vmem:[#allocation3 + $0x1d0] ss:$0 sm:$0xff] }
0x1e05   :  { %v3786_v38 = vrot.slane %v3781_v29, 4  ;;  %3902 = vmatpush.msrb.mxu1 %v3881_v16 }
0x1e06   :  { %v3791_v10 = vsel %vm1270_vm13, %v3790_v49, %v3773_v63  ;;  %v3789_v55 = vsel %vm1270_vm13, %v3781_v29, %v3788_v56  ;;  %v3792_v37 = vrot.slane %v3773_v63, 4 }
0x1e07   :  { %v3787_v39 = vsel %vm1270_vm13, %v3786_v38, %v3769_v22  ;;  %3806 = vrot.lane.b32.xlu2 %v3791_v10, %s4672_s25  ;;  %3798 = vrot.lane.b32.xlu0 %v3789_v55, %s4668_s15  ;;  %v4008_v10 = vld [vmem:[#allocation3 + $0x230] sm:$0xff]  ;;  %v4007_v55 = vld [vmem:[#allocation3 + $0x228] sm:$0xff] }
0x1e08   :  { %v3793_v31 = vsel %vm1270_vm13, %v3785_v52, %v3792_v37  ;;  %3903 = vmatpush.msrb.mxu1 %v3880_v8  ;;  %v4006_v37 = vld [vmem:[#allocation3 + $0x220] sm:$0xff] }
0x1e0a   :  { %3904 = vmatpush.msrb.mxu1 %v3879_v53 }
0x1e0f   :  { %3814 = vrot.lane.b32.xlu0 %v3793_v31, %s4689_s5  ;;  %v4005_v31 = vld [vmem:[#allocation3 + $0x218] sm:$0xff] }
0x1e11   :  { %v3805_v45 = vpop.permute.xlu2 %3804 }
0x1e28   :  { %v3813_v3 = vpop.permute.xlu1 %3812 }
0x1e29   :  { %v3797_v60 = vpop.permute.xlu0 %3796 }
0x1e2a   :  { %v3819_v54 = vsel %vm3818_vm1, %v6486_v47, %v3797_v60 }
0x1e2b   :  { %v3821_v61 = vsel %vm559_vm14, %v3819_v54, %v3805_v45 }
0x1e2c   :  { %v3824_v46 = vsel %vm3823_vm3, %v3821_v61, %v3813_v3 }
0x1e2d   :  { %v3827_v42 = vmul.f32 %v4317_v57, %v3824_v46 }
0x1e2f   :  { %v6618_v14 = vadd.f32 %v3827_v42, %v5806_v43 }
0x1e31   :  { %v3832_v12 = vsel %vm84_vm0, %v6618_v14, 0.0 }
0x1e32   :  { %3833 = vadd.xlane.f32.xlu1 %v3832_v12 }
0x1e61   :  { %v3807_v40 = vpop.permute.xlu2 %3806 }
0x1e79   :  { %v3799_v6 = vpop.permute.xlu0 %3798 }
0x1e7a   :  { %v3820_v28 = vsel %vm3818_vm1, %v3787_v39, %v3799_v6  ;;  %v4009_v39 = vld [vmem:[#allocation3 + $0x238] sm:$0xff] }
0x1e7b   :  { %v3822_v23 = vsel %vm559_vm14, %v3820_v28, %v3807_v40  ;;  %4024 = vmatpush.msrb.mxu2 %v4009_v39 }
0x1e7d   :  { %4025 = vmatpush.msrb.mxu2 %v4008_v10 }
0x1e7f   :  { %4026 = vmatpush.msrb.mxu2 %v4007_v55 }
0x1e81   :  { %v3815_v9 = vpop.permute.xlu0 %3814  ;;  %4027 = vmatpush.msrb.mxu2 %v4006_v37 }
0x1e82   :  { %v3825_v47 = vsel %vm3823_vm3, %v3822_v23, %v3815_v9 }
0x1e83   :  { %v3828_v18 = vmul.f32 %v4317_v57, %v3825_v47  ;;  %4028 = vmatpush.msrb.mxu2 %v4005_v31 }
0x1e85   :  { %v6625_v4 = vadd.f32 %v3828_v18, %v5811_v17 }
0x1e87   :  { %v3835_v43 = vsel %vm84_vm0, %v6625_v4, 0.0 }
0x1e88   :  { %3836 = vadd.xlane.f32.xlu2 %v3835_v43 }
0x1ea5   :  { %v3834_v59 = vpop.xlane.xlu1 %3833 }
0x1ea6   :  { %v3838_v7 = vmul.f32 %v3834_v59, %v4796_v58 }
0x1ea8   :  { %v3840_v44 = vsub.f32 %v6618_v14, %v3838_v7 }
0x1eaa   :  { %v3842_v15 = vmul.f32 %v3840_v44, %v3840_v44 }
0x1eac   :  { %v3844_v25 = vsel %vm84_vm0, %v3842_v15, 0.0 }
0x1ead   :  { %3845 = vadd.xlane.f32.xlu0 %v3844_v25 }
0x1efb   :  { %v3837_v11 = vpop.xlane.xlu2 %3836 }
0x1efc   :  { %v3839_v27 = vmul.f32 %v3837_v11, %v4796_v58 }
0x1efe   :  { %v3841_v21 = vsub.f32 %v6625_v4, %v3839_v27  ;;  %v4004_v27 = vld [vmem:[#allocation3 + $0x210] sm:$0xff] }
0x1eff   :  { %4029 = vmatpush.msrb.mxu2 %v4004_v27 }
0x1f00   :  { %v3843_v17 = vmul.f32 %v3841_v21, %v3841_v21 }
0x1f02   :  { %v3847_v36 = vsel %vm84_vm0, %v3843_v17, 0.0 }
0x1f03   :  { %3848 = vadd.xlane.f32.xlu1 %v3847_v36 }
0x1f20   :  { %v3846_v35 = vpop.xlane.xlu0 %3845 }
0x1f21   :  { %v3850_v48 = vmul.f32 %v3846_v35, %v4796_v58 }
0x1f23   :  { %v3852_v41 = vadd.f32 1e-05, %v3850_v48 }
0x1f25   :  { %4624 = vrsqrt.f32 %v3852_v41  ;;  %vm3860_vm2 = vweird.f32 %v3852_v41 }
0x1f2b   :  { %v4625_v13 = vpop.eup %4624 }
0x1f2c   :  { %v3855_v26 = vmul.f32 %v4625_v13, %v3852_v41  ;;  %vm3861_vm13 = vweird.f32 %v4625_v13 }
0x1f2d   :  { %vm3862_vm15 = vmor %vm3860_vm2, %vm3861_vm13 }
0x1f2e   :  { %v3856_v1 = vmul.f32 %v4625_v13, %v3855_v26 }
0x1f30   :  { %v3857_v20 = vmul.f32 0.5, %v3856_v1 }
0x1f32   :  { %v3858_v5 = vsub.f32 1.5, %v3857_v20 }
0x1f34   :  { %v3859_v24 = vmul.f32 %v4625_v13, %v3858_v5 }
0x1f36   :  { %v3863_v2 = vsel %vm3862_vm15, %v4625_v13, %v3859_v24 }
0x1f37   :  { %v3874_v50 = vmul.f32 %v3863_v2, %v3840_v44 }
0x1f39   :  { %v3877_v51 = vmul.f32 %v4318_v30, %v3874_v50 }
0x1f3b   :  { %4244 = vmatmul.msk.f32.vlgmr.msrb.gmra.mxu1 %vm84_vm0, %v3877_v51 }
0x1f76   :  { %v3849_v52 = vpop.xlane.xlu1 %3848 }
0x1f77   :  { %v3851_v0 = vmul.f32 %v3849_v52, %v4796_v58 }
0x1f79   :  { %v3853_v32 = vadd.f32 1e-05, %v3851_v0 }
0x1f7b   :  { %4626 = vrsqrt.f32 %v3853_v32  ;;  %vm3870_vm8 = vweird.f32 %v3853_v32 }
0x1f81   :  { %v4627_v62 = vpop.eup %4626 }
0x1f82   :  { %v3865_v33 = vmul.f32 %v4627_v62, %v3853_v32  ;;  %vm3871_vm10 = vweird.f32 %v4627_v62 }
0x1f83   :  { %vm3872_vm5 = vmor %vm3870_vm8, %vm3871_vm10 }
0x1f84   :  { %v3866_v29 = vmul.f32 %v4627_v62, %v3865_v33 }
0x1f86   :  { %v3867_v49 = vmul.f32 0.5, %v3866_v29 }
0x1f88   :  { %v3868_v22 = vsub.f32 1.5, %v3867_v49 }
0x1f8a   :  { %v3869_v19 = vmul.f32 %v4627_v62, %v3868_v22 }
0x1f8c   :  { %v3873_v38 = vsel %vm3872_vm5, %v4627_v62, %v3869_v19 }
0x1f8d   :  { %v3875_v63 = vmul.f32 %v3873_v38, %v3841_v21  ;;  %v4003_v21 = vld [vmem:[#allocation3 + $0x208] sm:$0xff] }
0x1f8e   :  { %4030 = vmatpush.msrb.mxu2 %v4003_v21 }
0x1f8f   :  { %v3878_v56 = vmul.f32 %v4318_v30, %v3875_v63 }
0x1f90   :  { %4031 = vmatpush.msrb.mxu2 %v4002_v34 }
0x1f91   :  { %4245 = vmatmul.msk.f32.gmra.mxu1 %vm84_vm0, %v3878_v56 }
0x1fb8   :  { %v3906_v60 = vpop.f32.mrf.mxu1 }
0x1fb9   :  { %v3914_v57 = vmul.f32 0.70710677, %v3906_v60  ;;  %3994 = vrot.lane.b32.xlu2 %v3906_v60, %s4670_s23  ;;  %v3912_v20 = vmul.f32 0.5, %v3906_v60 }
0x1fbb   :  { %v3916_v3 = vand.u32 2147483647, %v3914_v57  ;;  %vm3982_vm11 = vcmp.lt.f32.partialorder %v3914_v57, 0.0 }
0x1fbd   :  { %v3918_v45 = vmul.f32 0.3275911, %v3916_v3  ;;  %v3970_v15 = vsub.f32 0.0, %v3916_v3 }
0x1fbf   :  { %v3920_v54 = vadd.f32 1.0, %v3918_v45  ;;  %v3972_v11 = vmul.f32 %v3970_v15, %v3916_v3 }
0x1fc1   :  { %4628 = vrcp.f32 %v3920_v54  ;;  %v3933_v28 = vand.u32 2147483648, %v3920_v54  ;;  %vm3927_vm7 = vweird.f32 %v3920_v54  ;;  %v3931_v40 = vand.u32 2147483647, %v3920_v54 }
0x1fc2   :  { %v3974_v36 = vmul.f32 1.442695, %v3972_v11 }
0x1fc3   :  { %v3934_v23 = vor.u32 1.1754944e-38, %v3933_v28  ;;  %vm3932_vm4 = vcmp.eq.f32.partialorder %v3931_v40, 8.507059e+37 }
0x1fc4   :  { %4630 = vpow2.f32 %v3974_v36 }
0x1fc7   :  { %v4629_v61 = vpop.eup %4628 }
0x1fc8   :  { %v3923_v46 = vmul.f32 %v4629_v61, %v3920_v54  ;;  %vm3928_vm9 = vweird.f32 %v4629_v61 }
0x1fc9   :  { %vm3929_vm12 = vmor %vm3927_vm7, %vm3928_vm9 }
0x1fca   :  { %v3924_v42 = vsub.f32 1.0, %v3923_v46  ;;  %v4631_v53 = vpop.eup %4630 }
0x1fcc   :  { %v3925_v12 = vmul.f32 %v4629_v61, %v3924_v42 }
0x1fce   :  { %v3926_v6 = vadd.f32 %v4629_v61, %v3925_v12 }
0x1fd0   :  { %v3930_v9 = vsel %vm3929_vm12, %v4629_v61, %v3926_v6 }
0x1fd1   :  { %v3935_v47 = vsel %vm3932_vm4, %v3934_v23, %v3930_v9 }
0x1fd2   :  { %v3952_v18 = vmul.f32 1.0614054, %v3935_v47 }
0x1fd4   :  { %v4246_v43 = vadd.f32 -1.4531521, %v3952_v18 }
0x1fd6   :  { %v3956_v59 = vmul.f32 %v4246_v43, %v3935_v47 }
0x1fd8   :  { %v3958_v7 = vadd.f32 1.4214138, %v3956_v59 }
0x1fda   :  { %v3960_v44 = vmul.f32 %v3958_v7, %v3935_v47 }
0x1fdc   :  { %v4248_v25 = vadd.f32 -0.28449672, %v3960_v44 }
0x1fde   :  { %v3964_v17 = vmul.f32 %v4248_v25, %v3935_v47 }
0x1fe0   :  { %v3966_v16 = vadd.f32 0.2548296, %v3964_v17 }
0x1fe2   :  { %v3968_v8 = vmul.f32 %v3966_v16, %v3935_v47 }
0x1fe4   :  { %v3978_v35 = vmul.f32 %v4631_v53, %v3968_v8 }
0x1fe6   :  { %v3980_v48 = vsub.f32 1.0, %v3978_v35 }
0x1fe8   :  { %v3984_v41 = vsub.f32 0.0, %v3980_v48 }
0x1fea   :  { %v3986_v13 = vsel %vm3982_vm11, %v3984_v41, %v3980_v48  ;;  %v4116_v41 = vld [vmem:[#allocation3 + $0x260] sm:$0xff] }
0x1feb   :  { %v3988_v1 = vadd.f32 1.0, %v3986_v13  ;;  %v4115_v13 = vld [vmem:[#allocation3 + $0x258] sm:$0xff]  ;;  %4134 = vmatpush.msrb.mxu0 %v4116_v41 }
0x1fed   :  { %v3990_v5 = vmul.f32 %v3988_v1, %v3912_v20  ;;  %4135 = vmatpush.msrb.mxu0 %v4115_v13  ;;  %v4113_v20 = vld [vmem:[#allocation3 + $0x248] sm:$0xff] }
0x200e   :  { %v3909_v26 = vpop.f32.mrf.mxu1 }
0x200f   :  { %3996 = vrot.lane.b32.xlu0 %v3909_v26, %s4670_s23  ;;  %v3915_v2 = vmul.f32 0.70710677, %v3909_v26  ;;  %v3913_v9 = vmul.f32 0.5, %v3909_v26  ;;  %v4114_v26 = vld [vmem:[#allocation3 + $0x250] sm:$0xff] }
0x2010   :  { %4136 = vmatpush.msrb.mxu0 %v4114_v26 }
0x2011   :  { %v3917_v50 = vand.u32 2147483647, %v3915_v2  ;;  %vm3983_vm15 = vcmp.lt.f32.partialorder %v3915_v2, 0.0 }
0x2012   :  { %4137 = vmatpush.msrb.mxu0 %v4113_v20 }
0x2013   :  { %v3995_v24 = vpop.permute.xlu2 %3994  ;;  %v3919_v51 = vmul.f32 0.3275911, %v3917_v50  ;;  %v3971_v31 = vsub.f32 0.0, %v3917_v50 }
0x2014   :  { %v4000_v30 = vmul.f32 %v3995_v24, %v3990_v5 }
0x2015   :  { %v3921_v52 = vadd.f32 1.0, %v3919_v51  ;;  %v3973_v57 = vmul.f32 %v3971_v31, %v3917_v50  ;;  %v4149_v31 = vld [vmem:[#allocation3 + $0x2a0] sm:$0xff] }
0x2016   :  { %4250 = vmatmul.msk.f32.vlgmr.msrb.gmra.mxu2 %vm411_vm6, %v4000_v30 }
0x2017   :  { %4632 = vrcp.f32 %v3921_v52  ;;  %v3948_v49 = vand.u32 2147483648, %v3921_v52  ;;  %vm3942_vm3 = vweird.f32 %v3921_v52  ;;  %v3946_v22 = vand.u32 2147483647, %v3921_v52 }
0x2018   :  { %v3976_v45 = vmul.f32 1.442695, %v3973_v57  ;;  %v4147_v57 = vld [vmem:[#allocation3 + $0x290] sm:$0xff] }
0x2019   :  { %v3949_v38 = vor.u32 1.1754944e-38, %v3948_v49  ;;  %vm3947_vm2 = vcmp.eq.f32.partialorder %v3946_v22, 8.507059e+37 }
0x201a   :  { %4634 = vpow2.f32 %v3976_v45  ;;  %v4145_v45 = vld [vmem:[#allocation3 + $0x280] sm:$0xff] }
0x201d   :  { %v4633_v0 = vpop.eup %4632 }
0x201e   :  { %v3938_v32 = vmul.f32 %v4633_v0, %v3921_v52  ;;  %vm3943_vm1 = vweird.f32 %v4633_v0 }
0x201f   :  { %vm3944_vm13 = vmor %vm3942_vm3, %vm3943_vm1 }
0x2020   :  { %v3939_v62 = vsub.f32 1.0, %v3938_v32  ;;  %v4635_v46 = vpop.eup %4634 }
0x2022   :  { %v3940_v33 = vmul.f32 %v4633_v0, %v3939_v62 }
0x2024   :  { %v3941_v29 = vadd.f32 %v4633_v0, %v3940_v33  ;;  %v4319_v33 = vld [vmem:[#allocation3 + $0x240] ss:$0 sm:$0xff] }
0x2026   :  { %v3945_v19 = vsel %vm3944_vm13, %v4633_v0, %v3941_v29 }
0x2027   :  { %v3950_v63 = vsel %vm3947_vm2, %v3949_v38, %v3945_v19 }
0x2028   :  { %v3953_v56 = vmul.f32 1.0614054, %v3950_v63 }
0x202a   :  { %v4247_v39 = vadd.f32 -1.4531521, %v3953_v56 }
0x202c   :  { %v3957_v10 = vmul.f32 %v4247_v39, %v3950_v63 }
0x202e   :  { %v3959_v55 = vadd.f32 1.4214138, %v3957_v10 }
0x2030   :  { %v3961_v37 = vmul.f32 %v3959_v55, %v3950_v63  ;;  %v4089_v55 = vld [vmem:[%s6663_s1 + $0x20] sm:$0x3] }
0x2032   :  { %v4249_v60 = vadd.f32 -0.28449672, %v3961_v37  ;;  %v4150_v37 = vld [vmem:[#allocation3 + $0x2a8] sm:$0xff] }
0x2033   :  { %4164 = vmatpush.msra.mxu1 %v4150_v37 }
0x2034   :  { %v3965_v3 = vmul.f32 %v4249_v60, %v3950_v63  ;;  %v4148_v60 = vld [vmem:[#allocation3 + $0x298] sm:$0xff] }
0x2035   :  { %4165 = vmatpush.msra.mxu1 %v4149_v31 }
0x2036   :  { %v3967_v54 = vadd.f32 0.2548296, %v3965_v3  ;;  %v4146_v3 = vld [vmem:[#allocation3 + $0x288] sm:$0xff] }
0x2037   :  { %4166 = vmatpush.msra.mxu1 %v4148_v60 }
0x2038   :  { %v3969_v61 = vmul.f32 %v3967_v54, %v3950_v63 }
0x2039   :  { %4167 = vmatpush.msra.mxu1 %v4147_v57 }
0x203a   :  { %v3979_v42 = vmul.f32 %v4635_v46, %v3969_v61  ;;  %v4144_v61 = vld [vmem:[#allocation3 + $0x278] sm:$0xff]  ;;  %v4143_v46 = vld [vmem:[#allocation3 + $0x270] sm:$0xff] }
0x203b   :  { %4168 = vmatpush.msra.mxu1 %v4146_v3 }
0x203c   :  { %v3981_v12 = vsub.f32 1.0, %v3979_v42  ;;  %v4320_v42 = vld [vmem:[#allocation3 + $0x268] ss:$0 sm:$0xff] }
0x203d   :  { %4169 = vmatpush.msra.mxu1 %v4145_v45 }
0x203e   :  { %v3985_v6 = vsub.f32 0.0, %v3981_v12 }
0x203f   :  { %4170 = vmatpush.msra.mxu1 %v4144_v61 }
0x2040   :  { %v3987_v28 = vsel %vm3983_vm15, %v3985_v6, %v3981_v12 }
0x2041   :  { %v3989_v40 = vadd.f32 1.0, %v3987_v28  ;;  %4171 = vmatpush.msra.mxu1 %v4143_v46 }
0x2043   :  { %v3991_v23 = vmul.f32 %v3989_v40, %v3913_v9  ;;  %v4321_v40 = vld [vmem:[#allocation3 + $0x2b0] ss:$0 sm:$0xff] }
0x2081   :  { %v3997_v47 = vpop.permute.xlu0 %3996 }
0x2082   :  { %v4001_v18 = vmul.f32 %v3997_v47, %v3991_v23 }
0x2084   :  { %4251 = vmatmul.msk.f32.gmra.mxu2 %vm411_vm6, %v4001_v18 }
0x2099   :  { %v4033_v43 = vpop.f32.mrf.mxu2 }
0x209a   :  { %v4039_v15 = vadd.f32 %v4033_v43, %v6618_v14 }
0x209c   :  { %v4042_v25 = vsel %vm84_vm0, %v4039_v15, 0.0 }
0x2107   :  { %v4036_v59 = vpop.f32.mrf.mxu2 }
0x2108   :  { %v4040_v7 = vadd.f32 %v4036_v59, %v6625_v4 }
0x210a   :  { %v4045_v44 = vsel %vm84_vm0, %v4040_v7, 0.0 }
0x210b   :  { %4046 = vadd.xlane.f32.xlu1 %v4045_v44 }
0x2113   :  { %4043 = vadd.xlane.f32.xlu1 %v4042_v25 }
0x217e   :  { %v4047_v11 = vpop.xlane.xlu1 %4046 }
0x217f   :  { %v4049_v27 = vmul.f32 %v4047_v11, %v4796_v58 }
0x2181   :  { %v4051_v21 = vsub.f32 %v4040_v7, %v4049_v27 }
0x2183   :  { %v4053_v17 = vmul.f32 %v4051_v21, %v4051_v21 }
0x2185   :  { %v4057_v36 = vsel %vm84_vm0, %v4053_v17, 0.0 }
0x2186   :  { %4058 = vadd.xlane.f32.xlu1 %v4057_v36  ;;  %v4044_v34 = vpop.xlane.xlu1 %4043 }
0x2187   :  { %v4048_v16 = vmul.f32 %v4044_v34, %v4796_v58 }
0x2189   :  { %v4050_v4 = vsub.f32 %v4039_v15, %v4048_v16 }
0x218b   :  { %v4052_v8 = vmul.f32 %v4050_v4, %v4050_v4 }
0x218d   :  { %v4054_v53 = vsel %vm84_vm0, %v4052_v8, 0.0 }
0x218e   :  { %4055 = vadd.xlane.f32.xlu0 %v4054_v53 }
0x21f9   :  { %v4059_v14 = vpop.xlane.xlu1 %4058 }
0x21fa   :  { %v4061_v35 = vmul.f32 %v4059_v14, %v4796_v58 }
0x21fc   :  { %v4063_v48 = vadd.f32 1e-05, %v4061_v35 }
0x21fe   :  { %4636 = vrsqrt.f32 %v4063_v48  ;;  %vm4080_vm8 = vweird.f32 %v4063_v48 }
0x2201   :  { %v4056_v1 = vpop.xlane.xlu0 %4055 }
0x2202   :  { %v4060_v5 = vmul.f32 %v4056_v1, %v4796_v58 }
0x2204   :  { %v4637_v24 = vpop.eup %4636  ;;  %v4062_v30 = vadd.f32 1e-05, %v4060_v5 }
0x2205   :  { %v4075_v2 = vmul.f32 %v4637_v24, %v4063_v48  ;;  %vm4081_vm10 = vweird.f32 %v4637_v24 }
0x2206   :  { %4638 = vrsqrt.f32 %v4062_v30  ;;  %vm4082_vm5 = vmor %vm4080_vm8, %vm4081_vm10  ;;  %vm4070_vm7 = vweird.f32 %v4062_v30 }
0x2207   :  { %v4076_v50 = vmul.f32 %v4637_v24, %v4075_v2 }
0x2209   :  { %v4077_v51 = vmul.f32 0.5, %v4076_v50 }
0x220b   :  { %v4078_v52 = vsub.f32 1.5, %v4077_v51 }
0x220c   :  { %v4639_v0 = vpop.eup %4638 }
0x220d   :  { %v4079_v32 = vmul.f32 %v4637_v24, %v4078_v52  ;;  %v4065_v62 = vmul.f32 %v4639_v0, %v4062_v30  ;;  %vm4071_vm9 = vweird.f32 %v4639_v0 }
0x220e   :  { %vm4072_vm12 = vmor %vm4070_vm7, %vm4071_vm9 }
0x220f   :  { %v4083_v29 = vsel %vm4082_vm5, %v4637_v24, %v4079_v32  ;;  %v4066_v49 = vmul.f32 %v4639_v0, %v4065_v62 }
0x2210   :  { %v4085_v22 = vmul.f32 %v4083_v29, %v4051_v21 }
0x2211   :  { %v4067_v58 = vmul.f32 0.5, %v4066_v49 }
0x2212   :  { %v4088_v19 = vmul.f32 %v4319_v33, %v4085_v22 }
0x2213   :  { %v4068_v38 = vsub.f32 1.5, %v4067_v58 }
0x2214   :  { %4107 = vmatpush.msrb.mxu3 %v4088_v19 }
0x2215   :  { %v4069_v63 = vmul.f32 %v4639_v0, %v4068_v38 }
0x2217   :  { %v4073_v56 = vsel %vm4072_vm12, %v4639_v0, %v4069_v63 }
0x2218   :  { %v4084_v39 = vmul.f32 %v4073_v56, %v4050_v4 }
0x221a   :  { %v4087_v10 = vmul.f32 %v4319_v33, %v4084_v39 }
0x221c   :  { %4108 = vmatpush.msrb.mxu3 %v4087_v10 }
0x221d   :  { %4252 = vmatmul.msk.f32.vlgmr.msrb.gmra.mxu3 %vm559_vm14, %v4089_v55  ;;  %vm4176_vm14 = vcmask 1024  }
0x22a0   :  { %v4110_v54 = vpop.f32.mrf.mxu3 }
0x22a1   :  { %4253 = vmatmul.msk.f32.vlgmr.msrb.gmra.mxu0 %vm84_vm0, %v4110_v54 }
0x231e   :  { %v4139_v12 = vpop.f32.mrf.mxu0 }
0x231f   :  { %v4140_v6 = vadd.f32 %v4320_v42, %v4139_v12 }
0x2321   :  { %v4142_v28 = vmax.f32 %v4140_v6, 0.0 }
0x2323   :  { %4254 = vmatmul.msk.f32.vlgmr.msra.gmra.mxu1 %vm411_vm6, %v4142_v28 }
0x23a0   :  { %v4173_v9 = vpop.f32.mrf.mxu1 }
0x23a1   :  { %v4174_v23 = vadd.f32 %v4321_v40, %v4173_v9 }
0x23a3   :  { %4177 = vst.msk [vmem:[%s6664_s2] sm:$0x3] %vm4176_vm14, %v4174_v23 }
0x23a4   :  { %4182 = vsyncpa [#allocation4], 1 }

</bundles_post_ra>
